<compile_context>
chip_gen: v7x
topology: tpu7x:2x2x1
jax: 0.10.0
libtpu: 0.0.40
codegen_flags: <defaults>
</compile_context>

<pallas_src>
import functools

import jax
import jax.numpy as jnp
from jax import lax
from jax.experimental import pallas as pl
from jax.experimental.pallas import tpu as pltpu

LN_EPS = 1e-5


# ----------------------------- in-kernel helpers -----------------------------

def _ln(x, w, b):
    """LayerNorm over last dim (f32, biased variance, eps=1e-5 like PyTorch)."""
    mu = jnp.mean(x, axis=-1, keepdims=True)
    xc = x - mu
    var = jnp.mean(xc * xc, axis=-1, keepdims=True)
    return xc * lax.rsqrt(var + LN_EPS) * w + b


def _softmax(s):
    """Numerically-stable softmax, exact f32 denominator."""
    s = s - jnp.max(s, axis=-1, keepdims=True)
    p = jnp.exp(s)
    return p / jnp.sum(p, axis=-1, keepdims=True)


def _dot_nt(a, b):
    """a @ b.T with f32 accumulation, without materializing the transpose."""
    return lax.dot_general(a, b, (((1,), (1,)), ((), ())),
                           preferred_element_type=jnp.float32)


def _mha(q, k, v, wo, bo, nhead):
    """Multi-head attention on pre-projected q/k/v (f32).  q already carries the
    Dh^-0.5 scale (folded into Wq).  Static head loop; head outputs are lane-
    concatenated and projected by Wo with one bf16 MXU push."""
    C = q.shape[-1]
    Dh = C // nhead
    heads = []
    for h in range(nhead):
        lo = h * Dh
        qh = q[:, lo:lo + Dh].astype(jnp.bfloat16)
        kh = k[:, lo:lo + Dh].astype(jnp.bfloat16)
        vh = v[:, lo:lo + Dh].astype(jnp.bfloat16)
        p = _softmax(_dot_nt(qh, kh))                                 # (L, S) f32
        heads.append(jnp.dot(p.astype(jnp.bfloat16), vh,
                             preferred_element_type=jnp.float32))     # (L, Dh)
    o = jnp.concatenate(heads, axis=-1).astype(jnp.bfloat16)          # (L, C)
    return jnp.dot(o, wo, preferred_element_type=jnp.float32) + bo


def _ffn_norm(x, w1, b1, w2, b2, n2w, n2b):
    """x + Linear2(relu(Linear1(x))) -> LayerNorm."""
    h = jnp.maximum(
        jnp.dot(x.astype(jnp.bfloat16), w1,
                preferred_element_type=jnp.float32) + b1, 0.0)
    ff = jnp.dot(h.astype(jnp.bfloat16), w2,
                 preferred_element_type=jnp.float32) + b2
    return _ln(x + ff, n2w, n2b)


def _self_attention_layer(src, pos, wqk, bqk, wv, bv, wo, bo,
                          n1w, n1b, w1, b1, w2, b2, n2w, n2b, *, nhead):
    """SelfAttentionLayer (eval): q/k share the (src+pos) input, so Wq|Wk is a
    single fused (C, 2C) projection; value uses src without pos."""
    C = src.shape[-1]
    sp = (src + pos).astype(jnp.bfloat16)
    qk = jnp.dot(sp, wqk, preferred_element_type=jnp.float32) + bqk   # (L, 2C)
    v = jnp.dot(src.astype(jnp.bfloat16), wv,
                preferred_element_type=jnp.float32) + bv
    attn = _mha(qk[:, :C], qk[:, C:], v, wo, bo, nhead)
    x = _ln(src + attn, n1w, n1b)
    return _ffn_norm(x, w1, b1, w2, b2, n2w, n2b)


# ------------------------------ the fused kernel ------------------------------

def _fused_forward_kernel(
        # per-batch activations
        st_ref, pt_ref, rc_ref, rr_ref, ss_ref, ps_ref,
        # encoder SelfAttentionLayer (shared between template & search passes)
        e_wqk, e_bqk, e_wv, e_bv, e_wo, e_bo, e_n1w, e_n1b,
        e_w1, e_b1, e_w2, e_b2, e_n2w, e_n2b,
        # Fusion module
        f_wq, f_bq, f_wk, f_bk, f_n1w, f_n1b, f_n2w, f_n2b,
        f_lw, f_lb, f_n3w, f_n3b,
        # decoder TemporalAttentionLayer
        d_wq, d_bq, d_wk, d_bk, d_wv, d_bv, d_wo, d_bo,
        d_n1w, d_n1b, d_w1, d_b1, d_w2, d_b2, d_n2w, d_n2b,
        # decoder final LayerNorm + response MLP
        dn_w, dn_b, r_w0, r_b0, r_w1, r_b1, r_w2, r_b2,
        # output
        o_ref,
        *, nhead):
    st = st_ref[0]        # (Lt, C) template features
    pt = pt_ref[0]        # (Lt, C) template pos embedding
    r_col = rc_ref[0]     # (Lt, 1) response (column view)
    r_row = rr_ref[0]     # (1, Lt) response (row view)
    ss = ss_ref[0]        # (Ls, C) search features
    ps = ps_ref[0]        # (Ls, C) search pos embedding

    # ---- Encoder: one SelfAttentionLayer applied to template AND search ----
    enc_w = tuple(w[...] for w in (e_wqk, e_bqk, e_wv, e_bv, e_wo, e_bo,
                                   e_n1w, e_n1b, e_w1, e_b1, e_w2, e_b2,
                                   e_n2w, e_n2b))
    st = _self_attention_layer(st, pt, *enc_w, nhead=nhead)
    ss = _self_attention_layer(ss, ps, *enc_w, nhead=nhead)

    # ---- Fusion module (both cross-attn calls share one affinity matrix) ----
    key = st + st * r_col                                  # src + src * response
    wq = jnp.dot(st, f_wq[...], preferred_element_type=jnp.float32) + f_bq[...]
    wk = jnp.dot(key, f_wk[...], preferred_element_type=jnp.float32) + f_bk[...]
    wq = wq * lax.rsqrt(jnp.maximum(jnp.sum(wq * wq, -1, keepdims=True), 1e-24))
    wk = wk * lax.rsqrt(jnp.maximum(jnp.sum(wk * wk, -1, keepdims=True), 1e-24))
    aff = _softmax(_dot_nt(wq, wk) * 30.0)                 # cosine logits kept f32
    # mask_response = aff @ r : 1-column matmul folded onto the VPU (f32, free).
    mask_resp = jnp.sum(aff * r_row, axis=-1, keepdims=True)          # (Lt, 1)
    mask_feat = jnp.dot(aff.astype(jnp.bfloat16),
                        (key * r_col).astype(jnp.bfloat16),
                        preferred_element_type=jnp.float32)           # (Lt, C)
    f1 = _ln(st * mask_resp, f_n1w[...], f_n1b[...])
    f2 = _ln(st + mask_feat, f_n2w[...], f_n2b[...])
    feat = jnp.dot((f1 + f2).astype(jnp.bfloat16), f_lw[...],
                   preferred_element_type=jnp.float32) + f_lb[...]
    st = _ln(feat, f_n3w[...], f_n3b[...])

    # ---- Decoder (TemporalAttentionLayer): search queries attend to template ----
    dq = jnp.dot((ss + ps).astype(jnp.bfloat16), d_wq[...],
                 preferred_element_type=jnp.float32) + d_bq[...]
    dk = jnp.dot((st + pt).astype(jnp.bfloat16), d_wk[...],
                 preferred_element_type=jnp.float32) + d_bk[...]
    dv = jnp.dot(st.astype(jnp.bfloat16), d_wv[...],
                 preferred_element_type=jnp.float32) + d_bv[...]
    attn = _mha(dq, dk, dv, d_wo[...], d_bo[...], nhead)
    x = _ln(ss + attn, d_n1w[...], d_n1b[...])
    x = _ffn_norm(x, d_w1[...], d_b1[...], d_w2[...], d_b2[...],
                  d_n2w[...], d_n2b[...])

    # ---- decoder final LayerNorm + 3-layer response MLP (lane-dense store) ----
    x = _ln(x, dn_w[...], dn_b[...])
    h = jnp.maximum(jnp.dot(x.astype(jnp.bfloat16), r_w0[...],
                            preferred_element_type=jnp.float32) + r_b0[...], 0.0)
    h = jnp.maximum(jnp.dot(h.astype(jnp.bfloat16), r_w1[...],
                            preferred_element_type=jnp.float32) + r_b1[...], 0.0)
    # final 1-wide linear computed as (1, C/2) x (Ls, C/2)^T -> (1, Ls) row.
    out = lax.dot_general(r_w2[...], h.astype(jnp.bfloat16),
                          (((1,), (1,)), ((), ())),
                          preferred_element_type=jnp.float32) + r_b2[...]
    o_ref[0] = out


# ------------------------------- forward wrapper ------------------------------

def transformer_temporal_forward(params, src_temp, mask_temp, pos_temp,
                                 response_temp, src_search, mask_search,
                                 pos_search, *, nhead):
    del mask_temp, mask_search            # reference always uses padding_mask=None
    B, T, C, Ht, Wt = src_temp.shape
    _, _, Hs, Ws = src_search.shape
    Lt = T * Ht * Wt
    Ls = Hs * Ws

    # Batch-first layout, same sequence ordering as the torch flatten/permute chain.
    st = src_temp.transpose(0, 1, 3, 4, 2).reshape(B, Lt, C)
    pt = pos_temp.transpose(0, 1, 3, 4, 2).reshape(B, Lt, C)
    r = response_temp.reshape(B, Lt)
    rc = r.reshape(B, Lt, 1)              # column view (key/value construction)
    rr = r.reshape(B, 1, Lt)              # row view (VPU mask_response reduction)
    ss = src_search.reshape(B, C, Ls).transpose(0, 2, 1)
    ps = pos_search.reshape(B, C, Ls).transpose(0, 2, 1)

    enc = params['encoder']
    fus = params['fusion']
    dec = params['decoder']
    res = params['response']
    weights = (
        # encoder SelfAttentionLayer (14)
        enc['wqk'], enc['bqk'], enc['wv'], enc['bv'], enc['wo'], enc['bo'],
        enc['norm1_w'], enc['norm1_b'], enc['lin1_w'], enc['lin1_b'],
        enc['lin2_w'], enc['lin2_b'], enc['norm2_w'], enc['norm2_b'],
        # Fusion module (12)
        fus['WQ_w'], fus['WQ_b'], fus['WK_w'], fus['WK_b'],
        fus['norm1_w'], fus['norm1_b'], fus['norm2_w'], fus['norm2_b'],
        fus['lin_w'], fus['lin_b'], fus['norm3_w'], fus['norm3_b'],
        # decoder TemporalAttentionLayer (16)
        dec['wq'], dec['bq'], dec['wk'], dec['bk'], dec['wv'], dec['bv'],
        dec['wo'], dec['bo'], dec['norm1_w'], dec['norm1_b'],
        dec['lin1_w'], dec['lin1_b'], dec['lin2_w'], dec['lin2_b'],
        dec['norm2_w'], dec['norm2_b'],
        # decoder final LayerNorm + response MLP (8)
        params['dec_norm_w'], params['dec_norm_b'],
        res['w0'], res['b0'], res['w1'], res['b1'], res['w2'], res['b2'],
    )

    act = lambda b: (b, 0, 0)             # per-batch activation block
    wgt = lambda b: (0, 0)                # weights: same block every grid step
    in_specs = [
        pl.BlockSpec((1, Lt, C), act),    # template features
        pl.BlockSpec((1, Lt, C), act),    # template pos
        pl.BlockSpec((1, Lt, 1), act),    # response (column)
        pl.BlockSpec((1, 1, Lt), act),    # response (row)
        pl.BlockSpec((1, Ls, C), act),    # search features
        pl.BlockSpec((1, Ls, C), act),    # search pos
    ] + [pl.BlockSpec(w.shape, wgt) for w in weights]

    out = pl.pallas_call(
        functools.partial(_fused_forward_kernel, nhead=nhead),
        grid=(B,),
        in_specs=in_specs,
        out_specs=pl.BlockSpec((1, 1, Ls), act),
        out_shape=jax.ShapeDtypeStruct((B, 1, Ls), jnp.float32),
        compiler_params=pltpu.CompilerParams(
            # batch axis is parallel: lets v7x shard it over its 2 TensorCores;
            # on v5e/v6e it is just B sequential steps of a single launch.
            dimension_semantics=("parallel",),
            # explicit VMEM budget; everything resident here is well under 1 MiB.
            vmem_limit_bytes=32 * 1024 * 1024,
        ),
    )(st, pt, rc, rr, ss, ps, *weights)

    return out.reshape(B, 1, Hs, Ws)


# ------------------------------ parameter init --------------------------------

def init_params(key, C, nhead, F):
    """Deterministic synthetic weights in the PyTorch layout (in, out)."""
    keys = iter(jax.random.split(key, 64))

    def w(shape, scale=0.1):
        return scale * jax.random.normal(next(keys), shape, dtype=jnp.float32)

    zeros = lambda n: jnp.zeros((n,), jnp.float32)
    ones = lambda n: jnp.ones((n,), jnp.float32)

    def attn_params():
        return dict(
            mha=dict(wq=w((C, C)), bq=zeros(C), wk=w((C, C)), bk=zeros(C),
                     wv=w((C, C)), bv=zeros(C), wo=w((C, C)), bo=zeros(C)),
            lin1_w=w((C, F)), lin1_b=zeros(F),
            lin2_w=w((F, C)), lin2_b=zeros(C),
            norm1_w=ones(C), norm1_b=zeros(C),
            norm2_w=ones(C), norm2_b=zeros(C),
        )

    return dict(
        encoder=attn_params(),
        decoder=attn_params(),
        dec_norm_w=ones(C), dec_norm_b=zeros(C),
        fusion=dict(
            WQ_w=w((C, F)), WQ_b=zeros(F),
            WK_w=w((C, F)), WK_b=zeros(F),
            norm1_w=ones(C), norm1_b=zeros(C),
            norm2_w=ones(C), norm2_b=zeros(C),
            norm3_w=ones(C), norm3_b=zeros(C),
            lin_w=w((C, C)), lin_b=zeros(C),
        ),
        response=dict(
            w0=w((C, C // 2)), b0=zeros(C // 2),
            w1=w((C // 2, C // 2)), b1=zeros(C // 2),
            w2=w((C // 2, 1)), b2=zeros(1),
        ),
    )


def prepare_params(raw, C, nhead):
    """Fold the MHA query scale into Wq/bq, fuse Wq|Wk for self-attention, cast
    matmul weights to bf16 (f32 MXU accumulation in-kernel), keep the Fusion
    WQ/WK projections f32 (temp=30 cosine path), reshape biases/norms to rows."""
    row = lambda v: v.reshape(1, -1).astype(jnp.float32)
    bf = lambda m: m.astype(jnp.bfloat16)
    scale = (C // nhead) ** -0.5

    def common(p):
        return dict(
            norm1_w=row(p['norm1_w']), norm1_b=row(p['norm1_b']),
            lin1_w=bf(p['lin1_w']), lin1_b=row(p['lin1_b']),
            lin2_w=bf(p['lin2_w']), lin2_b=row(p['lin2_b']),
            norm2_w=row(p['norm2_w']), norm2_b=row(p['norm2_b']),
        )

    def prep_encoder(p):
        m = p['mha']
        d = dict(
            wqk=bf(jnp.concatenate([m['wq'] * scale, m['wk']], axis=1)),
            bqk=row(jnp.concatenate([m['bq'] * scale, m['bk']], axis=0)),
            wv=bf(m['wv']), bv=row(m['bv']),
            wo=bf(m['wo']), bo=row(m['bo']),
        )
        d.update(common(p))
        return d

    def prep_decoder(p):
        m = p['mha']
        d = dict(
            wq=bf(m['wq'] * scale), bq=row(m['bq'] * scale),
            wk=bf(m['wk']), bk=row(m['bk']),
            wv=bf(m['wv']), bv=row(m['bv']),
            wo=bf(m['wo']), bo=row(m['bo']),
        )
        d.update(common(p))
        return d

    f = raw['fusion']
    r = raw['response']
    return dict(
        encoder=prep_encoder(raw['encoder']),
        decoder=prep_decoder(raw['decoder']),
        dec_norm_w=row(raw['dec_norm_w']), dec_norm_b=row(raw['dec_norm_b']),
        fusion=dict(
            # WQ/WK kept f32: bf16 weights here measurably shift the temp=30
            # cosine-similarity softmax (review correctness concern).
            WQ_w=f['WQ_w'].astype(jnp.float32), WQ_b=row(f['WQ_b']),
            WK_w=f['WK_w'].astype(jnp.float32), WK_b=row(f['WK_b']),
            norm1_w=row(f['norm1_w']), norm1_b=row(f['norm1_b']),
            norm2_w=row(f['norm2_w']), norm2_b=row(f['norm2_b']),
            norm3_w=row(f['norm3_w']), norm3_b=row(f['norm3_b']),
            lin_w=bf(f['lin_w']), lin_b=row(f['lin_b']),
        ),
        response=dict(
            w0=bf(r['w0']), b0=row(r['b0']),
            w1=bf(r['w1']), b1=row(r['b1']),
            w2=bf(r['w2'].reshape(1, -1)), b2=row(r['b2']),   # (1, C/2), (1, 1)
        ),
    )


# --------------------------- pure-JAX f32 reference ---------------------------

def _reference_forward(raw, src_temp, pos_temp, response_temp, src_search,
                       pos_search, nhead):
    B, T, C, Ht, Wt = src_temp.shape
    _, _, Hs, Ws = src_search.shape
    Lt, Ls = T * Ht * Wt, Hs * Ws
    st = src_temp.transpose(0, 1, 3, 4, 2).reshape(B, Lt, C)
    pt = pos_temp.transpose(0, 1, 3, 4, 2).reshape(B, Lt, C)
    r = response_temp.reshape(B, Lt, 1)
    ss = src_search.reshape(B, C, Ls).transpose(0, 2, 1)
    ps = pos_search.reshape(B, C, Ls).transpose(0, 2, 1)

    def ln(x, w, b):
        mu = x.mean(-1, keepdims=True)
        xc = x - mu
        return xc / jnp.sqrt((xc * xc).mean(-1, keepdims=True) + LN_EPS) * w + b

    def mha(qin, kin, vin, m):
        scale = (C // nhead) ** -0.5
        q = (qin @ m['wq'] + m['bq']) * scale
        k = kin @ m['wk'] + m['bk']
        v = vin @ m['wv'] + m['bv']
        Bq, L, _ = q.shape
        S = k.shape[1]
        qh = q.reshape(Bq, L, nhead, -1).transpose(0, 2, 1, 3)
        kh = k.reshape(Bq, S, nhead, -1).transpose(0, 2, 1, 3)
        vh = v.reshape(Bq, S, nhead, -1).transpose(0, 2, 1, 3)
        p = jax.nn.softmax(jnp.einsum('bhqd,bhkd->bhqk', qh, kh), axis=-1)
        o = jnp.einsum('bhqk,bhkd->bhqd', p, vh)
        o = o.transpose(0, 2, 1, 3).reshape(Bq, L, C)
        return o @ m['wo'] + m['bo']

    def attn_layer(q, pos_q, k, pos_k, v, p):
        a = mha(q + pos_q, k + pos_k, v, p['mha'])
        x = ln(q + a, p['norm1_w'], p['norm1_b'])
        ff = jnp.maximum(x @ p['lin1_w'] + p['lin1_b'], 0.0) @ p['lin2_w'] + p['lin2_b']
        return ln(x + ff, p['norm2_w'], p['norm2_b'])

    enc = raw['encoder']
    st = attn_layer(st, pt, st, pt, st, enc)
    ss = attn_layer(ss, ps, ss, ps, ss, enc)

    f = raw['fusion']
    key = st + st * r
    wq = st @ f['WQ_w'] + f['WQ_b']
    wk = key @ f['WK_w'] + f['WK_b']
    wq = wq / jnp.maximum(jnp.linalg.norm(wq, axis=-1, keepdims=True), 1e-12)
    wk = wk / jnp.maximum(jnp.linalg.norm(wk, axis=-1, keepdims=True), 1e-12)
    aff = jax.nn.softmax(jnp.einsum('bqd,bkd->bqk', wq, wk) * 30.0, axis=-1)
    mask_resp = jnp.einsum('bqk,bkc->bqc', aff, r)
    mask_feat = jnp.einsum('bqk,bkc->bqc', aff, key * r)
    f1 = ln(st * mask_resp, f['norm1_w'], f['norm1_b'])
    f2 = ln(st + mask_feat, f['norm2_w'], f['norm2_b'])
    st = ln((f1 + f2) @ f['lin_w'] + f['lin_b'], f['norm3_w'], f['norm3_b'])

    ss = attn_layer(ss, ps, st, pt, st, raw['decoder'])
    ss = ln(ss, raw['dec_norm_w'], raw['dec_norm_b'])

    rp = raw['response']
    h = jnp.maximum(ss @ rp['w0'] + rp['b0'], 0.0)
    h = jnp.maximum(h @ rp['w1'] + rp['b1'], 0.0)
    out = h @ rp['w2'] + rp['b2']                       # (B, Ls, 1)
    return out.transpose(0, 2, 1).reshape(B, 1, Hs, Ws)


# ----------------------------------- main --------------------------------------

if __name__ == "__main__":
    # Small config: d_model=32, nhead=4, dim_feedforward=64 (= FusionLayer key dim),
    # 1 encoder layer, 1 decoder layer.
    B, T, C, Ht, Wt = 2, 2, 32, 4, 4
    Hs, Ws = 4, 4
    nhead, F = 4, 64

    root = jax.random.PRNGKey(0)
    kp, k1, k2, k3, k4, k5 = jax.random.split(root, 6)

    raw = init_params(kp, C, nhead, F)
    params = prepare_params(raw, C, nhead)

    src_temp = jax.random.normal(k1, (B, T, C, Ht, Wt), jnp.float32)
    pos_temp = jax.random.normal(k2, (B, T, C, Ht, Wt), jnp.float32)
    response_temp = jax.random.uniform(k3, (B, T, Ht, Wt), jnp.float32)
    src_search = jax.random.normal(k4, (B, C, Hs, Ws), jnp.float32)
    pos_search = jax.random.normal(k5, (B, C, Hs, Ws), jnp.float32)
    mask_temp = jnp.zeros((B, T, Ht, Wt), jnp.float32)    # unused (padding_mask=None)
    mask_search = jnp.zeros((B, Hs, Ws), jnp.float32)     # unused (padding_mask=None)

    fwd = jax.jit(functools.partial(transformer_temporal_forward, nhead=nhead))
    out = jax.block_until_ready(
        fwd(params, src_temp, mask_temp, pos_temp, response_temp,
            src_search, mask_search, pos_search))

    assert out.shape == (B, 1, Hs, Ws), out.shape
    assert bool(jnp.all(jnp.isfinite(out)))

    # Validate against the pure-JAX f32 reference (bf16 matmuls => loose tolerance).
    ref = _reference_forward(raw, src_temp, pos_temp, response_temp,
                             src_search, pos_search, nhead)
    assert float(jnp.max(jnp.abs(out - ref))) < 5e-2

    print("KERNEL_OK")
</pallas_src>

<mosaic_0001>
module attributes {stable_mosaic.version = 11 : i64} {
  func.func @_fused_forward_kernel(%arg0: i32, %arg1: memref<1x32x32xf32, #tpu.memory_space<vmem>>, %arg2: memref<1x32x32xf32, #tpu.memory_space<vmem>>, %arg3: memref<1x32x1xf32, #tpu.memory_space<vmem>>, %arg4: memref<1x1x32xf32, #tpu.memory_space<vmem>>, %arg5: memref<1x16x32xf32, #tpu.memory_space<vmem>>, %arg6: memref<1x16x32xf32, #tpu.memory_space<vmem>>, %arg7: memref<32x64xbf16, #tpu.memory_space<vmem>>, %arg8: memref<1x64xf32, #tpu.memory_space<vmem>>, %arg9: memref<32x32xbf16, #tpu.memory_space<vmem>>, %arg10: memref<1x32xf32, #tpu.memory_space<vmem>>, %arg11: memref<32x32xbf16, #tpu.memory_space<vmem>>, %arg12: memref<1x32xf32, #tpu.memory_space<vmem>>, %arg13: memref<1x32xf32, #tpu.memory_space<vmem>>, %arg14: memref<1x32xf32, #tpu.memory_space<vmem>>, %arg15: memref<32x64xbf16, #tpu.memory_space<vmem>>, %arg16: memref<1x64xf32, #tpu.memory_space<vmem>>, %arg17: memref<64x32xbf16, #tpu.memory_space<vmem>>, %arg18: memref<1x32xf32, #tpu.memory_space<vmem>>, %arg19: memref<1x32xf32, #tpu.memory_space<vmem>>, %arg20: memref<1x32xf32, #tpu.memory_space<vmem>>, %arg21: memref<32x64xf32, #tpu.memory_space<vmem>>, %arg22: memref<1x64xf32, #tpu.memory_space<vmem>>, %arg23: memref<32x64xf32, #tpu.memory_space<vmem>>, %arg24: memref<1x64xf32, #tpu.memory_space<vmem>>, %arg25: memref<1x32xf32, #tpu.memory_space<vmem>>, %arg26: memref<1x32xf32, #tpu.memory_space<vmem>>, %arg27: memref<1x32xf32, #tpu.memory_space<vmem>>, %arg28: memref<1x32xf32, #tpu.memory_space<vmem>>, %arg29: memref<32x32xbf16, #tpu.memory_space<vmem>>, %arg30: memref<1x32xf32, #tpu.memory_space<vmem>>, %arg31: memref<1x32xf32, #tpu.memory_space<vmem>>, %arg32: memref<1x32xf32, #tpu.memory_space<vmem>>, %arg33: memref<32x32xbf16, #tpu.memory_space<vmem>>, %arg34: memref<1x32xf32, #tpu.memory_space<vmem>>, %arg35: memref<32x32xbf16, #tpu.memory_space<vmem>>, %arg36: memref<1x32xf32, #tpu.memory_space<vmem>>, %arg37: memref<32x32xbf16, #tpu.memory_space<vmem>>, %arg38: memref<1x32xf32, #tpu.memory_space<vmem>>, %arg39: memref<32x32xbf16, #tpu.memory_space<vmem>>, %arg40: memref<1x32xf32, #tpu.memory_space<vmem>>, %arg41: memref<1x32xf32, #tpu.memory_space<vmem>>, %arg42: memref<1x32xf32, #tpu.memory_space<vmem>>, %arg43: memref<32x64xbf16, #tpu.memory_space<vmem>>, %arg44: memref<1x64xf32, #tpu.memory_space<vmem>>, %arg45: memref<64x32xbf16, #tpu.memory_space<vmem>>, %arg46: memref<1x32xf32, #tpu.memory_space<vmem>>, %arg47: memref<1x32xf32, #tpu.memory_space<vmem>>, %arg48: memref<1x32xf32, #tpu.memory_space<vmem>>, %arg49: memref<1x32xf32, #tpu.memory_space<vmem>>, %arg50: memref<1x32xf32, #tpu.memory_space<vmem>>, %arg51: memref<32x16xbf16, #tpu.memory_space<vmem>>, %arg52: memref<1x16xf32, #tpu.memory_space<vmem>>, %arg53: memref<16x16xbf16, #tpu.memory_space<vmem>>, %arg54: memref<1x16xf32, #tpu.memory_space<vmem>>, %arg55: memref<1x16xbf16, #tpu.memory_space<vmem>>, %arg56: memref<1x1xf32, #tpu.memory_space<vmem>>, %arg57: memref<1x1x16xf32, #tpu.memory_space<vmem>>) attributes {dimension_semantics = [#tpu.dimension_semantics<parallel>], iteration_bounds = array<i64: 2>, scalar_prefetch = 0 : i64, scratch_operands = 0 : i64, tpu.core_type = #tpu.core_type<tc>, window_params = [{transform_indices = @transform_0, window_bounds = array<i64: 1, 32, 32>}, {transform_indices = @transform_1, window_bounds = array<i64: 1, 32, 32>}, {transform_indices = @transform_2, window_bounds = array<i64: 1, 32, 1>}, {transform_indices = @transform_3, window_bounds = array<i64: 1, 1, 32>}, {transform_indices = @transform_4, window_bounds = array<i64: 1, 16, 32>}, {transform_indices = @transform_5, window_bounds = array<i64: 1, 16, 32>}, {pipeline_mode = #tpu.pipeline_mode<synchronous>, transform_indices = @transform_6, window_bounds = array<i64: 32, 64>}, {pipeline_mode = #tpu.pipeline_mode<synchronous>, transform_indices = @transform_7, window_bounds = array<i64: 1, 64>}, {pipeline_mode = #tpu.pipeline_mode<synchronous>, transform_indices = @transform_8, window_bounds = array<i64: 32, 32>}, {pipeline_mode = #tpu.pipeline_mode<synchronous>, transform_indices = @transform_9, window_bounds = array<i64: 1, 32>}, {pipeline_mode = #tpu.pipeline_mode<synchronous>, transform_indices = @transform_10, window_bounds = array<i64: 32, 32>}, {pipeline_mode = #tpu.pipeline_mode<synchronous>, transform_indices = @transform_11, window_bounds = array<i64: 1, 32>}, {pipeline_mode = #tpu.pipeline_mode<synchronous>, transform_indices = @transform_12, window_bounds = array<i64: 1, 32>}, {pipeline_mode = #tpu.pipeline_mode<synchronous>, transform_indices = @transform_13, window_bounds = array<i64: 1, 32>}, {pipeline_mode = #tpu.pipeline_mode<synchronous>, transform_indices = @transform_14, window_bounds = array<i64: 32, 64>}, {pipeline_mode = #tpu.pipeline_mode<synchronous>, transform_indices = @transform_15, window_bounds = array<i64: 1, 64>}, {pipeline_mode = #tpu.pipeline_mode<synchronous>, transform_indices = @transform_16, window_bounds = array<i64: 64, 32>}, {pipeline_mode = #tpu.pipeline_mode<synchronous>, transform_indices = @transform_17, window_bounds = array<i64: 1, 32>}, {pipeline_mode = #tpu.pipeline_mode<synchronous>, transform_indices = @transform_18, window_bounds = array<i64: 1, 32>}, {pipeline_mode = #tpu.pipeline_mode<synchronous>, transform_indices = @transform_19, window_bounds = array<i64: 1, 32>}, {pipeline_mode = #tpu.pipeline_mode<synchronous>, transform_indices = @transform_20, window_bounds = array<i64: 32, 64>}, {pipeline_mode = #tpu.pipeline_mode<synchronous>, transform_indices = @transform_21, window_bounds = array<i64: 1, 64>}, {pipeline_mode = #tpu.pipeline_mode<synchronous>, transform_indices = @transform_22, window_bounds = array<i64: 32, 64>}, {pipeline_mode = #tpu.pipeline_mode<synchronous>, transform_indices = @transform_23, window_bounds = array<i64: 1, 64>}, {pipeline_mode = #tpu.pipeline_mode<synchronous>, transform_indices = @transform_24, window_bounds = array<i64: 1, 32>}, {pipeline_mode = #tpu.pipeline_mode<synchronous>, transform_indices = @transform_25, window_bounds = array<i64: 1, 32>}, {pipeline_mode = #tpu.pipeline_mode<synchronous>, transform_indices = @transform_26, window_bounds = array<i64: 1, 32>}, {pipeline_mode = #tpu.pipeline_mode<synchronous>, transform_indices = @transform_27, window_bounds = array<i64: 1, 32>}, {pipeline_mode = #tpu.pipeline_mode<synchronous>, transform_indices = @transform_28, window_bounds = array<i64: 32, 32>}, {pipeline_mode = #tpu.pipeline_mode<synchronous>, transform_indices = @transform_29, window_bounds = array<i64: 1, 32>}, {pipeline_mode = #tpu.pipeline_mode<synchronous>, transform_indices = @transform_30, window_bounds = array<i64: 1, 32>}, {pipeline_mode = #tpu.pipeline_mode<synchronous>, transform_indices = @transform_31, window_bounds = array<i64: 1, 32>}, {pipeline_mode = #tpu.pipeline_mode<synchronous>, transform_indices = @transform_32, window_bounds = array<i64: 32, 32>}, {pipeline_mode = #tpu.pipeline_mode<synchronous>, transform_indices = @transform_33, window_bounds = array<i64: 1, 32>}, {pipeline_mode = #tpu.pipeline_mode<synchronous>, transform_indices = @transform_34, window_bounds = array<i64: 32, 32>}, {pipeline_mode = #tpu.pipeline_mode<synchronous>, transform_indices = @transform_35, window_bounds = array<i64: 1, 32>}, {pipeline_mode = #tpu.pipeline_mode<synchronous>, transform_indices = @transform_36, window_bounds = array<i64: 32, 32>}, {pipeline_mode = #tpu.pipeline_mode<synchronous>, transform_indices = @transform_37, window_bounds = array<i64: 1, 32>}, {pipeline_mode = #tpu.pipeline_mode<synchronous>, transform_indices = @transform_38, window_bounds = array<i64: 32, 32>}, {pipeline_mode = #tpu.pipeline_mode<synchronous>, transform_indices = @transform_39, window_bounds = array<i64: 1, 32>}, {pipeline_mode = #tpu.pipeline_mode<synchronous>, transform_indices = @transform_40, window_bounds = array<i64: 1, 32>}, {pipeline_mode = #tpu.pipeline_mode<synchronous>, transform_indices = @transform_41, window_bounds = array<i64: 1, 32>}, {pipeline_mode = #tpu.pipeline_mode<synchronous>, transform_indices = @transform_42, window_bounds = array<i64: 32, 64>}, {pipeline_mode = #tpu.pipeline_mode<synchronous>, transform_indices = @transform_43, window_bounds = array<i64: 1, 64>}, {pipeline_mode = #tpu.pipeline_mode<synchronous>, transform_indices = @transform_44, window_bounds = array<i64: 64, 32>}, {pipeline_mode = #tpu.pipeline_mode<synchronous>, transform_indices = @transform_45, window_bounds = array<i64: 1, 32>}, {pipeline_mode = #tpu.pipeline_mode<synchronous>, transform_indices = @transform_46, window_bounds = array<i64: 1, 32>}, {pipeline_mode = #tpu.pipeline_mode<synchronous>, transform_indices = @transform_47, window_bounds = array<i64: 1, 32>}, {pipeline_mode = #tpu.pipeline_mode<synchronous>, transform_indices = @transform_48, window_bounds = array<i64: 1, 32>}, {pipeline_mode = #tpu.pipeline_mode<synchronous>, transform_indices = @transform_49, window_bounds = array<i64: 1, 32>}, {pipeline_mode = #tpu.pipeline_mode<synchronous>, transform_indices = @transform_50, window_bounds = array<i64: 32, 16>}, {pipeline_mode = #tpu.pipeline_mode<synchronous>, transform_indices = @transform_51, window_bounds = array<i64: 1, 16>}, {pipeline_mode = #tpu.pipeline_mode<synchronous>, transform_indices = @transform_52, window_bounds = array<i64: 16, 16>}, {pipeline_mode = #tpu.pipeline_mode<synchronous>, transform_indices = @transform_53, window_bounds = array<i64: 1, 16>}, {pipeline_mode = #tpu.pipeline_mode<synchronous>, transform_indices = @transform_54, window_bounds = array<i64: 1, 16>}, {pipeline_mode = #tpu.pipeline_mode<synchronous>, transform_indices = @transform_55, window_bounds = array<i64: 1, 1>}, {transform_indices = @transform_56, window_bounds = array<i64: 1, 1, 16>}]} {
    %c0 = arith.constant 0 : index
    %c0_0 = arith.constant 0 : index
    %c0_1 = arith.constant 0 : index
    %0 = vector.load %arg1[%c0, %c0_0, %c0_1] : memref<1x32x32xf32, #tpu.memory_space<vmem>>, vector<1x32x32xf32>
    %1 = vector.shape_cast %0 : vector<1x32x32xf32> to vector<32x32xf32>
    %c0_2 = arith.constant 0 : index
    %c0_3 = arith.constant 0 : index
    %c0_4 = arith.constant 0 : index
    %2 = vector.load %arg2[%c0_2, %c0_3, %c0_4] : memref<1x32x32xf32, #tpu.memory_space<vmem>>, vector<1x32x32xf32>
    %3 = vector.shape_cast %2 : vector<1x32x32xf32> to vector<32x32xf32>
    %c0_5 = arith.constant 0 : index
    %c0_6 = arith.constant 0 : index
    %c0_7 = arith.constant 0 : index
    %4 = vector.load %arg3[%c0_5, %c0_6, %c0_7] : memref<1x32x1xf32, #tpu.memory_space<vmem>>, vector<1x32x1xf32>
    %5 = vector.shape_cast %4 : vector<1x32x1xf32> to vector<32x1xf32>
    %c0_8 = arith.constant 0 : index
    %c0_9 = arith.constant 0 : index
    %c0_10 = arith.constant 0 : index
    %6 = vector.load %arg4[%c0_8, %c0_9, %c0_10] : memref<1x1x32xf32, #tpu.memory_space<vmem>>, vector<1x1x32xf32>
    %7 = vector.shape_cast %6 : vector<1x1x32xf32> to vector<1x32xf32>
    %c0_11 = arith.constant 0 : index
    %c0_12 = arith.constant 0 : index
    %c0_13 = arith.constant 0 : index
    %8 = vector.load %arg5[%c0_11, %c0_12, %c0_13] : memref<1x16x32xf32, #tpu.memory_space<vmem>>, vector<1x16x32xf32>
    %9 = vector.shape_cast %8 : vector<1x16x32xf32> to vector<16x32xf32>
    %c0_14 = arith.constant 0 : index
    %c0_15 = arith.constant 0 : index
    %c0_16 = arith.constant 0 : index
    %10 = vector.load %arg6[%c0_14, %c0_15, %c0_16] : memref<1x16x32xf32, #tpu.memory_space<vmem>>, vector<1x16x32xf32>
    %11 = vector.shape_cast %10 : vector<1x16x32xf32> to vector<16x32xf32>
    %c0_17 = arith.constant 0 : index
    %c0_18 = arith.constant 0 : index
    %12 = vector.load %arg7[%c0_17, %c0_18] : memref<32x64xbf16, #tpu.memory_space<vmem>>, vector<32x64xbf16>
    %c0_19 = arith.constant 0 : index
    %c0_20 = arith.constant 0 : index
    %13 = vector.load %arg8[%c0_19, %c0_20] : memref<1x64xf32, #tpu.memory_space<vmem>>, vector<1x64xf32>
    %c0_21 = arith.constant 0 : index
    %c0_22 = arith.constant 0 : index
    %14 = vector.load %arg9[%c0_21, %c0_22] : memref<32x32xbf16, #tpu.memory_space<vmem>>, vector<32x32xbf16>
    %c0_23 = arith.constant 0 : index
    %c0_24 = arith.constant 0 : index
    %15 = vector.load %arg10[%c0_23, %c0_24] : memref<1x32xf32, #tpu.memory_space<vmem>>, vector<1x32xf32>
    %c0_25 = arith.constant 0 : index
    %c0_26 = arith.constant 0 : index
    %16 = vector.load %arg11[%c0_25, %c0_26] : memref<32x32xbf16, #tpu.memory_space<vmem>>, vector<32x32xbf16>
    %c0_27 = arith.constant 0 : index
    %c0_28 = arith.constant 0 : index
    %17 = vector.load %arg12[%c0_27, %c0_28] : memref<1x32xf32, #tpu.memory_space<vmem>>, vector<1x32xf32>
    %c0_29 = arith.constant 0 : index
    %c0_30 = arith.constant 0 : index
    %18 = vector.load %arg13[%c0_29, %c0_30] : memref<1x32xf32, #tpu.memory_space<vmem>>, vector<1x32xf32>
    %c0_31 = arith.constant 0 : index
    %c0_32 = arith.constant 0 : index
    %19 = vector.load %arg14[%c0_31, %c0_32] : memref<1x32xf32, #tpu.memory_space<vmem>>, vector<1x32xf32>
    %c0_33 = arith.constant 0 : index
    %c0_34 = arith.constant 0 : index
    %20 = vector.load %arg15[%c0_33, %c0_34] : memref<32x64xbf16, #tpu.memory_space<vmem>>, vector<32x64xbf16>
    %c0_35 = arith.constant 0 : index
    %c0_36 = arith.constant 0 : index
    %21 = vector.load %arg16[%c0_35, %c0_36] : memref<1x64xf32, #tpu.memory_space<vmem>>, vector<1x64xf32>
    %c0_37 = arith.constant 0 : index
    %c0_38 = arith.constant 0 : index
    %22 = vector.load %arg17[%c0_37, %c0_38] : memref<64x32xbf16, #tpu.memory_space<vmem>>, vector<64x32xbf16>
    %c0_39 = arith.constant 0 : index
    %c0_40 = arith.constant 0 : index
    %23 = vector.load %arg18[%c0_39, %c0_40] : memref<1x32xf32, #tpu.memory_space<vmem>>, vector<1x32xf32>
    %c0_41 = arith.constant 0 : index
    %c0_42 = arith.constant 0 : index
    %24 = vector.load %arg19[%c0_41, %c0_42] : memref<1x32xf32, #tpu.memory_space<vmem>>, vector<1x32xf32>
    %c0_43 = arith.constant 0 : index
    %c0_44 = arith.constant 0 : index
    %25 = vector.load %arg20[%c0_43, %c0_44] : memref<1x32xf32, #tpu.memory_space<vmem>>, vector<1x32xf32>
    %26 = arith.addf %1, %3 : vector<32x32xf32>
    %27 = arith.truncf %26 : vector<32x32xf32> to vector<32x32xbf16>
    %cst = arith.constant dense<0.000000e+00> : vector<32x64xf32>
    %28 = tpu.matmul %27, %12, %cst {dimension_numbers = #tpu.dot_dimension_numbers<[1], [0], [0], [1], [0, 0, 1, 1], [], []>} : vector<32x32xbf16>, vector<32x64xbf16>, vector<32x64xf32> -> vector<32x64xf32>
    %29 = vector.broadcast %13 : vector<1x64xf32> to vector<32x64xf32>
    %30 = arith.addf %28, %29 : vector<32x64xf32>
    %31 = arith.truncf %1 : vector<32x32xf32> to vector<32x32xbf16>
    %cst_45 = arith.constant dense<0.000000e+00> : vector<32x32xf32>
    %32 = tpu.matmul %31, %14, %cst_45 {dimension_numbers = #tpu.dot_dimension_numbers<[1], [0], [0], [1], [0, 0, 1, 1], [], []>} : vector<32x32xbf16>, vector<32x32xbf16>, vector<32x32xf32> -> vector<32x32xf32>
    %33 = vector.broadcast %15 : vector<1x32xf32> to vector<32x32xf32>
    %34 = arith.addf %32, %33 : vector<32x32xf32>
    %35 = vector.extract_strided_slice %30 {offsets = [0, 0], sizes = [32, 32], strides = [1, 1]} : vector<32x64xf32> to vector<32x32xf32>
    %36 = vector.extract_strided_slice %30 {offsets = [0, 32], sizes = [32, 32], strides = [1, 1]} : vector<32x64xf32> to vector<32x32xf32>
    %37 = vector.extract_strided_slice %35 {offsets = [0, 0], sizes = [32, 8], strides = [1, 1]} : vector<32x32xf32> to vector<32x8xf32>
    %38 = arith.truncf %37 : vector<32x8xf32> to vector<32x8xbf16>
    %39 = vector.extract_strided_slice %36 {offsets = [0, 0], sizes = [32, 8], strides = [1, 1]} : vector<32x32xf32> to vector<32x8xf32>
    %40 = arith.truncf %39 : vector<32x8xf32> to vector<32x8xbf16>
    %41 = vector.extract_strided_slice %34 {offsets = [0, 0], sizes = [32, 8], strides = [1, 1]} : vector<32x32xf32> to vector<32x8xf32>
    %42 = arith.truncf %41 : vector<32x8xf32> to vector<32x8xbf16>
    %cst_46 = arith.constant dense<0.000000e+00> : vector<32x32xf32>
    %43 = tpu.matmul %38, %40, %cst_46 {dimension_numbers = #tpu.dot_dimension_numbers<[1], [1], [0], [0], [0, 0, 1, 0], [], []>} : vector<32x8xbf16>, vector<32x8xbf16>, vector<32x32xf32> -> vector<32x32xf32>
    %cst_47 = arith.constant dense<0xFF800000> : vector<32xf32>
    %44 = vector.multi_reduction <maximumf>, %43, %cst_47 [1] : vector<32x32xf32> to vector<32xf32>
    %45 = vector.shape_cast %44 : vector<32xf32> to vector<32x1xf32>
    %46 = vector.broadcast %45 : vector<32x1xf32> to vector<32x32xf32>
    %47 = arith.subf %43, %46 : vector<32x32xf32>
    %48 = math.exp %47 : vector<32x32xf32>
    %cst_48 = arith.constant dense<0.000000e+00> : vector<32xf32>
    %49 = vector.multi_reduction <add>, %48, %cst_48 [1] : vector<32x32xf32> to vector<32xf32>
    %50 = vector.shape_cast %49 : vector<32xf32> to vector<32x1xf32>
    %51 = vector.broadcast %50 : vector<32x1xf32> to vector<32x32xf32>
    %52 = arith.divf %48, %51 : vector<32x32xf32>
    %53 = arith.truncf %52 : vector<32x32xf32> to vector<32x32xbf16>
    %cst_49 = arith.constant dense<0.000000e+00> : vector<32x8xf32>
    %54 = tpu.matmul %53, %42, %cst_49 {dimension_numbers = #tpu.dot_dimension_numbers<[1], [0], [0], [1], [0, 0, 1, 1], [], []>} : vector<32x32xbf16>, vector<32x8xbf16>, vector<32x8xf32> -> vector<32x8xf32>
    %55 = vector.extract_strided_slice %35 {offsets = [0, 8], sizes = [32, 8], strides = [1, 1]} : vector<32x32xf32> to vector<32x8xf32>
    %56 = arith.truncf %55 : vector<32x8xf32> to vector<32x8xbf16>
    %57 = vector.extract_strided_slice %36 {offsets = [0, 8], sizes = [32, 8], strides = [1, 1]} : vector<32x32xf32> to vector<32x8xf32>
    %58 = arith.truncf %57 : vector<32x8xf32> to vector<32x8xbf16>
    %59 = vector.extract_strided_slice %34 {offsets = [0, 8], sizes = [32, 8], strides = [1, 1]} : vector<32x32xf32> to vector<32x8xf32>
    %60 = arith.truncf %59 : vector<32x8xf32> to vector<32x8xbf16>
    %cst_50 = arith.constant dense<0.000000e+00> : vector<32x32xf32>
    %61 = tpu.matmul %56, %58, %cst_50 {dimension_numbers = #tpu.dot_dimension_numbers<[1], [1], [0], [0], [0, 0, 1, 0], [], []>} : vector<32x8xbf16>, vector<32x8xbf16>, vector<32x32xf32> -> vector<32x32xf32>
    %cst_51 = arith.constant dense<0xFF800000> : vector<32xf32>
    %62 = vector.multi_reduction <maximumf>, %61, %cst_51 [1] : vector<32x32xf32> to vector<32xf32>
    %63 = vector.shape_cast %62 : vector<32xf32> to vector<32x1xf32>
    %64 = vector.broadcast %63 : vector<32x1xf32> to vector<32x32xf32>
    %65 = arith.subf %61, %64 : vector<32x32xf32>
    %66 = math.exp %65 : vector<32x32xf32>
    %cst_52 = arith.constant dense<0.000000e+00> : vector<32xf32>
    %67 = vector.multi_reduction <add>, %66, %cst_52 [1] : vector<32x32xf32> to vector<32xf32>
    %68 = vector.shape_cast %67 : vector<32xf32> to vector<32x1xf32>
    %69 = vector.broadcast %68 : vector<32x1xf32> to vector<32x32xf32>
    %70 = arith.divf %66, %69 : vector<32x32xf32>
    %71 = arith.truncf %70 : vector<32x32xf32> to vector<32x32xbf16>
    %cst_53 = arith.constant dense<0.000000e+00> : vector<32x8xf32>
    %72 = tpu.matmul %71, %60, %cst_53 {dimension_numbers = #tpu.dot_dimension_numbers<[1], [0], [0], [1], [0, 0, 1, 1], [], []>} : vector<32x32xbf16>, vector<32x8xbf16>, vector<32x8xf32> -> vector<32x8xf32>
    %73 = vector.extract_strided_slice %35 {offsets = [0, 16], sizes = [32, 8], strides = [1, 1]} : vector<32x32xf32> to vector<32x8xf32>
    %74 = arith.truncf %73 : vector<32x8xf32> to vector<32x8xbf16>
    %75 = vector.extract_strided_slice %36 {offsets = [0, 16], sizes = [32, 8], strides = [1, 1]} : vector<32x32xf32> to vector<32x8xf32>
    %76 = arith.truncf %75 : vector<32x8xf32> to vector<32x8xbf16>
    %77 = vector.extract_strided_slice %34 {offsets = [0, 16], sizes = [32, 8], strides = [1, 1]} : vector<32x32xf32> to vector<32x8xf32>
    %78 = arith.truncf %77 : vector<32x8xf32> to vector<32x8xbf16>
    %cst_54 = arith.constant dense<0.000000e+00> : vector<32x32xf32>
    %79 = tpu.matmul %74, %76, %cst_54 {dimension_numbers = #tpu.dot_dimension_numbers<[1], [1], [0], [0], [0, 0, 1, 0], [], []>} : vector<32x8xbf16>, vector<32x8xbf16>, vector<32x32xf32> -> vector<32x32xf32>
    %cst_55 = arith.constant dense<0xFF800000> : vector<32xf32>
    %80 = vector.multi_reduction <maximumf>, %79, %cst_55 [1] : vector<32x32xf32> to vector<32xf32>
    %81 = vector.shape_cast %80 : vector<32xf32> to vector<32x1xf32>
    %82 = vector.broadcast %81 : vector<32x1xf32> to vector<32x32xf32>
    %83 = arith.subf %79, %82 : vector<32x32xf32>
    %84 = math.exp %83 : vector<32x32xf32>
    %cst_56 = arith.constant dense<0.000000e+00> : vector<32xf32>
    %85 = vector.multi_reduction <add>, %84, %cst_56 [1] : vector<32x32xf32> to vector<32xf32>
    %86 = vector.shape_cast %85 : vector<32xf32> to vector<32x1xf32>
    %87 = vector.broadcast %86 : vector<32x1xf32> to vector<32x32xf32>
    %88 = arith.divf %84, %87 : vector<32x32xf32>
    %89 = arith.truncf %88 : vector<32x32xf32> to vector<32x32xbf16>
    %cst_57 = arith.constant dense<0.000000e+00> : vector<32x8xf32>
    %90 = tpu.matmul %89, %78, %cst_57 {dimension_numbers = #tpu.dot_dimension_numbers<[1], [0], [0], [1], [0, 0, 1, 1], [], []>} : vector<32x32xbf16>, vector<32x8xbf16>, vector<32x8xf32> -> vector<32x8xf32>
    %91 = vector.extract_strided_slice %35 {offsets = [0, 24], sizes = [32, 8], strides = [1, 1]} : vector<32x32xf32> to vector<32x8xf32>
    %92 = arith.truncf %91 : vector<32x8xf32> to vector<32x8xbf16>
    %93 = vector.extract_strided_slice %36 {offsets = [0, 24], sizes = [32, 8], strides = [1, 1]} : vector<32x32xf32> to vector<32x8xf32>
    %94 = arith.truncf %93 : vector<32x8xf32> to vector<32x8xbf16>
    %95 = vector.extract_strided_slice %34 {offsets = [0, 24], sizes = [32, 8], strides = [1, 1]} : vector<32x32xf32> to vector<32x8xf32>
    %96 = arith.truncf %95 : vector<32x8xf32> to vector<32x8xbf16>
    %cst_58 = arith.constant dense<0.000000e+00> : vector<32x32xf32>
    %97 = tpu.matmul %92, %94, %cst_58 {dimension_numbers = #tpu.dot_dimension_numbers<[1], [1], [0], [0], [0, 0, 1, 0], [], []>} : vector<32x8xbf16>, vector<32x8xbf16>, vector<32x32xf32> -> vector<32x32xf32>
    %cst_59 = arith.constant dense<0xFF800000> : vector<32xf32>
    %98 = vector.multi_reduction <maximumf>, %97, %cst_59 [1] : vector<32x32xf32> to vector<32xf32>
    %99 = vector.shape_cast %98 : vector<32xf32> to vector<32x1xf32>
    %100 = vector.broadcast %99 : vector<32x1xf32> to vector<32x32xf32>
    %101 = arith.subf %97, %100 : vector<32x32xf32>
    %102 = math.exp %101 : vector<32x32xf32>
    %cst_60 = arith.constant dense<0.000000e+00> : vector<32xf32>
    %103 = vector.multi_reduction <add>, %102, %cst_60 [1] : vector<32x32xf32> to vector<32xf32>
    %104 = vector.shape_cast %103 : vector<32xf32> to vector<32x1xf32>
    %105 = vector.broadcast %104 : vector<32x1xf32> to vector<32x32xf32>
    %106 = arith.divf %102, %105 : vector<32x32xf32>
    %107 = arith.truncf %106 : vector<32x32xf32> to vector<32x32xbf16>
    %cst_61 = arith.constant dense<0.000000e+00> : vector<32x8xf32>
    %108 = tpu.matmul %107, %96, %cst_61 {dimension_numbers = #tpu.dot_dimension_numbers<[1], [0], [0], [1], [0, 0, 1, 1], [], []>} : vector<32x32xbf16>, vector<32x8xbf16>, vector<32x8xf32> -> vector<32x8xf32>
    %109 = tpu.concatenate %54, %72, %90, %108 in 1 : vector<32x8xf32>, vector<32x8xf32>, vector<32x8xf32>, vector<32x8xf32> -> vector<32x32xf32>
    %110 = arith.truncf %109 : vector<32x32xf32> to vector<32x32xbf16>
    %cst_62 = arith.constant dense<0.000000e+00> : vector<32x32xf32>
    %111 = tpu.matmul %110, %16, %cst_62 {dimension_numbers = #tpu.dot_dimension_numbers<[1], [0], [0], [1], [0, 0, 1, 1], [], []>} : vector<32x32xbf16>, vector<32x32xbf16>, vector<32x32xf32> -> vector<32x32xf32>
    %112 = vector.broadcast %17 : vector<1x32xf32> to vector<32x32xf32>
    %113 = arith.addf %111, %112 : vector<32x32xf32>
    %114 = arith.addf %1, %113 : vector<32x32xf32>
    %cst_63 = arith.constant dense<0.000000e+00> : vector<32xf32>
    %115 = vector.multi_reduction <add>, %114, %cst_63 [1] : vector<32x32xf32> to vector<32xf32>
    %116 = vector.shape_cast %115 : vector<32xf32> to vector<32x1xf32>
    %cst_64 = arith.constant 3.200000e+01 : f32
    %117 = vector.broadcast %cst_64 : f32 to vector<32x1xf32>
    %118 = arith.divf %116, %117 : vector<32x1xf32>
    %119 = vector.broadcast %118 : vector<32x1xf32> to vector<32x32xf32>
    %120 = arith.subf %114, %119 : vector<32x32xf32>
    %121 = arith.mulf %120, %120 : vector<32x32xf32>
    %cst_65 = arith.constant dense<0.000000e+00> : vector<32xf32>
    %122 = vector.multi_reduction <add>, %121, %cst_65 [1] : vector<32x32xf32> to vector<32xf32>
    %123 = vector.shape_cast %122 : vector<32xf32> to vector<32x1xf32>
    %cst_66 = arith.constant 3.200000e+01 : f32
    %124 = vector.broadcast %cst_66 : f32 to vector<32x1xf32>
    %125 = arith.divf %123, %124 : vector<32x1xf32>
    %cst_67 = arith.constant 9.99999974E-6 : f32
    %126 = vector.broadcast %cst_67 : f32 to vector<32x1xf32>
    %127 = arith.addf %125, %126 : vector<32x1xf32>
    %128 = math.rsqrt %127 : vector<32x1xf32>
    %129 = vector.broadcast %128 : vector<32x1xf32> to vector<32x32xf32>
    %130 = arith.mulf %120, %129 : vector<32x32xf32>
    %131 = vector.broadcast %18 : vector<1x32xf32> to vector<32x32xf32>
    %132 = arith.mulf %130, %131 : vector<32x32xf32>
    %133 = vector.broadcast %19 : vector<1x32xf32> to vector<32x32xf32>
    %134 = arith.addf %132, %133 : vector<32x32xf32>
    %135 = arith.truncf %134 : vector<32x32xf32> to vector<32x32xbf16>
    %cst_68 = arith.constant dense<0.000000e+00> : vector<32x64xf32>
    %136 = tpu.matmul %135, %20, %cst_68 {dimension_numbers = #tpu.dot_dimension_numbers<[1], [0], [0], [1], [0, 0, 1, 1], [], []>} : vector<32x32xbf16>, vector<32x64xbf16>, vector<32x64xf32> -> vector<32x64xf32>
    %137 = vector.broadcast %21 : vector<1x64xf32> to vector<32x64xf32>
    %138 = arith.addf %136, %137 : vector<32x64xf32>
    %cst_69 = arith.constant 0.000000e+00 : f32
    %139 = vector.broadcast %cst_69 : f32 to vector<32x64xf32>
    %140 = arith.maximumf %138, %139 : vector<32x64xf32>
    %141 = arith.truncf %140 : vector<32x64xf32> to vector<32x64xbf16>
    %cst_70 = arith.constant dense<0.000000e+00> : vector<32x32xf32>
    %142 = tpu.matmul %141, %22, %cst_70 {dimension_numbers = #tpu.dot_dimension_numbers<[1], [0], [0], [1], [0, 0, 1, 1], [], []>} : vector<32x64xbf16>, vector<64x32xbf16>, vector<32x32xf32> -> vector<32x32xf32>
    %143 = vector.broadcast %23 : vector<1x32xf32> to vector<32x32xf32>
    %144 = arith.addf %142, %143 : vector<32x32xf32>
    %145 = arith.addf %134, %144 : vector<32x32xf32>
    %cst_71 = arith.constant dense<0.000000e+00> : vector<32xf32>
    %146 = vector.multi_reduction <add>, %145, %cst_71 [1] : vector<32x32xf32> to vector<32xf32>
    %147 = vector.shape_cast %146 : vector<32xf32> to vector<32x1xf32>
    %cst_72 = arith.constant 3.200000e+01 : f32
    %148 = vector.broadcast %cst_72 : f32 to vector<32x1xf32>
    %149 = arith.divf %147, %148 : vector<32x1xf32>
    %150 = vector.broadcast %149 : vector<32x1xf32> to vector<32x32xf32>
    %151 = arith.subf %145, %150 : vector<32x32xf32>
    %152 = arith.mulf %151, %151 : vector<32x32xf32>
    %cst_73 = arith.constant dense<0.000000e+00> : vector<32xf32>
    %153 = vector.multi_reduction <add>, %152, %cst_73 [1] : vector<32x32xf32> to vector<32xf32>
    %154 = vector.shape_cast %153 : vector<32xf32> to vector<32x1xf32>
    %cst_74 = arith.constant 3.200000e+01 : f32
    %155 = vector.broadcast %cst_74 : f32 to vector<32x1xf32>
    %156 = arith.divf %154, %155 : vector<32x1xf32>
    %cst_75 = arith.constant 9.99999974E-6 : f32
    %157 = vector.broadcast %cst_75 : f32 to vector<32x1xf32>
    %158 = arith.addf %156, %157 : vector<32x1xf32>
    %159 = math.rsqrt %158 : vector<32x1xf32>
    %160 = vector.broadcast %159 : vector<32x1xf32> to vector<32x32xf32>
    %161 = arith.mulf %151, %160 : vector<32x32xf32>
    %162 = vector.broadcast %24 : vector<1x32xf32> to vector<32x32xf32>
    %163 = arith.mulf %161, %162 : vector<32x32xf32>
    %164 = vector.broadcast %25 : vector<1x32xf32> to vector<32x32xf32>
    %165 = arith.addf %163, %164 : vector<32x32xf32>
    %166 = arith.addf %9, %11 : vector<16x32xf32>
    %167 = arith.truncf %166 : vector<16x32xf32> to vector<16x32xbf16>
    %cst_76 = arith.constant dense<0.000000e+00> : vector<16x64xf32>
    %168 = tpu.matmul %167, %12, %cst_76 {dimension_numbers = #tpu.dot_dimension_numbers<[1], [0], [0], [1], [0, 0, 1, 1], [], []>} : vector<16x32xbf16>, vector<32x64xbf16>, vector<16x64xf32> -> vector<16x64xf32>
    %169 = vector.broadcast %13 : vector<1x64xf32> to vector<16x64xf32>
    %170 = arith.addf %168, %169 : vector<16x64xf32>
    %171 = arith.truncf %9 : vector<16x32xf32> to vector<16x32xbf16>
    %cst_77 = arith.constant dense<0.000000e+00> : vector<16x32xf32>
    %172 = tpu.matmul %171, %14, %cst_77 {dimension_numbers = #tpu.dot_dimension_numbers<[1], [0], [0], [1], [0, 0, 1, 1], [], []>} : vector<16x32xbf16>, vector<32x32xbf16>, vector<16x32xf32> -> vector<16x32xf32>
    %173 = vector.broadcast %15 : vector<1x32xf32> to vector<16x32xf32>
    %174 = arith.addf %172, %173 : vector<16x32xf32>
    %175 = vector.extract_strided_slice %170 {offsets = [0, 0], sizes = [16, 32], strides = [1, 1]} : vector<16x64xf32> to vector<16x32xf32>
    %176 = vector.extract_strided_slice %170 {offsets = [0, 32], sizes = [16, 32], strides = [1, 1]} : vector<16x64xf32> to vector<16x32xf32>
    %177 = vector.extract_strided_slice %175 {offsets = [0, 0], sizes = [16, 8], strides = [1, 1]} : vector<16x32xf32> to vector<16x8xf32>
    %178 = arith.truncf %177 : vector<16x8xf32> to vector<16x8xbf16>
    %179 = vector.extract_strided_slice %176 {offsets = [0, 0], sizes = [16, 8], strides = [1, 1]} : vector<16x32xf32> to vector<16x8xf32>
    %180 = arith.truncf %179 : vector<16x8xf32> to vector<16x8xbf16>
    %181 = vector.extract_strided_slice %174 {offsets = [0, 0], sizes = [16, 8], strides = [1, 1]} : vector<16x32xf32> to vector<16x8xf32>
    %182 = arith.truncf %181 : vector<16x8xf32> to vector<16x8xbf16>
    %cst_78 = arith.constant dense<0.000000e+00> : vector<16x16xf32>
    %183 = tpu.matmul %178, %180, %cst_78 {dimension_numbers = #tpu.dot_dimension_numbers<[1], [1], [0], [0], [0, 0, 1, 0], [], []>} : vector<16x8xbf16>, vector<16x8xbf16>, vector<16x16xf32> -> vector<16x16xf32>
    %cst_79 = arith.constant dense<0xFF800000> : vector<16xf32>
    %184 = vector.multi_reduction <maximumf>, %183, %cst_79 [1] : vector<16x16xf32> to vector<16xf32>
    %185 = vector.shape_cast %184 : vector<16xf32> to vector<16x1xf32>
    %186 = vector.broadcast %185 : vector<16x1xf32> to vector<16x16xf32>
    %187 = arith.subf %183, %186 : vector<16x16xf32>
    %188 = math.exp %187 : vector<16x16xf32>
    %cst_80 = arith.constant dense<0.000000e+00> : vector<16xf32>
    %189 = vector.multi_reduction <add>, %188, %cst_80 [1] : vector<16x16xf32> to vector<16xf32>
    %190 = vector.shape_cast %189 : vector<16xf32> to vector<16x1xf32>
    %191 = vector.broadcast %190 : vector<16x1xf32> to vector<16x16xf32>
    %192 = arith.divf %188, %191 : vector<16x16xf32>
    %193 = arith.truncf %192 : vector<16x16xf32> to vector<16x16xbf16>
    %cst_81 = arith.constant dense<0.000000e+00> : vector<16x8xf32>
    %194 = tpu.matmul %193, %182, %cst_81 {dimension_numbers = #tpu.dot_dimension_numbers<[1], [0], [0], [1], [0, 0, 1, 1], [], []>} : vector<16x16xbf16>, vector<16x8xbf16>, vector<16x8xf32> -> vector<16x8xf32>
    %195 = vector.extract_strided_slice %175 {offsets = [0, 8], sizes = [16, 8], strides = [1, 1]} : vector<16x32xf32> to vector<16x8xf32>
    %196 = arith.truncf %195 : vector<16x8xf32> to vector<16x8xbf16>
    %197 = vector.extract_strided_slice %176 {offsets = [0, 8], sizes = [16, 8], strides = [1, 1]} : vector<16x32xf32> to vector<16x8xf32>
    %198 = arith.truncf %197 : vector<16x8xf32> to vector<16x8xbf16>
    %199 = vector.extract_strided_slice %174 {offsets = [0, 8], sizes = [16, 8], strides = [1, 1]} : vector<16x32xf32> to vector<16x8xf32>
    %200 = arith.truncf %199 : vector<16x8xf32> to vector<16x8xbf16>
    %cst_82 = arith.constant dense<0.000000e+00> : vector<16x16xf32>
    %201 = tpu.matmul %196, %198, %cst_82 {dimension_numbers = #tpu.dot_dimension_numbers<[1], [1], [0], [0], [0, 0, 1, 0], [], []>} : vector<16x8xbf16>, vector<16x8xbf16>, vector<16x16xf32> -> vector<16x16xf32>
    %cst_83 = arith.constant dense<0xFF800000> : vector<16xf32>
    %202 = vector.multi_reduction <maximumf>, %201, %cst_83 [1] : vector<16x16xf32> to vector<16xf32>
    %203 = vector.shape_cast %202 : vector<16xf32> to vector<16x1xf32>
    %204 = vector.broadcast %203 : vector<16x1xf32> to vector<16x16xf32>
    %205 = arith.subf %201, %204 : vector<16x16xf32>
    %206 = math.exp %205 : vector<16x16xf32>
    %cst_84 = arith.constant dense<0.000000e+00> : vector<16xf32>
    %207 = vector.multi_reduction <add>, %206, %cst_84 [1] : vector<16x16xf32> to vector<16xf32>
    %208 = vector.shape_cast %207 : vector<16xf32> to vector<16x1xf32>
    %209 = vector.broadcast %208 : vector<16x1xf32> to vector<16x16xf32>
    %210 = arith.divf %206, %209 : vector<16x16xf32>
    %211 = arith.truncf %210 : vector<16x16xf32> to vector<16x16xbf16>
    %cst_85 = arith.constant dense<0.000000e+00> : vector<16x8xf32>
    %212 = tpu.matmul %211, %200, %cst_85 {dimension_numbers = #tpu.dot_dimension_numbers<[1], [0], [0], [1], [0, 0, 1, 1], [], []>} : vector<16x16xbf16>, vector<16x8xbf16>, vector<16x8xf32> -> vector<16x8xf32>
    %213 = vector.extract_strided_slice %175 {offsets = [0, 16], sizes = [16, 8], strides = [1, 1]} : vector<16x32xf32> to vector<16x8xf32>
    %214 = arith.truncf %213 : vector<16x8xf32> to vector<16x8xbf16>
    %215 = vector.extract_strided_slice %176 {offsets = [0, 16], sizes = [16, 8], strides = [1, 1]} : vector<16x32xf32> to vector<16x8xf32>
    %216 = arith.truncf %215 : vector<16x8xf32> to vector<16x8xbf16>
    %217 = vector.extract_strided_slice %174 {offsets = [0, 16], sizes = [16, 8], strides = [1, 1]} : vector<16x32xf32> to vector<16x8xf32>
    %218 = arith.truncf %217 : vector<16x8xf32> to vector<16x8xbf16>
    %cst_86 = arith.constant dense<0.000000e+00> : vector<16x16xf32>
    %219 = tpu.matmul %214, %216, %cst_86 {dimension_numbers = #tpu.dot_dimension_numbers<[1], [1], [0], [0], [0, 0, 1, 0], [], []>} : vector<16x8xbf16>, vector<16x8xbf16>, vector<16x16xf32> -> vector<16x16xf32>
    %cst_87 = arith.constant dense<0xFF800000> : vector<16xf32>
    %220 = vector.multi_reduction <maximumf>, %219, %cst_87 [1] : vector<16x16xf32> to vector<16xf32>
    %221 = vector.shape_cast %220 : vector<16xf32> to vector<16x1xf32>
    %222 = vector.broadcast %221 : vector<16x1xf32> to vector<16x16xf32>
    %223 = arith.subf %219, %222 : vector<16x16xf32>
    %224 = math.exp %223 : vector<16x16xf32>
    %cst_88 = arith.constant dense<0.000000e+00> : vector<16xf32>
    %225 = vector.multi_reduction <add>, %224, %cst_88 [1] : vector<16x16xf32> to vector<16xf32>
    %226 = vector.shape_cast %225 : vector<16xf32> to vector<16x1xf32>
    %227 = vector.broadcast %226 : vector<16x1xf32> to vector<16x16xf32>
    %228 = arith.divf %224, %227 : vector<16x16xf32>
    %229 = arith.truncf %228 : vector<16x16xf32> to vector<16x16xbf16>
    %cst_89 = arith.constant dense<0.000000e+00> : vector<16x8xf32>
    %230 = tpu.matmul %229, %218, %cst_89 {dimension_numbers = #tpu.dot_dimension_numbers<[1], [0], [0], [1], [0, 0, 1, 1], [], []>} : vector<16x16xbf16>, vector<16x8xbf16>, vector<16x8xf32> -> vector<16x8xf32>
    %231 = vector.extract_strided_slice %175 {offsets = [0, 24], sizes = [16, 8], strides = [1, 1]} : vector<16x32xf32> to vector<16x8xf32>
    %232 = arith.truncf %231 : vector<16x8xf32> to vector<16x8xbf16>
    %233 = vector.extract_strided_slice %176 {offsets = [0, 24], sizes = [16, 8], strides = [1, 1]} : vector<16x32xf32> to vector<16x8xf32>
    %234 = arith.truncf %233 : vector<16x8xf32> to vector<16x8xbf16>
    %235 = vector.extract_strided_slice %174 {offsets = [0, 24], sizes = [16, 8], strides = [1, 1]} : vector<16x32xf32> to vector<16x8xf32>
    %236 = arith.truncf %235 : vector<16x8xf32> to vector<16x8xbf16>
    %cst_90 = arith.constant dense<0.000000e+00> : vector<16x16xf32>
    %237 = tpu.matmul %232, %234, %cst_90 {dimension_numbers = #tpu.dot_dimension_numbers<[1], [1], [0], [0], [0, 0, 1, 0], [], []>} : vector<16x8xbf16>, vector<16x8xbf16>, vector<16x16xf32> -> vector<16x16xf32>
    %cst_91 = arith.constant dense<0xFF800000> : vector<16xf32>
    %238 = vector.multi_reduction <maximumf>, %237, %cst_91 [1] : vector<16x16xf32> to vector<16xf32>
    %239 = vector.shape_cast %238 : vector<16xf32> to vector<16x1xf32>
    %240 = vector.broadcast %239 : vector<16x1xf32> to vector<16x16xf32>
    %241 = arith.subf %237, %240 : vector<16x16xf32>
    %242 = math.exp %241 : vector<16x16xf32>
    %cst_92 = arith.constant dense<0.000000e+00> : vector<16xf32>
    %243 = vector.multi_reduction <add>, %242, %cst_92 [1] : vector<16x16xf32> to vector<16xf32>
    %244 = vector.shape_cast %243 : vector<16xf32> to vector<16x1xf32>
    %245 = vector.broadcast %244 : vector<16x1xf32> to vector<16x16xf32>
    %246 = arith.divf %242, %245 : vector<16x16xf32>
    %247 = arith.truncf %246 : vector<16x16xf32> to vector<16x16xbf16>
    %cst_93 = arith.constant dense<0.000000e+00> : vector<16x8xf32>
    %248 = tpu.matmul %247, %236, %cst_93 {dimension_numbers = #tpu.dot_dimension_numbers<[1], [0], [0], [1], [0, 0, 1, 1], [], []>} : vector<16x16xbf16>, vector<16x8xbf16>, vector<16x8xf32> -> vector<16x8xf32>
    %249 = tpu.concatenate %194, %212, %230, %248 in 1 : vector<16x8xf32>, vector<16x8xf32>, vector<16x8xf32>, vector<16x8xf32> -> vector<16x32xf32>
    %250 = arith.truncf %249 : vector<16x32xf32> to vector<16x32xbf16>
    %cst_94 = arith.constant dense<0.000000e+00> : vector<16x32xf32>
    %251 = tpu.matmul %250, %16, %cst_94 {dimension_numbers = #tpu.dot_dimension_numbers<[1], [0], [0], [1], [0, 0, 1, 1], [], []>} : vector<16x32xbf16>, vector<32x32xbf16>, vector<16x32xf32> -> vector<16x32xf32>
    %252 = vector.broadcast %17 : vector<1x32xf32> to vector<16x32xf32>
    %253 = arith.addf %251, %252 : vector<16x32xf32>
    %254 = arith.addf %9, %253 : vector<16x32xf32>
    %cst_95 = arith.constant dense<0.000000e+00> : vector<16xf32>
    %255 = vector.multi_reduction <add>, %254, %cst_95 [1] : vector<16x32xf32> to vector<16xf32>
    %256 = vector.shape_cast %255 : vector<16xf32> to vector<16x1xf32>
    %cst_96 = arith.constant 3.200000e+01 : f32
    %257 = vector.broadcast %cst_96 : f32 to vector<16x1xf32>
    %258 = arith.divf %256, %257 : vector<16x1xf32>
    %259 = vector.broadcast %258 : vector<16x1xf32> to vector<16x32xf32>
    %260 = arith.subf %254, %259 : vector<16x32xf32>
    %261 = arith.mulf %260, %260 : vector<16x32xf32>
    %cst_97 = arith.constant dense<0.000000e+00> : vector<16xf32>
    %262 = vector.multi_reduction <add>, %261, %cst_97 [1] : vector<16x32xf32> to vector<16xf32>
    %263 = vector.shape_cast %262 : vector<16xf32> to vector<16x1xf32>
    %cst_98 = arith.constant 3.200000e+01 : f32
    %264 = vector.broadcast %cst_98 : f32 to vector<16x1xf32>
    %265 = arith.divf %263, %264 : vector<16x1xf32>
    %cst_99 = arith.constant 9.99999974E-6 : f32
    %266 = vector.broadcast %cst_99 : f32 to vector<16x1xf32>
    %267 = arith.addf %265, %266 : vector<16x1xf32>
    %268 = math.rsqrt %267 : vector<16x1xf32>
    %269 = vector.broadcast %268 : vector<16x1xf32> to vector<16x32xf32>
    %270 = arith.mulf %260, %269 : vector<16x32xf32>
    %271 = vector.broadcast %18 : vector<1x32xf32> to vector<16x32xf32>
    %272 = arith.mulf %270, %271 : vector<16x32xf32>
    %273 = vector.broadcast %19 : vector<1x32xf32> to vector<16x32xf32>
    %274 = arith.addf %272, %273 : vector<16x32xf32>
    %275 = arith.truncf %274 : vector<16x32xf32> to vector<16x32xbf16>
    %cst_100 = arith.constant dense<0.000000e+00> : vector<16x64xf32>
    %276 = tpu.matmul %275, %20, %cst_100 {dimension_numbers = #tpu.dot_dimension_numbers<[1], [0], [0], [1], [0, 0, 1, 1], [], []>} : vector<16x32xbf16>, vector<32x64xbf16>, vector<16x64xf32> -> vector<16x64xf32>
    %277 = vector.broadcast %21 : vector<1x64xf32> to vector<16x64xf32>
    %278 = arith.addf %276, %277 : vector<16x64xf32>
    %cst_101 = arith.constant 0.000000e+00 : f32
    %279 = vector.broadcast %cst_101 : f32 to vector<16x64xf32>
    %280 = arith.maximumf %278, %279 : vector<16x64xf32>
    %281 = arith.truncf %280 : vector<16x64xf32> to vector<16x64xbf16>
    %cst_102 = arith.constant dense<0.000000e+00> : vector<16x32xf32>
    %282 = tpu.matmul %281, %22, %cst_102 {dimension_numbers = #tpu.dot_dimension_numbers<[1], [0], [0], [1], [0, 0, 1, 1], [], []>} : vector<16x64xbf16>, vector<64x32xbf16>, vector<16x32xf32> -> vector<16x32xf32>
    %283 = vector.broadcast %23 : vector<1x32xf32> to vector<16x32xf32>
    %284 = arith.addf %282, %283 : vector<16x32xf32>
    %285 = arith.addf %274, %284 : vector<16x32xf32>
    %cst_103 = arith.constant dense<0.000000e+00> : vector<16xf32>
    %286 = vector.multi_reduction <add>, %285, %cst_103 [1] : vector<16x32xf32> to vector<16xf32>
    %287 = vector.shape_cast %286 : vector<16xf32> to vector<16x1xf32>
    %cst_104 = arith.constant 3.200000e+01 : f32
    %288 = vector.broadcast %cst_104 : f32 to vector<16x1xf32>
    %289 = arith.divf %287, %288 : vector<16x1xf32>
    %290 = vector.broadcast %289 : vector<16x1xf32> to vector<16x32xf32>
    %291 = arith.subf %285, %290 : vector<16x32xf32>
    %292 = arith.mulf %291, %291 : vector<16x32xf32>
    %cst_105 = arith.constant dense<0.000000e+00> : vector<16xf32>
    %293 = vector.multi_reduction <add>, %292, %cst_105 [1] : vector<16x32xf32> to vector<16xf32>
    %294 = vector.shape_cast %293 : vector<16xf32> to vector<16x1xf32>
    %cst_106 = arith.constant 3.200000e+01 : f32
    %295 = vector.broadcast %cst_106 : f32 to vector<16x1xf32>
    %296 = arith.divf %294, %295 : vector<16x1xf32>
    %cst_107 = arith.constant 9.99999974E-6 : f32
    %297 = vector.broadcast %cst_107 : f32 to vector<16x1xf32>
    %298 = arith.addf %296, %297 : vector<16x1xf32>
    %299 = math.rsqrt %298 : vector<16x1xf32>
    %300 = vector.broadcast %299 : vector<16x1xf32> to vector<16x32xf32>
    %301 = arith.mulf %291, %300 : vector<16x32xf32>
    %302 = vector.broadcast %24 : vector<1x32xf32> to vector<16x32xf32>
    %303 = arith.mulf %301, %302 : vector<16x32xf32>
    %304 = vector.broadcast %25 : vector<1x32xf32> to vector<16x32xf32>
    %305 = arith.addf %303, %304 : vector<16x32xf32>
    %306 = vector.broadcast %5 : vector<32x1xf32> to vector<32x32xf32>
    %307 = arith.mulf %165, %306 : vector<32x32xf32>
    %308 = arith.addf %165, %307 : vector<32x32xf32>
    %c0_108 = arith.constant 0 : index
    %c0_109 = arith.constant 0 : index
    %309 = vector.load %arg21[%c0_108, %c0_109] : memref<32x64xf32, #tpu.memory_space<vmem>>, vector<32x64xf32>
    %cst_110 = arith.constant dense<0.000000e+00> : vector<32x64xf32>
    %310 = tpu.matmul %165, %309, %cst_110 {dimension_numbers = #tpu.dot_dimension_numbers<[1], [0], [0], [1], [0, 0, 1, 1], [], []>} : vector<32x32xf32>, vector<32x64xf32>, vector<32x64xf32> -> vector<32x64xf32>
    %c0_111 = arith.constant 0 : index
    %c0_112 = arith.constant 0 : index
    %311 = vector.load %arg22[%c0_111, %c0_112] : memref<1x64xf32, #tpu.memory_space<vmem>>, vector<1x64xf32>
    %312 = vector.broadcast %311 : vector<1x64xf32> to vector<32x64xf32>
    %313 = arith.addf %310, %312 : vector<32x64xf32>
    %c0_113 = arith.constant 0 : index
    %c0_114 = arith.constant 0 : index
    %314 = vector.load %arg23[%c0_113, %c0_114] : memref<32x64xf32, #tpu.memory_space<vmem>>, vector<32x64xf32>
    %cst_115 = arith.constant dense<0.000000e+00> : vector<32x64xf32>
    %315 = tpu.matmul %308, %314, %cst_115 {dimension_numbers = #tpu.dot_dimension_numbers<[1], [0], [0], [1], [0, 0, 1, 1], [], []>} : vector<32x32xf32>, vector<32x64xf32>, vector<32x64xf32> -> vector<32x64xf32>
    %c0_116 = arith.constant 0 : index
    %c0_117 = arith.constant 0 : index
    %316 = vector.load %arg24[%c0_116, %c0_117] : memref<1x64xf32, #tpu.memory_space<vmem>>, vector<1x64xf32>
    %317 = vector.broadcast %316 : vector<1x64xf32> to vector<32x64xf32>
    %318 = arith.addf %315, %317 : vector<32x64xf32>
    %319 = arith.mulf %313, %313 : vector<32x64xf32>
    %cst_118 = arith.constant dense<0.000000e+00> : vector<32xf32>
    %320 = vector.multi_reduction <add>, %319, %cst_118 [1] : vector<32x64xf32> to vector<32xf32>
    %321 = vector.shape_cast %320 : vector<32xf32> to vector<32x1xf32>
    %cst_119 = arith.constant 1.000000e-24 : f32
    %322 = vector.broadcast %cst_119 : f32 to vector<32x1xf32>
    %323 = arith.maximumf %321, %322 : vector<32x1xf32>
    %324 = math.rsqrt %323 : vector<32x1xf32>
    %325 = vector.broadcast %324 : vector<32x1xf32> to vector<32x64xf32>
    %326 = arith.mulf %313, %325 : vector<32x64xf32>
    %327 = arith.mulf %318, %318 : vector<32x64xf32>
    %cst_120 = arith.constant dense<0.000000e+00> : vector<32xf32>
    %328 = vector.multi_reduction <add>, %327, %cst_120 [1] : vector<32x64xf32> to vector<32xf32>
    %329 = vector.shape_cast %328 : vector<32xf32> to vector<32x1xf32>
    %cst_121 = arith.constant 1.000000e-24 : f32
    %330 = vector.broadcast %cst_121 : f32 to vector<32x1xf32>
    %331 = arith.maximumf %329, %330 : vector<32x1xf32>
    %332 = math.rsqrt %331 : vector<32x1xf32>
    %333 = vector.broadcast %332 : vector<32x1xf32> to vector<32x64xf32>
    %334 = arith.mulf %318, %333 : vector<32x64xf32>
    %cst_122 = arith.constant dense<0.000000e+00> : vector<32x32xf32>
    %335 = tpu.matmul %326, %334, %cst_122 {dimension_numbers = #tpu.dot_dimension_numbers<[1], [1], [0], [0], [0, 0, 1, 0], [], []>} : vector<32x64xf32>, vector<32x64xf32>, vector<32x32xf32> -> vector<32x32xf32>
    %cst_123 = arith.constant 3.000000e+01 : f32
    %336 = vector.broadcast %cst_123 : f32 to vector<32x32xf32>
    %337 = arith.mulf %335, %336 : vector<32x32xf32>
    %cst_124 = arith.constant dense<0xFF800000> : vector<32xf32>
    %338 = vector.multi_reduction <maximumf>, %337, %cst_124 [1] : vector<32x32xf32> to vector<32xf32>
    %339 = vector.shape_cast %338 : vector<32xf32> to vector<32x1xf32>
    %340 = vector.broadcast %339 : vector<32x1xf32> to vector<32x32xf32>
    %341 = arith.subf %337, %340 : vector<32x32xf32>
    %342 = math.exp %341 : vector<32x32xf32>
    %cst_125 = arith.constant dense<0.000000e+00> : vector<32xf32>
    %343 = vector.multi_reduction <add>, %342, %cst_125 [1] : vector<32x32xf32> to vector<32xf32>
    %344 = vector.shape_cast %343 : vector<32xf32> to vector<32x1xf32>
    %345 = vector.broadcast %344 : vector<32x1xf32> to vector<32x32xf32>
    %346 = arith.divf %342, %345 : vector<32x32xf32>
    %347 = vector.broadcast %7 : vector<1x32xf32> to vector<32x32xf32>
    %348 = arith.mulf %346, %347 : vector<32x32xf32>
    %cst_126 = arith.constant dense<0.000000e+00> : vector<32xf32>
    %349 = vector.multi_reduction <add>, %348, %cst_126 [1] : vector<32x32xf32> to vector<32xf32>
    %350 = vector.shape_cast %349 : vector<32xf32> to vector<32x1xf32>
    %351 = arith.truncf %346 : vector<32x32xf32> to vector<32x32xbf16>
    %352 = vector.broadcast %5 : vector<32x1xf32> to vector<32x32xf32>
    %353 = arith.mulf %308, %352 : vector<32x32xf32>
    %354 = arith.truncf %353 : vector<32x32xf32> to vector<32x32xbf16>
    %cst_127 = arith.constant dense<0.000000e+00> : vector<32x32xf32>
    %355 = tpu.matmul %351, %354, %cst_127 {dimension_numbers = #tpu.dot_dimension_numbers<[1], [0], [0], [1], [0, 0, 1, 1], [], []>} : vector<32x32xbf16>, vector<32x32xbf16>, vector<32x32xf32> -> vector<32x32xf32>
    %356 = vector.broadcast %350 : vector<32x1xf32> to vector<32x32xf32>
    %357 = arith.mulf %165, %356 : vector<32x32xf32>
    %c0_128 = arith.constant 0 : index
    %c0_129 = arith.constant 0 : index
    %358 = vector.load %arg25[%c0_128, %c0_129] : memref<1x32xf32, #tpu.memory_space<vmem>>, vector<1x32xf32>
    %c0_130 = arith.constant 0 : index
    %c0_131 = arith.constant 0 : index
    %359 = vector.load %arg26[%c0_130, %c0_131] : memref<1x32xf32, #tpu.memory_space<vmem>>, vector<1x32xf32>
    %cst_132 = arith.constant dense<0.000000e+00> : vector<32xf32>
    %360 = vector.multi_reduction <add>, %357, %cst_132 [1] : vector<32x32xf32> to vector<32xf32>
    %361 = vector.shape_cast %360 : vector<32xf32> to vector<32x1xf32>
    %cst_133 = arith.constant 3.200000e+01 : f32
    %362 = vector.broadcast %cst_133 : f32 to vector<32x1xf32>
    %363 = arith.divf %361, %362 : vector<32x1xf32>
    %364 = vector.broadcast %363 : vector<32x1xf32> to vector<32x32xf32>
    %365 = arith.subf %357, %364 : vector<32x32xf32>
    %366 = arith.mulf %365, %365 : vector<32x32xf32>
    %cst_134 = arith.constant dense<0.000000e+00> : vector<32xf32>
    %367 = vector.multi_reduction <add>, %366, %cst_134 [1] : vector<32x32xf32> to vector<32xf32>
    %368 = vector.shape_cast %367 : vector<32xf32> to vector<32x1xf32>
    %cst_135 = arith.constant 3.200000e+01 : f32
    %369 = vector.broadcast %cst_135 : f32 to vector<32x1xf32>
    %370 = arith.divf %368, %369 : vector<32x1xf32>
    %cst_136 = arith.constant 9.99999974E-6 : f32
    %371 = vector.broadcast %cst_136 : f32 to vector<32x1xf32>
    %372 = arith.addf %370, %371 : vector<32x1xf32>
    %373 = math.rsqrt %372 : vector<32x1xf32>
    %374 = vector.broadcast %373 : vector<32x1xf32> to vector<32x32xf32>
    %375 = arith.mulf %365, %374 : vector<32x32xf32>
    %376 = vector.broadcast %358 : vector<1x32xf32> to vector<32x32xf32>
    %377 = arith.mulf %375, %376 : vector<32x32xf32>
    %378 = vector.broadcast %359 : vector<1x32xf32> to vector<32x32xf32>
    %379 = arith.addf %377, %378 : vector<32x32xf32>
    %380 = arith.addf %165, %355 : vector<32x32xf32>
    %c0_137 = arith.constant 0 : index
    %c0_138 = arith.constant 0 : index
    %381 = vector.load %arg27[%c0_137, %c0_138] : memref<1x32xf32, #tpu.memory_space<vmem>>, vector<1x32xf32>
    %c0_139 = arith.constant 0 : index
    %c0_140 = arith.constant 0 : index
    %382 = vector.load %arg28[%c0_139, %c0_140] : memref<1x32xf32, #tpu.memory_space<vmem>>, vector<1x32xf32>
    %cst_141 = arith.constant dense<0.000000e+00> : vector<32xf32>
    %383 = vector.multi_reduction <add>, %380, %cst_141 [1] : vector<32x32xf32> to vector<32xf32>
    %384 = vector.shape_cast %383 : vector<32xf32> to vector<32x1xf32>
    %cst_142 = arith.constant 3.200000e+01 : f32
    %385 = vector.broadcast %cst_142 : f32 to vector<32x1xf32>
    %386 = arith.divf %384, %385 : vector<32x1xf32>
    %387 = vector.broadcast %386 : vector<32x1xf32> to vector<32x32xf32>
    %388 = arith.subf %380, %387 : vector<32x32xf32>
    %389 = arith.mulf %388, %388 : vector<32x32xf32>
    %cst_143 = arith.constant dense<0.000000e+00> : vector<32xf32>
    %390 = vector.multi_reduction <add>, %389, %cst_143 [1] : vector<32x32xf32> to vector<32xf32>
    %391 = vector.shape_cast %390 : vector<32xf32> to vector<32x1xf32>
    %cst_144 = arith.constant 3.200000e+01 : f32
    %392 = vector.broadcast %cst_144 : f32 to vector<32x1xf32>
    %393 = arith.divf %391, %392 : vector<32x1xf32>
    %cst_145 = arith.constant 9.99999974E-6 : f32
    %394 = vector.broadcast %cst_145 : f32 to vector<32x1xf32>
    %395 = arith.addf %393, %394 : vector<32x1xf32>
    %396 = math.rsqrt %395 : vector<32x1xf32>
    %397 = vector.broadcast %396 : vector<32x1xf32> to vector<32x32xf32>
    %398 = arith.mulf %388, %397 : vector<32x32xf32>
    %399 = vector.broadcast %381 : vector<1x32xf32> to vector<32x32xf32>
    %400 = arith.mulf %398, %399 : vector<32x32xf32>
    %401 = vector.broadcast %382 : vector<1x32xf32> to vector<32x32xf32>
    %402 = arith.addf %400, %401 : vector<32x32xf32>
    %403 = arith.addf %379, %402 : vector<32x32xf32>
    %404 = arith.truncf %403 : vector<32x32xf32> to vector<32x32xbf16>
    %c0_146 = arith.constant 0 : index
    %c0_147 = arith.constant 0 : index
    %405 = vector.load %arg29[%c0_146, %c0_147] : memref<32x32xbf16, #tpu.memory_space<vmem>>, vector<32x32xbf16>
    %cst_148 = arith.constant dense<0.000000e+00> : vector<32x32xf32>
    %406 = tpu.matmul %404, %405, %cst_148 {dimension_numbers = #tpu.dot_dimension_numbers<[1], [0], [0], [1], [0, 0, 1, 1], [], []>} : vector<32x32xbf16>, vector<32x32xbf16>, vector<32x32xf32> -> vector<32x32xf32>
    %c0_149 = arith.constant 0 : index
    %c0_150 = arith.constant 0 : index
    %407 = vector.load %arg30[%c0_149, %c0_150] : memref<1x32xf32, #tpu.memory_space<vmem>>, vector<1x32xf32>
    %408 = vector.broadcast %407 : vector<1x32xf32> to vector<32x32xf32>
    %409 = arith.addf %406, %408 : vector<32x32xf32>
    %c0_151 = arith.constant 0 : index
    %c0_152 = arith.constant 0 : index
    %410 = vector.load %arg31[%c0_151, %c0_152] : memref<1x32xf32, #tpu.memory_space<vmem>>, vector<1x32xf32>
    %c0_153 = arith.constant 0 : index
    %c0_154 = arith.constant 0 : index
    %411 = vector.load %arg32[%c0_153, %c0_154] : memref<1x32xf32, #tpu.memory_space<vmem>>, vector<1x32xf32>
    %cst_155 = arith.constant dense<0.000000e+00> : vector<32xf32>
    %412 = vector.multi_reduction <add>, %409, %cst_155 [1] : vector<32x32xf32> to vector<32xf32>
    %413 = vector.shape_cast %412 : vector<32xf32> to vector<32x1xf32>
    %cst_156 = arith.constant 3.200000e+01 : f32
    %414 = vector.broadcast %cst_156 : f32 to vector<32x1xf32>
    %415 = arith.divf %413, %414 : vector<32x1xf32>
    %416 = vector.broadcast %415 : vector<32x1xf32> to vector<32x32xf32>
    %417 = arith.subf %409, %416 : vector<32x32xf32>
    %418 = arith.mulf %417, %417 : vector<32x32xf32>
    %cst_157 = arith.constant dense<0.000000e+00> : vector<32xf32>
    %419 = vector.multi_reduction <add>, %418, %cst_157 [1] : vector<32x32xf32> to vector<32xf32>
    %420 = vector.shape_cast %419 : vector<32xf32> to vector<32x1xf32>
    %cst_158 = arith.constant 3.200000e+01 : f32
    %421 = vector.broadcast %cst_158 : f32 to vector<32x1xf32>
    %422 = arith.divf %420, %421 : vector<32x1xf32>
    %cst_159 = arith.constant 9.99999974E-6 : f32
    %423 = vector.broadcast %cst_159 : f32 to vector<32x1xf32>
    %424 = arith.addf %422, %423 : vector<32x1xf32>
    %425 = math.rsqrt %424 : vector<32x1xf32>
    %426 = vector.broadcast %425 : vector<32x1xf32> to vector<32x32xf32>
    %427 = arith.mulf %417, %426 : vector<32x32xf32>
    %428 = vector.broadcast %410 : vector<1x32xf32> to vector<32x32xf32>
    %429 = arith.mulf %427, %428 : vector<32x32xf32>
    %430 = vector.broadcast %411 : vector<1x32xf32> to vector<32x32xf32>
    %431 = arith.addf %429, %430 : vector<32x32xf32>
    %432 = arith.addf %305, %11 : vector<16x32xf32>
    %433 = arith.truncf %432 : vector<16x32xf32> to vector<16x32xbf16>
    %c0_160 = arith.constant 0 : index
    %c0_161 = arith.constant 0 : index
    %434 = vector.load %arg33[%c0_160, %c0_161] : memref<32x32xbf16, #tpu.memory_space<vmem>>, vector<32x32xbf16>
    %cst_162 = arith.constant dense<0.000000e+00> : vector<16x32xf32>
    %435 = tpu.matmul %433, %434, %cst_162 {dimension_numbers = #tpu.dot_dimension_numbers<[1], [0], [0], [1], [0, 0, 1, 1], [], []>} : vector<16x32xbf16>, vector<32x32xbf16>, vector<16x32xf32> -> vector<16x32xf32>
    %c0_163 = arith.constant 0 : index
    %c0_164 = arith.constant 0 : index
    %436 = vector.load %arg34[%c0_163, %c0_164] : memref<1x32xf32, #tpu.memory_space<vmem>>, vector<1x32xf32>
    %437 = vector.broadcast %436 : vector<1x32xf32> to vector<16x32xf32>
    %438 = arith.addf %435, %437 : vector<16x32xf32>
    %439 = arith.addf %431, %3 : vector<32x32xf32>
    %440 = arith.truncf %439 : vector<32x32xf32> to vector<32x32xbf16>
    %c0_165 = arith.constant 0 : index
    %c0_166 = arith.constant 0 : index
    %441 = vector.load %arg35[%c0_165, %c0_166] : memref<32x32xbf16, #tpu.memory_space<vmem>>, vector<32x32xbf16>
    %cst_167 = arith.constant dense<0.000000e+00> : vector<32x32xf32>
    %442 = tpu.matmul %440, %441, %cst_167 {dimension_numbers = #tpu.dot_dimension_numbers<[1], [0], [0], [1], [0, 0, 1, 1], [], []>} : vector<32x32xbf16>, vector<32x32xbf16>, vector<32x32xf32> -> vector<32x32xf32>
    %c0_168 = arith.constant 0 : index
    %c0_169 = arith.constant 0 : index
    %443 = vector.load %arg36[%c0_168, %c0_169] : memref<1x32xf32, #tpu.memory_space<vmem>>, vector<1x32xf32>
    %444 = vector.broadcast %443 : vector<1x32xf32> to vector<32x32xf32>
    %445 = arith.addf %442, %444 : vector<32x32xf32>
    %446 = arith.truncf %431 : vector<32x32xf32> to vector<32x32xbf16>
    %c0_170 = arith.constant 0 : index
    %c0_171 = arith.constant 0 : index
    %447 = vector.load %arg37[%c0_170, %c0_171] : memref<32x32xbf16, #tpu.memory_space<vmem>>, vector<32x32xbf16>
    %cst_172 = arith.constant dense<0.000000e+00> : vector<32x32xf32>
    %448 = tpu.matmul %446, %447, %cst_172 {dimension_numbers = #tpu.dot_dimension_numbers<[1], [0], [0], [1], [0, 0, 1, 1], [], []>} : vector<32x32xbf16>, vector<32x32xbf16>, vector<32x32xf32> -> vector<32x32xf32>
    %c0_173 = arith.constant 0 : index
    %c0_174 = arith.constant 0 : index
    %449 = vector.load %arg38[%c0_173, %c0_174] : memref<1x32xf32, #tpu.memory_space<vmem>>, vector<1x32xf32>
    %450 = vector.broadcast %449 : vector<1x32xf32> to vector<32x32xf32>
    %451 = arith.addf %448, %450 : vector<32x32xf32>
    %c0_175 = arith.constant 0 : index
    %c0_176 = arith.constant 0 : index
    %452 = vector.load %arg39[%c0_175, %c0_176] : memref<32x32xbf16, #tpu.memory_space<vmem>>, vector<32x32xbf16>
    %c0_177 = arith.constant 0 : index
    %c0_178 = arith.constant 0 : index
    %453 = vector.load %arg40[%c0_177, %c0_178] : memref<1x32xf32, #tpu.memory_space<vmem>>, vector<1x32xf32>
    %454 = vector.extract_strided_slice %438 {offsets = [0, 0], sizes = [16, 8], strides = [1, 1]} : vector<16x32xf32> to vector<16x8xf32>
    %455 = arith.truncf %454 : vector<16x8xf32> to vector<16x8xbf16>
    %456 = vector.extract_strided_slice %445 {offsets = [0, 0], sizes = [32, 8], strides = [1, 1]} : vector<32x32xf32> to vector<32x8xf32>
    %457 = arith.truncf %456 : vector<32x8xf32> to vector<32x8xbf16>
    %458 = vector.extract_strided_slice %451 {offsets = [0, 0], sizes = [32, 8], strides = [1, 1]} : vector<32x32xf32> to vector<32x8xf32>
    %459 = arith.truncf %458 : vector<32x8xf32> to vector<32x8xbf16>
    %cst_179 = arith.constant dense<0.000000e+00> : vector<16x32xf32>
    %460 = tpu.matmul %455, %457, %cst_179 {dimension_numbers = #tpu.dot_dimension_numbers<[1], [1], [0], [0], [0, 0, 1, 0], [], []>} : vector<16x8xbf16>, vector<32x8xbf16>, vector<16x32xf32> -> vector<16x32xf32>
    %cst_180 = arith.constant dense<0xFF800000> : vector<16xf32>
    %461 = vector.multi_reduction <maximumf>, %460, %cst_180 [1] : vector<16x32xf32> to vector<16xf32>
    %462 = vector.shape_cast %461 : vector<16xf32> to vector<16x1xf32>
    %463 = vector.broadcast %462 : vector<16x1xf32> to vector<16x32xf32>
    %464 = arith.subf %460, %463 : vector<16x32xf32>
    %465 = math.exp %464 : vector<16x32xf32>
    %cst_181 = arith.constant dense<0.000000e+00> : vector<16xf32>
    %466 = vector.multi_reduction <add>, %465, %cst_181 [1] : vector<16x32xf32> to vector<16xf32>
    %467 = vector.shape_cast %466 : vector<16xf32> to vector<16x1xf32>
    %468 = vector.broadcast %467 : vector<16x1xf32> to vector<16x32xf32>
    %469 = arith.divf %465, %468 : vector<16x32xf32>
    %470 = arith.truncf %469 : vector<16x32xf32> to vector<16x32xbf16>
    %cst_182 = arith.constant dense<0.000000e+00> : vector<16x8xf32>
    %471 = tpu.matmul %470, %459, %cst_182 {dimension_numbers = #tpu.dot_dimension_numbers<[1], [0], [0], [1], [0, 0, 1, 1], [], []>} : vector<16x32xbf16>, vector<32x8xbf16>, vector<16x8xf32> -> vector<16x8xf32>
    %472 = vector.extract_strided_slice %438 {offsets = [0, 8], sizes = [16, 8], strides = [1, 1]} : vector<16x32xf32> to vector<16x8xf32>
    %473 = arith.truncf %472 : vector<16x8xf32> to vector<16x8xbf16>
    %474 = vector.extract_strided_slice %445 {offsets = [0, 8], sizes = [32, 8], strides = [1, 1]} : vector<32x32xf32> to vector<32x8xf32>
    %475 = arith.truncf %474 : vector<32x8xf32> to vector<32x8xbf16>
    %476 = vector.extract_strided_slice %451 {offsets = [0, 8], sizes = [32, 8], strides = [1, 1]} : vector<32x32xf32> to vector<32x8xf32>
    %477 = arith.truncf %476 : vector<32x8xf32> to vector<32x8xbf16>
    %cst_183 = arith.constant dense<0.000000e+00> : vector<16x32xf32>
    %478 = tpu.matmul %473, %475, %cst_183 {dimension_numbers = #tpu.dot_dimension_numbers<[1], [1], [0], [0], [0, 0, 1, 0], [], []>} : vector<16x8xbf16>, vector<32x8xbf16>, vector<16x32xf32> -> vector<16x32xf32>
    %cst_184 = arith.constant dense<0xFF800000> : vector<16xf32>
    %479 = vector.multi_reduction <maximumf>, %478, %cst_184 [1] : vector<16x32xf32> to vector<16xf32>
    %480 = vector.shape_cast %479 : vector<16xf32> to vector<16x1xf32>
    %481 = vector.broadcast %480 : vector<16x1xf32> to vector<16x32xf32>
    %482 = arith.subf %478, %481 : vector<16x32xf32>
    %483 = math.exp %482 : vector<16x32xf32>
    %cst_185 = arith.constant dense<0.000000e+00> : vector<16xf32>
    %484 = vector.multi_reduction <add>, %483, %cst_185 [1] : vector<16x32xf32> to vector<16xf32>
    %485 = vector.shape_cast %484 : vector<16xf32> to vector<16x1xf32>
    %486 = vector.broadcast %485 : vector<16x1xf32> to vector<16x32xf32>
    %487 = arith.divf %483, %486 : vector<16x32xf32>
    %488 = arith.truncf %487 : vector<16x32xf32> to vector<16x32xbf16>
    %cst_186 = arith.constant dense<0.000000e+00> : vector<16x8xf32>
    %489 = tpu.matmul %488, %477, %cst_186 {dimension_numbers = #tpu.dot_dimension_numbers<[1], [0], [0], [1], [0, 0, 1, 1], [], []>} : vector<16x32xbf16>, vector<32x8xbf16>, vector<16x8xf32> -> vector<16x8xf32>
    %490 = vector.extract_strided_slice %438 {offsets = [0, 16], sizes = [16, 8], strides = [1, 1]} : vector<16x32xf32> to vector<16x8xf32>
    %491 = arith.truncf %490 : vector<16x8xf32> to vector<16x8xbf16>
    %492 = vector.extract_strided_slice %445 {offsets = [0, 16], sizes = [32, 8], strides = [1, 1]} : vector<32x32xf32> to vector<32x8xf32>
    %493 = arith.truncf %492 : vector<32x8xf32> to vector<32x8xbf16>
    %494 = vector.extract_strided_slice %451 {offsets = [0, 16], sizes = [32, 8], strides = [1, 1]} : vector<32x32xf32> to vector<32x8xf32>
    %495 = arith.truncf %494 : vector<32x8xf32> to vector<32x8xbf16>
    %cst_187 = arith.constant dense<0.000000e+00> : vector<16x32xf32>
    %496 = tpu.matmul %491, %493, %cst_187 {dimension_numbers = #tpu.dot_dimension_numbers<[1], [1], [0], [0], [0, 0, 1, 0], [], []>} : vector<16x8xbf16>, vector<32x8xbf16>, vector<16x32xf32> -> vector<16x32xf32>
    %cst_188 = arith.constant dense<0xFF800000> : vector<16xf32>
    %497 = vector.multi_reduction <maximumf>, %496, %cst_188 [1] : vector<16x32xf32> to vector<16xf32>
    %498 = vector.shape_cast %497 : vector<16xf32> to vector<16x1xf32>
    %499 = vector.broadcast %498 : vector<16x1xf32> to vector<16x32xf32>
    %500 = arith.subf %496, %499 : vector<16x32xf32>
    %501 = math.exp %500 : vector<16x32xf32>
    %cst_189 = arith.constant dense<0.000000e+00> : vector<16xf32>
    %502 = vector.multi_reduction <add>, %501, %cst_189 [1] : vector<16x32xf32> to vector<16xf32>
    %503 = vector.shape_cast %502 : vector<16xf32> to vector<16x1xf32>
    %504 = vector.broadcast %503 : vector<16x1xf32> to vector<16x32xf32>
    %505 = arith.divf %501, %504 : vector<16x32xf32>
    %506 = arith.truncf %505 : vector<16x32xf32> to vector<16x32xbf16>
    %cst_190 = arith.constant dense<0.000000e+00> : vector<16x8xf32>
    %507 = tpu.matmul %506, %495, %cst_190 {dimension_numbers = #tpu.dot_dimension_numbers<[1], [0], [0], [1], [0, 0, 1, 1], [], []>} : vector<16x32xbf16>, vector<32x8xbf16>, vector<16x8xf32> -> vector<16x8xf32>
    %508 = vector.extract_strided_slice %438 {offsets = [0, 24], sizes = [16, 8], strides = [1, 1]} : vector<16x32xf32> to vector<16x8xf32>
    %509 = arith.truncf %508 : vector<16x8xf32> to vector<16x8xbf16>
    %510 = vector.extract_strided_slice %445 {offsets = [0, 24], sizes = [32, 8], strides = [1, 1]} : vector<32x32xf32> to vector<32x8xf32>
    %511 = arith.truncf %510 : vector<32x8xf32> to vector<32x8xbf16>
    %512 = vector.extract_strided_slice %451 {offsets = [0, 24], sizes = [32, 8], strides = [1, 1]} : vector<32x32xf32> to vector<32x8xf32>
    %513 = arith.truncf %512 : vector<32x8xf32> to vector<32x8xbf16>
    %cst_191 = arith.constant dense<0.000000e+00> : vector<16x32xf32>
    %514 = tpu.matmul %509, %511, %cst_191 {dimension_numbers = #tpu.dot_dimension_numbers<[1], [1], [0], [0], [0, 0, 1, 0], [], []>} : vector<16x8xbf16>, vector<32x8xbf16>, vector<16x32xf32> -> vector<16x32xf32>
    %cst_192 = arith.constant dense<0xFF800000> : vector<16xf32>
    %515 = vector.multi_reduction <maximumf>, %514, %cst_192 [1] : vector<16x32xf32> to vector<16xf32>
    %516 = vector.shape_cast %515 : vector<16xf32> to vector<16x1xf32>
    %517 = vector.broadcast %516 : vector<16x1xf32> to vector<16x32xf32>
    %518 = arith.subf %514, %517 : vector<16x32xf32>
    %519 = math.exp %518 : vector<16x32xf32>
    %cst_193 = arith.constant dense<0.000000e+00> : vector<16xf32>
    %520 = vector.multi_reduction <add>, %519, %cst_193 [1] : vector<16x32xf32> to vector<16xf32>
    %521 = vector.shape_cast %520 : vector<16xf32> to vector<16x1xf32>
    %522 = vector.broadcast %521 : vector<16x1xf32> to vector<16x32xf32>
    %523 = arith.divf %519, %522 : vector<16x32xf32>
    %524 = arith.truncf %523 : vector<16x32xf32> to vector<16x32xbf16>
    %cst_194 = arith.constant dense<0.000000e+00> : vector<16x8xf32>
    %525 = tpu.matmul %524, %513, %cst_194 {dimension_numbers = #tpu.dot_dimension_numbers<[1], [0], [0], [1], [0, 0, 1, 1], [], []>} : vector<16x32xbf16>, vector<32x8xbf16>, vector<16x8xf32> -> vector<16x8xf32>
    %526 = tpu.concatenate %471, %489, %507, %525 in 1 : vector<16x8xf32>, vector<16x8xf32>, vector<16x8xf32>, vector<16x8xf32> -> vector<16x32xf32>
    %527 = arith.truncf %526 : vector<16x32xf32> to vector<16x32xbf16>
    %cst_195 = arith.constant dense<0.000000e+00> : vector<16x32xf32>
    %528 = tpu.matmul %527, %452, %cst_195 {dimension_numbers = #tpu.dot_dimension_numbers<[1], [0], [0], [1], [0, 0, 1, 1], [], []>} : vector<16x32xbf16>, vector<32x32xbf16>, vector<16x32xf32> -> vector<16x32xf32>
    %529 = vector.broadcast %453 : vector<1x32xf32> to vector<16x32xf32>
    %530 = arith.addf %528, %529 : vector<16x32xf32>
    %531 = arith.addf %305, %530 : vector<16x32xf32>
    %c0_196 = arith.constant 0 : index
    %c0_197 = arith.constant 0 : index
    %532 = vector.load %arg41[%c0_196, %c0_197] : memref<1x32xf32, #tpu.memory_space<vmem>>, vector<1x32xf32>
    %c0_198 = arith.constant 0 : index
    %c0_199 = arith.constant 0 : index
    %533 = vector.load %arg42[%c0_198, %c0_199] : memref<1x32xf32, #tpu.memory_space<vmem>>, vector<1x32xf32>
    %cst_200 = arith.constant dense<0.000000e+00> : vector<16xf32>
    %534 = vector.multi_reduction <add>, %531, %cst_200 [1] : vector<16x32xf32> to vector<16xf32>
    %535 = vector.shape_cast %534 : vector<16xf32> to vector<16x1xf32>
    %cst_201 = arith.constant 3.200000e+01 : f32
    %536 = vector.broadcast %cst_201 : f32 to vector<16x1xf32>
    %537 = arith.divf %535, %536 : vector<16x1xf32>
    %538 = vector.broadcast %537 : vector<16x1xf32> to vector<16x32xf32>
    %539 = arith.subf %531, %538 : vector<16x32xf32>
    %540 = arith.mulf %539, %539 : vector<16x32xf32>
    %cst_202 = arith.constant dense<0.000000e+00> : vector<16xf32>
    %541 = vector.multi_reduction <add>, %540, %cst_202 [1] : vector<16x32xf32> to vector<16xf32>
    %542 = vector.shape_cast %541 : vector<16xf32> to vector<16x1xf32>
    %cst_203 = arith.constant 3.200000e+01 : f32
    %543 = vector.broadcast %cst_203 : f32 to vector<16x1xf32>
    %544 = arith.divf %542, %543 : vector<16x1xf32>
    %cst_204 = arith.constant 9.99999974E-6 : f32
    %545 = vector.broadcast %cst_204 : f32 to vector<16x1xf32>
    %546 = arith.addf %544, %545 : vector<16x1xf32>
    %547 = math.rsqrt %546 : vector<16x1xf32>
    %548 = vector.broadcast %547 : vector<16x1xf32> to vector<16x32xf32>
    %549 = arith.mulf %539, %548 : vector<16x32xf32>
    %550 = vector.broadcast %532 : vector<1x32xf32> to vector<16x32xf32>
    %551 = arith.mulf %549, %550 : vector<16x32xf32>
    %552 = vector.broadcast %533 : vector<1x32xf32> to vector<16x32xf32>
    %553 = arith.addf %551, %552 : vector<16x32xf32>
    %c0_205 = arith.constant 0 : index
    %c0_206 = arith.constant 0 : index
    %554 = vector.load %arg43[%c0_205, %c0_206] : memref<32x64xbf16, #tpu.memory_space<vmem>>, vector<32x64xbf16>
    %c0_207 = arith.constant 0 : index
    %c0_208 = arith.constant 0 : index
    %555 = vector.load %arg44[%c0_207, %c0_208] : memref<1x64xf32, #tpu.memory_space<vmem>>, vector<1x64xf32>
    %c0_209 = arith.constant 0 : index
    %c0_210 = arith.constant 0 : index
    %556 = vector.load %arg45[%c0_209, %c0_210] : memref<64x32xbf16, #tpu.memory_space<vmem>>, vector<64x32xbf16>
    %c0_211 = arith.constant 0 : index
    %c0_212 = arith.constant 0 : index
    %557 = vector.load %arg46[%c0_211, %c0_212] : memref<1x32xf32, #tpu.memory_space<vmem>>, vector<1x32xf32>
    %c0_213 = arith.constant 0 : index
    %c0_214 = arith.constant 0 : index
    %558 = vector.load %arg47[%c0_213, %c0_214] : memref<1x32xf32, #tpu.memory_space<vmem>>, vector<1x32xf32>
    %c0_215 = arith.constant 0 : index
    %c0_216 = arith.constant 0 : index
    %559 = vector.load %arg48[%c0_215, %c0_216] : memref<1x32xf32, #tpu.memory_space<vmem>>, vector<1x32xf32>
    %560 = arith.truncf %553 : vector<16x32xf32> to vector<16x32xbf16>
    %cst_217 = arith.constant dense<0.000000e+00> : vector<16x64xf32>
    %561 = tpu.matmul %560, %554, %cst_217 {dimension_numbers = #tpu.dot_dimension_numbers<[1], [0], [0], [1], [0, 0, 1, 1], [], []>} : vector<16x32xbf16>, vector<32x64xbf16>, vector<16x64xf32> -> vector<16x64xf32>
    %562 = vector.broadcast %555 : vector<1x64xf32> to vector<16x64xf32>
    %563 = arith.addf %561, %562 : vector<16x64xf32>
    %cst_218 = arith.constant 0.000000e+00 : f32
    %564 = vector.broadcast %cst_218 : f32 to vector<16x64xf32>
    %565 = arith.maximumf %563, %564 : vector<16x64xf32>
    %566 = arith.truncf %565 : vector<16x64xf32> to vector<16x64xbf16>
    %cst_219 = arith.constant dense<0.000000e+00> : vector<16x32xf32>
    %567 = tpu.matmul %566, %556, %cst_219 {dimension_numbers = #tpu.dot_dimension_numbers<[1], [0], [0], [1], [0, 0, 1, 1], [], []>} : vector<16x64xbf16>, vector<64x32xbf16>, vector<16x32xf32> -> vector<16x32xf32>
    %568 = vector.broadcast %557 : vector<1x32xf32> to vector<16x32xf32>
    %569 = arith.addf %567, %568 : vector<16x32xf32>
    %570 = arith.addf %553, %569 : vector<16x32xf32>
    %cst_220 = arith.constant dense<0.000000e+00> : vector<16xf32>
    %571 = vector.multi_reduction <add>, %570, %cst_220 [1] : vector<16x32xf32> to vector<16xf32>
    %572 = vector.shape_cast %571 : vector<16xf32> to vector<16x1xf32>
    %cst_221 = arith.constant 3.200000e+01 : f32
    %573 = vector.broadcast %cst_221 : f32 to vector<16x1xf32>
    %574 = arith.divf %572, %573 : vector<16x1xf32>
    %575 = vector.broadcast %574 : vector<16x1xf32> to vector<16x32xf32>
    %576 = arith.subf %570, %575 : vector<16x32xf32>
    %577 = arith.mulf %576, %576 : vector<16x32xf32>
    %cst_222 = arith.constant dense<0.000000e+00> : vector<16xf32>
    %578 = vector.multi_reduction <add>, %577, %cst_222 [1] : vector<16x32xf32> to vector<16xf32>
    %579 = vector.shape_cast %578 : vector<16xf32> to vector<16x1xf32>
    %cst_223 = arith.constant 3.200000e+01 : f32
    %580 = vector.broadcast %cst_223 : f32 to vector<16x1xf32>
    %581 = arith.divf %579, %580 : vector<16x1xf32>
    %cst_224 = arith.constant 9.99999974E-6 : f32
    %582 = vector.broadcast %cst_224 : f32 to vector<16x1xf32>
    %583 = arith.addf %581, %582 : vector<16x1xf32>
    %584 = math.rsqrt %583 : vector<16x1xf32>
    %585 = vector.broadcast %584 : vector<16x1xf32> to vector<16x32xf32>
    %586 = arith.mulf %576, %585 : vector<16x32xf32>
    %587 = vector.broadcast %558 : vector<1x32xf32> to vector<16x32xf32>
    %588 = arith.mulf %586, %587 : vector<16x32xf32>
    %589 = vector.broadcast %559 : vector<1x32xf32> to vector<16x32xf32>
    %590 = arith.addf %588, %589 : vector<16x32xf32>
    %c0_225 = arith.constant 0 : index
    %c0_226 = arith.constant 0 : index
    %591 = vector.load %arg49[%c0_225, %c0_226] : memref<1x32xf32, #tpu.memory_space<vmem>>, vector<1x32xf32>
    %c0_227 = arith.constant 0 : index
    %c0_228 = arith.constant 0 : index
    %592 = vector.load %arg50[%c0_227, %c0_228] : memref<1x32xf32, #tpu.memory_space<vmem>>, vector<1x32xf32>
    %cst_229 = arith.constant dense<0.000000e+00> : vector<16xf32>
    %593 = vector.multi_reduction <add>, %590, %cst_229 [1] : vector<16x32xf32> to vector<16xf32>
    %594 = vector.shape_cast %593 : vector<16xf32> to vector<16x1xf32>
    %cst_230 = arith.constant 3.200000e+01 : f32
    %595 = vector.broadcast %cst_230 : f32 to vector<16x1xf32>
    %596 = arith.divf %594, %595 : vector<16x1xf32>
    %597 = vector.broadcast %596 : vector<16x1xf32> to vector<16x32xf32>
    %598 = arith.subf %590, %597 : vector<16x32xf32>
    %599 = arith.mulf %598, %598 : vector<16x32xf32>
    %cst_231 = arith.constant dense<0.000000e+00> : vector<16xf32>
    %600 = vector.multi_reduction <add>, %599, %cst_231 [1] : vector<16x32xf32> to vector<16xf32>
    %601 = vector.shape_cast %600 : vector<16xf32> to vector<16x1xf32>
    %cst_232 = arith.constant 3.200000e+01 : f32
    %602 = vector.broadcast %cst_232 : f32 to vector<16x1xf32>
    %603 = arith.divf %601, %602 : vector<16x1xf32>
    %cst_233 = arith.constant 9.99999974E-6 : f32
    %604 = vector.broadcast %cst_233 : f32 to vector<16x1xf32>
    %605 = arith.addf %603, %604 : vector<16x1xf32>
    %606 = math.rsqrt %605 : vector<16x1xf32>
    %607 = vector.broadcast %606 : vector<16x1xf32> to vector<16x32xf32>
    %608 = arith.mulf %598, %607 : vector<16x32xf32>
    %609 = vector.broadcast %591 : vector<1x32xf32> to vector<16x32xf32>
    %610 = arith.mulf %608, %609 : vector<16x32xf32>
    %611 = vector.broadcast %592 : vector<1x32xf32> to vector<16x32xf32>
    %612 = arith.addf %610, %611 : vector<16x32xf32>
    %613 = arith.truncf %612 : vector<16x32xf32> to vector<16x32xbf16>
    %c0_234 = arith.constant 0 : index
    %c0_235 = arith.constant 0 : index
    %614 = vector.load %arg51[%c0_234, %c0_235] : memref<32x16xbf16, #tpu.memory_space<vmem>>, vector<32x16xbf16>
    %cst_236 = arith.constant dense<0.000000e+00> : vector<16x16xf32>
    %615 = tpu.matmul %613, %614, %cst_236 {dimension_numbers = #tpu.dot_dimension_numbers<[1], [0], [0], [1], [0, 0, 1, 1], [], []>} : vector<16x32xbf16>, vector<32x16xbf16>, vector<16x16xf32> -> vector<16x16xf32>
    %c0_237 = arith.constant 0 : index
    %c0_238 = arith.constant 0 : index
    %616 = vector.load %arg52[%c0_237, %c0_238] : memref<1x16xf32, #tpu.memory_space<vmem>>, vector<1x16xf32>
    %617 = vector.broadcast %616 : vector<1x16xf32> to vector<16x16xf32>
    %618 = arith.addf %615, %617 : vector<16x16xf32>
    %cst_239 = arith.constant 0.000000e+00 : f32
    %619 = vector.broadcast %cst_239 : f32 to vector<16x16xf32>
    %620 = arith.maximumf %618, %619 : vector<16x16xf32>
    %621 = arith.truncf %620 : vector<16x16xf32> to vector<16x16xbf16>
    %c0_240 = arith.constant 0 : index
    %c0_241 = arith.constant 0 : index
    %622 = vector.load %arg53[%c0_240, %c0_241] : memref<16x16xbf16, #tpu.memory_space<vmem>>, vector<16x16xbf16>
    %cst_242 = arith.constant dense<0.000000e+00> : vector<16x16xf32>
    %623 = tpu.matmul %621, %622, %cst_242 {dimension_numbers = #tpu.dot_dimension_numbers<[1], [0], [0], [1], [0, 0, 1, 1], [], []>} : vector<16x16xbf16>, vector<16x16xbf16>, vector<16x16xf32> -> vector<16x16xf32>
    %c0_243 = arith.constant 0 : index
    %c0_244 = arith.constant 0 : index
    %624 = vector.load %arg54[%c0_243, %c0_244] : memref<1x16xf32, #tpu.memory_space<vmem>>, vector<1x16xf32>
    %625 = vector.broadcast %624 : vector<1x16xf32> to vector<16x16xf32>
    %626 = arith.addf %623, %625 : vector<16x16xf32>
    %cst_245 = arith.constant 0.000000e+00 : f32
    %627 = vector.broadcast %cst_245 : f32 to vector<16x16xf32>
    %628 = arith.maximumf %626, %627 : vector<16x16xf32>
    %c0_246 = arith.constant 0 : index
    %c0_247 = arith.constant 0 : index
    %629 = vector.load %arg55[%c0_246, %c0_247] : memref<1x16xbf16, #tpu.memory_space<vmem>>, vector<1x16xbf16>
    %630 = arith.truncf %628 : vector<16x16xf32> to vector<16x16xbf16>
    %cst_248 = arith.constant dense<0.000000e+00> : vector<1x16xf32>
    %631 = tpu.matmul %629, %630, %cst_248 {dimension_numbers = #tpu.dot_dimension_numbers<[1], [1], [0], [0], [0, 0, 1, 0], [], []>} : vector<1x16xbf16>, vector<16x16xbf16>, vector<1x16xf32> -> vector<1x16xf32>
    %c0_249 = arith.constant 0 : index
    %c0_250 = arith.constant 0 : index
    %632 = vector.load %arg56[%c0_249, %c0_250] : memref<1x1xf32, #tpu.memory_space<vmem>>, vector<1x1xf32>
    %633 = vector.broadcast %632 : vector<1x1xf32> to vector<1x16xf32>
    %634 = arith.addf %631, %633 : vector<1x16xf32>
    %c0_251 = arith.constant 0 : index
    %c0_252 = arith.constant 0 : index
    %c0_253 = arith.constant 0 : index
    %635 = vector.load %arg57[%c0_251, %c0_252, %c0_253] : memref<1x1x16xf32, #tpu.memory_space<vmem>>, vector<1x1x16xf32>
    %636 = vector.shape_cast %635 : vector<1x1x16xf32> to vector<1x16xf32>
    %637 = vector.shape_cast %634 : vector<1x16xf32> to vector<1x1x16xf32>
    tpu.vector_store %arg57[%c0_251, %c0_252, %c0_253], %637 {strides = array<i32>} : memref<1x1x16xf32, #tpu.memory_space<vmem>>, vector<1x1x16xf32>,
    return
  }
  func.func @transform_0(%arg0: i32) -> (i32, i32, i32) {
    %c0_i32 = arith.constant 0 : i32
    %c0_i32_0 = arith.constant 0 : i32
    %c0_i32_1 = arith.constant 0 : i32
    return %arg0, %c0_i32, %c0_i32_0 : i32, i32, i32
  }
  func.func @transform_1(%arg0: i32) -> (i32, i32, i32) {
    %c0_i32 = arith.constant 0 : i32
    %c0_i32_0 = arith.constant 0 : i32
    %c0_i32_1 = arith.constant 0 : i32
    return %arg0, %c0_i32, %c0_i32_0 : i32, i32, i32
  }
  func.func @transform_2(%arg0: i32) -> (i32, i32, i32) {
    %c0_i32 = arith.constant 0 : i32
    %c0_i32_0 = arith.constant 0 : i32
    %c0_i32_1 = arith.constant 0 : i32
    return %arg0, %c0_i32, %c0_i32_0 : i32, i32, i32
  }
  func.func @transform_3(%arg0: i32) -> (i32, i32, i32) {
    %c0_i32 = arith.constant 0 : i32
    %c0_i32_0 = arith.constant 0 : i32
    %c0_i32_1 = arith.constant 0 : i32
    return %arg0, %c0_i32, %c0_i32_0 : i32, i32, i32
  }
  func.func @transform_4(%arg0: i32) -> (i32, i32, i32) {
    %c0_i32 = arith.constant 0 : i32
    %c0_i32_0 = arith.constant 0 : i32
    %c0_i32_1 = arith.constant 0 : i32
    return %arg0, %c0_i32, %c0_i32_0 : i32, i32, i32
  }
  func.func @transform_5(%arg0: i32) -> (i32, i32, i32) {
    %c0_i32 = arith.constant 0 : i32
    %c0_i32_0 = arith.constant 0 : i32
    %c0_i32_1 = arith.constant 0 : i32
    return %arg0, %c0_i32, %c0_i32_0 : i32, i32, i32
  }
  func.func @transform_6(%arg0: i32) -> (i32, i32) {
    %c0_i32 = arith.constant 0 : i32
    %c0_i32_0 = arith.constant 0 : i32
    %c0_i32_1 = arith.constant 0 : i32
    return %c0_i32, %c0_i32_0 : i32, i32
  }
  func.func @transform_7(%arg0: i32) -> (i32, i32) {
    %c0_i32 = arith.constant 0 : i32
    %c0_i32_0 = arith.constant 0 : i32
    %c0_i32_1 = arith.constant 0 : i32
    return %c0_i32, %c0_i32_0 : i32, i32
  }
  func.func @transform_8(%arg0: i32) -> (i32, i32) {
    %c0_i32 = arith.constant 0 : i32
    %c0_i32_0 = arith.constant 0 : i32
    %c0_i32_1 = arith.constant 0 : i32
    return %c0_i32, %c0_i32_0 : i32, i32
  }
  func.func @transform_9(%arg0: i32) -> (i32, i32) {
    %c0_i32 = arith.constant 0 : i32
    %c0_i32_0 = arith.constant 0 : i32
    %c0_i32_1 = arith.constant 0 : i32
    return %c0_i32, %c0_i32_0 : i32, i32
  }
  func.func @transform_10(%arg0: i32) -> (i32, i32) {
    %c0_i32 = arith.constant 0 : i32
    %c0_i32_0 = arith.constant 0 : i32
    %c0_i32_1 = arith.constant 0 : i32
    return %c0_i32, %c0_i32_0 : i32, i32
  }
  func.func @transform_11(%arg0: i32) -> (i32, i32) {
    %c0_i32 = arith.constant 0 : i32
    %c0_i32_0 = arith.constant 0 : i32
    %c0_i32_1 = arith.constant 0 : i32
    return %c0_i32, %c0_i32_0 : i32, i32
  }
  func.func @transform_12(%arg0: i32) -> (i32, i32) {
    %c0_i32 = arith.constant 0 : i32
    %c0_i32_0 = arith.constant 0 : i32
    %c0_i32_1 = arith.constant 0 : i32
    return %c0_i32, %c0_i32_0 : i32, i32
  }
  func.func @transform_13(%arg0: i32) -> (i32, i32) {
    %c0_i32 = arith.constant 0 : i32
    %c0_i32_0 = arith.constant 0 : i32
    %c0_i32_1 = arith.constant 0 : i32
    return %c0_i32, %c0_i32_0 : i32, i32
  }
  func.func @transform_14(%arg0: i32) -> (i32, i32) {
    %c0_i32 = arith.constant 0 : i32
    %c0_i32_0 = arith.constant 0 : i32
    %c0_i32_1 = arith.constant 0 : i32
    return %c0_i32, %c0_i32_0 : i32, i32
  }
  func.func @transform_15(%arg0: i32) -> (i32, i32) {
    %c0_i32 = arith.constant 0 : i32
    %c0_i32_0 = arith.constant 0 : i32
    %c0_i32_1 = arith.constant 0 : i32
    return %c0_i32, %c0_i32_0 : i32, i32
  }
  func.func @transform_16(%arg0: i32) -> (i32, i32) {
    %c0_i32 = arith.constant 0 : i32
    %c0_i32_0 = arith.constant 0 : i32
    %c0_i32_1 = arith.constant 0 : i32
    return %c0_i32, %c0_i32_0 : i32, i32
  }
  func.func @transform_17(%arg0: i32) -> (i32, i32) {
    %c0_i32 = arith.constant 0 : i32
    %c0_i32_0 = arith.constant 0 : i32
    %c0_i32_1 = arith.constant 0 : i32
    return %c0_i32, %c0_i32_0 : i32, i32
  }
  func.func @transform_18(%arg0: i32) -> (i32, i32) {
    %c0_i32 = arith.constant 0 : i32
    %c0_i32_0 = arith.constant 0 : i32
    %c0_i32_1 = arith.constant 0 : i32
    return %c0_i32, %c0_i32_0 : i32, i32
  }
  func.func @transform_19(%arg0: i32) -> (i32, i32) {
    %c0_i32 = arith.constant 0 : i32
    %c0_i32_0 = arith.constant 0 : i32
    %c0_i32_1 = arith.constant 0 : i32
    return %c0_i32, %c0_i32_0 : i32, i32
  }
  func.func @transform_20(%arg0: i32) -> (i32, i32) {
    %c0_i32 = arith.constant 0 : i32
    %c0_i32_0 = arith.constant 0 : i32
    %c0_i32_1 = arith.constant 0 : i32
    return %c0_i32, %c0_i32_0 : i32, i32
  }
  func.func @transform_21(%arg0: i32) -> (i32, i32) {
    %c0_i32 = arith.constant 0 : i32
    %c0_i32_0 = arith.constant 0 : i32
    %c0_i32_1 = arith.constant 0 : i32
    return %c0_i32, %c0_i32_0 : i32, i32
  }
  func.func @transform_22(%arg0: i32) -> (i32, i32) {
    %c0_i32 = arith.constant 0 : i32
    %c0_i32_0 = arith.constant 0 : i32
    %c0_i32_1 = arith.constant 0 : i32
    return %c0_i32, %c0_i32_0 : i32, i32
  }
  func.func @transform_23(%arg0: i32) -> (i32, i32) {
    %c0_i32 = arith.constant 0 : i32
    %c0_i32_0 = arith.constant 0 : i32
    %c0_i32_1 = arith.constant 0 : i32
    return %c0_i32, %c0_i32_0 : i32, i32
  }
  func.func @transform_24(%arg0: i32) -> (i32, i32) {
    %c0_i32 = arith.constant 0 : i32
    %c0_i32_0 = arith.constant 0 : i32
    %c0_i32_1 = arith.constant 0 : i32
    return %c0_i32, %c0_i32_0 : i32, i32
  }
  func.func @transform_25(%arg0: i32) -> (i32, i32) {
    %c0_i32 = arith.constant 0 : i32
    %c0_i32_0 = arith.constant 0 : i32
    %c0_i32_1 = arith.constant 0 : i32
    return %c0_i32, %c0_i32_0 : i32, i32
  }
  func.func @transform_26(%arg0: i32) -> (i32, i32) {
    %c0_i32 = arith.constant 0 : i32
    %c0_i32_0 = arith.constant 0 : i32
    %c0_i32_1 = arith.constant 0 : i32
    return %c0_i32, %c0_i32_0 : i32, i32
  }
  func.func @transform_27(%arg0: i32) -> (i32, i32) {
    %c0_i32 = arith.constant 0 : i32
    %c0_i32_0 = arith.constant 0 : i32
    %c0_i32_1 = arith.constant 0 : i32
    return %c0_i32, %c0_i32_0 : i32, i32
  }
  func.func @transform_28(%arg0: i32) -> (i32, i32) {
    %c0_i32 = arith.constant 0 : i32
    %c0_i32_0 = arith.constant 0 : i32
    %c0_i32_1 = arith.constant 0 : i32
    return %c0_i32, %c0_i32_0 : i32, i32
  }
  func.func @transform_29(%arg0: i32) -> (i32, i32) {
    %c0_i32 = arith.constant 0 : i32
    %c0_i32_0 = arith.constant 0 : i32
    %c0_i32_1 = arith.constant 0 : i32
    return %c0_i32, %c0_i32_0 : i32, i32
  }
  func.func @transform_30(%arg0: i32) -> (i32, i32) {
    %c0_i32 = arith.constant 0 : i32
    %c0_i32_0 = arith.constant 0 : i32
    %c0_i32_1 = arith.constant 0 : i32
    return %c0_i32, %c0_i32_0 : i32, i32
  }
  func.func @transform_31(%arg0: i32) -> (i32, i32) {
    %c0_i32 = arith.constant 0 : i32
    %c0_i32_0 = arith.constant 0 : i32
    %c0_i32_1 = arith.constant 0 : i32
    return %c0_i32, %c0_i32_0 : i32, i32
  }
  func.func @transform_32(%arg0: i32) -> (i32, i32) {
    %c0_i32 = arith.constant 0 : i32
    %c0_i32_0 = arith.constant 0 : i32
    %c0_i32_1 = arith.constant 0 : i32
    return %c0_i32, %c0_i32_0 : i32, i32
  }
  func.func @transform_33(%arg0: i32) -> (i32, i32) {
    %c0_i32 = arith.constant 0 : i32
    %c0_i32_0 = arith.constant 0 : i32
    %c0_i32_1 = arith.constant 0 : i32
    return %c0_i32, %c0_i32_0 : i32, i32
  }
  func.func @transform_34(%arg0: i32) -> (i32, i32) {
    %c0_i32 = arith.constant 0 : i32
    %c0_i32_0 = arith.constant 0 : i32
    %c0_i32_1 = arith.constant 0 : i32
    return %c0_i32, %c0_i32_0 : i32, i32
  }
  func.func @transform_35(%arg0: i32) -> (i32, i32) {
    %c0_i32 = arith.constant 0 : i32
    %c0_i32_0 = arith.constant 0 : i32
    %c0_i32_1 = arith.constant 0 : i32
    return %c0_i32, %c0_i32_0 : i32, i32
  }
  func.func @transform_36(%arg0: i32) -> (i32, i32) {
    %c0_i32 = arith.constant 0 : i32
    %c0_i32_0 = arith.constant 0 : i32
    %c0_i32_1 = arith.constant 0 : i32
    return %c0_i32, %c0_i32_0 : i32, i32
  }
  func.func @transform_37(%arg0: i32) -> (i32, i32) {
    %c0_i32 = arith.constant 0 : i32
    %c0_i32_0 = arith.constant 0 : i32
    %c0_i32_1 = arith.constant 0 : i32
    return %c0_i32, %c0_i32_0 : i32, i32
  }
  func.func @transform_38(%arg0: i32) -> (i32, i32) {
    %c0_i32 = arith.constant 0 : i32
    %c0_i32_0 = arith.constant 0 : i32
    %c0_i32_1 = arith.constant 0 : i32
    return %c0_i32, %c0_i32_0 : i32, i32
  }
  func.func @transform_39(%arg0: i32) -> (i32, i32) {
    %c0_i32 = arith.constant 0 : i32
    %c0_i32_0 = arith.constant 0 : i32
    %c0_i32_1 = arith.constant 0 : i32
    return %c0_i32, %c0_i32_0 : i32, i32
  }
  func.func @transform_40(%arg0: i32) -> (i32, i32) {
    %c0_i32 = arith.constant 0 : i32
    %c0_i32_0 = arith.constant 0 : i32
    %c0_i32_1 = arith.constant 0 : i32
    return %c0_i32, %c0_i32_0 : i32, i32
  }
  func.func @transform_41(%arg0: i32) -> (i32, i32) {
    %c0_i32 = arith.constant 0 : i32
    %c0_i32_0 = arith.constant 0 : i32
    %c0_i32_1 = arith.constant 0 : i32
    return %c0_i32, %c0_i32_0 : i32, i32
  }
  func.func @transform_42(%arg0: i32) -> (i32, i32) {
    %c0_i32 = arith.constant 0 : i32
    %c0_i32_0 = arith.constant 0 : i32
    %c0_i32_1 = arith.constant 0 : i32
    return %c0_i32, %c0_i32_0 : i32, i32
  }
  func.func @transform_43(%arg0: i32) -> (i32, i32) {
    %c0_i32 = arith.constant 0 : i32
    %c0_i32_0 = arith.constant 0 : i32
    %c0_i32_1 = arith.constant 0 : i32
    return %c0_i32, %c0_i32_0 : i32, i32
  }
  func.func @transform_44(%arg0: i32) -> (i32, i32) {
    %c0_i32 = arith.constant 0 : i32
    %c0_i32_0 = arith.constant 0 : i32
    %c0_i32_1 = arith.constant 0 : i32
    return %c0_i32, %c0_i32_0 : i32, i32
  }
  func.func @transform_45(%arg0: i32) -> (i32, i32) {
    %c0_i32 = arith.constant 0 : i32
    %c0_i32_0 = arith.constant 0 : i32
    %c0_i32_1 = arith.constant 0 : i32
    return %c0_i32, %c0_i32_0 : i32, i32
  }
  func.func @transform_46(%arg0: i32) -> (i32, i32) {
    %c0_i32 = arith.constant 0 : i32
    %c0_i32_0 = arith.constant 0 : i32
    %c0_i32_1 = arith.constant 0 : i32
    return %c0_i32, %c0_i32_0 : i32, i32
  }
  func.func @transform_47(%arg0: i32) -> (i32, i32) {
    %c0_i32 = arith.constant 0 : i32
    %c0_i32_0 = arith.constant 0 : i32
    %c0_i32_1 = arith.constant 0 : i32
    return %c0_i32, %c0_i32_0 : i32, i32
  }
  func.func @transform_48(%arg0: i32) -> (i32, i32) {
    %c0_i32 = arith.constant 0 : i32
    %c0_i32_0 = arith.constant 0 : i32
    %c0_i32_1 = arith.constant 0 : i32
    return %c0_i32, %c0_i32_0 : i32, i32
  }
  func.func @transform_49(%arg0: i32) -> (i32, i32) {
    %c0_i32 = arith.constant 0 : i32
    %c0_i32_0 = arith.constant 0 : i32
    %c0_i32_1 = arith.constant 0 : i32
    return %c0_i32, %c0_i32_0 : i32, i32
  }
  func.func @transform_50(%arg0: i32) -> (i32, i32) {
    %c0_i32 = arith.constant 0 : i32
    %c0_i32_0 = arith.constant 0 : i32
    %c0_i32_1 = arith.constant 0 : i32
    return %c0_i32, %c0_i32_0 : i32, i32
  }
  func.func @transform_51(%arg0: i32) -> (i32, i32) {
    %c0_i32 = arith.constant 0 : i32
    %c0_i32_0 = arith.constant 0 : i32
    %c0_i32_1 = arith.constant 0 : i32
    return %c0_i32, %c0_i32_0 : i32, i32
  }
  func.func @transform_52(%arg0: i32) -> (i32, i32) {
    %c0_i32 = arith.constant 0 : i32
    %c0_i32_0 = arith.constant 0 : i32
    %c0_i32_1 = arith.constant 0 : i32
    return %c0_i32, %c0_i32_0 : i32, i32
  }
  func.func @transform_53(%arg0: i32) -> (i32, i32) {
    %c0_i32 = arith.constant 0 : i32
    %c0_i32_0 = arith.constant 0 : i32
    %c0_i32_1 = arith.constant 0 : i32
    return %c0_i32, %c0_i32_0 : i32, i32
  }
  func.func @transform_54(%arg0: i32) -> (i32, i32) {
    %c0_i32 = arith.constant 0 : i32
    %c0_i32_0 = arith.constant 0 : i32
    %c0_i32_1 = arith.constant 0 : i32
    return %c0_i32, %c0_i32_0 : i32, i32
  }
  func.func @transform_55(%arg0: i32) -> (i32, i32) {
    %c0_i32 = arith.constant 0 : i32
    %c0_i32_0 = arith.constant 0 : i32
    %c0_i32_1 = arith.constant 0 : i32
    return %c0_i32, %c0_i32_0 : i32, i32
  }
  func.func @transform_56(%arg0: i32) -> (i32, i32, i32) {
    %c0_i32 = arith.constant 0 : i32
    %c0_i32_0 = arith.constant 0 : i32
    %c0_i32_1 = arith.constant 0 : i32
    return %arg0, %c0_i32, %c0_i32_0 : i32, i32, i32
  }
}

</mosaic_0001>

<bundles_post_ra>
// kernel: transformer_temporal_forward.1
= control target key start
LH: loop header
LB: loop body
LE: loop exit
PB: predicated region body
PF: predicated region fallthrough
CT: control target
= control target key end

     0   :  { %s9418_s6 = smov 1   ;;  %s9419_s10 = smov 2   ;;  %s11177_s0 = inlined_call_operand.smem [shape: u32[57], index: -1, kind: input, shape index: {}] }
   0x1   :  { %s9530_s5 = sld [smem:[%s11177_s0]]   ;;  %s9420_s14 = smov 3  }
   0x2   :  { %s9535_s9 = sld [smem:[%s11177_s0 + %s9418_s6]]   ;;  %s9421_s18 = smov 4  }
   0x3   :  { %s9540_s13 = sld [smem:[%s11177_s0 + %s9419_s10]]   ;;  %s9422_s22 = smov 5  }
   0x4   :  { %s9545_s17 = sld [smem:[%s11177_s0 + %s9420_s14]]   ;;  %s9423_s26 = smov 6  }
   0x5   :  { %s9550_s21 = sld [smem:[%s11177_s0 + %s9421_s18]]   ;;  %s9424_s30 = smov 7  }
   0x6   :  { %s9555_s25 = sld [smem:[%s11177_s0 + %s9422_s22]]   ;;  %s9425_s4 = smov 8  }
   0x7   :  { %11242 = sst [smem:[#allocation70_spill]] %s9530_s5  ;;  %s9426_s10 = smov 9  }
   0x8   :  { %11243 = sst [smem:[#allocation71_spill]] %s9535_s9  ;;  %s9427_s15 = smov 10  }
   0x9   :  { %11244 = sst [smem:[#allocation72_spill]] %s9540_s13  ;;  %s9428_s20 = smov 11  }
   0xa   :  { %11245 = sst [smem:[#allocation73_spill]] %s9545_s17  ;;  %s9430_s1 = smov 13  }
   0xb   :  { %11246 = sst [smem:[#allocation74_spill]] %s9550_s21  ;;  %s9431_s7 = smov 14  }
   0xc   :  { %11247 = sst [smem:[#allocation75_spill]] %s9555_s25  ;;  %s9433_s22 = smov 16  }
   0xd   :  { %s9560_s29 = sld [smem:[%s11177_s0 + %s9423_s26]]   ;;  %s9429_s26 = smov 12  }
   0xe   :  { %s9565_s3 = sld [smem:[%s11177_s0 + %s9424_s30]]   ;;  %s9434_s28 = smov 17  }
   0xf   :  { %s9570_s8 = sld [smem:[%s11177_s0 + %s9425_s4]]   ;;  %s9473_s23 = smov 56  }
  0x10   :  { %s9575_s14 = sld [smem:[%s11177_s0 + %s9426_s10]]  }
  0x11   :  { %s9580_s19 = sld [smem:[%s11177_s0 + %s9427_s15]]   ;;  %s9432_s15 = smov 15  }
  0x12   :  { %s9585_s24 = sld [smem:[%s11177_s0 + %s9428_s20]]  }
  0x13   :  { %11248 = sst [smem:[#allocation76_spill]] %s9560_s29 }
  0x14   :  { %11249 = sst [smem:[#allocation77_spill]] %s9565_s3 }
  0x15   :  { %11250 = sst [smem:[#allocation78_spill]] %s9570_s8 }
  0x16   :  { %s9590_s30 = sld [smem:[%s11177_s0 + %s9429_s26]]  }
  0x17   :  { %11251 = sst [smem:[#allocation79_spill]] %s9580_s19 }
  0x18   :  { %s9595_s6 = sld [smem:[%s11177_s0 + %s9430_s1]]  }
  0x19   :  { %s9600_s12 = sld [smem:[%s11177_s0 + %s9431_s7]]   ;;  %s9435_s7 = smov 18  }
  0x1a   :  { %s9605_s20 = sld [smem:[%s11177_s0 + %s9432_s15]]   ;;  %s9436_s15 = smov 19  }
  0x1b   :  { %s9610_s27 = sld [smem:[%s11177_s0 + %s9433_s22]]   ;;  %s9437_s22 = smov 20  }
  0x1c   :  { %11252 = sst [smem:[#allocation80_spill]] %s9590_s30 }
  0x1d   :  { %s9615_s4 = sld [smem:[%s11177_s0 + %s9434_s28]]   ;;  %s9438_s28 = smov 21  }
  0x1e   :  { %11253 = sst [smem:[#allocation81_spill]] %s9595_s6 }
  0x1f   :  { %11254 = sst [smem:[#allocation82_spill]] %s9600_s12 }
  0x20   :  { %11255 = sst [smem:[#allocation83_spill]] %s9605_s20 }
  0x21   :  { %11256 = sst [smem:[#allocation84_spill]] %s9610_s27 }
  0x22   :  { %s9620_s17 = sld [smem:[%s11177_s0 + %s9435_s7]]   ;;  %s9439_s7 = smov 22  }
  0x23   :  { %11257 = sst [smem:[#allocation85_spill]] %s9615_s4 }
  0x24   :  { %s9625_s13 = sld [smem:[%s11177_s0 + %s9436_s15]]   ;;  %s9440_s15 = smov 23  }
  0x25   :  { %s9630_s25 = sld [smem:[%s11177_s0 + %s9437_s22]]   ;;  %s9441_s22 = smov 24  }
  0x26   :  { %s9635_s21 = sld [smem:[%s11177_s0 + %s9438_s28]]   ;;  %s9442_s28 = smov 25  }
  0x27   :  { %s9640_s27 = sld [smem:[%s11177_s0 + %s9439_s7]]   ;;  %s9443_s7 = smov 26  }
  0x28   :  { %11258 = sst [smem:[#allocation86_spill]] %s9620_s17 }
  0x29   :  { %s9645_s12 = sld [smem:[%s11177_s0 + %s9440_s15]]   ;;  %s9444_s15 = smov 27  }
  0x2a   :  { %s9655_s9 = sld [smem:[%s11177_s0 + %s9442_s28]]   ;;  %s9446_s28 = smov 29  }
  0x2b   :  { %11259 = sst [smem:[#allocation87_spill]] %s9630_s25 }
  0x2c   :  { %11260 = sst [smem:[#allocation88_spill]] %s9635_s21 }
  0x2d   :  { %11261 = sst [smem:[#allocation89_spill]] %s9640_s27 }
  0x2e   :  { %s9650_s25 = sld [smem:[%s11177_s0 + %s9441_s22]]   ;;  %s9445_s22 = smov 28  }
  0x2f   :  { %11262 = sst [smem:[#allocation90_spill]] %s9645_s12 }
  0x30   :  { %11264 = sst [smem:[#allocation92_spill]] %s9655_s9 }
  0x31   :  { %s9660_s27 = sld [smem:[%s11177_s0 + %s9443_s7]]   ;;  %s9447_s7 = smov 30  }
  0x32   :  { %s9665_s5 = sld [smem:[%s11177_s0 + %s9444_s15]]   ;;  %s9448_s15 = smov 31  }
  0x33   :  { %s9675_s21 = sld [smem:[%s11177_s0 + %s9446_s28]]   ;;  %s9450_s28 = smov 33  }
  0x34   :  { %11263 = sst [smem:[#allocation91_spill]] %s9650_s25 }
  0x35   :  { %s9670_s25 = sld [smem:[%s11177_s0 + %s9445_s22]]   ;;  %s9449_s22 = smov 32  }
  0x36   :  { %s9685_s17 = sld [smem:[%s11177_s0 + %s9448_s15]]   ;;  %s9452_s15 = smov 35  }
  0x37   :  { %11265 = sst [smem:[#allocation93_spill]] %s9660_s27 }
  0x38   :  { %11266 = sst [smem:[#allocation94_spill]] %s9665_s5 }
  0x39   :  { %s9680_s27 = sld [smem:[%s11177_s0 + %s9447_s7]]   ;;  %s9451_s7 = smov 34  }
  0x3a   :  { %s9695_s20 = sld [smem:[%s11177_s0 + %s9450_s28]]   ;;  %s9454_s28 = smov 37  }
  0x3b   :  { %11267 = sst [smem:[#allocation95_spill]] %s9670_s25 }
  0x3c   :  { %s9690_s25 = sld [smem:[%s11177_s0 + %s9449_s22]]   ;;  %s9453_s22 = smov 36  }
  0x3d   :  { %s9705_s30 = sld [smem:[%s11177_s0 + %s9452_s15]]   ;;  %s9456_s15 = smov 39  }
  0x3f   :  { %11268 = sst [smem:[#allocation96_spill]] %s9680_s27 }
  0x40   :  { %11270 = sst [smem:[#allocation98_spill]] %s9695_s20 }
  0x41   :  { %s9700_s27 = sld [smem:[%s11177_s0 + %s9451_s7]]   ;;  %s9455_s7 = smov 38  }
  0x42   :  { %11269 = sst [smem:[#allocation97_spill]] %s9690_s25 }
  0x43   :  { %11272 = sst [smem:[#allocation100_spill]] %s9705_s30 }
  0x44   :  { %s9710_s25 = sld [smem:[%s11177_s0 + %s9453_s22]]   ;;  %s9457_s22 = smov 40  }
  0x45   :  { %s9715_s20 = sld [smem:[%s11177_s0 + %s9454_s28]]   ;;  %s9458_s28 = smov 41  }
  0x46   :  { %s9725_s30 = sld [smem:[%s11177_s0 + %s9456_s15]]   ;;  %s9460_s15 = smov 43  }
  0x47   :  { %11271 = sst [smem:[#allocation99_spill]] %s9700_s27 }
  0x48   :  { %s9720_s27 = sld [smem:[%s11177_s0 + %s9455_s7]]   ;;  %s9459_s7 = smov 42  }
  0x49   :  { %s9740_s19 = sld [smem:[%s11177_s0 + %s9459_s7]]   ;;  %s9463_s7 = smov 46  }
  0x4a   :  { %11273 = sst [smem:[#allocation101_spill]] %s9710_s25 }
  0x4b   :  { %11274 = sst [smem:[#allocation102_spill]] %s9715_s20 }
  0x4c   :  { %11275 = sst [smem:[#allocation103_spill]] %s9725_s30 }
  0x4d   :  { %s9730_s25 = sld [smem:[%s11177_s0 + %s9457_s22]]   ;;  %s9461_s22 = smov 44  }
  0x4e   :  { %s9735_s20 = sld [smem:[%s11177_s0 + %s9458_s28]]   ;;  %s9462_s28 = smov 45  }
  0x4f   :  { %11277 = sst [smem:[#allocation105_spill]] %s9740_s19 }
  0x50   :  { %s9745_s30 = sld [smem:[%s11177_s0 + %s9460_s15]]   ;;  %s9464_s15 = smov 47  }
  0x51   :  { %s9755_s8 = sld [smem:[%s11177_s0 + %s9462_s28]]   ;;  %s9466_s28 = smov 49  }
  0x52   :  { %s9760_s19 = sld [smem:[%s11177_s0 + %s9463_s7]]   ;;  %s9467_s7 = smov 50  }
  0x53   :  { %11276 = sst [smem:[#allocation104_spill]] %s9730_s25 }
  0x54   :  { %s9750_s25 = sld [smem:[%s11177_s0 + %s9461_s22]]   ;;  %s9465_s22 = smov 48  }
  0x55   :  { %s9780_s29 = sld [smem:[%s11177_s0 + %s9467_s7]]   ;;  %s9471_s7 = smov 54  }
  0x56   :  { %11278 = sst [smem:[#allocation106_spill]] %s9745_s30 }
  0x57   :  { %11280 = sst [smem:[#allocation108_spill]] %s9755_s8 }
  0x58   :  { %s9765_s30 = sld [smem:[%s11177_s0 + %s9464_s15]]   ;;  %s9468_s15 = smov 51  }
  0x59   :  { %s9775_s8 = sld [smem:[%s11177_s0 + %s9466_s28]]   ;;  %s9470_s28 = smov 53  }
  0x5a   :  { %11279 = sst [smem:[#allocation107_spill]] %s9750_s25 }
  0x5b   :  { %s9770_s25 = sld [smem:[%s11177_s0 + %s9465_s22]]   ;;  %s9469_s22 = smov 52  }
  0x5c   :  { %11284 = sst [smem:[#allocation112_spill]] %s9780_s29 }
  0x5d   :  { %s9800_s29 = sld [smem:[%s11177_s0 + %s9471_s7]]  }
  0x5e   :  { %11281 = sst [smem:[#allocation109_spill]] %s9765_s30 }
  0x5f   :  { %11283 = sst [smem:[#allocation111_spill]] %s9775_s8 }
  0x60   :  { %s9785_s30 = sld [smem:[%s11177_s0 + %s9468_s15]]   ;;  %s9472_s15 = smov 55  }
  0x61   :  { %11282 = sst [smem:[#allocation110_spill]] %s9770_s25 }
  0x62   :  { %s9790_s25 = sld [smem:[%s11177_s0 + %s9469_s22]]  }
  0x63   :  { %s9795_s8 = sld [smem:[%s11177_s0 + %s9470_s28]]  }
  0x66   :  { %11285 = sst [smem:[#allocation113_spill]] %s9785_s30 }
  0x67   :  { %s7008_s30 = sld [smem:[%s11177_s0 + %s9472_s15]]  }
  0x68   :  { %11286 = sst [smem:[#allocation114_spill]] %s9790_s25 }
  0x69   :  { %11287 = sst [smem:[#allocation115_spill]] %s9795_s8 }
  0x6a   :  { %s9808_s25 = sld [smem:[%s11177_s0 + %s9473_s23]]  }
  0x6d   :  { %v118_v0 = vstv %s7008_s30 }
  0x6e   :  { %119 = vst [vmem:[#allocation2] sm:$0x1] %v118_v0 }
  0x6f   :  { %120 = vsyncpa [#allocation4], 0 }
  0x70   :  { %121 = vsyncpa [#allocation6], 0 }
  0x71   :  { %122 = vsyncpa [#allocation9], 0 }
  0x72   :  { %123 = vsyncpa [#allocation12], 0 }
  0x73   :  { %124 = vsyncpa [#allocation15], 0 }
  0x74   :  { %125 = vsyncpa [#allocation18], 0 }
  0x75   :  { %126 = vsyncpa [#allocation21], 0 }
  0x76   :  { %127 = vsyncpa [#allocation24], 0 }
  0x77   :  { %128 = vsyncpa [#allocation27], 0 }
  0x78   :  { %129 = vsyncpa [#allocation30], 0 }
  0x79   :  { %130 = vsyncpa [#allocation33], 0 }
  0x7a   :  { %131 = vsyncpa [#allocation36], 0 }
  0x7b   :  { %132 = vsyncpa [#allocation39], 0 }
  0x7c   :  { %133 = vsyncpa [#allocation42], 0 }
  0x7d   :  { %134 = vsyncpa [#allocation45], 0 }
  0x7e   :  { %135 = vsyncpa [#allocation48], 0 }
  0x7f   :  { %136 = vsyncpa [#allocation51], 0  ;;  %s9810_s0 = smov 0  }
  0x80 LB: > { %s11288_s12 = sld [smem:[#allocation90_spill]]  ;;  %s11289_s9 = sld [smem:[#allocation92_spill]]  ;;  %s9416_s0 = sphi %s9810_s0, %s142_s0  }
  0x81   : > { %s11290_s8 = sld [smem:[#allocation115_spill]]  ;;  %s11291_s6 = sld [smem:[#allocation81_spill]] }
  0x82   : > { %s11292_s5 = sld [smem:[#allocation94_spill]]  ;;  %s11293_s4 = sld [smem:[#allocation85_spill]] }
  0x83   : > { %s11294_s3 = sld [smem:[#allocation77_spill]]  ;;  %s9816_s30 = sadd.s32 4294967295, %s9416_s0  }
  0x84   : > { %p7012_p0 = scmp.ge.s32.totalorder %s9416_s0, 1  ;;  %p1379_p1 = scmp.lt.s32.totalorder %s9416_s0, 3 }
  0x86   : > { %p9820_p2 = pnand %p7012_p0, %p1379_p1 }
  0x87   : > { %p7974_p3 = scmp.eq.s32.totalorder (!%p9820_p2), %s9816_s30, 0  ;;  %s9474_s1 = smov (!%p9820_p2), [#allocation5]  }
  0x88   : > { %1383 = sbr.rel (%p9820_p2) target bundleno = 931 (0x3a3), region = 12  ;;  %s1405_s2 = sshll.u32 (!%p9820_p2), %s9474_s1, 4  ;;  %s1406_s2 = int_to_ptr.vmem [resolvable:$true] %s1405_s2 }
  0x89   : > { %s9475_s7 = smov (!%p9820_p2), [#allocation8]   ;;  %s8484_s11 = scalar_lea.hbm (!%p9820_p2), %s11294_s3, 16 }
  0x8a   : > { %s1429_s10 = sshll.u32 (!%p9820_p2), %s9475_s7, 4  ;;  %p8485_p4 = scmp.ne.s32.totalorder (!%p9820_p2), %s11294_s3, %s8484_s11  ;;  %s1430_s10 = int_to_ptr.vmem [resolvable:$true] %s1429_s10 }
  0x8b   : > { %p8490_p7 = scmp.lt.u32.totalorder (!%p9820_p2), %s8484_s11, %s11294_s3 }
  0x8c   : > { %p8486_p5 = pnand (!%p9820_p2), %p8485_p4, %p7974_p3 }
  0x8e   : > { %p8487_p6 = pneg (!%p9820_p2), %p8486_p5 }
  0x90   : > { %p8492_p8 = pnand %p8490_p7, %p8487_p6 }
  0x92   : > { %8495 = shalt.err (!%p8492_p8)
}
  0x93   : > { %s8496_s15 = scalar_lea.vmem %s1406_s2, 16  ;;  %s8502_s16 = scalar_lea.vmem %s1406_s2, 32 }
  0x94   : > { %p8497_p9 = scmp.ne.s32.totalorder %s1406_s2, %s8496_s15  ;;  %p8503_p12 = scmp.lt.s32.totalorder %s1406_s2, %s1406_s2 }
  0x95   : > { %p8504_p13 = scmp.lt.s32.totalorder %s8502_s16, %s8496_s15 }
  0x96   : > { %p8498_p10 = pnand %p8497_p9, %p7974_p3 }
  0x97   : > { %p8505_p0 = por %p8504_p13, %p8503_p12 }
  0x98   : > { %p8499_p11 = pneg %p8498_p10 }
  0x9a   : > { %p8506_p1 = pnand %p8505_p0, %p8499_p11 }
  0x9c   : > { %8509 = shalt.err (!%p8506_p1)
}
  0x9d   : > { %7845 = dma.hbm_to_vmem [thread:$0]  (%p7974_p3), %s11294_s3, 16, %s1406_s2, [#allocation6]  }
  0x9e   : > { %s8510_s18 = scalar_lea.hbm %s9575_s14, 16 }
  0x9f   : > { %p8511_p4 = scmp.ne.s32.totalorder %s9575_s14, %s8510_s18  ;;  %p8516_p7 = scmp.lt.u32.totalorder %s8510_s18, %s9575_s14 }
  0xa1   : > { %p8512_p5 = pnand %p8511_p4, %p7974_p3 }
  0xa3   : > { %p8513_p6 = pneg %p8512_p5 }
  0xa5   : > { %p8518_p8 = pnand %p8516_p7, %p8513_p6 }
  0xa7   : > { %8521 = shalt.err (!%p8518_p8)
}
  0xa8   : > { %s8522_s23 = scalar_lea.vmem %s1430_s10, 16  ;;  %s8528_s22 = scalar_lea.vmem %s1430_s10, 32 }
  0xa9   : > { %p8523_p9 = scmp.ne.s32.totalorder %s1430_s10, %s8522_s23  ;;  %p8529_p12 = scmp.lt.s32.totalorder %s1430_s10, %s1430_s10 }
  0xaa   : > { %p8530_p13 = scmp.lt.s32.totalorder %s8528_s22, %s8522_s23 }
  0xab   : > { %p8524_p10 = pnand %p8523_p9, %p7974_p3 }
  0xac   : > { %p8531_p0 = por %p8530_p13, %p8529_p12 }
  0xad   : > { %p8525_p11 = pneg %p8524_p10 }
  0xaf   : > { %p8532_p1 = pnand %p8531_p0, %p8525_p11 }
  0xb1   : > { %8535 = shalt.err (!%p8532_p1)
}
  0xb2   : > { %7849 = dma.hbm_to_vmem [thread:$0]  (%p7974_p3), %s9575_s14, 16, %s1430_s10, [#allocation9]  }
  0xb3   : > { %s9476_s26 = smov [#allocation11]   ;;  %s9477_s2 = smov [#allocation14]  }
  0xb4   : > { %s1453_s1 = sshll.u32 %s9476_s26, 4  ;;  %s1475_s7 = sshll.u32 %s9477_s2, 4  ;;  %s1454_s1 = int_to_ptr.vmem [resolvable:$true] %s1453_s1  ;;  %s1476_s7 = int_to_ptr.vmem [resolvable:$true] %s1475_s7 }
  0xb5   : > { %s8536_s11 = scalar_lea.hbm %s9585_s24, 16 }
  0xb6   : > { %p8537_p4 = scmp.ne.s32.totalorder %s9585_s24, %s8536_s11  ;;  %p8542_p7 = scmp.lt.u32.totalorder %s8536_s11, %s9585_s24 }
  0xb8   : > { %p8538_p5 = pnand %p8537_p4, %p7974_p3 }
  0xba   : > { %p8539_p6 = pneg %p8538_p5 }
  0xbc   : > { %p8544_p8 = pnand %p8542_p7, %p8539_p6 }
  0xbe   : > { %8547 = shalt.err (!%p8544_p8)
}
  0xbf   : > { %s8548_s15 = scalar_lea.vmem %s1454_s1, 16  ;;  %s8554_s10 = scalar_lea.vmem %s1454_s1, 32 }
  0xc0   : > { %p8549_p9 = scmp.ne.s32.totalorder %s1454_s1, %s8548_s15  ;;  %p8555_p12 = scmp.lt.s32.totalorder %s1454_s1, %s1454_s1 }
  0xc1   : > { %p8556_p13 = scmp.lt.s32.totalorder %s8554_s10, %s8548_s15 }
  0xc2   : > { %p8550_p10 = pnand %p8549_p9, %p7974_p3 }
  0xc3   : > { %p8557_p0 = por %p8556_p13, %p8555_p12 }
  0xc4   : > { %p8551_p11 = pneg %p8550_p10 }
  0xc6   : > { %p8558_p1 = pnand %p8557_p0, %p8551_p11 }
  0xc8   : > { %8561 = shalt.err (!%p8558_p1)
}
  0xc9   : > { %7853 = dma.hbm_to_vmem [thread:$0]  (%p7974_p3), %s9585_s24, 16, %s1454_s1, [#allocation12]  }
  0xca   : > { %s8562_s16 = scalar_lea.hbm %s11291_s6, 16 }
  0xcb   : > { %p8563_p4 = scmp.ne.s32.totalorder %s11291_s6, %s8562_s16  ;;  %p8568_p7 = scmp.lt.u32.totalorder %s8562_s16, %s11291_s6 }
  0xcd   : > { %p8564_p5 = pnand %p8563_p4, %p7974_p3 }
  0xcf   : > { %p8565_p6 = pneg %p8564_p5 }
  0xd1   : > { %p8570_p8 = pnand %p8568_p7, %p8565_p6 }
  0xd3   : > { %8573 = shalt.err (!%p8570_p8)
}
  0xd4   : > { %s8574_s18 = scalar_lea.vmem %s1476_s7, 16  ;;  %s8580_s23 = scalar_lea.vmem %s1476_s7, 32 }
  0xd5   : > { %p8575_p9 = scmp.ne.s32.totalorder %s1476_s7, %s8574_s18  ;;  %p8581_p12 = scmp.lt.s32.totalorder %s1476_s7, %s1476_s7 }
  0xd6   : > { %p8582_p13 = scmp.lt.s32.totalorder %s8580_s23, %s8574_s18 }
  0xd7   : > { %p8576_p10 = pnand %p8575_p9, %p7974_p3 }
  0xd8   : > { %p8583_p0 = por %p8582_p13, %p8581_p12 }
  0xd9   : > { %p8577_p11 = pneg %p8576_p10 }
  0xdb   : > { %p8584_p1 = pnand %p8583_p0, %p8577_p11 }
  0xdd   : > { %8587 = shalt.err (!%p8584_p1)
}
  0xde   : > { %7857 = dma.hbm_to_vmem [thread:$0]  (%p7974_p3), %s11291_s6, 16, %s1476_s7, [#allocation15]  }
  0xdf   : > { %s9478_s22 = smov [#allocation17]   ;;  %s9479_s1 = smov [#allocation20]  }
  0xe0   : > { %s1503_s26 = sshll.u32 %s9478_s22, 4  ;;  %s1525_s2 = sshll.u32 %s9479_s1, 4  ;;  %s1504_s26 = int_to_ptr.vmem [resolvable:$true] %s1503_s26  ;;  %s1526_s2 = int_to_ptr.vmem [resolvable:$true] %s1525_s2 }
  0xe1   : > { %s8588_s11 = scalar_lea.hbm %s11293_s4, 16 }
  0xe2   : > { %p8589_p4 = scmp.ne.s32.totalorder %s11293_s4, %s8588_s11  ;;  %p8594_p7 = scmp.lt.u32.totalorder %s8588_s11, %s11293_s4 }
  0xe4   : > { %p8590_p5 = pnand %p8589_p4, %p7974_p3 }
  0xe6   : > { %p8591_p6 = pneg %p8590_p5 }
  0xe8   : > { %p8596_p8 = pnand %p8594_p7, %p8591_p6 }
  0xea   : > { %8599 = shalt.err (!%p8596_p8)
}
  0xeb   : > { %s8600_s15 = scalar_lea.vmem %s1504_s26, 16  ;;  %s8606_s7 = scalar_lea.vmem %s1504_s26, 32 }
  0xec   : > { %p8601_p9 = scmp.ne.s32.totalorder %s1504_s26, %s8600_s15  ;;  %p8607_p12 = scmp.lt.s32.totalorder %s1504_s26, %s1504_s26 }
  0xed   : > { %p8608_p13 = scmp.lt.s32.totalorder %s8606_s7, %s8600_s15 }
  0xee   : > { %p8602_p10 = pnand %p8601_p9, %p7974_p3 }
  0xef   : > { %p8609_p0 = por %p8608_p13, %p8607_p12 }
  0xf0   : > { %p8603_p11 = pneg %p8602_p10 }
  0xf2   : > { %p8610_p1 = pnand %p8609_p0, %p8603_p11 }
  0xf4   : > { %8613 = shalt.err (!%p8610_p1)
}
  0xf5   : > { %7861 = dma.hbm_to_vmem [thread:$0]  (%p7974_p3), %s11293_s4, 16, %s1504_s26, [#allocation18]  }
  0xf6   : > { %s8614_s10 = scalar_lea.hbm %s9625_s13, 16 }
  0xf7   : > { %p8615_p4 = scmp.ne.s32.totalorder %s9625_s13, %s8614_s10  ;;  %p8620_p7 = scmp.lt.u32.totalorder %s8614_s10, %s9625_s13 }
  0xf9   : > { %p8616_p5 = pnand %p8615_p4, %p7974_p3 }
  0xfb   : > { %p8617_p6 = pneg %p8616_p5 }
  0xfd   : > { %p8622_p8 = pnand %p8620_p7, %p8617_p6 }
  0xff   : > { %8625 = shalt.err (!%p8622_p8)
}
 0x100   : > { %s8626_s16 = scalar_lea.vmem %s1526_s2, 16  ;;  %s8632_s18 = scalar_lea.vmem %s1526_s2, 32 }
 0x101   : > { %p8627_p9 = scmp.ne.s32.totalorder %s1526_s2, %s8626_s16  ;;  %p8633_p12 = scmp.lt.s32.totalorder %s1526_s2, %s1526_s2 }
 0x102   : > { %p8634_p13 = scmp.lt.s32.totalorder %s8632_s18, %s8626_s16 }
 0x103   : > { %p8628_p10 = pnand %p8627_p9, %p7974_p3 }
 0x104   : > { %p8635_p0 = por %p8634_p13, %p8633_p12 }
 0x105   : > { %p8629_p11 = pneg %p8628_p10 }
 0x107   : > { %p8636_p1 = pnand %p8635_p0, %p8629_p11 }
 0x109   : > { %8639 = shalt.err (!%p8636_p1)
}
 0x10a   : > { %7865 = dma.hbm_to_vmem [thread:$0]  (%p7974_p3), %s9625_s13, 16, %s1526_s2, [#allocation21]  }
 0x10b   : > { %s9480_s23 = smov [#allocation23]   ;;  %s9481_s26 = smov [#allocation26]  }
 0x10c   : > { %s1553_s22 = sshll.u32 %s9480_s23, 4  ;;  %s1575_s1 = sshll.u32 %s9481_s26, 4  ;;  %s1554_s22 = int_to_ptr.vmem [resolvable:$true] %s1553_s22  ;;  %s1576_s1 = int_to_ptr.vmem [resolvable:$true] %s1575_s1 }
 0x10d   : > { %s8640_s11 = scalar_lea.hbm %s11288_s12, 16 }
 0x10e   : > { %p8641_p4 = scmp.ne.s32.totalorder %s11288_s12, %s8640_s11  ;;  %p8646_p7 = scmp.lt.u32.totalorder %s8640_s11, %s11288_s12 }
 0x110   : > { %p8642_p5 = pnand %p8641_p4, %p7974_p3 }
 0x112   : > { %p8643_p6 = pneg %p8642_p5 }
 0x114   : > { %p8648_p8 = pnand %p8646_p7, %p8643_p6 }
 0x116   : > { %8651 = shalt.err (!%p8648_p8)
}
 0x117   : > { %s8652_s15 = scalar_lea.vmem %s1554_s22, 16  ;;  %s8658_s2 = scalar_lea.vmem %s1554_s22, 32 }
 0x118   : > { %p8653_p9 = scmp.ne.s32.totalorder %s1554_s22, %s8652_s15  ;;  %p8659_p12 = scmp.lt.s32.totalorder %s1554_s22, %s1554_s22 }
 0x119   : > { %p8660_p13 = scmp.lt.s32.totalorder %s8658_s2, %s8652_s15 }
 0x11a   : > { %p8654_p10 = pnand %p8653_p9, %p7974_p3 }
 0x11b   : > { %p8661_p0 = por %p8660_p13, %p8659_p12 }
 0x11c   : > { %p8655_p11 = pneg %p8654_p10 }
 0x11e   : > { %p8662_p1 = pnand %p8661_p0, %p8655_p11 }
 0x120   : > { %8665 = shalt.err (!%p8662_p1)
}
 0x121   : > { %7869 = dma.hbm_to_vmem [thread:$0]  (%p7974_p3), %s11288_s12, 16, %s1554_s22, [#allocation24]  }
 0x122   : > { %s8666_s7 = scalar_lea.hbm %s11289_s9, 16 }
 0x123   : > { %p8667_p4 = scmp.ne.s32.totalorder %s11289_s9, %s8666_s7  ;;  %p8672_p7 = scmp.lt.u32.totalorder %s8666_s7, %s11289_s9 }
 0x125   : > { %p8668_p5 = pnand %p8667_p4, %p7974_p3 }
 0x127   : > { %p8669_p6 = pneg %p8668_p5 }
 0x129   : > { %p8674_p8 = pnand %p8672_p7, %p8669_p6 }
 0x12b   : > { %8677 = shalt.err (!%p8674_p8)
}
 0x12c   : > { %s8678_s10 = scalar_lea.vmem %s1576_s1, 16  ;;  %s8684_s16 = scalar_lea.vmem %s1576_s1, 32 }
 0x12d   : > { %p8679_p9 = scmp.ne.s32.totalorder %s1576_s1, %s8678_s10  ;;  %p8685_p12 = scmp.lt.s32.totalorder %s1576_s1, %s1576_s1 }
 0x12e   : > { %p8686_p13 = scmp.lt.s32.totalorder %s8684_s16, %s8678_s10 }
 0x12f   : > { %p8680_p10 = pnand %p8679_p9, %p7974_p3 }
 0x130   : > { %p8687_p0 = por %p8686_p13, %p8685_p12 }
 0x131   : > { %p8681_p11 = pneg %p8680_p10 }
 0x133   : > { %p8688_p1 = pnand %p8687_p0, %p8681_p11 }
 0x135   : > { %8691 = shalt.err (!%p8688_p1)
}
 0x136   : > { %7873 = dma.hbm_to_vmem [thread:$0]  (%p7974_p3), %s11289_s9, 16, %s1576_s1, [#allocation27]  }
 0x137   : > { %s9482_s18 = smov [#allocation29]   ;;  %s9483_s22 = smov [#allocation32]  }
 0x138   : > { %s1597_s23 = sshll.u32 %s9482_s18, 4  ;;  %s1621_s26 = sshll.u32 %s9483_s22, 4  ;;  %s1598_s23 = int_to_ptr.vmem [resolvable:$true] %s1597_s23  ;;  %s1622_s26 = int_to_ptr.vmem [resolvable:$true] %s1621_s26 }
 0x139   : > { %s8692_s11 = scalar_lea.hbm %s11292_s5, 16 }
 0x13a   : > { %p8693_p4 = scmp.ne.s32.totalorder %s11292_s5, %s8692_s11  ;;  %p8698_p7 = scmp.lt.u32.totalorder %s8692_s11, %s11292_s5 }
 0x13c   : > { %p8694_p5 = pnand %p8693_p4, %p7974_p3 }
 0x13e   : > { %p8695_p6 = pneg %p8694_p5 }
 0x140   : > { %p8700_p8 = pnand %p8698_p7, %p8695_p6 }
 0x142   : > { %8703 = shalt.err (!%p8700_p8)
}
 0x143   : > { %s8704_s15 = scalar_lea.vmem %s1598_s23, 16  ;;  %s8710_s1 = scalar_lea.vmem %s1598_s23, 32 }
 0x144   : > { %p8705_p9 = scmp.ne.s32.totalorder %s1598_s23, %s8704_s15  ;;  %p8711_p12 = scmp.lt.s32.totalorder %s1598_s23, %s1598_s23 }
 0x145   : > { %p8712_p13 = scmp.lt.s32.totalorder %s8710_s1, %s8704_s15 }
 0x146   : > { %p8706_p10 = pnand %p8705_p9, %p7974_p3 }
 0x147   : > { %p8713_p0 = por %p8712_p13, %p8711_p12 }
 0x148   : > { %p8707_p11 = pneg %p8706_p10 }
 0x14a   : > { %p8714_p1 = pnand %p8713_p0, %p8707_p11 }
 0x14c   : > { %8717 = shalt.err (!%p8714_p1)
}
 0x14d   : > { %7877 = dma.hbm_to_vmem [thread:$0]  (%p7974_p3), %s11292_s5, 16, %s1598_s23, [#allocation30]  }
 0x14e   : > { %s8718_s2 = scalar_lea.hbm %s9675_s21, 16 }
 0x14f   : > { %p8719_p4 = scmp.ne.s32.totalorder %s9675_s21, %s8718_s2  ;;  %p8724_p7 = scmp.lt.u32.totalorder %s8718_s2, %s9675_s21 }
 0x151   : > { %p8720_p5 = pnand %p8719_p4, %p7974_p3 }
 0x153   : > { %p8721_p6 = pneg %p8720_p5 }
 0x155   : > { %p8726_p8 = pnand %p8724_p7, %p8721_p6 }
 0x157   : > { %8729 = shalt.err (!%p8726_p8)
}
 0x158   : > { %s8730_s7 = scalar_lea.vmem %s1622_s26, 16  ;;  %s8736_s10 = scalar_lea.vmem %s1622_s26, 32 }
 0x159   : > { %p8731_p9 = scmp.ne.s32.totalorder %s1622_s26, %s8730_s7  ;;  %p8737_p12 = scmp.lt.s32.totalorder %s1622_s26, %s1622_s26 }
 0x15a   : > { %p8738_p13 = scmp.lt.s32.totalorder %s8736_s10, %s8730_s7 }
 0x15b   : > { %p8732_p10 = pnand %p8731_p9, %p7974_p3 }
 0x15c   : > { %p8739_p0 = por %p8738_p13, %p8737_p12 }
 0x15d   : > { %p8733_p11 = pneg %p8732_p10 }
 0x15f   : > { %p8740_p1 = pnand %p8739_p0, %p8733_p11 }
 0x161   : > { %8743 = shalt.err (!%p8740_p1)
}
 0x162   : > { %7881 = dma.hbm_to_vmem [thread:$0]  (%p7974_p3), %s9675_s21, 16, %s1622_s26, [#allocation33]  }
 0x163   : > { %s9484_s16 = smov [#allocation35]   ;;  %s8744_s23 = scalar_lea.hbm %s9685_s17, 16 }
 0x164   : > { %s1643_s18 = sshll.u32 %s9484_s16, 4  ;;  %p8745_p4 = scmp.ne.s32.totalorder %s9685_s17, %s8744_s23  ;;  %s1644_s18 = int_to_ptr.vmem [resolvable:$true] %s1643_s18 }
 0x165   : > { %p8750_p7 = scmp.lt.u32.totalorder %s8744_s23, %s9685_s17 }
 0x166   : > { %p8746_p5 = pnand %p8745_p4, %p7974_p3 }
 0x168   : > { %p8747_p6 = pneg %p8746_p5 }
 0x16a   : > { %p8752_p8 = pnand %p8750_p7, %p8747_p6 }
 0x16c   : > { %8755 = shalt.err (!%p8752_p8)
}
 0x16d   : > { %s8756_s22 = scalar_lea.vmem %s1644_s18, 16  ;;  %s8762_s11 = scalar_lea.vmem %s1644_s18, 32 }
 0x16e   : > { %p8757_p9 = scmp.ne.s32.totalorder %s1644_s18, %s8756_s22  ;;  %p8763_p12 = scmp.lt.s32.totalorder %s1644_s18, %s1644_s18 }
 0x16f   : > { %p8764_p13 = scmp.lt.s32.totalorder %s8762_s11, %s8756_s22 }
 0x170   : > { %p8758_p10 = pnand %p8757_p9, %p7974_p3 }
 0x171   : > { %p8765_p0 = por %p8764_p13, %p8763_p12 }
 0x172   : > { %p8759_p11 = pneg %p8758_p10 }
 0x174   : > { %p8766_p1 = pnand %p8765_p0, %p8759_p11 }
 0x176   : > { %8769 = shalt.err (!%p8766_p1)
}
 0x177   : > { %7885 = dma.hbm_to_vmem [thread:$0]  (%p7974_p3), %s9685_s17, 16, %s1644_s18, [#allocation36]  }
 0x178   : > { %s9485_s26 = smov [#allocation38]   ;;  %s9486_s1 = smov [#allocation41]  }
 0x179   : > { %s1681_s15 = sshll.u32 %s9485_s26, 4  ;;  %s1709_s2 = sshll.u32 %s9486_s1, 4  ;;  %s1682_s15 = int_to_ptr.vmem [resolvable:$true] %s1681_s15  ;;  %s9937_s2 = int_to_ptr.vmem [resolvable:$true] %s1709_s2 }
 0x17a   : > { %s8770_s7 = scalar_lea.hbm %s9720_s27, 256 }
 0x17b   : > { %p8771_p4 = scmp.ne.s32.totalorder %s9720_s27, %s8770_s7  ;;  %p8776_p7 = scmp.lt.u32.totalorder %s8770_s7, %s9720_s27 }
 0x17d   : > { %p8772_p5 = pnand %p8771_p4, %p7974_p3 }
 0x17f   : > { %p8773_p6 = pneg %p8772_p5 }
 0x181   : > { %p8778_p8 = pnand %p8776_p7, %p8773_p6 }
 0x183   : > { %8781 = shalt.err (!%p8778_p8)
}
 0x184   : > { %s8782_s10 = scalar_lea.vmem %s1682_s15, 256  ;;  %p8789_p12 = scmp.lt.s32.totalorder %s1682_s15, %s1682_s15 }
 0x185   : > { %p8783_p9 = scmp.ne.s32.totalorder %s1682_s15, %s8782_s10  ;;  %p8790_p13 = scmp.lt.s32.totalorder %s8782_s10, %s8782_s10 }
 0x187   : > { %p8784_p10 = pnand %p8783_p9, %p7974_p3  ;;  %p8791_p0 = por %p8790_p13, %p8789_p12 }
 0x189   : > { %p8785_p11 = pneg %p8784_p10 }
 0x18b   : > { %p8792_p1 = pnand %p8791_p0, %p8785_p11 }
 0x18d   : > { %8795 = shalt.err (!%p8792_p1)
}
 0x18e   : > { %s11207_s16 = smov 64   ;;  %s11209_s18 = smov 4  }
 0x18f   : > { %7889 = dma.hbm_to_vmem [thread:$0]  (%p7974_p3), %s9720_s27, 256, %s1682_s15, [#allocation39], %s11207_s16, %s11207_s16, %s11209_s18  }
 0x190   : > { %s8796_s23 = scalar_lea.hbm %s9735_s20, 16 }
 0x191   : > { %p8797_p4 = scmp.ne.s32.totalorder %s9735_s20, %s8796_s23  ;;  %p8802_p7 = scmp.lt.u32.totalorder %s8796_s23, %s9735_s20 }
 0x193   : > { %p8798_p5 = pnand %p8797_p4, %p7974_p3 }
 0x195   : > { %p8799_p6 = pneg %p8798_p5 }
 0x197   : > { %p8804_p8 = pnand %p8802_p7, %p8799_p6 }
 0x199   : > { %8807 = shalt.err (!%p8804_p8)
}
 0x19a   : > { %s8808_s22 = scalar_lea.vmem %s9937_s2, 16  ;;  %s8814_s11 = scalar_lea.vmem %s9937_s2, 32 }
 0x19b   : > { %p8809_p9 = scmp.ne.s32.totalorder %s9937_s2, %s8808_s22  ;;  %p8815_p12 = scmp.lt.s32.totalorder %s9937_s2, %s9937_s2 }
 0x19c   : > { %p8816_p13 = scmp.lt.s32.totalorder %s8814_s11, %s8808_s22 }
 0x19d   : > { %p8810_p10 = pnand %p8809_p9, %p7974_p3 }
 0x19e   : > { %p8817_p0 = por %p8816_p13, %p8815_p12 }
 0x19f   : > { %p8811_p11 = pneg %p8810_p10 }
 0x1a1   : > { %p8818_p1 = pnand %p8817_p0, %p8811_p11 }
 0x1a3   : > { %8821 = shalt.err (!%p8818_p1)
}
 0x1a4   : > { %7893 = dma.hbm_to_vmem [thread:$0]  (%p7974_p3), %s9735_s20, 16, %s9937_s2, [#allocation42]  }
 0x1a5   : > { %s9489_s26 = smov [#allocation44]   ;;  %s9490_s1 = smov [#allocation47]  }
 0x1a6   : > { %s1740_s15 = sshll.u32 %s9489_s26, 4  ;;  %s1771_s7 = sshll.u32 %s9490_s1, 4  ;;  %s1741_s15 = int_to_ptr.vmem [resolvable:$true] %s1740_s15  ;;  %s9968_s7 = int_to_ptr.vmem [resolvable:$true] %s1771_s7 }
 0x1a7   : > { %s8822_s10 = scalar_lea.hbm %s9760_s19, 16 }
 0x1a8   : > { %p8823_p4 = scmp.ne.s32.totalorder %s9760_s19, %s8822_s10  ;;  %p8828_p7 = scmp.lt.u32.totalorder %s8822_s10, %s9760_s19 }
 0x1aa   : > { %p8824_p5 = pnand %p8823_p4, %p7974_p3 }
 0x1ac   : > { %p8825_p6 = pneg %p8824_p5 }
 0x1ae   : > { %p8830_p8 = pnand %p8828_p7, %p8825_p6 }
 0x1b0   : > { %8833 = shalt.err (!%p8830_p8)
}
 0x1b1   : > { %s8834_s23 = scalar_lea.vmem %s1741_s15, 16  ;;  %s8840_s2 = scalar_lea.vmem %s1741_s15, 32 }
 0x1b2   : > { %p8835_p9 = scmp.ne.s32.totalorder %s1741_s15, %s8834_s23  ;;  %p8841_p12 = scmp.lt.s32.totalorder %s1741_s15, %s1741_s15 }
 0x1b3   : > { %p8842_p13 = scmp.lt.s32.totalorder %s8840_s2, %s8834_s23 }
 0x1b4   : > { %p8836_p10 = pnand %p8835_p9, %p7974_p3 }
 0x1b5   : > { %p8843_p0 = por %p8842_p13, %p8841_p12 }
 0x1b6   : > { %p8837_p11 = pneg %p8836_p10 }
 0x1b8   : > { %p8844_p1 = pnand %p8843_p0, %p8837_p11 }
 0x1ba   : > { %8847 = shalt.err (!%p8844_p1)
}
 0x1bb   : > { %s11296_s22 = sld [smem:[#allocation113_spill]] }
 0x1bc   : > { %7897 = dma.hbm_to_vmem [thread:$0]  (%p7974_p3), %s9760_s19, 16, %s1741_s15, [#allocation45]  }
 0x1c1   : > { %s8848_s11 = scalar_lea.hbm %s11296_s22, 16 }
 0x1c2   : > { %p8849_p4 = scmp.ne.s32.totalorder %s11296_s22, %s8848_s11  ;;  %p8854_p7 = scmp.lt.u32.totalorder %s8848_s11, %s11296_s22 }
 0x1c4   : > { %p8850_p5 = pnand %p8849_p4, %p7974_p3 }
 0x1c6   : > { %p8851_p6 = pneg %p8850_p5 }
 0x1c8   : > { %p8856_p8 = pnand %p8854_p7, %p8851_p6 }
 0x1ca   : > { %8859 = shalt.err (!%p8856_p8)
}
 0x1cb   : > { %s8860_s26 = scalar_lea.vmem %s9968_s7, 16  ;;  %s8866_s1 = scalar_lea.vmem %s9968_s7, 32 }
 0x1cc   : > { %p8861_p9 = scmp.ne.s32.totalorder %s9968_s7, %s8860_s26  ;;  %p8867_p12 = scmp.lt.s32.totalorder %s9968_s7, %s9968_s7 }
 0x1cd   : > { %p8868_p13 = scmp.lt.s32.totalorder %s8866_s1, %s8860_s26 }
 0x1ce   : > { %p8862_p10 = pnand %p8861_p9, %p7974_p3 }
 0x1cf   : > { %p8869_p0 = por %p8868_p13, %p8867_p12 }
 0x1d0   : > { %p8863_p11 = pneg %p8862_p10 }
 0x1d2   : > { %p8870_p1 = pnand %p8869_p0, %p8863_p11 }
 0x1d4   : > { %8873 = shalt.err (!%p8870_p1)
}
 0x1d5   : > { %7901 = dma.hbm_to_vmem [thread:$0]  (%p7974_p3), %s11296_s22, 16, %s9968_s7, [#allocation48]  }
 0x1d6   : > { %s9491_s15 = smov [#allocation50]   ;;  %s9492_s23 = smov [#allocation3]  }
 0x1d7   : > { %s1795_s10 = sshll.u32 %s9491_s15, 4  ;;  %s1391_s2 = sshll.u32 %s9492_s23, 4  ;;  %s1796_s10 = int_to_ptr.vmem [resolvable:$true] %s1795_s10  ;;  %s1392_s2 = int_to_ptr.vmem [resolvable:$true] %s1391_s2 }
 0x1d8   : > { %s8874_s11 = scalar_lea.hbm %s11290_s8, 16 }
 0x1d9   : > { %p8875_p4 = scmp.ne.s32.totalorder %s11290_s8, %s8874_s11  ;;  %p8880_p7 = scmp.lt.u32.totalorder %s8874_s11, %s11290_s8 }
 0x1db   : > { %p8876_p5 = pnand %p8875_p4, %p7974_p3 }
 0x1dd   : > { %p8877_p6 = pneg %p8876_p5 }
 0x1df   : > { %p8882_p8 = pnand %p8880_p7, %p8877_p6 }
 0x1e1   : > { %8885 = shalt.err (!%p8882_p8)
}
 0x1e2   : > { %s8886_s26 = scalar_lea.vmem %s1796_s10, 16  ;;  %s8892_s7 = scalar_lea.vmem %s1796_s10, 32 }
 0x1e3   : > { %p8887_p9 = scmp.ne.s32.totalorder %s1796_s10, %s8886_s26  ;;  %p8893_p12 = scmp.lt.s32.totalorder %s1796_s10, %s1796_s10 }
 0x1e4   : > { %p8894_p13 = scmp.lt.s32.totalorder %s8892_s7, %s8886_s26 }
 0x1e5   : > { %p8888_p10 = pnand %p8887_p9, %p7974_p3 }
 0x1e6   : > { %p8895_p0 = por %p8894_p13, %p8893_p12 }
 0x1e7   : > { %p8889_p11 = pneg %p8888_p10 }
 0x1e9   : > { %p8896_p1 = pnand %p8895_p0, %p8889_p11 }
 0x1eb   : > { %8899 = shalt.err (!%p8896_p1)
}
 0x1ec   : > { %s11297_s1 = sld [smem:[#allocation76_spill]] }
 0x1ed   : > { %7905 = dma.hbm_to_vmem [thread:$0]  (%p7974_p3), %s11290_s8, 16, %s1796_s10, [#allocation51]  }
 0x1f2   : > { %s8900_s15 = scalar_lea.hbm %s11297_s1, 256 }
 0x1f3   : > { %p8901_p4 = scmp.ne.s32.totalorder %s11297_s1, %s8900_s15  ;;  %p8906_p7 = scmp.lt.u32.totalorder %s8900_s15, %s11297_s1 }
 0x1f5   : > { %p8902_p5 = pnand %p8901_p4, %p7974_p3 }
 0x1f7   : > { %p8903_p6 = pneg %p8902_p5 }
 0x1f9   : > { %p8908_p8 = pnand %p8906_p7, %p8903_p6 }
 0x1fb   : > { %8911 = shalt.err (!%p8908_p8)
}
 0x1fc   : > { %s8912_s23 = scalar_lea.vmem %s1392_s2, 256  ;;  %p8919_p12 = scmp.lt.s32.totalorder %s1392_s2, %s1392_s2 }
 0x1fd   : > { %p8913_p9 = scmp.ne.s32.totalorder %s1392_s2, %s8912_s23  ;;  %p8920_p13 = scmp.lt.s32.totalorder %s8912_s23, %s8912_s23 }
 0x1ff   : > { %p8914_p10 = pnand %p8913_p9, %p7974_p3  ;;  %p8921_p0 = por %p8920_p13, %p8919_p12 }
 0x201   : > { %p8915_p11 = pneg %p8914_p10 }
 0x203   : > { %p8922_p1 = pnand %p8921_p0, %p8915_p11 }
 0x205   : > { %8925 = shalt.err (!%p8922_p1)
}
 0x206   : > { %s11298_s10 = sld [smem:[#allocation78_spill]]  ;;  %s9493_s11 = smov [#allocation7]  }
 0x207   : > { %7843 = dma.hbm_to_vmem [thread:$0]  (%p7974_p3), %s11297_s1, 256, %s1392_s2, [#allocation4], %s11207_s16, %s11207_s16, %s11209_s18  }
 0x208   : > { %s1415_s26 = sshll.u32 %s9493_s11, 4  ;;  %s9494_s7 = smov [#allocation10]   ;;  %s1416_s26 = int_to_ptr.vmem [resolvable:$true] %s1415_s26 }
 0x209   : > { %s1439_s15 = sshll.u32 %s9494_s7, 4  ;;  %s1440_s15 = int_to_ptr.vmem [resolvable:$true] %s1439_s15 }
 0x20c   : > { %s8926_s23 = scalar_lea.hbm %s11298_s10, 256 }
 0x20d   : > { %p8927_p4 = scmp.ne.s32.totalorder %s11298_s10, %s8926_s23  ;;  %p8932_p7 = scmp.lt.u32.totalorder %s8926_s23, %s11298_s10 }
 0x20f   : > { %p8928_p5 = pnand %p8927_p4, %p7974_p3 }
 0x211   : > { %p8929_p6 = pneg %p8928_p5 }
 0x213   : > { %p8934_p8 = pnand %p8932_p7, %p8929_p6 }
 0x215   : > { %8937 = shalt.err (!%p8934_p8)
}
 0x216   : > { %s8938_s3 = scalar_lea.vmem %s1416_s26, 256  ;;  %p8945_p12 = scmp.lt.s32.totalorder %s1416_s26, %s1416_s26 }
 0x217   : > { %p8939_p9 = scmp.ne.s32.totalorder %s1416_s26, %s8938_s3  ;;  %p8946_p13 = scmp.lt.s32.totalorder %s8938_s3, %s8938_s3 }
 0x219   : > { %p8940_p10 = pnand %p8939_p9, %p7974_p3  ;;  %p8947_p0 = por %p8946_p13, %p8945_p12 }
 0x21b   : > { %p8941_p11 = pneg %p8940_p10 }
 0x21d   : > { %p8948_p1 = pnand %p8947_p0, %p8941_p11 }
 0x21f   : > { %8951 = shalt.err (!%p8948_p1)
}
 0x220   : > { %s11299_s2 = sld [smem:[#allocation79_spill]] }
 0x221   : > { %7847 = dma.hbm_to_vmem [thread:$0]  (%p7974_p3), %s11298_s10, 256, %s1416_s26, [#allocation6], %s11207_s16, %s11207_s16, %s11209_s18  }
 0x226   : > { %s8952_s11 = scalar_lea.hbm %s11299_s2, 256 }
 0x227   : > { %p8953_p4 = scmp.ne.s32.totalorder %s11299_s2, %s8952_s11  ;;  %p8958_p7 = scmp.lt.u32.totalorder %s8952_s11, %s11299_s2 }
 0x229   : > { %p8954_p5 = pnand %p8953_p4, %p7974_p3 }
 0x22b   : > { %p8955_p6 = pneg %p8954_p5 }
 0x22d   : > { %p8960_p8 = pnand %p8958_p7, %p8955_p6 }
 0x22f   : > { %8963 = shalt.err (!%p8960_p8)
}
 0x230   : > { %s8964_s3 = scalar_lea.vmem %s1440_s15, 256  ;;  %p8971_p12 = scmp.lt.s32.totalorder %s1440_s15, %s1440_s15 }
 0x231   : > { %p8965_p9 = scmp.ne.s32.totalorder %s1440_s15, %s8964_s3  ;;  %p8972_p13 = scmp.lt.s32.totalorder %s8964_s3, %s8964_s3 }
 0x233   : > { %p8966_p10 = pnand %p8965_p9, %p7974_p3  ;;  %p8973_p0 = por %p8972_p13, %p8971_p12 }
 0x235   : > { %p8967_p11 = pneg %p8966_p10 }
 0x237   : > { %p8974_p1 = pnand %p8973_p0, %p8967_p11 }
 0x239   : > { %8977 = shalt.err (!%p8974_p1)
}
 0x23a   : > { %s11300_s26 = sld [smem:[#allocation80_spill]]  ;;  %s9495_s7 = smov [#allocation13]  }
 0x23b   : > { %7851 = dma.hbm_to_vmem [thread:$0]  (%p7974_p3), %s11299_s2, 256, %s1440_s15, [#allocation9], %s11207_s16, %s11207_s16, %s11209_s18  }
 0x23c   : > { %s1464_s23 = sshll.u32 %s9495_s7, 4  ;;  %s9496_s11 = smov [#allocation16]   ;;  %s1465_s23 = int_to_ptr.vmem [resolvable:$true] %s1464_s23 }
 0x23d   : > { %s1489_s1 = sshll.u32 %s9496_s11, 4  ;;  %s1490_s1 = int_to_ptr.vmem [resolvable:$true] %s1489_s1 }
 0x240   : > { %s8978_s3 = scalar_lea.hbm %s11300_s26, 16 }
 0x241   : > { %p8979_p4 = scmp.ne.s32.totalorder %s11300_s26, %s8978_s3  ;;  %p8984_p7 = scmp.lt.u32.totalorder %s8978_s3, %s11300_s26 }
 0x243   : > { %p8980_p5 = pnand %p8979_p4, %p7974_p3 }
 0x245   : > { %p8981_p6 = pneg %p8980_p5 }
 0x247   : > { %p8986_p8 = pnand %p8984_p7, %p8981_p6 }
 0x249   : > { %8989 = shalt.err (!%p8986_p8)
}
 0x24a   : > { %s8990_s4 = scalar_lea.vmem %s1465_s23, 16  ;;  %s8996_s15 = scalar_lea.vmem %s1465_s23, 32 }
 0x24b   : > { %p8991_p9 = scmp.ne.s32.totalorder %s1465_s23, %s8990_s4  ;;  %p8997_p12 = scmp.lt.s32.totalorder %s1465_s23, %s1465_s23 }
 0x24c   : > { %p8998_p13 = scmp.lt.s32.totalorder %s8996_s15, %s8990_s4 }
 0x24d   : > { %p8992_p10 = pnand %p8991_p9, %p7974_p3 }
 0x24e   : > { %p8999_p0 = por %p8998_p13, %p8997_p12 }
 0x24f   : > { %p8993_p11 = pneg %p8992_p10 }
 0x251   : > { %p9000_p1 = pnand %p8999_p0, %p8993_p11 }
 0x253   : > { %9003 = shalt.err (!%p9000_p1)
}
 0x254   : > { %s11301_s7 = sld [smem:[#allocation83_spill]] }
 0x255   : > { %7855 = dma.hbm_to_vmem [thread:$0]  (%p7974_p3), %s11300_s26, 16, %s1465_s23, [#allocation12]  }
 0x25a   : > { %s9004_s11 = scalar_lea.hbm %s11301_s7, 16 }
 0x25b   : > { %p9005_p4 = scmp.ne.s32.totalorder %s11301_s7, %s9004_s11  ;;  %p9010_p7 = scmp.lt.u32.totalorder %s9004_s11, %s11301_s7 }
 0x25d   : > { %p9006_p5 = pnand %p9005_p4, %p7974_p3 }
 0x25f   : > { %p9007_p6 = pneg %p9006_p5 }
 0x261   : > { %p9012_p8 = pnand %p9010_p7, %p9007_p6 }
 0x263   : > { %9015 = shalt.err (!%p9012_p8)
}
 0x264   : > { %s9016_s4 = scalar_lea.vmem %s1490_s1, 16  ;;  %s9022_s3 = scalar_lea.vmem %s1490_s1, 32 }
 0x265   : > { %p9017_p9 = scmp.ne.s32.totalorder %s1490_s1, %s9016_s4  ;;  %p9023_p12 = scmp.lt.s32.totalorder %s1490_s1, %s1490_s1 }
 0x266   : > { %p9024_p13 = scmp.lt.s32.totalorder %s9022_s3, %s9016_s4 }
 0x267   : > { %p9018_p10 = pnand %p9017_p9, %p7974_p3 }
 0x268   : > { %p9025_p0 = por %p9024_p13, %p9023_p12 }
 0x269   : > { %p9019_p11 = pneg %p9018_p10 }
 0x26b   : > { %p9026_p1 = pnand %p9025_p0, %p9019_p11 }
 0x26d   : > { %9029 = shalt.err (!%p9026_p1)
}
 0x26e   : > { %s11302_s23 = sld [smem:[#allocation86_spill]]  ;;  %s9497_s15 = smov [#allocation19]  }
 0x26f   : > { %7859 = dma.hbm_to_vmem [thread:$0]  (%p7974_p3), %s11301_s7, 16, %s1490_s1, [#allocation15]  }
 0x270   : > { %s1514_s11 = sshll.u32 %s9497_s15, 4  ;;  %s9498_s16 = smov [#allocation22]   ;;  %s1515_s11 = int_to_ptr.vmem [resolvable:$true] %s1514_s11 }
 0x271   : > { %s1539_s18 = sshll.u32 %s9498_s16, 4  ;;  %s1540_s18 = int_to_ptr.vmem [resolvable:$true] %s1539_s18 }
 0x274   : > { %s9030_s2 = scalar_lea.hbm %s11302_s23, 16 }
 0x275   : > { %p9031_p4 = scmp.ne.s32.totalorder %s11302_s23, %s9030_s2  ;;  %p9036_p7 = scmp.lt.u32.totalorder %s9030_s2, %s11302_s23 }
 0x277   : > { %p9032_p5 = pnand %p9031_p4, %p7974_p3 }
 0x279   : > { %p9033_p6 = pneg %p9032_p5 }
 0x27b   : > { %p9038_p8 = pnand %p9036_p7, %p9033_p6 }
 0x27d   : > { %9041 = shalt.err (!%p9038_p8)
}
 0x27e   : > { %s9042_s4 = scalar_lea.vmem %s1515_s11, 16  ;;  %s9048_s1 = scalar_lea.vmem %s1515_s11, 32 }
 0x27f   : > { %p9043_p9 = scmp.ne.s32.totalorder %s1515_s11, %s9042_s4  ;;  %p9049_p12 = scmp.lt.s32.totalorder %s1515_s11, %s1515_s11 }
 0x280   : > { %p9050_p13 = scmp.lt.s32.totalorder %s9048_s1, %s9042_s4 }
 0x281   : > { %p9044_p10 = pnand %p9043_p9, %p7974_p3 }
 0x282   : > { %p9051_p0 = por %p9050_p13, %p9049_p12 }
 0x283   : > { %p9045_p11 = pneg %p9044_p10 }
 0x285   : > { %p9052_p1 = pnand %p9051_p0, %p9045_p11 }
 0x287   : > { %9055 = shalt.err (!%p9052_p1)
}
 0x288   : > { %s11303_s16 = sld [smem:[#allocation88_spill]] }
 0x289   : > { %7863 = dma.hbm_to_vmem [thread:$0]  (%p7974_p3), %s11302_s23, 16, %s1515_s11, [#allocation18]  }
 0x28e   : > { %s9056_s2 = scalar_lea.hbm %s11303_s16, 16 }
 0x28f   : > { %p9057_p4 = scmp.ne.s32.totalorder %s11303_s16, %s9056_s2  ;;  %p9062_p7 = scmp.lt.u32.totalorder %s9056_s2, %s11303_s16 }
 0x291   : > { %p9058_p5 = pnand %p9057_p4, %p7974_p3 }
 0x293   : > { %p9059_p6 = pneg %p9058_p5 }
 0x295   : > { %p9064_p8 = pnand %p9062_p7, %p9059_p6 }
 0x297   : > { %9067 = shalt.err (!%p9064_p8)
}
 0x298   : > { %s9068_s3 = scalar_lea.vmem %s1540_s18, 16  ;;  %s9074_s15 = scalar_lea.vmem %s1540_s18, 32 }
 0x299   : > { %p9069_p9 = scmp.ne.s32.totalorder %s1540_s18, %s9068_s3  ;;  %p9075_p12 = scmp.lt.s32.totalorder %s1540_s18, %s1540_s18 }
 0x29a   : > { %p9076_p13 = scmp.lt.s32.totalorder %s9074_s15, %s9068_s3 }
 0x29b   : > { %p9070_p10 = pnand %p9069_p9, %p7974_p3 }
 0x29c   : > { %p9077_p0 = por %p9076_p13, %p9075_p12 }
 0x29d   : > { %p9071_p11 = pneg %p9070_p10 }
 0x29f   : > { %p9078_p1 = pnand %p9077_p0, %p9071_p11 }
 0x2a1   : > { %9081 = shalt.err (!%p9078_p1)
}
 0x2a2   : > { %s11304_s11 = sld [smem:[#allocation91_spill]]  ;;  %s9499_s4 = smov [#allocation25]  }
 0x2a3   : > { %7867 = dma.hbm_to_vmem [thread:$0]  (%p7974_p3), %s11303_s16, 16, %s1540_s18, [#allocation21]  }
 0x2a4   : > { %s1564_s1 = sshll.u32 %s9499_s4, 4  ;;  %s9500_s2 = smov [#allocation28]   ;;  %s1565_s1 = int_to_ptr.vmem [resolvable:$true] %s1564_s1 }
 0x2a5   : > { %s1586_s5 = sshll.u32 %s9500_s2, 4  ;;  %s1587_s5 = int_to_ptr.vmem [resolvable:$true] %s1586_s5 }
 0x2a8   : > { %s9082_s6 = scalar_lea.hbm %s11304_s11, 16 }
 0x2a9   : > { %p9083_p4 = scmp.ne.s32.totalorder %s11304_s11, %s9082_s6  ;;  %p9088_p7 = scmp.lt.u32.totalorder %s9082_s6, %s11304_s11 }
 0x2ab   : > { %p9084_p5 = pnand %p9083_p4, %p7974_p3 }
 0x2ad   : > { %p9085_p6 = pneg %p9084_p5 }
 0x2af   : > { %p9090_p8 = pnand %p9088_p7, %p9085_p6 }
 0x2b1   : > { %9093 = shalt.err (!%p9090_p8)
}
 0x2b2   : > { %s9094_s3 = scalar_lea.vmem %s1565_s1, 16  ;;  %s9100_s18 = scalar_lea.vmem %s1565_s1, 32 }
 0x2b3   : > { %p9095_p9 = scmp.ne.s32.totalorder %s1565_s1, %s9094_s3  ;;  %p9101_p12 = scmp.lt.s32.totalorder %s1565_s1, %s1565_s1 }
 0x2b4   : > { %p9102_p13 = scmp.lt.s32.totalorder %s9100_s18, %s9094_s3 }
 0x2b5   : > { %p9096_p10 = pnand %p9095_p9, %p7974_p3 }
 0x2b6   : > { %p9103_p0 = por %p9102_p13, %p9101_p12 }
 0x2b7   : > { %p9097_p11 = pneg %p9096_p10 }
 0x2b9   : > { %p9104_p1 = pnand %p9103_p0, %p9097_p11 }
 0x2bb   : > { %9107 = shalt.err (!%p9104_p1)
}
 0x2bc   : > { %s11305_s15 = sld [smem:[#allocation93_spill]] }
 0x2bd   : > { %7871 = dma.hbm_to_vmem [thread:$0]  (%p7974_p3), %s11304_s11, 16, %s1565_s1, [#allocation24]  }
 0x2c2   : > { %s9108_s6 = scalar_lea.hbm %s11305_s15, 16 }
 0x2c3   : > { %p9109_p4 = scmp.ne.s32.totalorder %s11305_s15, %s9108_s6  ;;  %p9114_p7 = scmp.lt.u32.totalorder %s9108_s6, %s11305_s15 }
 0x2c5   : > { %p9110_p5 = pnand %p9109_p4, %p7974_p3 }
 0x2c7   : > { %p9111_p6 = pneg %p9110_p5 }
 0x2c9   : > { %p9116_p8 = pnand %p9114_p7, %p9111_p6 }
 0x2cb   : > { %9119 = shalt.err (!%p9116_p8)
}
 0x2cc   : > { %s9120_s4 = scalar_lea.vmem %s1587_s5, 16  ;;  %s9126_s2 = scalar_lea.vmem %s1587_s5, 32 }
 0x2cd   : > { %p9121_p9 = scmp.ne.s32.totalorder %s1587_s5, %s9120_s4  ;;  %p9127_p12 = scmp.lt.s32.totalorder %s1587_s5, %s1587_s5 }
 0x2ce   : > { %p9128_p13 = scmp.lt.s32.totalorder %s9126_s2, %s9120_s4 }
 0x2cf   : > { %p9122_p10 = pnand %p9121_p9, %p7974_p3 }
 0x2d0   : > { %p9129_p0 = por %p9128_p13, %p9127_p12 }
 0x2d1   : > { %p9123_p11 = pneg %p9122_p10 }
 0x2d3   : > { %p9130_p1 = pnand %p9129_p0, %p9123_p11 }
 0x2d5   : > { %9133 = shalt.err (!%p9130_p1)
}
 0x2d6   : > { %s11306_s1 = sld [smem:[#allocation95_spill]]  ;;  %s9501_s3 = smov [#allocation31]  }
 0x2d7   : > { %7875 = dma.hbm_to_vmem [thread:$0]  (%p7974_p3), %s11305_s15, 16, %s1587_s5, [#allocation27]  }
 0x2d8   : > { %s1607_s18 = sshll.u32 %s9501_s3, 4  ;;  %s9502_s6 = smov [#allocation34]   ;;  %s1608_s18 = int_to_ptr.vmem [resolvable:$true] %s1607_s18 }
 0x2d9   : > { %s1632_s7 = sshll.u32 %s9502_s6, 4  ;;  %s1633_s7 = int_to_ptr.vmem [resolvable:$true] %s1632_s7 }
 0x2dc   : > { %s9134_s8 = scalar_lea.hbm %s11306_s1, 256 }
 0x2dd   : > { %p9135_p4 = scmp.ne.s32.totalorder %s11306_s1, %s9134_s8  ;;  %p9140_p7 = scmp.lt.u32.totalorder %s9134_s8, %s11306_s1 }
 0x2df   : > { %p9136_p5 = pnand %p9135_p4, %p7974_p3 }
 0x2e1   : > { %p9137_p6 = pneg %p9136_p5 }
 0x2e3   : > { %p9142_p8 = pnand %p9140_p7, %p9137_p6 }
 0x2e5   : > { %9145 = shalt.err (!%p9142_p8)
}
 0x2e6   : > { %s9146_s4 = scalar_lea.vmem %s1608_s18, 256  ;;  %p9153_p12 = scmp.lt.s32.totalorder %s1608_s18, %s1608_s18 }
 0x2e7   : > { %p9147_p9 = scmp.ne.s32.totalorder %s1608_s18, %s9146_s4  ;;  %p9154_p13 = scmp.lt.s32.totalorder %s9146_s4, %s9146_s4 }
 0x2e9   : > { %p9148_p10 = pnand %p9147_p9, %p7974_p3  ;;  %p9155_p0 = por %p9154_p13, %p9153_p12 }
 0x2eb   : > { %p9149_p11 = pneg %p9148_p10 }
 0x2ed   : > { %p9156_p1 = pnand %p9155_p0, %p9149_p11 }
 0x2ef   : > { %9159 = shalt.err (!%p9156_p1)
}
 0x2f0   : > { %s11307_s5 = smov 4   ;;  %s11308_s2 = smov 64  }
 0x2f1   : > { %s11309_s8 = sld [smem:[#allocation96_spill]] }
 0x2f2   : > { %7879 = dma.hbm_to_vmem [thread:$0]  (%p7974_p3), %s11306_s1, 256, %s1608_s18, [#allocation30], %s11308_s2, %s11308_s2, %s11307_s5  }
 0x2f7   : > { %s9160_s3 = scalar_lea.hbm %s11309_s8, 16 }
 0x2f8   : > { %p9161_p4 = scmp.ne.s32.totalorder %s11309_s8, %s9160_s3  ;;  %p9166_p7 = scmp.lt.u32.totalorder %s9160_s3, %s11309_s8 }
 0x2fa   : > { %p9162_p5 = pnand %p9161_p4, %p7974_p3 }
 0x2fc   : > { %p9163_p6 = pneg %p9162_p5 }
 0x2fe   : > { %p9168_p8 = pnand %p9166_p7, %p9163_p6 }
 0x300   : > { %9171 = shalt.err (!%p9168_p8)
}
 0x301   : > { %s9172_s6 = scalar_lea.vmem %s1633_s7, 16  ;;  %s9178_s4 = scalar_lea.vmem %s1633_s7, 32 }
 0x302   : > { %p9173_p9 = scmp.ne.s32.totalorder %s1633_s7, %s9172_s6  ;;  %p9179_p12 = scmp.lt.s32.totalorder %s1633_s7, %s1633_s7 }
 0x303   : > { %p9180_p13 = scmp.lt.s32.totalorder %s9178_s4, %s9172_s6 }
 0x304   : > { %p9174_p10 = pnand %p9173_p9, %p7974_p3 }
 0x305   : > { %p9181_p0 = por %p9180_p13, %p9179_p12 }
 0x306   : > { %p9175_p11 = pneg %p9174_p10 }
 0x308   : > { %p9182_p1 = pnand %p9181_p0, %p9175_p11 }
 0x30a   : > { %9185 = shalt.err (!%p9182_p1)
}
 0x30b   : > { %s11310_s18 = sld [smem:[#allocation101_spill]]  ;;  %s9503_s3 = smov [#allocation37]  }
 0x30c   : > { %7883 = dma.hbm_to_vmem [thread:$0]  (%p7974_p3), %s11309_s8, 16, %s1633_s7, [#allocation33]  }
 0x30d   : > { %s1665_s1 = sshll.u32 %s9503_s3, 4  ;;  %s9504_s9 = smov [#allocation40]   ;;  %s1666_s1 = int_to_ptr.vmem [resolvable:$true] %s1665_s1 }
 0x30e   : > { %s1698_s10 = sshll.u32 %s9504_s9, 4  ;;  %s1699_s10 = int_to_ptr.vmem [resolvable:$true] %s1698_s10 }
 0x311   : > { %s9186_s11 = scalar_lea.hbm %s11310_s18, 256 }
 0x312   : > { %p9187_p4 = scmp.ne.s32.totalorder %s11310_s18, %s9186_s11  ;;  %p9192_p7 = scmp.lt.u32.totalorder %s9186_s11, %s11310_s18 }
 0x314   : > { %p9188_p5 = pnand %p9187_p4, %p7974_p3 }
 0x316   : > { %p9189_p6 = pneg %p9188_p5 }
 0x318   : > { %p9194_p8 = pnand %p9192_p7, %p9189_p6 }
 0x31a   : > { %9197 = shalt.err (!%p9194_p8)
}
 0x31b   : > { %s9198_s6 = scalar_lea.vmem %s1666_s1, 256  ;;  %p9205_p12 = scmp.lt.s32.totalorder %s1666_s1, %s1666_s1 }
 0x31c   : > { %p9199_p9 = scmp.ne.s32.totalorder %s1666_s1, %s9198_s6  ;;  %p9206_p13 = scmp.lt.s32.totalorder %s9198_s6, %s9198_s6 }
 0x31e   : > { %p9200_p10 = pnand %p9199_p9, %p7974_p3  ;;  %p9207_p0 = por %p9206_p13, %p9205_p12 }
 0x320   : > { %p9201_p11 = pneg %p9200_p10 }
 0x322   : > { %p9208_p1 = pnand %p9207_p0, %p9201_p11 }
 0x324   : > { %9211 = shalt.err (!%p9208_p1)
}
 0x325   : > { %s11311_s9 = sld [smem:[#allocation104_spill]] }
 0x326   : > { %7887 = dma.hbm_to_vmem [thread:$0]  (%p7974_p3), %s11310_s18, 256, %s1666_s1, [#allocation36], %s11308_s2, %s11308_s2, %s11307_s5  }
 0x32b   : > { %s9212_s7 = scalar_lea.hbm %s11311_s9, 16 }
 0x32c   : > { %p9213_p4 = scmp.ne.s32.totalorder %s11311_s9, %s9212_s7  ;;  %p9218_p7 = scmp.lt.u32.totalorder %s9212_s7, %s11311_s9 }
 0x32e   : > { %p9214_p5 = pnand %p9213_p4, %p7974_p3 }
 0x330   : > { %p9215_p6 = pneg %p9214_p5 }
 0x332   : > { %p9220_p8 = pnand %p9218_p7, %p9215_p6 }
 0x334   : > { %9223 = shalt.err (!%p9220_p8)
}
 0x335   : > { %s9224_s11 = scalar_lea.vmem %s1699_s10, 16  ;;  %s9230_s4 = scalar_lea.vmem %s1699_s10, 32 }
 0x336   : > { %p9225_p9 = scmp.ne.s32.totalorder %s1699_s10, %s9224_s11  ;;  %p9231_p12 = scmp.lt.s32.totalorder %s1699_s10, %s1699_s10 }
 0x337   : > { %p9232_p13 = scmp.lt.s32.totalorder %s9230_s4, %s9224_s11 }
 0x338   : > { %p9226_p10 = pnand %p9225_p9, %p7974_p3 }
 0x339   : > { %p9233_p0 = por %p9232_p13, %p9231_p12 }
 0x33a   : > { %p9227_p11 = pneg %p9226_p10 }
 0x33c   : > { %p9234_p1 = pnand %p9233_p0, %p9227_p11 }
 0x33e   : > { %9237 = shalt.err (!%p9234_p1)
}
 0x33f   : > { %s11312_s1 = sld [smem:[#allocation108_spill]]  ;;  %s9505_s3 = smov [#allocation43]  }
 0x340   : > { %7891 = dma.hbm_to_vmem [thread:$0]  (%p7974_p3), %s11311_s9, 16, %s1699_s10, [#allocation39]  }
 0x341   : > { %s1729_s6 = sshll.u32 %s9505_s3, 4  ;;  %s9506_s7 = smov [#allocation46]   ;;  %s1730_s6 = int_to_ptr.vmem [resolvable:$true] %s1729_s6 }
 0x342   : > { %s1751_s8 = sshll.u32 %s9506_s7, 4  ;;  %s1752_s8 = int_to_ptr.vmem [resolvable:$true] %s1751_s8 }
 0x345   : > { %s9238_s12 = scalar_lea.hbm %s11312_s1, 16 }
 0x346   : > { %p9239_p4 = scmp.ne.s32.totalorder %s11312_s1, %s9238_s12  ;;  %p9244_p7 = scmp.lt.u32.totalorder %s9238_s12, %s11312_s1 }
 0x348   : > { %p9240_p5 = pnand %p9239_p4, %p7974_p3 }
 0x34a   : > { %p9241_p6 = pneg %p9240_p5 }
 0x34c   : > { %p9246_p8 = pnand %p9244_p7, %p9241_p6 }
 0x34e   : > { %9249 = shalt.err (!%p9246_p8)
}
 0x34f   : > { %s9250_s11 = scalar_lea.vmem %s1730_s6, 16  ;;  %s9256_s10 = scalar_lea.vmem %s1730_s6, 32 }
 0x350   : > { %p9251_p9 = scmp.ne.s32.totalorder %s1730_s6, %s9250_s11  ;;  %p9257_p12 = scmp.lt.s32.totalorder %s1730_s6, %s1730_s6 }
 0x351   : > { %p9258_p13 = scmp.lt.s32.totalorder %s9256_s10, %s9250_s11 }
 0x352   : > { %p9252_p10 = pnand %p9251_p9, %p7974_p3 }
 0x353   : > { %p9259_p0 = por %p9258_p13, %p9257_p12 }
 0x354   : > { %p9253_p11 = pneg %p9252_p10 }
 0x356   : > { %p9260_p1 = pnand %p9259_p0, %p9253_p11 }
 0x358   : > { %9263 = shalt.err (!%p9260_p1)
}
 0x359   : > { %s11313_s4 = sld [smem:[#allocation109_spill]] }
 0x35a   : > { %7895 = dma.hbm_to_vmem [thread:$0]  (%p7974_p3), %s11312_s1, 16, %s1730_s6, [#allocation42]  }
 0x35f   : > { %s9264_s12 = scalar_lea.hbm %s11313_s4, 16 }
 0x360   : > { %p9265_p4 = scmp.ne.s32.totalorder %s11313_s4, %s9264_s12  ;;  %p9270_p7 = scmp.lt.u32.totalorder %s9264_s12, %s11313_s4 }
 0x362   : > { %p9266_p5 = pnand %p9265_p4, %p7974_p3 }
 0x364   : > { %p9267_p6 = pneg %p9266_p5 }
 0x366   : > { %p9272_p8 = pnand %p9270_p7, %p9267_p6 }
 0x368   : > { %9275 = shalt.err (!%p9272_p8)
}
 0x369   : > { %s9276_s3 = scalar_lea.vmem %s1752_s8, 16  ;;  %s9282_s7 = scalar_lea.vmem %s1752_s8, 32 }
 0x36a   : > { %p9277_p9 = scmp.ne.s32.totalorder %s1752_s8, %s9276_s3  ;;  %p9283_p12 = scmp.lt.s32.totalorder %s1752_s8, %s1752_s8 }
 0x36b   : > { %p9284_p13 = scmp.lt.s32.totalorder %s9282_s7, %s9276_s3 }
 0x36c   : > { %p9278_p10 = pnand %p9277_p9, %p7974_p3 }
 0x36d   : > { %p9285_p0 = por %p9284_p13, %p9283_p12 }
 0x36e   : > { %p9279_p11 = pneg %p9278_p10 }
 0x370   : > { %p9286_p1 = pnand %p9285_p0, %p9279_p11 }
 0x372   : > { %9289 = shalt.err (!%p9286_p1)
}
 0x373   : > { %s11314_s6 = sld [smem:[#allocation114_spill]]  ;;  %s9507_s11 = smov [#allocation49]  }
 0x374   : > { %7899 = dma.hbm_to_vmem [thread:$0]  (%p7974_p3), %s11313_s4, 16, %s1752_s8, [#allocation45]  }
 0x375   : > { %s1781_s10 = sshll.u32 %s9507_s11, 4  ;;  %s9508_s12 = smov [#allocation52]   ;;  %s1782_s10 = int_to_ptr.vmem [resolvable:$true] %s1781_s10 }
 0x376   : > { %s1806_s1 = sshll.u32 %s9508_s12, 4  ;;  %s1807_s1 = int_to_ptr.vmem [resolvable:$true] %s1806_s1 }
 0x379   : > { %s9290_s9 = scalar_lea.hbm %s11314_s6, 128 }
 0x37a   : > { %p9291_p4 = scmp.ne.s32.totalorder %s11314_s6, %s9290_s9  ;;  %p9296_p7 = scmp.lt.u32.totalorder %s9290_s9, %s11314_s6 }
 0x37c   : > { %p9292_p5 = pnand %p9291_p4, %p7974_p3 }
 0x37e   : > { %p9293_p6 = pneg %p9292_p5 }
 0x380   : > { %p9298_p8 = pnand %p9296_p7, %p9293_p6 }
 0x382   : > { %9301 = shalt.err (!%p9298_p8)
}
 0x383   : > { %s9302_s3 = scalar_lea.vmem %s1782_s10, 128  ;;  %p9309_p12 = scmp.lt.s32.totalorder %s1782_s10, %s1782_s10 }
 0x384   : > { %p9303_p9 = scmp.ne.s32.totalorder %s1782_s10, %s9302_s3  ;;  %p9310_p13 = scmp.lt.s32.totalorder %s9302_s3, %s9302_s3 }
 0x386   : > { %p9304_p10 = pnand %p9303_p9, %p7974_p3  ;;  %p9311_p0 = por %p9310_p13, %p9309_p12 }
 0x388   : > { %p9305_p11 = pneg %p9304_p10 }
 0x38a   : > { %p9312_p1 = pnand %p9311_p0, %p9305_p11 }
 0x38c   : > { %9315 = shalt.err (!%p9312_p1)
}
 0x38d   : > { %7903 = dma.hbm_to_vmem [thread:$0]  (%p7974_p3), %s11314_s6, 128, %s1782_s10, [#allocation48], %s11308_s2, %s11308_s2, %s11307_s5  }
 0x38e   : > { %s9316_s8 = scalar_lea.hbm %s9800_s29, 16 }
 0x38f   : > { %p9317_p4 = scmp.ne.s32.totalorder %s9800_s29, %s9316_s8  ;;  %p9322_p7 = scmp.lt.u32.totalorder %s9316_s8, %s9800_s29 }
 0x391   : > { %p9318_p5 = pnand %p9317_p4, %p7974_p3 }
 0x393   : > { %p9319_p6 = pneg %p9318_p5 }
 0x395   : > { %p9324_p8 = pnand %p9322_p7, %p9319_p6 }
 0x397   : > { %9327 = shalt.err (!%p9324_p8)
}
 0x398   : > { %s9328_s9 = scalar_lea.vmem %s1807_s1, 16  ;;  %s9334_s7 = scalar_lea.vmem %s1807_s1, 32 }
 0x399   : > { %p9329_p9 = scmp.ne.s32.totalorder %s1807_s1, %s9328_s9  ;;  %p9335_p12 = scmp.lt.s32.totalorder %s1807_s1, %s1807_s1 }
 0x39a   : > { %p9336_p13 = scmp.lt.s32.totalorder %s9334_s7, %s9328_s9 }
 0x39b   : > { %p9330_p10 = pnand %p9329_p9, %p7974_p3 }
 0x39c   : > { %p9337_p0 = por %p9336_p13, %p9335_p12 }
 0x39d   : > { %p9331_p11 = pneg %p9330_p10 }
 0x39f   : > { %p9338_p1 = pnand %p9337_p0, %p9331_p11 }
 0x3a1   : > { %9341 = shalt.err (!%p9338_p1)
}
 0x3a2   : > { %7907 = dma.hbm_to_vmem [thread:$0]  (%p7974_p3), %s9800_s29, 16, %s1807_s1, [#allocation51]  }
 0x3a3 PF: > { %1868 = sbr.rel (%p9820_p2) target bundleno = 13269 (0x33d5), region = 244  ;;  %p8007_p4 = scmp.eq.s32.totalorder (!%p9820_p2), %s9816_s30, 0 }
 0x3aa   : > { %9347 = dma.done.wait (%p8007_p4), [#allocation4], 256  }
 0x3ab   : > { %9349 = vsyncadd (%p8007_p4), [#allocation4], 4294967040 }
 0x3ac   : > { %9351 = dma.done.wait (%p8007_p4), [#allocation6], 272  }
 0x3ad   : > { %9353 = vsyncadd (%p8007_p4), [#allocation6], 4294967024 }
 0x3ae   : > { %9355 = dma.done.wait (%p8007_p4), [#allocation9], 272  }
 0x3af   : > { %9357 = vsyncadd (%p8007_p4), [#allocation9], 4294967024 }
 0x3b0   : > { %9359 = dma.done.wait (%p8007_p4), [#allocation12], 32  }
 0x3b1   : > { %9361 = vsyncadd (%p8007_p4), [#allocation12], 4294967264 }
 0x3b2   : > { %9363 = dma.done.wait (%p8007_p4), [#allocation15], 32  }
 0x3b3   : > { %9365 = vsyncadd (%p8007_p4), [#allocation15], 4294967264 }
 0x3b4   : > { %9367 = dma.done.wait (%p8007_p4), [#allocation18], 32  }
 0x3b5   : > { %9369 = vsyncadd (%p8007_p4), [#allocation18], 4294967264 }
 0x3b6   : > { %9371 = dma.done.wait (%p8007_p4), [#allocation21], 32  }
 0x3b7   : > { %9373 = vsyncadd (%p8007_p4), [#allocation21], 4294967264 }
 0x3b8   : > { %9375 = dma.done.wait (%p8007_p4), [#allocation24], 32  }
 0x3b9   : > { %9377 = vsyncadd (%p8007_p4), [#allocation24], 4294967264 }
 0x3ba   : > { %9379 = dma.done.wait (%p8007_p4), [#allocation27], 32  }
 0x3bb   : > { %9381 = vsyncadd (%p8007_p4), [#allocation27], 4294967264 }
 0x3bc   : > { %9383 = dma.done.wait (%p8007_p4), [#allocation30], 272  }
 0x3bd   : > { %9385 = vsyncadd (%p8007_p4), [#allocation30], 4294967024 }
 0x3be   : > { %9387 = dma.done.wait (%p8007_p4), [#allocation33], 32  }
 0x3bf   : > { %9389 = vsyncadd (%p8007_p4), [#allocation33], 4294967264 }
 0x3c0   : > { %9391 = dma.done.wait (%p8007_p4), [#allocation36], 272  }
 0x3c1   : > { %9393 = vsyncadd (%p8007_p4), [#allocation36], 4294967024 }
 0x3c2   : > { %9395 = dma.done.wait (%p8007_p4), [#allocation39], 272  }
 0x3c3   : > { %9397 = vsyncadd (%p8007_p4), [#allocation39], 4294967024 }
 0x3c4   : > { %9399 = dma.done.wait (%p8007_p4), [#allocation42], 32  }
 0x3c5   : > { %9401 = vsyncadd (%p8007_p4), [#allocation42], 4294967264 }
 0x3c6   : > { %9403 = dma.done.wait (%p8007_p4), [#allocation45], 32  }
 0x3c7   : > { %9405 = vsyncadd (%p8007_p4), [#allocation45], 4294967264 }
 0x3c8   : > { %9407 = dma.done.wait (%p8007_p4), [#allocation48], 144  }
 0x3c9   : > { %9409 = vsyncadd (%p8007_p4), [#allocation48], 4294967152 }
 0x3ca   : > { %9411 = dma.done.wait (%p8007_p4), [#allocation51], 32  }
 0x3cb   : > { %9413 = vsyncadd (%p8007_p4), [#allocation51], 4294967264  ;;  %s11315_s28 = sld [smem:[#allocation70_spill]]  ;;  %s11316_s5 = sld [smem:[#allocation71_spill]]  ;;  %v8214_v1 = vld [vmem:[#allocation3] sm:$0xff]   ;;  %v8215_v2 = vld [vmem:[#allocation3 + $0x8] sm:$0xff]  }
 0x3cc   : > { %p2147_p2 = scmp.lt.s32.totalorder %s9816_s30, 1  ;;  %7412 = vmatprep.subr.bf16.mxu0 %v8214_v1  ;;  %vm2253_vm0 = vcmask 261120   ;;  %v7091_v18 = vld [vmem:[#allocation5] ss:$0 sm:$0xff]  ;;  %vm2394_vm1 = vcmask 64512   ;;  %s9509_s10 = smov 96  }
 0x3cd   : > { %7413 = vmatpush3.bf16.msra.mxu0 %v8214_v1  ;;  %v8216_v32 = vld [vmem:[#allocation7] sm:$0xff]   ;;  %v8217_v33 = vld [vmem:[#allocation7 + $0x8] sm:$0xff]   ;;  %s9510_s12 = smov 88   ;;  %v7096_v1 = vld [vmem:[#allocation8] ss:$0 sm:$0xff]  ;;  %s11234_s3 = smov 120  }
 0x3ce   : > { %s11348_s30 = smov (!%p2147_p2, %s9816_s30), 1  ;;  %7414 = vmatprep.subr.bf16.mxu0 %v8215_v2  ;;  %7420 = vmatprep.subr.bf16.mxu1 %v8216_v32  ;;  %s11231_s8 = smov 80   ;;  %vm3139_vm2 = vcmask 130048   ;;  %vm3144_vm3 = vcmask 195584   ;;  %vm9520_vm4 = vmmov 0   ;;  %vm3412_vm5 = vcmask 523264  }
 0x3cf   : > { %s10270_s2 = sshll.u32 %s11348_s30, 5  ;;  %7421 = vmatpush3.bf16.msra.mxu1 %v8216_v32  ;;  %s11236_s9 = smov 112   ;;  %vm10801_vm6 = vmpackc.low %vm3412_vm5, %vm3412_vm5  ;;  %vm6532_vm7 = vcmask 122880  }
 0x3d0   : > { %7422 = vmatprep.subr.bf16.mxu1 %v8217_v33  ;;  %s11224_s7 = smov 72   ;;  %s11330_s4 = sld [smem:[#allocation87_spill]] }
 0x3d1   : > { %s10274_s1 = scalar_lea.vmem %s11315_s28, %s10270_s2  ;;  %s10278_s11 = scalar_lea.vmem %s11316_s5, %s10270_s2  ;;  %7415 = vmatpush3.bf16.msra.mxu0 %v8215_v2 }
 0x3d2   : > { %v2179_v3 = vld [vmem:[%s10274_s1] sm:$0xff]  ;;  %v2180_v4 = vld [vmem:[%s10274_s1 + $0x8] sm:$0xff]  ;;  %v2181_v8 = vld [vmem:[%s10274_s1 + $0x10] sm:$0xff]  ;;  %s11232_s28 = smov 104   ;;  %s11229_s5 = smov 8  }
 0x3d3   : > { %v2183_v5 = vld [vmem:[%s10278_s11] sm:$0xff]  ;;  %v2184_v6 = vld [vmem:[%s10278_s11 + $0x8] sm:$0xff]  ;;  %v2182_v9 = vld [vmem:[%s10274_s1 + $0x18] sm:$0xff]  ;;  %v2309_v34 = vpack.c.bf16 %v2180_v4, %v2179_v3  ;;  %7423 = vmatpush3.bf16.msra.mxu1 %v8217_v33 }
 0x3d4   : > { %v2229_v7 = vadd.f32 %v2183_v5, %v2179_v3  ;;  %v2230_v10 = vadd.f32 %v2184_v6, %v2180_v4  ;;  %v2185_v11 = vld [vmem:[%s10278_s11 + $0x10] sm:$0xff]  ;;  %v2186_v12 = vld [vmem:[%s10278_s11 + $0x18] sm:$0xff]  ;;  %v2310_v35 = vpack.c.bf16 %v2182_v9, %v2181_v8 }
 0x3d5   : > { %v2231_v13 = vadd.f32 %v2185_v11, %v2181_v8  ;;  %v2232_v14 = vadd.f32 %v2186_v12, %v2182_v9  ;;  %7424 = vmatprep.mubr.msk.bf16.mxu1 %vm2253_vm0, %v2309_v34 }
 0x3d6   : > { %v2233_v15 = vpack.c.bf16 %v2230_v10, %v2229_v7  ;;  %7425 = vmatmul.mubr.msk.bf16.vlgmr.msra.gmra.mrb[0].mxu1 %vm2253_vm0, %v2310_v35 }
 0x3d7   : > { %v2234_v16 = vpack.c.bf16 %v2232_v14, %v2231_v13 }
 0x3d8   : > { %7416 = vmatprep.mubr.msk.bf16.mxu0 %vm2253_vm0, %v2233_v15 }
 0x3d9   : > { %7417 = vmatmul.mubr.msk.bf16.vlgmr.msra.gmra.mrb[0].mxu0 %vm2253_vm0, %v2234_v16 }
 0x4a9   : > { %v7426_v44 = vpop.f32.mrb[0].mxu1 }
 0x4aa   : > { %v2369_v2 = vpop.f32.mrb[1].mxu1  ;;  %v2378_v7 = vadd.f32 %v7426_v44, %v7096_v1 }
 0x4ab   : > { %v7427_v3 = vpop.f32.mrb[2].mxu1  ;;  %v2370_v5 = vadd.f32 %v7096_v1, %v2369_v2 }
 0x4ac   : > { %v7418_v17 = vpop.f32.mrb[0].mxu0  ;;  %v2372_v4 = vpop.f32.mrb[3].mxu1  ;;  %v2381_v9 = vadd.f32 %v7427_v3, %v7096_v1 }
 0x4ad   : > { %v2294_v19 = vpop.f32.mrb[1].mxu0  ;;  %v2303_v21 = vadd.f32 %v7418_v17, %v7091_v18  ;;  %v2373_v6 = vadd.f32 %v7096_v1, %v2372_v4 }
 0x4ae   : > { %v7419_v20 = vpop.f32.mrb[2].mxu0  ;;  %v2295_v24 = vadd.f32 %v7091_v18, %v2294_v19  ;;  %v10322_v10 = vpack.c.bf16 %v2381_v9, %v2378_v7 }
 0x4af   : > { %v2306_v22 = vadd.f32 %v7419_v20, %v7091_v18  ;;  %v2297_v23 = vpop.f32.mrb[3].mxu0  ;;  %v10318_v8 = vpack.c.bf16 %v2373_v6, %v2370_v5 }
 0x4b0   : > { %v2298_v25 = vadd.f32 %v7091_v18, %v2297_v23 }
 0x4b1   : > { %v10290_v26 = vpack.c.bf16 %v2306_v22, %v2303_v21  ;;  %7436 = vmatprep.subr.bf16.mxu1 %v10318_v8 }
 0x4b2   : > { %v10292_v27 = vpack.c.bf16 %v2298_v25, %v2295_v24  ;;  %7437 = vmatpush3.bf16.msra.mxu1 %v10318_v8 }
 0x4b3   : > { %7438 = vmatprep.subr.bf16.mxu1 %v10322_v10 }
 0x4b4   : > { %2390 = vrot.lane.b32.xlu0 %v10292_v27, %s9509_s10  ;;  %7432 = vmatprep.mubr.msk.bf16.mxu0 %vm2394_vm1, %v10292_v27 }
 0x4b6   : > { %7439 = vmatpush3.bf16.msra.mxu1 %v10322_v10 }
 0x4b8   : > { %2392 = vrot.lane.b32.xlu0 %v10290_v26, %s9509_s10 }
 0x526   : > { %v2391_v28 = vpop.permute.xlu0 %2390 }
 0x527   : > { %7834 = vmatprep.subr.msk.bf16.mxu0 %vm2394_vm1, %v2391_v28  ;;  %v2402_v29 = vsel %vm2394_vm1, %v2391_v28, 0 }
 0x528   : > { %7429 = vmatpush3.bf16.xpose.msra.mxu0 %v2402_v29 }
 0x52a   : > { %v2393_v30 = vpop.permute.xlu0 %2392 }
 0x52b   : > { %7835 = vmatprep.subr.msk.bf16.mxu0 %vm2394_vm1, %v2393_v30  ;;  %v2405_v31 = vsel %vm2394_vm1, %v2393_v30, 0 }
 0x530   : > { %7431 = vmatpush3.bf16.xpose.msra.mxu0 %v2405_v31 }
 0x537   : > { %7433 = vmatmul.mubr.msk.bf16.vlgmr.msra.gmra.mrb[4].mxu0 %vm2394_vm1, %v10290_v26 }
 0x60a   : > { %v7434_v36 = vpop.f32.mrb[4].mxu0 }
 0x60b   : > { %v2441_v37 = vpop.f32.mrb[5].mxu0  ;;  %v2462_v38 = vsel %vm2253_vm0, %v7434_v36, -inf }
 0x60c   : > { %2463 = vmax.xlane.f32.xlu0 %v2462_v38  ;;  %v7435_v39 = vpop.f32.mrb[6].mxu0  ;;  %v2456_v40 = vsel %vm2253_vm0, %v2441_v37, -inf }
 0x60d   : > { %2457 = vmax.xlane.f32.xlu1 %v2456_v40  ;;  %v2444_v41 = vpop.f32.mrb[7].mxu0  ;;  %v2465_v43 = vsel %vm2253_vm0, %v7435_v39, -inf }
 0x60e   : > { %v2459_v42 = vsel %vm2253_vm0, %v2444_v41, -inf }
 0x611   : > { %2460 = vmax.xlane.f32.xlu1 %v2459_v42 }
 0x615   : > { %2466 = vmax.xlane.f32.xlu1 %v2465_v43 }
 0x622   : > { %2563 = vrot.lane.b32.xlu0 %v10290_v26, %s9510_s12 }
 0x699   : > { %v2464_v45 = vpop.xlane.xlu0 %2463 }
 0x69a   : > { %v2470_v46 = vsub.f32 %v7434_v36, %v2464_v45  ;;  %v2458_v47 = vpop.xlane.xlu1 %2457 }
 0x69b   : > { %v2468_v48 = vsub.f32 %v2441_v37, %v2458_v47 }
 0x69c   : > { %v2476_v49 = vmul.f32 1.442695, %v2470_v46 }
 0x69d   : > { %v2472_v50 = vmul.f32 1.442695, %v2468_v48  ;;  %v2564_v30 = vpop.permute.xlu0 %2563 }
 0x69e   : > { %8245 = vpow2.f32 %v2476_v49  ;;  %v2461_v51 = vpop.xlane.xlu1 %2460  ;;  %v2575_v31 = vsel %vm2394_vm1, %v2564_v30, 0 }
 0x69f   : > { %8247 = vpow2.f32 %v2472_v50  ;;  %v2469_v52 = vsub.f32 %v2444_v41, %v2461_v51 }
 0x6a1   : > { %v2474_v55 = vmul.f32 1.442695, %v2469_v52 }
 0x6a2   : > { %v2467_v53 = vpop.xlane.xlu1 %2466 }
 0x6a3   : > { %v2471_v54 = vsub.f32 %v7435_v39, %v2467_v53 }
 0x6a5   : > { %v2478_v56 = vmul.f32 1.442695, %v2471_v54 }
 0x6a7   : > { %8249 = vpow2.f32 %v2478_v56 }
 0x6a8   : > { %v8246_v57 = vpop.eup %8245  ;;  %8251 = vpow2.f32 %v2474_v55 }
 0x6a9   : > { %v2486_v58 = vsel %vm2253_vm0, %v8246_v57, 0.0  ;;  %v8248_v59 = vpop.eup %8247 }
 0x6aa   : > { %2487 = vadd.xlane.f32.xlu1 %v2486_v58  ;;  %v2480_v60 = vsel %vm2253_vm0, %v8248_v59, 0.0 }
 0x6ae   : > { %2481 = vadd.xlane.f32.xlu1 %v2480_v60 }
 0x6b1   : > { %v8250_v61 = vpop.eup %8249 }
 0x6b2   : > { %v2489_v62 = vsel %vm2253_vm0, %v8250_v61, 0.0  ;;  %v8252_v63 = vpop.eup %8251 }
 0x6b3   : > { %2490 = vadd.xlane.f32.xlu1 %v2489_v62  ;;  %v2483_v0 = vsel %vm2253_vm0, %v8252_v63, 0.0 }
 0x6b7   : > { %2484 = vadd.xlane.f32.xlu1 %v2483_v0 }
 0x6c8   : > { %2561 = vrot.lane.b32.xlu1 %v10292_v27, %s9510_s12 }
 0x6cc   : > { %2557 = vrot.lane.b32.xlu1 %v10292_v27, %s11234_s3 }
 0x6d0   : > { %2559 = vrot.lane.b32.xlu1 %v10290_v26, %s11234_s3 }
 0x737   : > { %v2488_v11 = vpop.xlane.xlu1 %2487 }
 0x73b   : > { %v2482_v12 = vpop.xlane.xlu1 %2481 }
 0x740   : > { %v2491_v13 = vpop.xlane.xlu1 %2490 }
 0x741   : > { %8253 = vrcp.f32 %v2491_v13 }
 0x742   : > { %8255 = vrcp.f32 %v2482_v12 }
 0x743   : > { %8257 = vrcp.f32 %v2488_v11 }
 0x744   : > { %v2485_v14 = vpop.xlane.xlu1 %2484 }
 0x745   : > { %8259 = vrcp.f32 %v2485_v14 }
 0x748   : > { %v2562_v15 = vpop.permute.xlu1 %2561 }
 0x749   : > { %7836 = vmatprep.subr.msk.bf16.mxu1 %vm2394_vm1, %v2562_v15  ;;  %v2572_v29 = vsel %vm2394_vm1, %v2562_v15, 0 }
 0x74b   : > { %v8254_v16 = vpop.eup %8253 }
 0x74c   : > { %v8256_v17 = vpop.eup %8255  ;;  %v2499_v20 = vmul.f32 %v8254_v16, %v8250_v61  ;;  %v2558_v28 = vpop.permute.xlu1 %2557 }
 0x74d   : > { %v8258_v18 = vpop.eup %8257  ;;  %v2493_v21 = vmul.f32 %v8256_v17, %v8248_v59 }
 0x74e   : > { %v2497_v23 = vmul.f32 %v8258_v18, %v8246_v57 }
 0x74f   : > { %v8260_v19 = vpop.eup %8259 }
 0x750   : > { %v2495_v22 = vmul.f32 %v8260_v19, %v8252_v63  ;;  %v2501_v25 = vpack.c.bf16 %v2499_v20, %v2497_v23  ;;  %v2560_v32 = vpop.permute.xlu1 %2559 }
 0x752   : > { %v2500_v24 = vpack.c.bf16 %v2495_v22, %v2493_v21 }
 0x754   : > { %7440 = vmatprep.mubr.msk.bf16.mxu1 %vm2253_vm0, %v2500_v24 }
 0x755   : > { %7441 = vmatmul.mubr.msk.bf16.vlgmr.msra.gmra.mrb[4].mxu1 %vm2253_vm0, %v2501_v25 }
 0x756   : > { %7445 = vmatpush3.bf16.xpose.msra.mxu1 %v2572_v29  ;;  %7448 = vmatprep.mubr.msk.bf16.mxu1 %vm2394_vm1, %v2558_v28 }
 0x757   : > { %7837 = vmatprep.subr.msk.bf16.mxu1 %vm2394_vm1, %v2564_v30 }
 0x75e   : > { %7447 = vmatpush3.bf16.xpose.msra.mxu1 %v2575_v31 }
 0x765   : > { %7449 = vmatmul.mubr.msk.bf16.vlgmr.msra.gmra.mrb[8].mxu1 %vm2394_vm1, %v2560_v32 }
 0x828   : > { %v10340_v33 = vpop.f32.mrb[4].mxu1 }
 0x829   : > { %v10342_v34 = vpop.f32.mrb[5].mxu1 }
 0x82a   : > { %v10344_v35 = vpop.f32.mrb[6].mxu1 }
 0x82b   : > { %v10346_v36 = vpop.f32.mrb[7].mxu1 }
 0x838   : > { %v7450_v37 = vpop.f32.mrb[8].mxu1 }
 0x839   : > { %v2611_v38 = vpop.f32.mrb[9].mxu1  ;;  %v2632_v43 = vsel %vm2253_vm0, %v7450_v37, -inf }
 0x83a   : > { %v7451_v39 = vpop.f32.mrb[10].mxu1  ;;  %v2626_v40 = vsel %vm2253_vm0, %v2611_v38, -inf }
 0x83b   : > { %2627 = vmax.xlane.f32.xlu1 %v2626_v40  ;;  %v2614_v41 = vpop.f32.mrb[11].mxu1  ;;  %v2635_v44 = vsel %vm2253_vm0, %v7451_v39, -inf }
 0x83c   : > { %v2629_v42 = vsel %vm2253_vm0, %v2614_v41, -inf }
 0x83d   : > { %2630 = vmax.xlane.f32.xlu0 %v2629_v42 }
 0x83f   : > { %2633 = vmax.xlane.f32.xlu1 %v2632_v43 }
 0x841   : > { %2636 = vmax.xlane.f32.xlu0 %v2635_v44 }
 0x850   : > { %2674 = vrot.lane.b32.xlu1 %v10318_v8, %s11234_s3 }
 0x8c8   : > { %v2628_v45 = vpop.xlane.xlu1 %2627 }
 0x8c9   : > { %v2638_v46 = vsub.f32 %v2611_v38, %v2628_v45 }
 0x8ca   : > { %v2631_v47 = vpop.xlane.xlu0 %2630 }
 0x8cb   : > { %v2639_v49 = vsub.f32 %v2614_v41, %v2631_v47  ;;  %v2642_v51 = vmul.f32 1.442695, %v2638_v46 }
 0x8cc   : > { %v2634_v48 = vpop.xlane.xlu1 %2633 }
 0x8cd   : > { %v2640_v50 = vsub.f32 %v7450_v37, %v2634_v48  ;;  %v2644_v56 = vmul.f32 1.442695, %v2639_v49 }
 0x8ce   : > { %v2637_v52 = vpop.xlane.xlu0 %2636 }
 0x8cf   : > { %v2646_v53 = vmul.f32 1.442695, %v2640_v50  ;;  %v2641_v54 = vsub.f32 %v7451_v39, %v2637_v52 }
 0x8d0   : > { %v2675_v55 = vpop.permute.xlu1 %2674 }
 0x8d1   : > { %8261 = vpow2.f32 %v2646_v53  ;;  %v2648_v57 = vmul.f32 1.442695, %v2641_v54  ;;  %7452 = vmatprep.subr.bf16.mxu0 %v2675_v55 }
 0x8d2   : > { %8263 = vpow2.f32 %v2642_v51  ;;  %7453 = vmatpush3.bf16.msra.mxu0 %v2675_v55 }
 0x8d3   : > { %8265 = vpow2.f32 %v2648_v57 }
 0x8d4   : > { %8267 = vpow2.f32 %v2644_v56 }
 0x8db   : > { %v8262_v58 = vpop.eup %8261 }
 0x8dc   : > { %v8264_v59 = vpop.eup %8263  ;;  %v2656_v60 = vsel %vm2253_vm0, %v8262_v58, 0.0 }
 0x8dd   : > { %v8266_v61 = vpop.eup %8265  ;;  %2657 = vadd.xlane.f32.xlu1 %v2656_v60  ;;  %v2650_v0 = vsel %vm2253_vm0, %v8264_v59, 0.0 }
 0x8de   : > { %v2659_v62 = vsel %vm2253_vm0, %v8266_v61, 0.0  ;;  %v8268_v63 = vpop.eup %8267 }
 0x8df   : > { %2660 = vadd.xlane.f32.xlu0 %v2659_v62  ;;  %v2653_v1 = vsel %vm2253_vm0, %v8268_v63, 0.0 }
 0x8e1   : > { %2651 = vadd.xlane.f32.xlu1 %v2650_v0 }
 0x8e3   : > { %2654 = vadd.xlane.f32.xlu0 %v2653_v1 }
 0x8f2   : > { %2739 = vrot.lane.b32.xlu1 %v10292_v27, %s11231_s8 }
 0x8f6   : > { %2741 = vrot.lane.b32.xlu1 %v10290_v26, %s11231_s8  ;;  %s11320_s8 = sld [smem:[#allocation75_spill]] }
 0x8f9   : > { %2676 = vrot.lane.b32.xlu0 %v10322_v10, %s11234_s3 }
 0x8fa   : > { %2737 = vrot.lane.b32.xlu1 %v10290_v26, %s11236_s9 }
 0x8fd   : > { %2735 = vrot.lane.b32.xlu0 %v10292_v27, %s11236_s9 }
 0x96a   : > { %v2658_v2 = vpop.xlane.xlu1 %2657 }
 0x96c   : > { %v2661_v3 = vpop.xlane.xlu0 %2660 }
 0x96d   : > { %8269 = vrcp.f32 %v2661_v3 }
 0x96e   : > { %v2652_v4 = vpop.xlane.xlu1 %2651 }
 0x96f   : > { %8271 = vrcp.f32 %v2652_v4 }
 0x970   : > { %8273 = vrcp.f32 %v2658_v2  ;;  %v2655_v5 = vpop.xlane.xlu0 %2654 }
 0x971   : > { %8275 = vrcp.f32 %v2655_v5 }
 0x972   : > { %v2740_v7 = vpop.permute.xlu1 %2739 }
 0x973   : > { %v2750_v21 = vsel %vm2394_vm1, %v2740_v7, 0 }
 0x974   : > { %v2677_v6 = vpop.permute.xlu0 %2676 }
 0x975   : > { %7454 = vmatprep.subr.bf16.mxu0 %v2677_v6 }
 0x976   : > { %7455 = vmatpush3.bf16.msra.mxu0 %v2677_v6  ;;  %v2742_v22 = vpop.permute.xlu1 %2741 }
 0x977   : > { %7838 = vmatprep.subr.msk.bf16.mxu0 %vm2394_vm1, %v2740_v7  ;;  %v8270_v9 = vpop.eup %8269  ;;  %v2753_v23 = vsel %vm2394_vm1, %v2742_v22, 0 }
 0x978   : > { %v2669_v14 = vmul.f32 %v8270_v9, %v8266_v61  ;;  %v2736_v20 = vpop.permute.xlu0 %2735 }
 0x979   : > { %v8272_v11 = vpop.eup %8271 }
 0x97a   : > { %v8274_v12 = vpop.eup %8273  ;;  %v2663_v15 = vmul.f32 %v8272_v11, %v8264_v59  ;;  %v2738_v24 = vpop.permute.xlu1 %2737 }
 0x97b   : > { %v8276_v13 = vpop.eup %8275  ;;  %v2667_v17 = vmul.f32 %v8274_v12, %v8262_v58 }
 0x97c   : > { %v2665_v16 = vmul.f32 %v8276_v13, %v8268_v63 }
 0x97d   : > { %v2671_v19 = vpack.c.bf16 %v2669_v14, %v2667_v17 }
 0x97e   : > { %v2670_v18 = vpack.c.bf16 %v2665_v16, %v2663_v15 }
 0x980   : > { %7456 = vmatprep.mubr.msk.bf16.mxu0 %vm2253_vm0, %v2670_v18 }
 0x981   : > { %7457 = vmatmul.mubr.msk.bf16.vlgmr.msra.gmra.mrb[8].mxu0 %vm2253_vm0, %v2671_v19 }
 0x982   : > { %7461 = vmatpush3.bf16.xpose.msra.mxu0 %v2750_v21  ;;  %7464 = vmatprep.mubr.msk.bf16.mxu0 %vm2394_vm1, %v2736_v20 }
 0x983   : > { %7839 = vmatprep.subr.msk.bf16.mxu0 %vm2394_vm1, %v2742_v22 }
 0x98a   : > { %7463 = vmatpush3.bf16.xpose.msra.mxu0 %v2753_v23 }
 0x991   : > { %7465 = vmatmul.mubr.msk.bf16.vlgmr.msra.gmra.mrb[12].mxu0 %vm2394_vm1, %v2738_v24 }
 0xa54   : > { %v10376_v25 = vpop.f32.mrb[8].mxu0 }
 0xa55   : > { %v10378_v28 = vpop.f32.mrb[9].mxu0 }
 0xa56   : > { %v10380_v29 = vpop.f32.mrb[10].mxu0 }
 0xa57   : > { %v8157_v30 = vpack.i.bf16 %v10380_v29, %v10376_v25  ;;  %v10384_v31 = vpop.f32.mrb[11].mxu0 }
 0xa58   : > { %v8152_v32 = vpack.i.bf16 %v10384_v31, %v10378_v28 }
 0xa64   : > { %v7466_v37 = vpop.f32.mrb[12].mxu0 }
 0xa65   : > { %v2789_v38 = vpop.f32.mrb[13].mxu0  ;;  %v2810_v43 = vsel %vm2253_vm0, %v7466_v37, -inf }
 0xa66   : > { %v7467_v39 = vpop.f32.mrb[14].mxu0  ;;  %v2804_v40 = vsel %vm2253_vm0, %v2789_v38, -inf }
 0xa67   : > { %2805 = vmax.xlane.f32.xlu0 %v2804_v40  ;;  %v2792_v41 = vpop.f32.mrb[15].mxu0  ;;  %v2813_v44 = vsel %vm2253_vm0, %v7467_v39, -inf }
 0xa68   : > { %v2807_v42 = vsel %vm2253_vm0, %v2792_v41, -inf }
 0xa69   : > { %2808 = vmax.xlane.f32.xlu1 %v2807_v42 }
 0xa6b   : > { %2811 = vmax.xlane.f32.xlu0 %v2810_v43 }
 0xa6f   : > { %2814 = vmax.xlane.f32.xlu0 %v2813_v44 }
 0xa7a   : > { %2850 = vrot.lane.b32.xlu1 %v10318_v8, %s11236_s9 }
 0xaf4   : > { %v2806_v45 = vpop.xlane.xlu0 %2805 }
 0xaf5   : > { %v2816_v47 = vsub.f32 %v2789_v38, %v2806_v45 }
 0xaf6   : > { %v2809_v46 = vpop.xlane.xlu1 %2808 }
 0xaf7   : > { %v2820_v51 = vmul.f32 1.442695, %v2816_v47  ;;  %v2817_v52 = vsub.f32 %v2792_v41, %v2809_v46 }
 0xaf8   : > { %v2812_v48 = vpop.xlane.xlu0 %2811 }
 0xaf9   : > { %v2818_v49 = vsub.f32 %v7466_v37, %v2812_v48  ;;  %v2822_v56 = vmul.f32 1.442695, %v2817_v52 }
 0xafa   : > { %v2851_v50 = vpop.permute.xlu1 %2850 }
 0xafb   : > { %v2824_v53 = vmul.f32 1.442695, %v2818_v49  ;;  %7468 = vmatprep.subr.bf16.mxu1 %v2851_v50 }
 0xafc   : > { %v2815_v54 = vpop.xlane.xlu0 %2814  ;;  %7469 = vmatpush3.bf16.msra.mxu1 %v2851_v50 }
 0xafd   : > { %8277 = vpow2.f32 %v2824_v53  ;;  %v2819_v55 = vsub.f32 %v7467_v39, %v2815_v54 }
 0xafe   : > { %8279 = vpow2.f32 %v2820_v51 }
 0xaff   : > { %v2826_v57 = vmul.f32 1.442695, %v2819_v55 }
 0xb01   : > { %8281 = vpow2.f32 %v2826_v57 }
 0xb02   : > { %8283 = vpow2.f32 %v2822_v56 }
 0xb07   : > { %v8278_v58 = vpop.eup %8277 }
 0xb08   : > { %v2834_v59 = vsel %vm2253_vm0, %v8278_v58, 0.0  ;;  %v8280_v60 = vpop.eup %8279 }
 0xb09   : > { %2835 = vadd.xlane.f32.xlu1 %v2834_v59  ;;  %v2828_v63 = vsel %vm2253_vm0, %v8280_v60, 0.0 }
 0xb0b   : > { %v8282_v61 = vpop.eup %8281 }
 0xb0c   : > { %v2837_v62 = vsel %vm2253_vm0, %v8282_v61, 0.0  ;;  %v8284_v0 = vpop.eup %8283 }
 0xb0d   : > { %2838 = vadd.xlane.f32.xlu0 %v2837_v62  ;;  %2829 = vadd.xlane.f32.xlu1 %v2828_v63  ;;  %v2831_v1 = vsel %vm2253_vm0, %v8284_v0, 0.0 }
 0xb11   : > { %2832 = vadd.xlane.f32.xlu0 %v2831_v1 }
 0xb1e   : > { %2915 = vrot.lane.b32.xlu1 %v10292_v27, %s11224_s7 }
 0xb22   : > { %2917 = vrot.lane.b32.xlu1 %v10290_v26, %s11224_s7  ;;  %s11225_s7 = smov 16  }
 0xb26   : > { %2913 = vrot.lane.b32.xlu1 %v10290_v26, %s11232_s28 }
 0xb27   : > { %2852 = vrot.lane.b32.xlu0 %v10322_v10, %s11236_s9 }
 0xb2b   : > { %2911 = vrot.lane.b32.xlu0 %v10292_v27, %s11232_s28 }
 0xb96   : > { %v2836_v2 = vpop.xlane.xlu1 %2835 }
 0xb9a   : > { %v2839_v3 = vpop.xlane.xlu0 %2838  ;;  %v2830_v4 = vpop.xlane.xlu1 %2829 }
 0xb9b   : > { %8285 = vrcp.f32 %v2839_v3 }
 0xb9c   : > { %8287 = vrcp.f32 %v2830_v4 }
 0xb9d   : > { %8289 = vrcp.f32 %v2836_v2 }
 0xb9e   : > { %v2833_v5 = vpop.xlane.xlu0 %2832  ;;  %v2916_v7 = vpop.permute.xlu1 %2915 }
 0xb9f   : > { %8291 = vrcp.f32 %v2833_v5  ;;  %v2926_v19 = vsel %vm2394_vm1, %v2916_v7, 0 }
 0xba2   : > { %v2853_v6 = vpop.permute.xlu0 %2852  ;;  %v2918_v20 = vpop.permute.xlu1 %2917 }
 0xba3   : > { %7470 = vmatprep.subr.bf16.mxu1 %v2853_v6  ;;  %v2929_v21 = vsel %vm2394_vm1, %v2918_v20, 0 }
 0xba4   : > { %7471 = vmatpush3.bf16.msra.mxu1 %v2853_v6 }
 0xba5   : > { %7840 = vmatprep.subr.msk.bf16.mxu1 %vm2394_vm1, %v2916_v7  ;;  %v8286_v26 = vpop.eup %8285 }
 0xba6   : > { %v8288_v9 = vpop.eup %8287  ;;  %v2847_v13 = vmul.f32 %v8286_v26, %v8282_v61  ;;  %v2912_v18 = vpop.permute.xlu0 %2911 }
 0xba7   : > { %v8290_v11 = vpop.eup %8289  ;;  %v2841_v27 = vmul.f32 %v8288_v9, %v8280_v60  ;;  %v2914_v22 = vpop.permute.xlu1 %2913 }
 0xba8   : > { %v2845_v15 = vmul.f32 %v8290_v11, %v8278_v58 }
 0xba9   : > { %v8292_v12 = vpop.eup %8291 }
 0xbaa   : > { %v2843_v14 = vmul.f32 %v8292_v12, %v8284_v0  ;;  %v2849_v17 = vpack.c.bf16 %v2847_v13, %v2845_v15 }
 0xbac   : > { %v2848_v16 = vpack.c.bf16 %v2843_v14, %v2841_v27  ;;  %v10440_v27 = vld [vmem:[#allocation10] sm:$0xff]   ;;  %v10444_v14 = vld [vmem:[#allocation10 + $0x8] sm:$0xff]  }
 0xbae   : > { %7472 = vmatprep.mubr.msk.bf16.mxu1 %vm2253_vm0, %v2848_v16 }
 0xbaf   : > { %7473 = vmatmul.mubr.msk.bf16.vlgmr.msra.gmra.mrb[12].mxu1 %vm2253_vm0, %v2849_v17 }
 0xbb0   : > { %7477 = vmatpush3.bf16.xpose.msra.mxu1 %v2926_v19  ;;  %7480 = vmatprep.mubr.msk.bf16.mxu1 %vm2394_vm1, %v2912_v18 }
 0xbb1   : > { %7841 = vmatprep.subr.msk.bf16.mxu1 %vm2394_vm1, %v2918_v20 }
 0xbb8   : > { %7479 = vmatpush3.bf16.xpose.msra.mxu1 %v2929_v21 }
 0xbbf   : > { %7481 = vmatmul.mubr.msk.bf16.vlgmr.msra.gmra.mrb[16].mxu1 %vm2394_vm1, %v2914_v22 }
 0xc82   : > { %v7474_v23 = vpop.f32.mrb[12].mxu1 }
 0xc83   : > { %v2896_v24 = vpop.f32.mrb[13].mxu1 }
 0xc84   : > { %v7475_v37 = vpop.f32.mrb[14].mxu1 }
 0xc85   : > { %v8167_v38 = vpack.i.bf16 %v7475_v37, %v7474_v23  ;;  %v2899_v39 = vpop.f32.mrb[15].mxu1 }
 0xc86   : > { %v8162_v40 = vpack.i.bf16 %v2899_v39, %v2896_v24 }
 0xc92   : > { %v7482_v41 = vpop.f32.mrb[16].mxu1 }
 0xc93   : > { %v2965_v42 = vpop.f32.mrb[17].mxu1  ;;  %v2986_v47 = vsel %vm2253_vm0, %v7482_v41, -inf }
 0xc94   : > { %v7483_v43 = vpop.f32.mrb[18].mxu1  ;;  %v2980_v44 = vsel %vm2253_vm0, %v2965_v42, -inf }
 0xc95   : > { %2981 = vmax.xlane.f32.xlu0 %v2980_v44  ;;  %v2968_v45 = vpop.f32.mrb[19].mxu1  ;;  %v2989_v48 = vsel %vm2253_vm0, %v7483_v43, -inf }
 0xc96   : > { %v2983_v46 = vsel %vm2253_vm0, %v2968_v45, -inf }
 0xc97   : > { %2984 = vmax.xlane.f32.xlu1 %v2983_v46 }
 0xc99   : > { %2987 = vmax.xlane.f32.xlu0 %v2986_v47 }
 0xc9d   : > { %2990 = vmax.xlane.f32.xlu0 %v2989_v48 }
 0xd22   : > { %v2982_v49 = vpop.xlane.xlu0 %2981 }
 0xd23   : > { %v2992_v50 = vsub.f32 %v2965_v42, %v2982_v49 }
 0xd24   : > { %v2985_v51 = vpop.xlane.xlu1 %2984 }
 0xd25   : > { %v2996_v54 = vmul.f32 1.442695, %v2992_v50  ;;  %v2993_v55 = vsub.f32 %v2968_v45, %v2985_v51 }
 0xd26   : > { %v2988_v52 = vpop.xlane.xlu0 %2987 }
 0xd27   : > { %v2994_v53 = vsub.f32 %v7482_v41, %v2988_v52  ;;  %v2998_v59 = vmul.f32 1.442695, %v2993_v55 }
 0xd29   : > { %v3000_v56 = vmul.f32 1.442695, %v2994_v53 }
 0xd2a   : > { %v2991_v57 = vpop.xlane.xlu0 %2990 }
 0xd2b   : > { %8293 = vpow2.f32 %v3000_v56  ;;  %v2995_v58 = vsub.f32 %v7483_v43, %v2991_v57 }
 0xd2c   : > { %8295 = vpow2.f32 %v2996_v54 }
 0xd2d   : > { %v3002_v60 = vmul.f32 1.442695, %v2995_v58 }
 0xd2f   : > { %8297 = vpow2.f32 %v3002_v60 }
 0xd30   : > { %8299 = vpow2.f32 %v2998_v59 }
 0xd35   : > { %v8294_v61 = vpop.eup %8293 }
 0xd36   : > { %v3010_v62 = vsel %vm2253_vm0, %v8294_v61, 0.0  ;;  %v8296_v63 = vpop.eup %8295 }
 0xd37   : > { %3011 = vadd.xlane.f32.xlu1 %v3010_v62  ;;  %v3004_v2 = vsel %vm2253_vm0, %v8296_v63, 0.0 }
 0xd39   : > { %v8298_v0 = vpop.eup %8297 }
 0xd3a   : > { %v3013_v1 = vsel %vm2253_vm0, %v8298_v0, 0.0  ;;  %v8300_v3 = vpop.eup %8299 }
 0xd3b   : > { %3014 = vadd.xlane.f32.xlu0 %v3013_v1  ;;  %3005 = vadd.xlane.f32.xlu1 %v3004_v2  ;;  %v3007_v4 = vsel %vm2253_vm0, %v8300_v3, 0.0 }
 0xd3f   : > { %3008 = vadd.xlane.f32.xlu0 %v3007_v4 }
 0xd4c   : > { %3026 = vrot.lane.b32.xlu1 %v10318_v8, %s11232_s28 }
 0xd50   : > { %8153 = vrot.lane.b32.xlu1 %v8152_v32, %s11229_s5 }
 0xd54   : > { %8158 = vrot.lane.b32.xlu1 %v8157_v30, %s11229_s5  ;;  %s11319_s5 = sld [smem:[#allocation74_spill]] }
 0xd55   : > { %3028 = vrot.lane.b32.xlu0 %v10322_v10, %s11232_s28  ;;  %s7238_s28 = sshll.u32 %s11348_s30, 4 }
 0xd56   : > { %s10527_s9 = scalar_lea.vmem %s11320_s8, %s7238_s28  ;;  %s11322_s8 = smov 120  }
 0xd58   : > { %8168 = vrot.lane.b32.xlu1 %v8167_v38, %s11225_s7 }
 0xd59   : > { %8163 = vrot.lane.b32.xlu0 %v8162_v40, %s11225_s7  ;;  %s11227_s7 = smov 24  }
 0xd5a   : > { %s2169_s3 = scalar_lea.vmem %s11319_s5, %s7238_s28  ;;  %s11323_s28 = smov 104  }
 0xd5b   : > { %s11324_s5 = smov 80  }
 0xdc4   : > { %v3012_v8 = vpop.xlane.xlu1 %3011 }
 0xdc8   : > { %v3015_v5 = vpop.xlane.xlu0 %3014  ;;  %v3006_v6 = vpop.xlane.xlu1 %3005 }
 0xdc9   : > { %8301 = vrcp.f32 %v3015_v5 }
 0xdca   : > { %8303 = vrcp.f32 %v3006_v6 }
 0xdcb   : > { %8305 = vrcp.f32 %v3012_v8  ;;  %v8465_v8 = vld [vmem:[%s10274_s1] sm:$0xff] }
 0xdcc   : > { %v3009_v28 = vpop.xlane.xlu0 %3008  ;;  %v3027_v31 = vpop.permute.xlu1 %3026 }
 0xdcd   : > { %8307 = vrcp.f32 %v3009_v28  ;;  %7484 = vmatprep.subr.bf16.mxu0 %v3027_v31 }
 0xdce   : > { %7485 = vmatpush3.bf16.msra.mxu0 %v3027_v31  ;;  %v8466_v31 = vld [vmem:[%s10274_s1 + $0x8] sm:$0xff] }
 0xdd0   : > { %v3029_v25 = vpop.permute.xlu0 %3028  ;;  %v8154_v21 = vpop.permute.xlu1 %8153 }
 0xdd1   : > { %7486 = vmatprep.subr.bf16.mxu0 %v3029_v25  ;;  %v8156_v24 = vunpack.i.h.bf16 %v8154_v21  ;;  %v8155_v37 = vunpack.i.l.bf16 %v8154_v21 }
 0xdd2   : > { %7487 = vmatpush3.bf16.msra.mxu0 %v3029_v25 }
 0xdd3   : > { %v8302_v10 = vpop.eup %8301  ;;  %7492 = vmatprep.subr.bf16.mxu0 %v10440_v27  ;;  %v3136_v45 = vsel %vm2394_vm1, %v10346_v36, %v8156_v24  ;;  %v3135_v46 = vsel %vm2394_vm1, %v10342_v34, %v8155_v37 }
 0xdd4   : > { %v8304_v29 = vpop.eup %8303  ;;  %v3023_v7 = vmul.f32 %v8302_v10, %v8298_v0  ;;  %v8159_v22 = vpop.permute.xlu1 %8158  ;;  %v8467_v10 = vld [vmem:[%s10274_s1 + $0x10] sm:$0xff] }
 0xdd5   : > { %v8306_v30 = vpop.eup %8305  ;;  %v3017_v26 = vmul.f32 %v8304_v29, %v8296_v63  ;;  %v8164_v38 = vpop.permute.xlu0 %8163  ;;  %v8161_v39 = vunpack.i.h.bf16 %v8159_v22  ;;  %v8160_v40 = vunpack.i.l.bf16 %v8159_v22 }
 0xdd6   : > { %v3021_v11 = vmul.f32 %v8306_v30, %v8294_v61  ;;  %v8166_v43 = vunpack.i.h.bf16 %v8164_v38  ;;  %v8165_v44 = vunpack.i.l.bf16 %v8164_v38  ;;  %v10468_v61 = vld [vmem:[#allocation11] ss:$0 sm:$0xff] }
 0xdd7   : > { %v8308_v32 = vpop.eup %8307  ;;  %v3138_v48 = vsel %vm2394_vm1, %v10344_v35, %v8161_v39  ;;  %v3137_v49 = vsel %vm2394_vm1, %v10340_v33, %v8160_v40 }
 0xdd8   : > { %v3019_v9 = vmul.f32 %v8308_v32, %v8300_v3  ;;  %v3025_v13 = vpack.c.bf16 %v3023_v7, %v3021_v11  ;;  %v8169_v23 = vpop.permute.xlu1 %8168  ;;  %v3140_v34 = vsel %vm3139_vm2, %v3135_v46, %v8165_v44  ;;  %v3141_v56 = vsel %vm3139_vm2, %v3136_v45, %v8166_v43  ;;  %v8468_v7 = vld [vmem:[%s10274_s1 + $0x18] sm:$0xff]  ;;  %s11318_s1 = sld [smem:[#allocation84_spill]] }
 0xdd9   : > { %v8171_v41 = vunpack.i.h.bf16 %v8169_v23  ;;  %v8170_v42 = vunpack.i.l.bf16 %v8169_v23  ;;  %v9519_v46 = vmov 0.0  }
 0xdda   : > { %v3024_v12 = vpack.c.bf16 %v3019_v9, %v3017_v26 }
 0xddb   : > { %v3142_v53 = vsel %vm3139_vm2, %v3137_v49, %v8170_v42  ;;  %v3143_v54 = vsel %vm3139_vm2, %v3138_v48, %v8171_v41 }
 0xddc   : > { %7488 = vmatprep.mubr.msk.bf16.mxu0 %vm2253_vm0, %v3024_v12 }
 0xddd   : > { %7489 = vmatmul.mubr.msk.bf16.vlgmr.msra.gmra.mrb[16].mxu0 %vm2253_vm0, %v3025_v13 }
 0xdde   : > { %7493 = vmatpush3.bf16.msra.mxu0 %v10440_v27  ;;  %v10501_v48 = vld [vmem:[%s11318_s1 + $0x8] sm:$0xff]  }
 0xddf   : > { %7494 = vmatprep.subr.bf16.mxu0 %v10444_v14 }
 0xde2   : > { %7495 = vmatpush3.bf16.msra.mxu0 %v10444_v14 }
 0xeb0   : > { %v7490_v15 = vpop.f32.mrb[16].mxu0 }
 0xeb1   : > { %v3072_v16 = vpop.f32.mrb[17].mxu0 }
 0xeb2   : > { %v7491_v17 = vpop.f32.mrb[18].mxu0 }
 0xeb3   : > { %v8177_v18 = vpack.i.bf16 %v7491_v17, %v7490_v15  ;;  %v3075_v19 = vpop.f32.mrb[19].mxu0 }
 0xeb4   : > { %v8172_v20 = vpack.i.bf16 %v3075_v19, %v3072_v16 }
 0xeb5   : > { %8178 = vrot.lane.b32.xlu1 %v8177_v18, %s11227_s7 }
 0xeb6   : > { %8173 = vrot.lane.b32.xlu0 %v8172_v20, %s11227_s7  ;;  %s11317_s7 = sld [smem:[#allocation82_spill]] }
 0xebc   : > { %v10487_v44 = vld [vmem:[%s11317_s7] sm:$0xff]   ;;  %v10491_v45 = vld [vmem:[%s11317_s7 + $0x8] sm:$0xff]  }
 0xebd   : > { %7500 = vmatprep.subr.bf16.mxu1 %v10487_v44 }
 0xebe   : > { %7501 = vmatpush3.bf16.msra.mxu1 %v10487_v44 }
 0xebf   : > { %7502 = vmatprep.subr.bf16.mxu1 %v10491_v45 }
 0xec2   : > { %7503 = vmatpush3.bf16.msra.mxu1 %v10491_v45 }
 0xec3   : > { %7520 = vmatprep.subr.bf16.mxu1 %v9519_v46 }
 0xf27   : > { %v8179_v47 = vpop.permute.xlu1 %8178 }
 0xf28   : > { %v8181_v50 = vunpack.i.h.bf16 %v8179_v47  ;;  %v8180_v51 = vunpack.i.l.bf16 %v8179_v47  ;;  %v8174_v52 = vpop.permute.xlu0 %8173  ;;  %v10498_v47 = vld [vmem:[%s11318_s1] sm:$0xff]  }
 0xf29   : > { %v8176_v36 = vunpack.i.h.bf16 %v8174_v52  ;;  %v8175_v55 = vunpack.i.l.bf16 %v8174_v52  ;;  %7508 = vmatprep.subr.bf16.mxu0 %v10498_v47 }
 0xf2a   : > { %v3147_v57 = vsel %vm3144_vm3, %v3142_v53, %v8180_v51  ;;  %v3148_v35 = vsel %vm3144_vm3, %v3143_v54, %v8181_v50 }
 0xf2b   : > { %v3150_v58 = vpack.c.bf16 %v3148_v35, %v3147_v57  ;;  %v3145_v33 = vsel %vm3144_vm3, %v3140_v34, %v8175_v55  ;;  %v3146_v59 = vsel %vm3144_vm3, %v3141_v56, %v8176_v36 }
 0xf2c   : > { %v3149_v60 = vpack.c.bf16 %v3146_v59, %v3145_v33  ;;  %v10507_v33 = vld [vmem:[#allocation13] ss:$0 sm:$0xff] }
 0xf2e   : > { %7496 = vmatprep.mubr.msk.bf16.mxu0 %vm2253_vm0, %v3149_v60 }
 0xf2f   : > { %7497 = vmatmul.mubr.msk.bf16.vlgmr.msra.gmra.mrb[20].mxu0 %vm2253_vm0, %v3150_v58 }
 0xf30   : > { %7509 = vmatpush3.bf16.msra.mxu0 %v10498_v47 }
 0xf31   : > { %7510 = vmatprep.subr.bf16.mxu0 %v10501_v48 }
 0xf34   : > { %7511 = vmatpush3.bf16.msra.mxu0 %v10501_v48 }
0x1002   : > { %v7498_v62 = vpop.f32.mrb[20].mxu0 }
0x1003   : > { %v3209_v63 = vpop.f32.mrb[21].mxu0  ;;  %v3218_v0 = vadd.f32 %v7498_v62, %v10468_v61 }
0x1004   : > { %v3210_v1 = vadd.f32 %v10468_v61, %v3209_v63  ;;  %v7499_v2 = vpop.f32.mrb[22].mxu0 }
0x1005   : > { %v3212_v3 = vpop.f32.mrb[23].mxu0  ;;  %v3221_v6 = vadd.f32 %v7499_v2, %v10468_v61  ;;  %v3226_v29 = vadd.f32 %v8467_v10, %v3218_v0 }
0x1006   : > { %v3213_v4 = vadd.f32 %v10468_v61, %v3212_v3  ;;  %v3224_v5 = vadd.f32 %v8465_v8, %v3210_v1  ;;  %v10510_v1 = vld [vmem:[#allocation14] ss:$0 sm:$0xff] }
0x1007   : > { %v3234_v32 = vsel %vm2253_vm0, %v3226_v29, 0.0  ;;  %v3227_v26 = vadd.f32 %v8468_v7, %v3221_v6  ;;  %v2194_v7 = vld [vmem:[%s10527_s9] sm:$0xff] }
0x1008   : > { %v3228_v28 = vsel %vm2253_vm0, %v3224_v5, 0.0  ;;  %v3225_v25 = vadd.f32 %v8466_v31, %v3213_v4 }
0x1009   : > { %3229 = vadd.xlane.f32.xlu0 %v3228_v28  ;;  %v3237_v9 = vsel %vm2253_vm0, %v3227_v26, 0.0 }
0x100a   : > { %v3231_v30 = vsel %vm2253_vm0, %v3225_v25, 0.0 }
0x100b   : > { %3232 = vadd.xlane.f32.xlu1 %v3231_v30  ;;  %v10535_v30 = vld [vmem:[%s2169_s3] sm:$0xff] }
0x100d   : > { %3235 = vadd.xlane.f32.xlu0 %v3234_v32  ;;  %v10537_v32 = vld [vmem:[%s2169_s3 + $0x8] sm:$0xff]  ;;  %s11321_s3 = smov 112  }
0x1011   : > { %3238 = vadd.xlane.f32.xlu0 %v3237_v9 }
0x1096   : > { %v3230_v11 = vpop.xlane.xlu0 %3229 }
0x1097   : > { %v3241_v12 = vmul.f32 0.03125, %v3230_v11  ;;  %v3544_v11 = vadd.f32 %v2194_v7, %v10535_v30 }
0x1098   : > { %v3233_v13 = vpop.xlane.xlu1 %3232 }
0x1099   : > { %v3245_v15 = vsub.f32 %v3224_v5, %v3241_v12  ;;  %v3242_v16 = vmul.f32 0.03125, %v3233_v13  ;;  %v8469_v13 = vld [vmem:[#allocation3] sm:$0xff]  }
0x109a   : > { %v3236_v17 = vpop.xlane.xlu0 %3235 }
0x109b   : > { %v3246_v18 = vsub.f32 %v3225_v25, %v3242_v16  ;;  %v3243_v19 = vmul.f32 0.03125, %v3236_v17  ;;  %v3249_v20 = vmul.f32 %v3245_v15, %v3245_v15  ;;  %v8470_v16 = vld [vmem:[#allocation3 + $0x8] sm:$0xff]   ;;  %v8471_v17 = vld [vmem:[#allocation7] sm:$0xff]  }
0x109d   : > { %v3247_v21 = vsub.f32 %v3226_v29, %v3243_v19  ;;  %v3253_v22 = vsel %vm2253_vm0, %v3249_v20, 0.0  ;;  %v3250_v23 = vmul.f32 %v3246_v18, %v3246_v18  ;;  %v10556_v19 = vld [vmem:[%s11318_s1 + $0x10] sm:$0xff]   ;;  %v10561_v20 = vld [vmem:[%s11318_s1 + $0x18] sm:$0xff]   ;;  %s11325_s1 = smov 72  }
0x109e   : > { %3254 = vadd.xlane.f32.xlu1 %v3253_v22  ;;  %v3239_v24 = vpop.xlane.xlu0 %3238  ;;  %7512 = vmatprep.subr.bf16.mxu0 %v10556_v19 }
0x109f   : > { %v3244_v37 = vmul.f32 0.03125, %v3239_v24  ;;  %v3256_v38 = vsel %vm2253_vm0, %v3250_v23, 0.0  ;;  %v3251_v39 = vmul.f32 %v3247_v21, %v3247_v21  ;;  %7513 = vmatpush3.bf16.msra.mxu0 %v10556_v19 }
0x10a0   : > { %3257 = vadd.xlane.f32.xlu0 %v3256_v38  ;;  %7514 = vmatprep.subr.bf16.mxu0 %v10561_v20 }
0x10a1   : > { %v3248_v40 = vsub.f32 %v3227_v26, %v3244_v37  ;;  %v3259_v41 = vsel %vm2253_vm0, %v3251_v39, 0.0  ;;  %v2195_v26 = vld [vmem:[%s10527_s9 + $0x8] sm:$0xff] }
0x10a2   : > { %3260 = vadd.xlane.f32.xlu1 %v3259_v41  ;;  %v3545_v12 = vadd.f32 %v2195_v26, %v10537_v32 }
0x10a3   : > { %v3252_v42 = vmul.f32 %v3248_v40, %v3248_v40  ;;  %7515 = vmatpush3.bf16.msra.mxu0 %v10561_v20 }
0x10a4   : > { %7536 = vmatprep.subr.bf16.mxu0 %v9519_v46 }
0x10a5   : > { %v3262_v43 = vsel %vm2253_vm0, %v3252_v42, 0.0 }
0x10a6   : > { %3263 = vadd.xlane.f32.xlu0 %v3262_v43 }
0x112b   : > { %v3255_v49 = vpop.xlane.xlu1 %3254 }
0x112c   : > { %v3265_v50 = vmul.f32 0.03125, %v3255_v49 }
0x112d   : > { %v3258_v51 = vpop.xlane.xlu0 %3257 }
0x112e   : > { %v3269_v52 = vadd.f32 1e-05, %v3265_v50  ;;  %v3266_v53 = vmul.f32 0.03125, %v3258_v51 }
0x112f   : > { %v3261_v54 = vpop.xlane.xlu1 %3260 }
0x1130   : > { %8309 = vrsqrt.f32 %v3269_v52  ;;  %v3270_v36 = vadd.f32 1e-05, %v3266_v53  ;;  %v3267_v55 = vmul.f32 0.03125, %v3261_v54 }
0x1132   : > { %8311 = vrsqrt.f32 %v3270_v36  ;;  %v3271_v34 = vadd.f32 1e-05, %v3267_v55  ;;  %v8473_v55 = vld [vmem:[#allocation5] ss:$0 sm:$0xff] }
0x1133   : > { %v3264_v56 = vpop.xlane.xlu0 %3263 }
0x1134   : > { %8313 = vrsqrt.f32 %v3271_v34  ;;  %v3268_v57 = vmul.f32 0.03125, %v3264_v56 }
0x1136   : > { %v3272_v35 = vadd.f32 1e-05, %v3268_v57 }
0x1138   : > { %8315 = vrsqrt.f32 %v3272_v35 }
0x113a   : > { %v8310_v58 = vpop.eup %8309 }
0x113b   : > { %v3277_v59 = vmul.f32 %v8310_v58, %v3245_v15  ;;  %v3546_v15 = vpack.c.bf16 %v3545_v12, %v3544_v11  ;;  %v3591_v58 = vpack.c.bf16 %v10537_v32, %v10535_v30 }
0x113c   : > { %v8312_v60 = vpop.eup %8311 }
0x113d   : > { %v3278_v62 = vmul.f32 %v8312_v60, %v3246_v18  ;;  %v3287_v63 = vmul.f32 %v10507_v33, %v3277_v59  ;;  %v8472_v18 = vld [vmem:[#allocation7 + $0x8] sm:$0xff]  }
0x113e   : > { %v8314_v0 = vpop.eup %8313 }
0x113f   : > { %v3279_v2 = vmul.f32 %v8314_v0, %v3247_v21  ;;  %v3288_v3 = vmul.f32 %v10507_v33, %v3278_v62  ;;  %v10514_v4 = vadd.f32 %v10510_v1, %v3287_v63  ;;  %v10566_v21 = vld [vmem:[#allocation16] ss:$0 sm:$0xff] }
0x1141   : > { %v10517_v8 = vadd.f32 %v10510_v1, %v3288_v3  ;;  %v3289_v6 = vmul.f32 %v10507_v33, %v3279_v2 }
0x1142   : > { %v8316_v5 = vpop.eup %8315 }
0x1143   : > { %v3280_v28 = vmul.f32 %v8316_v5, %v3248_v40  ;;  %v3301_v31 = vpack.c.bf16 %v10517_v8, %v10514_v4  ;;  %v10530_v10 = vadd.f32 %v10510_v1, %v3289_v6 }
0x1145   : > { %v3290_v25 = vmul.f32 %v10507_v33, %v3280_v28  ;;  %7504 = vmatprep.mubr.msk.bf16.mxu1 %vm2253_vm0, %v3301_v31 }
0x1147   : > { %v10533_v29 = vadd.f32 %v10510_v1, %v3290_v25 }
0x1149   : > { %v3302_v9 = vpack.c.bf16 %v10533_v29, %v10530_v10 }
0x114b   : > { %7505 = vmatmul.mubr.msk.bf16.vlgmr.msra.gmra.mrb[20].mxu1 %vm2253_vm0, %v3302_v9 }
0x114c   : > { %7521 = vmatpush3.bf16.msra.mxu1 %v8469_v13  ;;  %7524 = vmatprep.mubr.msk.bf16.mxu1 %vm9520_vm4, %v9519_v46 }
0x114d   : > { %7522 = vmatprep.subr.bf16.mxu1 %v9519_v46 }
0x1150   : > { %7523 = vmatpush3.bf16.msra.mxu1 %v8470_v16 }
0x1151   : > { %7528 = vmatprep.subr.bf16.mxu1 %v9519_v46 }
0x1153   : > { %7525 = vmatmul.mubr.msk.bf16.vlgmr.msra.gmra.mrb[24].mxu1 %vm2253_vm0, %v3546_v15 }
0x1154   : > { %7529 = vmatpush3.bf16.msra.mxu1 %v8471_v17  ;;  %7532 = vmatprep.mubr.msk.bf16.mxu1 %vm9520_vm4, %v9519_v46 }
0x1155   : > { %7530 = vmatprep.subr.bf16.mxu1 %v9519_v46 }
0x1158   : > { %7531 = vmatpush3.bf16.msra.mxu1 %v8472_v18 }
0x1159   : > { %7542 = vmatprep.subr.bf16.mxu1 %v9519_v46 }
0x115b   : > { %7533 = vmatmul.mubr.msk.bf16.vlgmr.msra.gmra.mrb[28].mxu1 %vm2253_vm0, %v3591_v58 }
0x115c   : > { %7544 = vmatprep.mubr.msk.bf16.mxu1 %vm9520_vm4, %v9519_v46 }
0x121e   : > { %v7506_v22 = vpop.f32.mrb[20].mxu1 }
0x121f   : > { %v3370_v23 = vadd.f32 %v7506_v22, %v10566_v21  ;;  %v3361_v24 = vpop.f32.mrb[21].mxu1 }
0x1220   : > { %v3362_v37 = vadd.f32 %v10566_v21, %v3361_v24  ;;  %v7507_v38 = vpop.f32.mrb[22].mxu1 }
0x1221   : > { %v3373_v39 = vadd.f32 %v7507_v38, %v10566_v21  ;;  %v3364_v40 = vpop.f32.mrb[23].mxu1  ;;  %v3378_v42 = vmax.f32 %v3370_v23, 0.0 }
0x1222   : > { %v3365_v41 = vadd.f32 %v10566_v21, %v3364_v40  ;;  %v3376_v49 = vmax.f32 %v3362_v37, 0.0 }
0x1223   : > { %v3379_v43 = vmax.f32 %v3373_v39, 0.0 }
0x1224   : > { %v3377_v50 = vmax.f32 %v3365_v41, 0.0 }
0x1225   : > { %v3381_v51 = vpack.c.bf16 %v3379_v43, %v3378_v42 }
0x1226   : > { %v3380_v52 = vpack.c.bf16 %v3377_v50, %v3376_v49  ;;  %v3584_v53 = vpop.f32.mrb[24].mxu1 }
0x1227   : > { %v7526_v54 = vpop.f32.mrb[25].mxu1  ;;  %v3585_v34 = vadd.f32 %v8473_v55, %v3584_v53 }
0x1228   : > { %7516 = vmatprep.mubr.msk.bf16.mxu0 %vm3412_vm5, %v3380_v52  ;;  %v3587_v36 = vpop.f32.mrb[26].mxu1 }
0x1229   : > { %v3588_v56 = vadd.f32 %v8473_v55, %v3587_v36  ;;  %7517 = vmatmul.mubr.msk.bf16.vlgmr.msra.gmra.mrb[24].mxu0 %vm3412_vm5, %v3381_v51  ;;  %v7527_v57 = vpop.f32.mrb[27].mxu1  ;;  %v8474_v36 = vld [vmem:[#allocation8] ss:$0 sm:$0xff] }
0x122a   : > { %7538 = vmatprep.mubr.msk.bf16.mxu0 %vm9520_vm4, %v9519_v46 }
0x122b   : > { %v3636_v35 = vpack.c.bf16 %v3588_v56, %v3585_v34 }
0x122d   : > { %3757 = vrot.lane.b32.xlu0 %v3636_v35, %s9510_s12  ;;  %3639 = vrot.lane.b32.xlu1 %v3636_v35, %s9509_s10  ;;  %s11326_s10 = smov 8   ;;  %s11327_s12 = smov 16  }
0x122e   : > { %v3629_v54 = vpop.f32.mrb[28].mxu1 }
0x122f   : > { %v3630_v55 = vadd.f32 %v8474_v36, %v3629_v54  ;;  %v7534_v34 = vpop.f32.mrb[29].mxu1 }
0x1230   : > { %v3632_v56 = vpop.f32.mrb[30].mxu1 }
0x1231   : > { %3877 = vrot.lane.b32.xlu0 %v3636_v35, %s11321_s3  ;;  %3755 = vrot.lane.b32.xlu1 %v3636_v35, %s11322_s8  ;;  %v3633_v57 = vadd.f32 %v8474_v36, %v3632_v56 }
0x1233   : > { %v3637_v58 = vpack.c.bf16 %v3633_v57, %v3630_v55 }
0x1235   : > { %3998 = vrot.lane.b32.xlu0 %v3636_v35, %s11323_s28  ;;  %3879 = vrot.lane.b32.xlu1 %v3636_v35, %s11324_s5  ;;  %s11329_s5 = sld [smem:[#allocation72_spill]] }
0x1236   : > { %7543 = vmatpush3.bf16.msra.mxu1 %v3637_v58 }
0x1237   : > { %7554 = vmatprep.subr.bf16.mxu1 %v9519_v46 }
0x1239   : > { %4000 = vrot.lane.b32.xlu1 %v3636_v35, %s11325_s1  ;;  %s11328_s1 = smov 24  }
0x123b   : > { %s2161_s6 = scalar_lea.vmem %s11329_s5, %s10270_s2  ;;  %s11334_s2 = sld [smem:[#allocation73_spill]] }
0x1241   : > { %s2164_s5 = scalar_lea.vmem %s11334_s2, %s11348_s30  ;;  %s11335_s2 = sld [smem:[#allocation99_spill]] }
0x129f   : > { %v3640_v59 = vpop.permute.xlu1 %3639  ;;  %v3758_v62 = vpop.permute.xlu0 %3757 }
0x12a0   : > { %v3645_v60 = vsel %vm2394_vm1, %v3640_v59, 0  ;;  %v3763_v0 = vsel %vm2394_vm1, %v3758_v62, 0 }
0x12a1   : > { %7537 = vmatpush3.bf16.xpose.msra.mxu0 %v3645_v60 }
0x12a2   : > { %7548 = vmatprep.subr.bf16.mxu0 %v9519_v46 }
0x12a3   : > { %v3756_v63 = vpop.permute.xlu1 %3755  ;;  %v3878_v6 = vpop.permute.xlu0 %3877 }
0x12a7   : > { %v3880_v2 = vpop.permute.xlu1 %3879  ;;  %v3999_v31 = vpop.permute.xlu0 %3998 }
0x12a8   : > { %7539 = vmatmul.mubr.msk.bf16.vlgmr.msra.gmra.mrb[28].mxu0 %vm2394_vm1, %v3636_v35  ;;  %v3885_v3 = vsel %vm2394_vm1, %v3880_v2, 0  ;;  %v7535_v35 = vpop.f32.mrb[31].mxu1 }
0x12a9   : > { %7549 = vmatpush3.bf16.xpose.msra.mxu0 %v3763_v0  ;;  %7550 = vmatprep.mubr.msk.bf16.mxu0 %vm9520_vm4, %v9519_v46 }
0x12aa   : > { %7560 = vmatprep.subr.bf16.mxu0 %v9519_v46 }
0x12ab   : > { %v4001_v5 = vpop.permute.xlu1 %4000 }
0x12ac   : > { %v4006_v28 = vsel %vm2394_vm1, %v4001_v5, 0 }
0x12b0   : > { %7551 = vmatmul.mubr.msk.bf16.vlgmr.msra.gmra.mrb[32].mxu0 %vm2394_vm1, %v3756_v63 }
0x12b1   : > { %7561 = vmatpush3.bf16.xpose.msra.mxu0 %v3885_v3  ;;  %7562 = vmatprep.mubr.msk.bf16.mxu0 %vm9520_vm4, %v9519_v46 }
0x12b2   : > { %7572 = vmatprep.subr.bf16.mxu0 %v9519_v46 }
0x12b8   : > { %7563 = vmatmul.mubr.msk.bf16.vlgmr.msra.gmra.mrb[36].mxu0 %vm2394_vm1, %v3878_v6 }
0x12b9   : > { %7573 = vmatpush3.bf16.xpose.msra.mxu0 %v4006_v28  ;;  %7574 = vmatprep.mubr.msk.bf16.mxu0 %vm9520_vm4, %v9519_v46 }
0x12ba   : > { %7584 = vmatprep.subr.bf16.mxu0 %v9519_v46 }
0x12c0   : > { %7575 = vmatmul.mubr.msk.bf16.vlgmr.msra.gmra.mrb[40].mxu0 %vm2394_vm1, %v3999_v31 }
0x12c1   : > { %7585 = vmatpush3.bf16.msra.mxu0 %v10440_v27  ;;  %7588 = vmatprep.mubr.msk.bf16.mxu0 %vm9520_vm4, %v9519_v46 }
0x12c2   : > { %7586 = vmatprep.subr.bf16.mxu0 %v9519_v46 }
0x12c5   : > { %7587 = vmatpush3.bf16.msra.mxu0 %v10444_v14 }
0x12c6   : > { %7600 = vmatprep.subr.bf16.mxu0 %v9519_v46 }
0x12fc   : > { %v10612_v25 = vpop.f32.mrb[24].mxu0 }
0x12fd   : > { %v10614_v7 = vpop.f32.mrb[25].mxu0 }
0x12fe   : > { %v10616_v26 = vpop.f32.mrb[26].mxu0 }
0x12ff   : > { %v10618_v9 = vpop.f32.mrb[27].mxu0 }
0x137b   : > { %v3681_v11 = vpop.f32.mrb[28].mxu0 }
0x137c   : > { %v7540_v12 = vpop.f32.mrb[29].mxu0  ;;  %v3688_v27 = vsel %vm3139_vm2, %v3681_v11, -inf }
0x137d   : > { %3689 = vmax.xlane.f32.xlu1 %v3688_v27  ;;  %v3684_v13 = vpop.f32.mrb[30].mxu0 }
0x137e   : > { %v7541_v15 = vpop.f32.mrb[31].mxu0  ;;  %v3691_v16 = vsel %vm3139_vm2, %v3684_v13, -inf }
0x137f   : > { %3692 = vmax.xlane.f32.xlu0 %v3691_v16 }
0x1383   : > { %v3799_v14 = vpop.f32.mrb[32].mxu0 }
0x1384   : > { %v7552_v17 = vpop.f32.mrb[33].mxu0  ;;  %v3806_v18 = vsel %vm3139_vm2, %v3799_v14, -inf }
0x1385   : > { %3807 = vmax.xlane.f32.xlu0 %v3806_v18  ;;  %v3802_v22 = vpop.f32.mrb[34].mxu0 }
0x1386   : > { %v7553_v23 = vpop.f32.mrb[35].mxu0  ;;  %v3809_v24 = vsel %vm3139_vm2, %v3802_v22, -inf }
0x1387   : > { %3810 = vmax.xlane.f32.xlu1 %v3809_v24 }
0x138b   : > { %v3921_v37 = vpop.f32.mrb[36].mxu0 }
0x138c   : > { %v7564_v38 = vpop.f32.mrb[37].mxu0  ;;  %v3928_v39 = vsel %vm3139_vm2, %v3921_v37, -inf }
0x138d   : > { %3929 = vmax.xlane.f32.xlu0 %v3928_v39  ;;  %v3924_v40 = vpop.f32.mrb[38].mxu0 }
0x138e   : > { %v7565_v41 = vpop.f32.mrb[39].mxu0  ;;  %v3931_v42 = vsel %vm3139_vm2, %v3924_v40, -inf }
0x138f   : > { %3932 = vmax.xlane.f32.xlu1 %v3931_v42 }
0x1393   : > { %v4042_v43 = vpop.f32.mrb[40].mxu0 }
0x1394   : > { %v7576_v49 = vpop.f32.mrb[41].mxu0  ;;  %v4049_v50 = vsel %vm3139_vm2, %v4042_v43, -inf }
0x1395   : > { %4050 = vmax.xlane.f32.xlu0 %v4049_v50  ;;  %v10627_v51 = vpop.f32.mrb[42].mxu0 }
0x1396   : > { %v7577_v52 = vpop.f32.mrb[43].mxu0  ;;  %v4052_v53 = vsel %vm3139_vm2, %v10627_v51, -inf }
0x1397   : > { %4053 = vmax.xlane.f32.xlu1 %v4052_v53 }
0x140a   : > { %v3690_v59 = vpop.xlane.xlu1 %3689 }
0x140b   : > { %v3694_v60 = vsub.f32 %v3681_v11, %v3690_v59 }
0x140c   : > { %v3693_v62 = vpop.xlane.xlu0 %3692 }
0x140d   : > { %v3696_v63 = vmul.f32 1.442695, %v3694_v60  ;;  %v3695_v0 = vsub.f32 %v3684_v13, %v3693_v62 }
0x140f   : > { %8317 = vpow2.f32 %v3696_v63  ;;  %v3698_v2 = vmul.f32 1.442695, %v3695_v0 }
0x1411   : > { %8319 = vpow2.f32 %v3698_v2 }
0x1412   : > { %v3808_v3 = vpop.xlane.xlu0 %3807 }
0x1413   : > { %v3812_v5 = vsub.f32 %v3799_v14, %v3808_v3 }
0x1414   : > { %v3811_v6 = vpop.xlane.xlu1 %3810 }
0x1415   : > { %v3814_v28 = vmul.f32 1.442695, %v3812_v5  ;;  %v3813_v31 = vsub.f32 %v3802_v22, %v3811_v6 }
0x1417   : > { %8321 = vpow2.f32 %v3814_v28  ;;  %v3816_v12 = vmul.f32 1.442695, %v3813_v31 }
0x1419   : > { %v8318_v27 = vpop.eup %8317  ;;  %8323 = vpow2.f32 %v3816_v12 }
0x141a   : > { %v3930_v15 = vpop.xlane.xlu0 %3929  ;;  %v3700_v16 = vsel %vm3139_vm2, %v8318_v27, 0.0 }
0x141b   : > { %v8320_v17 = vpop.eup %8319  ;;  %v3934_v11 = vsub.f32 %v3921_v37, %v3930_v15  ;;  %3701 = vadd.xlane.f32.xlu0 %v3700_v16 }
0x141c   : > { %v3933_v18 = vpop.xlane.xlu1 %3932  ;;  %v3703_v13 = vsel %vm3139_vm2, %v8320_v17, 0.0 }
0x141d   : > { %v3936_v23 = vmul.f32 1.442695, %v3934_v11  ;;  %v3935_v24 = vsub.f32 %v3924_v40, %v3933_v18  ;;  %3704 = vadd.xlane.f32.xlu1 %v3703_v13 }
0x141f   : > { %8325 = vpow2.f32 %v3936_v23  ;;  %v3938_v14 = vmul.f32 1.442695, %v3935_v24 }
0x1421   : > { %v8322_v38 = vpop.eup %8321  ;;  %8327 = vpow2.f32 %v3938_v14 }
0x1422   : > { %v4051_v22 = vpop.xlane.xlu0 %4050  ;;  %v3818_v39 = vsel %vm3139_vm2, %v8322_v38, 0.0 }
0x1423   : > { %v8324_v41 = vpop.eup %8323  ;;  %v4055_v42 = vsub.f32 %v4042_v43, %v4051_v22  ;;  %3819 = vadd.xlane.f32.xlu0 %v3818_v39 }
0x1424   : > { %v3821_v49 = vsel %vm3139_vm2, %v8324_v41, 0.0  ;;  %v4054_v43 = vpop.xlane.xlu1 %4053 }
0x1425   : > { %v4057_v37 = vmul.f32 1.442695, %v4055_v42  ;;  %3822 = vadd.xlane.f32.xlu1 %v3821_v49  ;;  %v4056_v55 = vsub.f32 %v10627_v51, %v4054_v43 }
0x1427   : > { %8329 = vpow2.f32 %v4057_v37  ;;  %v4059_v34 = vmul.f32 1.442695, %v4056_v55 }
0x1429   : > { %v8326_v50 = vpop.eup %8325  ;;  %8331 = vpow2.f32 %v4059_v34 }
0x142a   : > { %v3940_v52 = vsel %vm3139_vm2, %v8326_v50, 0.0 }
0x142b   : > { %v8328_v40 = vpop.eup %8327  ;;  %3941 = vadd.xlane.f32.xlu0 %v3940_v52 }
0x142c   : > { %v3943_v53 = vsel %vm3139_vm2, %v8328_v40, 0.0 }
0x142d   : > { %3944 = vadd.xlane.f32.xlu1 %v3943_v53 }
0x1431   : > { %v8330_v54 = vpop.eup %8329 }
0x1432   : > { %v4061_v36 = vsel %vm3139_vm2, %v8330_v54, 0.0 }
0x1433   : > { %4062 = vadd.xlane.f32.xlu0 %v4061_v36  ;;  %v8332_v56 = vpop.eup %8331 }
0x1434   : > { %v4064_v57 = vsel %vm3139_vm2, %v8332_v56, 0.0 }
0x143e   : > { %3951 = vrot.lane.b32.xlu1 %v3637_v58, %s11321_s3 }
0x1449   : > { %3830 = vrot.lane.b32.xlu0 %v3637_v58, %s11322_s8 }
0x1462   : > { %4065 = vadd.xlane.f32.xlu1 %v4064_v57 }
0x1473   : > { %4072 = vrot.lane.b32.xlu1 %v3637_v58, %s11323_s28 }
0x14a8   : > { %v3702_v35 = vpop.xlane.xlu0 %3701 }
0x14a9   : > { %8333 = vrcp.f32 %v3702_v35 }
0x14aa   : > { %v3705_v59 = vpop.xlane.xlu1 %3704 }
0x14ab   : > { %8335 = vrcp.f32 %v3705_v59 }
0x14b0   : > { %v3820_v63 = vpop.xlane.xlu0 %3819 }
0x14b2   : > { %v3823_v60 = vpop.xlane.xlu1 %3822 }
0x14b3   : > { %v8334_v62 = vpop.eup %8333  ;;  %8337 = vrcp.f32 %v3823_v60 }
0x14b4   : > { %v3707_v2 = vmul.f32 %v8334_v62, %v8318_v27  ;;  %8339 = vrcp.f32 %v3820_v63 }
0x14b5   : > { %v8336_v0 = vpop.eup %8335 }
0x14b6   : > { %v3709_v3 = vmul.f32 %v8336_v0, %v8320_v17 }
0x14b8   : > { %v3710_v51 = vpack.c.bf16 %v3709_v3, %v3707_v2  ;;  %v3942_v58 = vpop.xlane.xlu0 %3941 }
0x14ba   : > { %7545 = vmatmul.mubr.msk.bf16.vlgmr.msra.gmra.mrb[32].mxu1 %vm3139_vm2, %v3710_v51  ;;  %v3945_v5 = vpop.xlane.xlu1 %3944 }
0x14bb   : > { %7556 = vmatprep.mubr.msk.bf16.mxu1 %vm9520_vm4, %v9519_v46  ;;  %8341 = vrcp.f32 %v3945_v5 }
0x14bc   : > { %8343 = vrcp.f32 %v3942_v58 }
0x14bd   : > { %v8338_v6 = vpop.eup %8337 }
0x14be   : > { %v8340_v31 = vpop.eup %8339  ;;  %v3827_v12 = vmul.f32 %v8338_v6, %v8324_v41  ;;  %v3952_v11 = vpop.permute.xlu1 %3951 }
0x14bf   : > { %v3825_v15 = vmul.f32 %v8340_v31, %v8322_v38 }
0x14c0   : > { %v4063_v28 = vpop.xlane.xlu0 %4062 }
0x14c1   : > { %v3828_v27 = vpack.c.bf16 %v3827_v12, %v3825_v15  ;;  %8345 = vrcp.f32 %v4063_v28 }
0x14c4   : > { %v3831_v16 = vpop.permute.xlu0 %3830 }
0x14c5   : > { %7555 = vmatpush3.bf16.msra.mxu1 %v3831_v16  ;;  %v8342_v17 = vpop.eup %8341 }
0x14c6   : > { %7566 = vmatprep.subr.bf16.mxu1 %v9519_v46  ;;  %v8344_v18 = vpop.eup %8343  ;;  %v3949_v13 = vmul.f32 %v8342_v17, %v8328_v40 }
0x14c7   : > { %v3947_v23 = vmul.f32 %v8344_v18, %v8326_v50 }
0x14c8   : > { %7557 = vmatmul.mubr.msk.bf16.vlgmr.msra.gmra.mrb[36].mxu1 %vm3139_vm2, %v3828_v27 }
0x14c9   : > { %7567 = vmatpush3.bf16.msra.mxu1 %v3952_v11  ;;  %7568 = vmatprep.mubr.msk.bf16.mxu1 %vm9520_vm4, %v9519_v46  ;;  %v3950_v24 = vpack.c.bf16 %v3949_v13, %v3947_v23  ;;  %v7129_v13 = vld [vmem:[#allocation17] ss:$0 sm:$0xff] }
0x14ca   : > { %7578 = vmatprep.subr.bf16.mxu1 %v9519_v46 }
0x14cb   : > { %v8346_v22 = vpop.eup %8345 }
0x14cc   : > { %v4068_v41 = vmul.f32 %v8346_v22, %v8330_v54  ;;  %v3454_v22 = vadd.f32 %v7129_v13, %v10614_v7 }
0x14ce   : > { %v3468_v7 = vadd.f32 %v3454_v22, %v10514_v4 }
0x14d0   : > { %7569 = vmatmul.mubr.msk.bf16.vlgmr.msra.gmra.mrb[40].mxu1 %vm3139_vm2, %v3950_v24  ;;  %v3457_v24 = vadd.f32 %v7129_v13, %v10618_v9  ;;  %v3462_v9 = vadd.f32 %v10612_v25, %v7129_v13 }
0x14d1   : > { %7580 = vmatprep.mubr.msk.bf16.mxu1 %vm9520_vm4, %v9519_v46 }
0x14ef   : > { %v4066_v14 = vpop.xlane.xlu1 %4065 }
0x14f0   : > { %8347 = vrcp.f32 %v4066_v14 }
0x14f3   : > { %v4073_v38 = vpop.permute.xlu1 %4072 }
0x14f4   : > { %7579 = vmatpush3.bf16.msra.mxu1 %v4073_v38 }
0x14f5   : > { %7592 = vmatprep.subr.bf16.mxu1 %v9519_v46 }
0x14fa   : > { %v8348_v39 = vpop.eup %8347 }
0x14fb   : > { %v4070_v42 = vmul.f32 %v8348_v39, %v8332_v56 }
0x14fd   : > { %v4071_v49 = vpack.c.bf16 %v4070_v42, %v4068_v41  ;;  %v3469_v42 = vadd.f32 %v3457_v24, %v10517_v8  ;;  %v3470_v8 = vadd.f32 %v3462_v9, %v10530_v10 }
0x14ff   : > { %7581 = vmatmul.mubr.msk.bf16.vlgmr.msra.gmra.mrb[44].mxu1 %vm3139_vm2, %v4071_v49  ;;  %v3478_v25 = vsel %vm2253_vm0, %v3470_v8, 0.0 }
0x1500   : > { %7593 = vmatpush3.bf16.msra.mxu1 %v10487_v44  ;;  %7596 = vmatprep.mubr.msk.bf16.mxu1 %vm9520_vm4, %v9519_v46 }
0x1501   : > { %7594 = vmatprep.subr.bf16.mxu1 %v9519_v46 }
0x1504   : > { %7595 = vmatpush3.bf16.msra.mxu1 %v10491_v45 }
0x158d   : > { %v3748_v37 = vpop.f32.mrb[32].mxu1 }
0x158e   : > { %v7546_v50 = vpop.f32.mrb[33].mxu1 }
0x158f   : > { %v3751_v52 = vpop.f32.mrb[34].mxu1  ;;  %v9521_v50 = vmov 0  }
0x1590   : > { %v7547_v40 = vpop.f32.mrb[35].mxu1  ;;  %8198 = vset.pattern.permute.xlu1 %v9521_v50  ;;  %8197 = vset.pattern.permute.xlu0 %v9521_v50 }
0x159b   : > { %v3870_v53 = vpop.f32.mrb[36].mxu1 }
0x159c   : > { %v7558_v36 = vpop.f32.mrb[37].mxu1 }
0x159d   : > { %v3873_v54 = vpop.f32.mrb[38].mxu1 }
0x159e   : > { %v8182_v43 = vpack.i.bf16 %v3873_v54, %v3870_v53  ;;  %v7559_v55 = vpop.f32.mrb[39].mxu1 }
0x15a0   : > { %8183 = vrot.lane.b32.xlu0 %v8182_v43, %s11326_s10 }
0x15a3   : > { %v3991_v34 = vpop.f32.mrb[40].mxu1 }
0x15a4   : > { %v7570_v44 = vpop.f32.mrb[41].mxu1 }
0x15a5   : > { %v3994_v56 = vpop.f32.mrb[42].mxu1 }
0x15a6   : > { %v8187_v57 = vpack.i.bf16 %v3994_v56, %v3991_v34  ;;  %v7571_v35 = vpop.f32.mrb[43].mxu1 }
0x15a8   : > { %8188 = vrot.lane.b32.xlu1 %v8187_v57, %s11327_s12 }
0x15d2   : > { %v4112_v59 = vpop.f32.mrb[44].mxu1 }
0x15d3   : > { %v7582_v45 = vpop.f32.mrb[45].mxu1 }
0x15d4   : > { %v4115_v60 = vpop.f32.mrb[46].mxu1 }
0x15d5   : > { %v8192_v62 = vpack.i.bf16 %v4115_v60, %v4112_v59  ;;  %v7583_v63 = vpop.f32.mrb[47].mxu1 }
0x15d7   : > { %8193 = vrot.lane.b32.xlu0 %v8192_v62, %s11328_s1 }
0x1612   : > { %v8184_v0 = vpop.permute.xlu0 %8183 }
0x1613   : > { %v8186_v3 = vunpack.i.h.bf16 %v8184_v0  ;;  %v8185_v51 = vunpack.i.l.bf16 %v8184_v0 }
0x1615   : > { %v4144_v28 = vsel %vm2394_vm1, %v3751_v52, %v8186_v3  ;;  %v4143_v31 = vsel %vm2394_vm1, %v3748_v37, %v8185_v51 }
0x161a   : > { %v8189_v2 = vpop.permute.xlu1 %8188 }
0x161b   : > { %v8191_v5 = vunpack.i.h.bf16 %v8189_v2  ;;  %v8190_v58 = vunpack.i.l.bf16 %v8189_v2 }
0x161d   : > { %v4146_v16 = vsel %vm3139_vm2, %v4144_v28, %v8191_v5  ;;  %v4145_v27 = vsel %vm3139_vm2, %v4143_v31, %v8190_v58 }
0x1649   : > { %v8194_v6 = vpop.permute.xlu0 %8193 }
0x164a   : > { %v8196_v12 = vunpack.i.h.bf16 %v8194_v6  ;;  %v8195_v15 = vunpack.i.l.bf16 %v8194_v6 }
0x164c   : > { %v4147_v17 = vsel %vm3144_vm3, %v4145_v27, %v8195_v15  ;;  %v4148_v11 = vsel %vm3144_vm3, %v4146_v16, %v8196_v12  ;;  %v2188_v15 = vld [vmem:[%s2161_s6 + $0x8] sm:$0xff]  ;;  %v2189_v16 = vld [vmem:[%s2161_s6 + $0x10] sm:$0xff]  ;;  %v2187_v27 = vld [vmem:[%s2161_s6] sm:$0xff] }
0x164d   : > { %v4149_v18 = vpack.c.bf16 %v4148_v11, %v4147_v17  ;;  %v2190_v17 = vld [vmem:[%s2161_s6 + $0x18] sm:$0xff]  ;;  %v4378_v11 = vld [vmem:[%s11330_s4] sm:$0xff]  ;;  %s11331_s6 = sld [smem:[#allocation89_spill]] }
0x164f   : > { %7589 = vmatmul.mubr.msk.bf16.vlgmr.msra.gmra.mrb[44].mxu0 %vm2253_vm0, %v4149_v18  ;;  %v4379_v18 = vld [vmem:[%s11330_s4 + $0x8] sm:$0xff] }
0x1650   : > { %7601 = vmatpush3.bf16.msra.mxu0 %v10498_v47  ;;  %7608 = vmatprep.mubr.msk.bf16.mxu0 %vm9520_vm4, %v9519_v46 }
0x1651   : > { %7602 = vmatprep.subr.bf16.mxu0 %v9519_v46 }
0x1654   : > { %7603 = vmatpush3.bf16.msra.mxu0 %v10501_v48 }
0x1655   : > { %7604 = vmatprep.subr.bf16.mxu0 %v9519_v46 }
0x1658   : > { %7605 = vmatpush3.bf16.msra.mxu0 %v10556_v19  ;;  %v3465_v19 = vadd.f32 %v10616_v26, %v7129_v13  ;;  %v3472_v26 = vsel %vm2253_vm0, %v3468_v7, 0.0  ;;  %v7806_v13 = vpack.c.bf16 %v4379_v18, %v4378_v11 }
0x1659   : > { %7606 = vmatprep.subr.bf16.mxu0 %v9519_v46 }
0x165a   : > { %7807 = vmatprep.subr.bf16.mxu1 %v7806_v13 }
0x165c   : > { %7607 = vmatpush3.bf16.msra.mxu0 %v10561_v20 }
0x1722   : > { %v4187_v23 = vpop.f32.mrb[44].mxu0 }
0x1723   : > { %v4188_v47 = vadd.f32 %v10468_v61, %v4187_v23  ;;  %v7590_v14 = vpop.f32.mrb[45].mxu0 }
0x1724   : > { %v4190_v38 = vpop.f32.mrb[46].mxu0 }
0x1725   : > { %v4194_v48 = vadd.f32 %v4188_v47, %v10535_v30  ;;  %v4191_v39 = vadd.f32 %v10468_v61, %v4190_v38  ;;  %v7591_v41 = vpop.f32.mrb[47].mxu0  ;;  %v3471_v30 = vadd.f32 %v3465_v19, %v10533_v29  ;;  %v3475_v61 = vsel %vm2253_vm0, %v3469_v42, 0.0 }
0x1727   : > { %v4196_v20 = vsel %vm2253_vm0, %v4194_v48, 0.0  ;;  %v4195_v49 = vadd.f32 %v4191_v39, %v10537_v32  ;;  %v3481_v32 = vsel %vm2253_vm0, %v3471_v30, 0.0 }
0x1728   : > { %4197 = vadd.xlane.f32.xlu1 %v4196_v20 }
0x1729   : > { %v4199_v37 = vsel %vm2253_vm0, %v4195_v49, 0.0 }
0x172a   : > { %4200 = vadd.xlane.f32.xlu0 %v4199_v37 }
0x172c   : > { %3476 = vadd.xlane.f32.xlu1 %v3475_v61 }
0x172e   : > { %3473 = vadd.xlane.f32.xlu0 %v3472_v26 }
0x1730   : > { %3482 = vadd.xlane.f32.xlu1 %v3481_v32 }
0x1732   : > { %3479 = vadd.xlane.f32.xlu0 %v3478_v25 }
0x17b5   : > { %v4198_v4 = vpop.xlane.xlu1 %4197 }
0x17b6   : > { %v4202_v52 = vmul.f32 0.03125, %v4198_v4 }
0x17b7   : > { %v4201_v29 = vpop.xlane.xlu0 %4200 }
0x17b8   : > { %v10699_v40 = vsub.f32 %v4194_v48, %v4202_v52  ;;  %v4203_v53 = vmul.f32 0.03125, %v4201_v29 }
0x17b9   : > { %v3477_v36 = vpop.xlane.xlu1 %3476 }
0x17ba   : > { %v10701_v54 = vsub.f32 %v4195_v49, %v4203_v53  ;;  %v3485_v10 = vmul.f32 0.03125, %v3477_v36  ;;  %v4206_v43 = vmul.f32 %v10699_v40, %v10699_v40  ;;  %v7136_v53 = vld [vmem:[#allocation19] ss:$0 sm:$0xff]  ;;  %v4380_v36 = vld [vmem:[%s11330_s4 + $0x10] sm:$0xff] }
0x17bb   : > { %v3474_v55 = vpop.xlane.xlu0 %3473 }
0x17bc   : > { %v10705_v34 = vsub.f32 %v3469_v42, %v3485_v10  ;;  %v3484_v44 = vmul.f32 0.03125, %v3474_v55  ;;  %v4208_v56 = vsel %vm2253_vm0, %v4206_v43, 0.0  ;;  %v4207_v57 = vmul.f32 %v10701_v54, %v10701_v54  ;;  %v4381_v10 = vld [vmem:[%s11330_s4 + $0x18] sm:$0xff] }
0x17bd   : > { %v3483_v35 = vpop.xlane.xlu1 %3482  ;;  %4209 = vadd.xlane.f32.xlu0 %v4208_v56 }
0x17be   : > { %v10710_v59 = vsub.f32 %v3468_v7, %v3484_v44  ;;  %v3487_v45 = vmul.f32 0.03125, %v3483_v35  ;;  %v4211_v60 = vsel %vm2253_vm0, %v4207_v57, 0.0  ;;  %v3493_v62 = vmul.f32 %v10705_v34, %v10705_v34 }
0x17bf   : > { %4212 = vadd.xlane.f32.xlu1 %v4211_v60  ;;  %v3480_v63 = vpop.xlane.xlu0 %3479 }
0x17c0   : > { %v10715_v0 = vsub.f32 %v3471_v30, %v3487_v45  ;;  %v3486_v2 = vmul.f32 0.03125, %v3480_v63  ;;  %v3492_v3 = vmul.f32 %v10710_v59, %v10710_v59  ;;  %v3499_v5 = vsel %vm2253_vm0, %v3493_v62, 0.0  ;;  %v4486_v63 = vld [vmem:[%s11331_s6] sm:$0xff] }
0x17c1   : > { %v7810_v45 = vpack.c.bf16 %v4381_v10, %v4380_v36 }
0x17c2   : > { %v10719_v51 = vsub.f32 %v3470_v8, %v3486_v2  ;;  %v3496_v58 = vsel %vm2253_vm0, %v3492_v3, 0.0  ;;  %v3495_v6 = vmul.f32 %v10715_v0, %v10715_v0  ;;  %v4487_v2 = vld [vmem:[%s11331_s6 + $0x8] sm:$0xff] }
0x17c3   : > { %3500 = vadd.xlane.f32.xlu1 %v3499_v5  ;;  %3497 = vadd.xlane.f32.xlu0 %v3496_v58 }
0x17c4   : > { %v3494_v28 = vmul.f32 %v10719_v51, %v10719_v51  ;;  %v3505_v31 = vsel %vm2253_vm0, %v3495_v6, 0.0 }
0x17c6   : > { %v3502_v12 = vsel %vm2253_vm0, %v3494_v28, 0.0 }
0x17c7   : > { %3506 = vadd.xlane.f32.xlu1 %v3505_v31  ;;  %3503 = vadd.xlane.f32.xlu0 %v3502_v12  ;;  %v7814_v31 = vpack.c.bf16 %v4487_v2, %v4486_v63 }
0x17d8   : > { %4357 = vperm.xlu1 %8198, %v2188_v15  }
0x17dc   : > { %4362 = vperm.xlu1 %8198, %v2189_v16   ;;  %v4488_v16 = vld [vmem:[%s11331_s6 + $0x10] sm:$0xff] }
0x17dd   : > { %4352 = vperm.xlu0 %8197, %v2187_v27   ;;  %v4489_v27 = vld [vmem:[%s11331_s6 + $0x18] sm:$0xff] }
0x17e0   : > { %4367 = vperm.xlu1 %8198, %v2190_v17  }
0x184a   : > { %v4210_v23 = vpop.xlane.xlu0 %4209 }
0x184b   : > { %v4214_v24 = vmul.f32 0.03125, %v4210_v23  ;;  %v7818_v23 = vpack.c.bf16 %v4489_v27, %v4488_v16 }
0x184c   : > { %v4213_v47 = vpop.xlane.xlu1 %4212 }
0x184d   : > { %v4216_v14 = vadd.f32 1e-05, %v4214_v24  ;;  %v4215_v38 = vmul.f32 0.03125, %v4213_v47 }
0x184f   : > { %8349 = vrsqrt.f32 %v4216_v14  ;;  %v4217_v22 = vadd.f32 1e-05, %v4215_v38 }
0x1850   : > { %v3501_v48 = vpop.xlane.xlu1 %3500  ;;  %v3498_v39 = vpop.xlane.xlu0 %3497 }
0x1851   : > { %8351 = vrsqrt.f32 %v4217_v22  ;;  %v3509_v41 = vmul.f32 0.03125, %v3501_v48  ;;  %v3508_v19 = vmul.f32 0.03125, %v3498_v39 }
0x1853   : > { %v3513_v42 = vadd.f32 1e-05, %v3509_v41  ;;  %v3512_v20 = vadd.f32 1e-05, %v3508_v19 }
0x1854   : > { %v3507_v49 = vpop.xlane.xlu1 %3506  ;;  %v3504_v9 = vpop.xlane.xlu0 %3503 }
0x1855   : > { %8353 = vrsqrt.f32 %v3513_v42  ;;  %v3511_v37 = vmul.f32 0.03125, %v3507_v49  ;;  %v3510_v7 = vmul.f32 0.03125, %v3504_v9 }
0x1856   : > { %8355 = vrsqrt.f32 %v3512_v20 }
0x1857   : > { %v3515_v30 = vadd.f32 1e-05, %v3511_v37  ;;  %v3514_v61 = vadd.f32 1e-05, %v3510_v7 }
0x1858   : > { %v4358_v25 = vpop.permute.xlu1 %4357 }
0x1859   : > { %v8350_v26 = vpop.eup %8349  ;;  %8357 = vrsqrt.f32 %v3515_v30 }
0x185a   : > { %v4220_v8 = vmul.f32 %v8350_v26, %v10699_v40  ;;  %8359 = vrsqrt.f32 %v3514_v61 }
0x185b   : > { %v8352_v32 = vpop.eup %8351 }
0x185c   : > { %v4222_v50 = vmul.f32 %v10507_v33, %v4220_v8  ;;  %v4221_v4 = vmul.f32 %v8352_v32, %v10701_v54  ;;  %v7137_v54 = vld [vmem:[#allocation20] ss:$0 sm:$0xff]  ;;  %v4363_v57 = vpop.permute.xlu1 %4362 }
0x185e   : > { %v4223_v52 = vmul.f32 %v10507_v33, %v4221_v4  ;;  %v10741_v40 = vadd.f32 %v10510_v1, %v4222_v50  ;;  %v7156_v4 = vld [vmem:[#allocation23] ss:$0 sm:$0xff] }
0x185f   : > { %v8354_v29 = vpop.eup %8353 }
0x1860   : > { %v8356_v43 = vpop.eup %8355  ;;  %v3521_v55 = vmul.f32 %v8354_v29, %v10705_v34  ;;  %v10744_v44 = vadd.f32 %v10510_v1, %v4223_v52  ;;  %v7151_v52 = vld [vmem:[#allocation22] ss:$0 sm:$0xff] }
0x1861   : > { %v3520_v56 = vmul.f32 %v8356_v43, %v10710_v59  ;;  %v4353_v59 = vpop.permute.xlu0 %4352 }
0x1862   : > { %v3531_v33 = vmul.f32 %v7136_v53, %v3521_v55  ;;  %v4226_v35 = vpack.c.bf16 %v10744_v44, %v10741_v40 }
0x1863   : > { %v8358_v60 = vpop.eup %8357  ;;  %v3530_v62 = vmul.f32 %v7136_v53, %v3520_v56 }
0x1864   : > { %v8360_v34 = vpop.eup %8359  ;;  %v3523_v3 = vmul.f32 %v8358_v60, %v10715_v0  ;;  %v10752_v1 = vadd.f32 %v7137_v54, %v3531_v33  ;;  %7597 = vmatmul.mubr.msk.bf16.vlgmr.msra.gmra.mrb[48].mxu1 %vm2253_vm0, %v4226_v35  ;;  %v4368_v0 = vpop.permute.xlu1 %4367 }
0x1865   : > { %v3522_v5 = vmul.f32 %v8360_v34, %v10719_v51  ;;  %7809 = vmatpush3.bf16.msra.mxu1 %v7806_v13  ;;  %v10756_v58 = vadd.f32 %v7137_v54, %v3530_v62 }
0x1866   : > { %v3533_v6 = vmul.f32 %v7136_v53, %v3523_v3  ;;  %v4371_v28 = vmul.f32 %v4358_v25, %v10752_v1  ;;  %7811 = vmatprep.subr.bf16.mxu1 %v7810_v45 }
0x1867   : > { %v3532_v12 = vmul.f32 %v7136_v53, %v3522_v5  ;;  %v4370_v15 = vmul.f32 %v4353_v59, %v10756_v58  ;;  %7620 = vmatprep.mubr.msk.f32.mxu1 %vm2253_vm0, %v10756_v58 }
0x1868   : > { %v4375_v17 = vadd.f32 %v4371_v28, %v10752_v1  ;;  %v10765_v51 = vadd.f32 %v7137_v54, %v3533_v6 }
0x1869   : > { %v10767_v11 = vadd.f32 %v7137_v54, %v3532_v12  ;;  %v4374_v18 = vadd.f32 %v4370_v15, %v10756_v58  ;;  %7813 = vmatpush3.bf16.msra.mxu1 %v7810_v45 }
0x186a   : > { %v4373_v13 = vmul.f32 %v4368_v0, %v10765_v51  ;;  %7815 = vmatprep.subr.bf16.mxu1 %v7814_v31  ;;  %v4832_v47 = vmul.f32 %v4375_v17, %v4358_v25 }
0x186b   : > { %v4372_v24 = vmul.f32 %v4363_v57, %v10767_v11  ;;  %v4831_v14 = vmul.f32 %v4374_v18, %v4353_v59 }
0x186c   : > { %v4377_v38 = vadd.f32 %v4373_v13, %v10765_v51  ;;  %7621 = vmatmul.mubr.msk.f32.vlgmr.msra.gmra.mrb[52].mxu1 %vm2253_vm0, %v10752_v1 }
0x186d   : > { %v4376_v22 = vadd.f32 %v4372_v24, %v10767_v11  ;;  %7817 = vmatpush3.bf16.msra.mxu1 %v7814_v31  ;;  %7623 = vmatprep.mubr.msk.f32.mxu1 %vm2253_vm0, %v10767_v11  ;;  %v4835_v39 = vpack.c.bf16 %v4832_v47, %v4831_v14 }
0x186e   : > { %7819 = vmatprep.subr.bf16.mxu1 %v7818_v23  ;;  %v4834_v41 = vmul.f32 %v4377_v38, %v4368_v0 }
0x186f   : > { %v4833_v48 = vmul.f32 %v4376_v22, %v4363_v57 }
0x1870   : > { %7624 = vmatmul.mubr.msk.f32.gmra.mrb[54].mxu1 %vm2253_vm0, %v10765_v51 }
0x1871   : > { %7821 = vmatpush3.bf16.msra.mxu1 %v7818_v23  ;;  %7634 = vmatprep.mubr.msk.f32.mxu1 %vm2253_vm0, %v4374_v18  ;;  %v4836_v19 = vpack.c.bf16 %v4834_v41, %v4833_v48 }
0x1872   : > { %7654 = vmatprep.subr.bf16.mxu1 %v4835_v39 }
0x1874   : > { %7635 = vmatmul.mubr.msk.f32.vlgmr.msra.gmra.mrb[56].mxu1 %vm2253_vm0, %v4375_v17 }
0x1875   : > { %7655 = vmatpush3.bf16.msra.mxu1 %v4835_v39  ;;  %7637 = vmatprep.mubr.msk.f32.mxu1 %vm2253_vm0, %v4376_v22 }
0x1876   : > { %7656 = vmatprep.subr.bf16.mxu1 %v4836_v19 }
0x1878   : > { %7638 = vmatmul.mubr.msk.f32.gmra.mrb[58].mxu1 %vm2253_vm0, %v4377_v38 }
0x1879   : > { %7657 = vmatpush3.bf16.msra.mxu1 %v4836_v19 }
0x1937   : > { %v4264_v42 = vpop.f32.mrb[48].mxu1 }
0x1938   : > { %v4265_v20 = vadd.f32 %v10566_v21, %v4264_v42  ;;  %v7598_v49 = vpop.f32.mrb[49].mxu1 }
0x1939   : > { %v4267_v9 = vpop.f32.mrb[50].mxu1 }
0x193a   : > { %v4268_v37 = vadd.f32 %v10566_v21, %v4267_v9  ;;  %v7599_v7 = vpop.f32.mrb[51].mxu1  ;;  %v4271_v30 = vmax.f32 %v4265_v20, 0.0 }
0x193c   : > { %v4272_v61 = vmax.f32 %v4268_v37, 0.0 }
0x193e   : > { %v4273_v26 = vpack.c.bf16 %v4272_v61, %v4271_v30 }
0x193f   : > { %v7622_v8 = vpop.f32.mrb[52].mxu1 }
0x1940   : > { %7609 = vmatmul.mubr.msk.bf16.vlgmr.msra.gmra.mrb[48].mxu0 %vm3412_vm5, %v4273_v26  ;;  %v4467_v32 = vpop.f32.mrb[53].mxu1  ;;  %v4473_v59 = vadd.f32 %v7622_v8, %v7151_v52 }
0x1941   : > { %v4468_v2 = vadd.f32 %v7151_v52, %v4467_v32 }
0x1942   : > { %v4595_v28 = vmul.f32 %v4473_v59, %v4473_v59 }
0x1943   : > { %v7625_v25 = vpop.f32.mrb[54].mxu1  ;;  %v4594_v5 = vmul.f32 %v4468_v2, %v4468_v2 }
0x1944   : > { %v4477_v50 = vpop.f32.mrb[55].mxu1  ;;  %v4483_v31 = vadd.f32 %v7625_v25, %v7151_v52  ;;  %v4601_v0 = vsel %vm3412_vm5, %v4595_v28, 0.0 }
0x1945   : > { %v10787_v53 = vadd.f32 %v7151_v52, %v4477_v50  ;;  %v4598_v12 = vsel %vm3412_vm5, %v4594_v5, 0.0 }
0x1946   : > { %v4597_v15 = vmul.f32 %v4483_v31, %v4483_v31 }
0x1947   : > { %v7636_v29 = vpop.f32.mrb[56].mxu1  ;;  %v4596_v54 = vmul.f32 %v10787_v53, %v10787_v53 }
0x1948   : > { %v4581_v36 = vadd.f32 %v7636_v29, %v7156_v4  ;;  %v4575_v10 = vpop.f32.mrb[57].mxu1  ;;  %v4607_v16 = vsel %vm3412_vm5, %v4597_v15, 0.0 }
0x1949   : > { %v4576_v43 = vadd.f32 %v7156_v4, %v4575_v10  ;;  %v4604_v63 = vsel %vm3412_vm5, %v4596_v54, 0.0 }
0x194a   : > { %v4623_v55 = vmul.f32 %v4581_v36, %v4581_v36 }
0x194b   : > { %v4622_v21 = vmul.f32 %v4576_v43, %v4576_v43  ;;  %v7639_v56 = vpop.f32.mrb[58].mxu1 }
0x194c   : > { %v4585_v57 = vpop.f32.mrb[59].mxu1  ;;  %v4629_v33 = vsel %vm3412_vm5, %v4623_v55, 0.0  ;;  %v4591_v35 = vadd.f32 %v7639_v56, %v7156_v4 }
0x194d   : > { %v4586_v45 = vadd.f32 %v7156_v4, %v4585_v57  ;;  %4630 = vadd.xlane.f32.xlu0 %v4629_v33  ;;  %v4626_v60 = vsel %vm3412_vm5, %v4622_v21, 0.0 }
0x194e   : > { %4627 = vadd.xlane.f32.xlu1 %v4626_v60  ;;  %v4625_v34 = vmul.f32 %v4591_v35, %v4591_v35 }
0x194f   : > { %v4624_v62 = vmul.f32 %v4586_v45, %v4586_v45 }
0x1950   : > { %v4635_v6 = vsel %vm3412_vm5, %v4625_v34, 0.0 }
0x1951   : > { %4605 = vadd.xlane.f32.xlu0 %v4604_v63  ;;  %v4632_v3 = vsel %vm3412_vm5, %v4624_v62, 0.0 }
0x1952   : > { %4633 = vadd.xlane.f32.xlu1 %v4632_v3 }
0x1956   : > { %4636 = vadd.xlane.f32.xlu1 %v4635_v6 }
0x195a   : > { %4599 = vadd.xlane.f32.xlu1 %v4598_v12 }
0x195e   : > { %4602 = vadd.xlane.f32.xlu1 %v4601_v0 }
0x1962   : > { %4608 = vadd.xlane.f32.xlu1 %v4607_v16 }
0x19da   : > { %v4631_v27 = vpop.xlane.xlu0 %4630 }
0x19db   : > { %v4639_v17 = vmax.f32 %v4631_v27, 1e-24  ;;  %v4628_v18 = vpop.xlane.xlu1 %4627 }
0x19dc   : > { %v4638_v13 = vmax.f32 %v4628_v18, 1e-24 }
0x19dd   : > { %8361 = vrsqrt.f32 %v4639_v17 }
0x19de   : > { %8363 = vrsqrt.f32 %v4638_v13  ;;  %v4606_v39 = vpop.xlane.xlu0 %4605 }
0x19df   : > { %v4634_v23 = vpop.xlane.xlu1 %4633  ;;  %v4612_v49 = vmax.f32 %v4606_v39, 1e-24 }
0x19e0   : > { %v4640_v24 = vmax.f32 %v4634_v23, 1e-24 }
0x19e2   : > { %8365 = vrsqrt.f32 %v4640_v24 }
0x19e3   : > { %v4637_v47 = vpop.xlane.xlu1 %4636 }
0x19e4   : > { %v4641_v14 = vmax.f32 %v4637_v47, 1e-24 }
0x19e6   : > { %8367 = vrsqrt.f32 %v4641_v14 }
0x19e7   : > { %v8362_v38 = vpop.eup %8361  ;;  %v4600_v22 = vpop.xlane.xlu1 %4599 }
0x19e8   : > { %v8364_v48 = vpop.eup %8363  ;;  %v4610_v41 = vmax.f32 %v4600_v22, 1e-24  ;;  %v4647_v19 = vmul.f32 %v8362_v38, %v4581_v36 }
0x19e9   : > { %v4646_v42 = vmul.f32 %v8364_v48, %v4576_v43 }
0x19ea   : > { %8369 = vrsqrt.f32 %v4610_v41 }
0x19eb   : > { %v4603_v9 = vpop.xlane.xlu1 %4602  ;;  %v7822_v37 = vpack.c.bf16 %v4647_v19, %v4646_v42 }
0x19ec   : > { %v4611_v7 = vmax.f32 %v4603_v9, 1e-24  ;;  %v8366_v30 = vpop.eup %8365 }
0x19ed   : > { %7824 = vmatprep.subr.msk.bf16.mxu0 %vm10801_vm6, %v7822_v37  ;;  %v4648_v32 = vmul.f32 %v8366_v30, %v4586_v45 }
0x19ee   : > { %8371 = vrsqrt.f32 %v4611_v7  ;;  %7827 = vmatpush3.bf16.xpose.msk.msra.mxu0 %vm10801_vm6, %v7822_v37  ;;  %v7169_v7 = vld [vmem:[%s2164_s5] ss:$0 sm:$0xff]  ;;  %s11336_s5 = sld [smem:[#allocation97_spill]] }
0x19ef   : > { %8373 = vrsqrt.f32 %v4612_v49  ;;  %v4609_v61 = vpop.xlane.xlu1 %4608 }
0x19f0   : > { %v8368_v26 = vpop.eup %8367  ;;  %v4613_v8 = vmax.f32 %v4609_v61, 1e-24 }
0x19f1   : > { %v4649_v25 = vmul.f32 %v8368_v26, %v4591_v35 }
0x19f2   : > { %8375 = vrsqrt.f32 %v4613_v8 }
0x19f3   : > { %v7828_v50 = vpack.c.bf16 %v4649_v25, %v4648_v32 }
0x19f4   : > { %v8370_v4 = vpop.eup %8369 }
0x19f5   : > { %7830 = vmatprep.subr.msk.bf16.mxu0 %vm10801_vm6, %v7828_v50  ;;  %v4618_v52 = vmul.f32 %v8370_v4, %v4468_v2 }
0x19f6   : > { %7833 = vmatpush3.bf16.xpose.msk.msra.mxu0 %vm10801_vm6, %v7828_v50 }
0x19f7   : > { %7648 = vmatprep.mubr.msk.f32.mxu0 %vm3412_vm5, %v4618_v52  ;;  %7670 = vmatprep.subr.bf16.mxu0 %v9519_v46 }
0x19f8   : > { %v8372_v29 = vpop.eup %8371 }
0x19f9   : > { %v8374_v36 = vpop.eup %8373  ;;  %v4619_v10 = vmul.f32 %v8372_v29, %v4473_v59 }
0x19fa   : > { %v4620_v55 = vmul.f32 %v8374_v36, %v10787_v53 }
0x19fc   : > { %v8376_v43 = vpop.eup %8375 }
0x19fd   : > { %7649 = vmatmul.mubr.msk.f32.vlgmr.msra.gmra.mrb[52].mxu0 %vm3412_vm5, %v4619_v10  ;;  %v4621_v21 = vmul.f32 %v8376_v43, %v4483_v31 }
0x19fe   : > { %7651 = vmatprep.mubr.msk.f32.mxu0 %vm3412_vm5, %v4620_v55 }
0x1a01   : > { %7652 = vmatmul.mubr.msk.f32.gmra.mrb[54].mxu0 %vm3412_vm5, %v4621_v21 }
0x1a02   : > { %7674 = vmatprep.mubr.msk.bf16.mxu0 %vm9520_vm4, %v9519_v46 }
0x1a13   : > { %v10821_v56 = vpop.f32.mrb[48].mxu0 }
0x1a14   : > { %v7610_v54 = vpop.f32.mrb[49].mxu0 }
0x1a15   : > { %v10823_v57 = vpop.f32.mrb[50].mxu0 }
0x1a16   : > { %v7611_v33 = vpop.f32.mrb[51].mxu0 }
0x1ad0   : > { %v7650_v35 = vpop.f32.mrb[52].mxu0 }
0x1ad1   : > { %v4760_v45 = vmul.f32 30.0, %v7650_v35  ;;  %v4740_v60 = vpop.f32.mrb[53].mxu0 }
0x1ad2   : > { %v4759_v53 = vmul.f32 30.0, %v4740_v60 }
0x1ad3   : > { %v4766_v62 = vsel %vm2253_vm0, %v4760_v45, -inf }
0x1ad4   : > { %4767 = vmax.xlane.f32.xlu1 %v4766_v62  ;;  %v7653_v63 = vpop.f32.mrb[54].mxu0  ;;  %v4763_v2 = vsel %vm2253_vm0, %v4759_v53, -inf }
0x1ad5   : > { %v4762_v34 = vmul.f32 30.0, %v7653_v63  ;;  %4764 = vmax.xlane.f32.xlu0 %v4763_v2  ;;  %v4750_v3 = vpop.f32.mrb[55].mxu0 }
0x1ad6   : > { %v4761_v59 = vmul.f32 30.0, %v4750_v3 }
0x1ad7   : > { %v4772_v5 = vsel %vm2253_vm0, %v4762_v34, -inf }
0x1ad8   : > { %4773 = vmax.xlane.f32.xlu1 %v4772_v5  ;;  %v4769_v6 = vsel %vm2253_vm0, %v4761_v59, -inf }
0x1ad9   : > { %4770 = vmax.xlane.f32.xlu0 %v4769_v6 }
0x1b61   : > { %v4768_v28 = vpop.xlane.xlu1 %4767 }
0x1b62   : > { %v4776_v31 = vsub.f32 %v4760_v45, %v4768_v28  ;;  %v4765_v12 = vpop.xlane.xlu0 %4764 }
0x1b63   : > { %v4775_v15 = vsub.f32 %v4759_v53, %v4765_v12 }
0x1b64   : > { %v4781_v0 = vmul.f32 1.442695, %v4776_v31 }
0x1b65   : > { %v4779_v16 = vmul.f32 1.442695, %v4775_v15  ;;  %v4774_v27 = vpop.xlane.xlu1 %4773 }
0x1b66   : > { %8377 = vpow2.f32 %v4781_v0  ;;  %v4778_v17 = vsub.f32 %v4762_v34, %v4774_v27  ;;  %v4771_v18 = vpop.xlane.xlu0 %4770 }
0x1b67   : > { %8379 = vpow2.f32 %v4779_v16  ;;  %v4777_v13 = vsub.f32 %v4761_v59, %v4771_v18 }
0x1b68   : > { %v4785_v23 = vmul.f32 1.442695, %v4778_v17 }
0x1b69   : > { %v4783_v24 = vmul.f32 1.442695, %v4777_v13 }
0x1b6a   : > { %8381 = vpow2.f32 %v4785_v23 }
0x1b6b   : > { %8383 = vpow2.f32 %v4783_v24 }
0x1b70   : > { %v8378_v47 = vpop.eup %8377 }
0x1b71   : > { %v8380_v14 = vpop.eup %8379  ;;  %v4790_v38 = vsel %vm2253_vm0, %v8378_v47, 0.0 }
0x1b72   : > { %4791 = vadd.xlane.f32.xlu1 %v4790_v38  ;;  %v4787_v22 = vsel %vm2253_vm0, %v8380_v14, 0.0 }
0x1b73   : > { %4788 = vadd.xlane.f32.xlu0 %v4787_v22 }
0x1b74   : > { %v8382_v48 = vpop.eup %8381 }
0x1b75   : > { %v8384_v39 = vpop.eup %8383  ;;  %v4796_v41 = vsel %vm2253_vm0, %v8382_v48, 0.0 }
0x1b76   : > { %4797 = vadd.xlane.f32.xlu1 %v4796_v41  ;;  %v4793_v19 = vsel %vm2253_vm0, %v8384_v39, 0.0 }
0x1b77   : > { %4794 = vadd.xlane.f32.xlu0 %v4793_v19 }
0x1bff   : > { %v4792_v42 = vpop.xlane.xlu1 %4791 }
0x1c00   : > { %8385 = vrcp.f32 %v4792_v42  ;;  %v4789_v20 = vpop.xlane.xlu0 %4788 }
0x1c01   : > { %8387 = vrcp.f32 %v4789_v20 }
0x1c03   : > { %v4798_v49 = vpop.xlane.xlu1 %4797 }
0x1c04   : > { %8389 = vrcp.f32 %v4798_v49  ;;  %v4795_v9 = vpop.xlane.xlu0 %4794 }
0x1c05   : > { %8391 = vrcp.f32 %v4795_v9 }
0x1c0a   : > { %v8386_v37 = vpop.eup %8385 }
0x1c0b   : > { %v8388_v30 = vpop.eup %8387  ;;  %v4802_v61 = vmul.f32 %v8386_v37, %v8378_v47 }
0x1c0c   : > { %v4800_v26 = vmul.f32 %v8388_v30, %v8380_v14 }
0x1c0d   : > { %v4814_v8 = vmul.f32 %v7169_v7, %v4802_v61 }
0x1c0e   : > { %v8390_v32 = vpop.eup %8389  ;;  %v4829_v25 = vpack.c.bf16 %v4802_v61, %v4800_v26  ;;  %v4813_v50 = vmul.f32 %v7169_v7, %v4800_v26 }
0x1c0f   : > { %v8392_v4 = vpop.eup %8391  ;;  %v4806_v52 = vmul.f32 %v8390_v32, %v8382_v48  ;;  %v4820_v29 = vsel %vm2253_vm0, %v4814_v8, 0.0 }
0x1c10   : > { %v4804_v36 = vmul.f32 %v8392_v4, %v8384_v39  ;;  %7658 = vmatprep.mubr.msk.bf16.mxu1 %vm2253_vm0, %v4829_v25  ;;  %4821 = vadd.xlane.f32.xlu1 %v4820_v29  ;;  %v4817_v10 = vsel %vm2253_vm0, %v4813_v50, 0.0 }
0x1c11   : > { %4818 = vadd.xlane.f32.xlu0 %v4817_v10  ;;  %v4816_v43 = vmul.f32 %v7169_v7, %v4806_v52 }
0x1c12   : > { %v4830_v55 = vpack.c.bf16 %v4806_v52, %v4804_v36  ;;  %v4815_v21 = vmul.f32 %v7169_v7, %v4804_v36 }
0x1c13   : > { %v4826_v54 = vsel %vm2253_vm0, %v4816_v43, 0.0 }
0x1c14   : > { %7659 = vmatmul.mubr.msk.bf16.vlgmr.msra.gmra.mrb[60].mxu1 %vm2253_vm0, %v4830_v55  ;;  %4827 = vadd.xlane.f32.xlu1 %v4826_v54  ;;  %v4823_v33 = vsel %vm2253_vm0, %v4815_v21, 0.0 }
0x1c15   : > { %4824 = vadd.xlane.f32.xlu0 %v4823_v33 }
0x1c9d   : > { %v4822_v35 = vpop.xlane.xlu1 %4821 }
0x1c9e   : > { %v4893_v45 = vmul.f32 %v4822_v35, %v10752_v1  ;;  %v4819_v60 = vpop.xlane.xlu0 %4818 }
0x1c9f   : > { %v4892_v53 = vmul.f32 %v4819_v60, %v10756_v58 }
0x1ca0   : > { %v4901_v62 = vsel %vm2253_vm0, %v4893_v45, 0.0 }
0x1ca1   : > { %4902 = vadd.xlane.f32.xlu1 %v4901_v62  ;;  %v4828_v63 = vpop.xlane.xlu1 %4827  ;;  %v4898_v2 = vsel %vm2253_vm0, %v4892_v53, 0.0 }
0x1ca2   : > { %v4895_v34 = vmul.f32 %v4828_v63, %v10765_v51  ;;  %4899 = vadd.xlane.f32.xlu0 %v4898_v2  ;;  %v4825_v3 = vpop.xlane.xlu0 %4824  ;;  %v8226_v63 = vld [vmem:[#allocation31] sm:$0xff]   ;;  %v8227_v2 = vld [vmem:[#allocation31 + $0x8] sm:$0xff]  }
0x1ca3   : > { %v4894_v59 = vmul.f32 %v4825_v3, %v10767_v11  ;;  %7662 = vmatprep.subr.bf16.mxu1 %v8226_v63 }
0x1ca4   : > { %v4907_v5 = vsel %vm2253_vm0, %v4895_v34, 0.0  ;;  %7663 = vmatpush3.bf16.msra.mxu1 %v8226_v63 }
0x1ca5   : > { %4908 = vadd.xlane.f32.xlu1 %v4907_v5  ;;  %v4904_v6 = vsel %vm2253_vm0, %v4894_v59, 0.0  ;;  %7664 = vmatprep.subr.bf16.mxu1 %v8227_v2 }
0x1ca6   : > { %4905 = vadd.xlane.f32.xlu0 %v4904_v6 }
0x1ca8   : > { %7665 = vmatpush3.bf16.msra.mxu1 %v8227_v2 }
0x1ce7   : > { %v7660_v28 = vpop.f32.mrb[60].mxu1 }
0x1ce8   : > { %v4877_v31 = vpop.f32.mrb[61].mxu1  ;;  %v4972_v16 = vadd.f32 %v7660_v28, %v10767_v11 }
0x1ce9   : > { %v4970_v12 = vadd.f32 %v4877_v31, %v10756_v58  ;;  %v7661_v15 = vpop.f32.mrb[62].mxu1 }
0x1cea   : > { %v4880_v0 = vpop.f32.mrb[63].mxu1  ;;  %v4973_v18 = vadd.f32 %v7661_v15, %v10765_v51  ;;  %v4982_v23 = vsel %vm2253_vm0, %v4972_v16, 0.0 }
0x1ceb   : > { %v4971_v27 = vadd.f32 %v4880_v0, %v10752_v1  ;;  %v4976_v17 = vsel %vm2253_vm0, %v4970_v12, 0.0 }
0x1cec   : > { %4977 = vadd.xlane.f32.xlu0 %v4976_v17  ;;  %v4985_v24 = vsel %vm2253_vm0, %v4973_v18, 0.0 }
0x1ced   : > { %v4979_v13 = vsel %vm2253_vm0, %v4971_v27, 0.0 }
0x1cee   : > { %4980 = vadd.xlane.f32.xlu1 %v4979_v13 }
0x1cf0   : > { %4983 = vadd.xlane.f32.xlu0 %v4982_v23 }
0x1cf2   : > { %4986 = vadd.xlane.f32.xlu1 %v4985_v24 }
0x1d2e   : > { %v4903_v58 = vpop.xlane.xlu1 %4902 }
0x1d2f   : > { %v4911_v47 = vmul.f32 0.03125, %v4903_v58  ;;  %v4900_v14 = vpop.xlane.xlu0 %4899 }
0x1d30   : > { %v4910_v11 = vmul.f32 0.03125, %v4900_v14 }
0x1d31   : > { %v10857_v38 = vsub.f32 %v4893_v45, %v4911_v47 }
0x1d32   : > { %v10859_v1 = vsub.f32 %v4892_v53, %v4910_v11  ;;  %v4909_v22 = vpop.xlane.xlu1 %4908 }
0x1d33   : > { %v4913_v48 = vmul.f32 0.03125, %v4909_v22  ;;  %v4906_v51 = vpop.xlane.xlu0 %4905  ;;  %v4919_v39 = vmul.f32 %v10857_v38, %v10857_v38 }
0x1d34   : > { %v4912_v41 = vmul.f32 0.03125, %v4906_v51  ;;  %v4918_v19 = vmul.f32 %v10859_v1, %v10859_v1 }
0x1d35   : > { %v10865_v42 = vsub.f32 %v4895_v34, %v4913_v48  ;;  %v4925_v20 = vsel %vm2253_vm0, %v4919_v39, 0.0 }
0x1d36   : > { %v10868_v49 = vsub.f32 %v4894_v59, %v4912_v41  ;;  %4926 = vadd.xlane.f32.xlu1 %v4925_v20  ;;  %v4922_v9 = vsel %vm2253_vm0, %v4918_v19, 0.0 }
0x1d37   : > { %4923 = vadd.xlane.f32.xlu0 %v4922_v9  ;;  %v4921_v37 = vmul.f32 %v10865_v42, %v10865_v42 }
0x1d38   : > { %v4920_v7 = vmul.f32 %v10868_v49, %v10868_v49 }
0x1d39   : > { %v4931_v30 = vsel %vm2253_vm0, %v4921_v37, 0.0 }
0x1d3a   : > { %4932 = vadd.xlane.f32.xlu1 %v4931_v30  ;;  %v4928_v61 = vsel %vm2253_vm0, %v4920_v7, 0.0  ;;  %v7172_v7 = vld [vmem:[#allocation25] ss:$0 sm:$0xff] }
0x1d3b   : > { %4929 = vadd.xlane.f32.xlu0 %v4928_v61  ;;  %v7174_v61 = vld [vmem:[#allocation28] ss:$0 sm:$0xff] }
0x1d79   : > { %v4978_v26 = vpop.xlane.xlu0 %4977 }
0x1d7a   : > { %v4988_v8 = vmul.f32 0.03125, %v4978_v26 }
0x1d7b   : > { %v4981_v32 = vpop.xlane.xlu1 %4980 }
0x1d7c   : > { %v10877_v25 = vsub.f32 %v4970_v12, %v4988_v8  ;;  %v4989_v50 = vmul.f32 0.03125, %v4981_v32 }
0x1d7d   : > { %v4984_v4 = vpop.xlane.xlu0 %4983 }
0x1d7e   : > { %v10879_v52 = vsub.f32 %v4971_v27, %v4989_v50  ;;  %v4990_v29 = vmul.f32 0.03125, %v4984_v4  ;;  %v4996_v36 = vmul.f32 %v10877_v25, %v10877_v25 }
0x1d7f   : > { %v4987_v10 = vpop.xlane.xlu1 %4986 }
0x1d80   : > { %v10883_v43 = vsub.f32 %v4972_v16, %v4990_v29  ;;  %v4991_v55 = vmul.f32 0.03125, %v4987_v10  ;;  %v5000_v21 = vsel %vm2253_vm0, %v4996_v36, 0.0  ;;  %v4997_v54 = vmul.f32 %v10879_v52, %v10879_v52  ;;  %v7175_v29 = vld [vmem:[#allocation29] ss:$0 sm:$0xff] }
0x1d81   : > { %5001 = vadd.xlane.f32.xlu0 %v5000_v21 }
0x1d82   : > { %v10888_v33 = vsub.f32 %v4973_v18, %v4991_v55  ;;  %v5003_v35 = vsel %vm2253_vm0, %v4997_v54, 0.0  ;;  %v4998_v45 = vmul.f32 %v10883_v43, %v10883_v43  ;;  %v7173_v55 = vld [vmem:[#allocation26] ss:$0 sm:$0xff] }
0x1d83   : > { %5004 = vadd.xlane.f32.xlu1 %v5003_v35 }
0x1d84   : > { %v5006_v60 = vsel %vm2253_vm0, %v4998_v45, 0.0  ;;  %v4999_v53 = vmul.f32 %v10888_v33, %v10888_v33 }
0x1d85   : > { %5007 = vadd.xlane.f32.xlu0 %v5006_v60 }
0x1d86   : > { %v5009_v62 = vsel %vm2253_vm0, %v4999_v53, 0.0 }
0x1d87   : > { %5010 = vadd.xlane.f32.xlu1 %v5009_v62 }
0x1dc3   : > { %v4927_v34 = vpop.xlane.xlu1 %4926 }
0x1dc4   : > { %v4924_v3 = vpop.xlane.xlu0 %4923  ;;  %v4935_v59 = vmul.f32 0.03125, %v4927_v34 }
0x1dc5   : > { %v4934_v5 = vmul.f32 0.03125, %v4924_v3 }
0x1dc6   : > { %v4939_v31 = vadd.f32 1e-05, %v4935_v59 }
0x1dc7   : > { %v4933_v6 = vpop.xlane.xlu1 %4932  ;;  %v4938_v15 = vadd.f32 1e-05, %v4934_v5 }
0x1dc8   : > { %v4930_v28 = vpop.xlane.xlu0 %4929  ;;  %v4937_v12 = vmul.f32 0.03125, %v4933_v6  ;;  %8393 = vrsqrt.f32 %v4939_v31 }
0x1dc9   : > { %v4936_v0 = vmul.f32 0.03125, %v4930_v28  ;;  %8395 = vrsqrt.f32 %v4938_v15  ;;  %v7176_v15 = vld [vmem:[#allocation32] ss:$0 sm:$0xff] }
0x1dca   : > { %v4941_v16 = vadd.f32 1e-05, %v4937_v12 }
0x1dcb   : > { %v4940_v27 = vadd.f32 1e-05, %v4936_v0 }
0x1dcc   : > { %8397 = vrsqrt.f32 %v4941_v16 }
0x1dcd   : > { %8399 = vrsqrt.f32 %v4940_v27 }
0x1dd2   : > { %v8394_v51 = vpop.eup %8393 }
0x1dd3   : > { %v8396_v41 = vpop.eup %8395  ;;  %v4947_v20 = vmul.f32 %v8394_v51, %v10857_v38 }
0x1dd4   : > { %v4946_v9 = vmul.f32 %v8396_v41, %v10859_v1 }
0x1dd5   : > { %v4957_v4 = vmul.f32 %v7172_v7, %v4947_v20 }
0x1dd6   : > { %v8398_v19 = vpop.eup %8397  ;;  %v4956_v50 = vmul.f32 %v7172_v7, %v4946_v9 }
0x1dd7   : > { %v8400_v37 = vpop.eup %8399  ;;  %v4949_v32 = vmul.f32 %v8398_v19, %v10865_v42  ;;  %v4967_v53 = vadd.f32 %v7173_v55, %v4957_v4 }
0x1dd8   : > { %v4948_v36 = vmul.f32 %v8400_v37, %v10868_v49 }
0x1dd9   : > { %v4959_v60 = vmul.f32 %v7172_v7, %v4949_v32 }
0x1dda   : > { %v4958_v62 = vmul.f32 %v7172_v7, %v4948_v36 }
0x1ddb   : > { %v4969_v6 = vadd.f32 %v7173_v55, %v4959_v60 }
0x1ddc   : > { %v4968_v5 = vadd.f32 %v7173_v55, %v4958_v62 }
0x1e0e   : > { %v5002_v17 = vpop.xlane.xlu0 %5001 }
0x1e0f   : > { %v5012_v18 = vmul.f32 0.03125, %v5002_v17 }
0x1e10   : > { %v5005_v13 = vpop.xlane.xlu1 %5004 }
0x1e11   : > { %v5016_v23 = vadd.f32 1e-05, %v5012_v18  ;;  %v5013_v24 = vmul.f32 0.03125, %v5005_v13  ;;  %v8475_v18 = vld [vmem:[#allocation17] ss:$0 sm:$0xff] }
0x1e12   : > { %v5008_v58 = vpop.xlane.xlu0 %5007  ;;  %v4312_v13 = vadd.f32 %v8475_v18, %v10821_v56 }
0x1e13   : > { %8401 = vrsqrt.f32 %v5016_v23  ;;  %v5017_v47 = vadd.f32 1e-05, %v5013_v24  ;;  %v5014_v14 = vmul.f32 0.03125, %v5008_v58 }
0x1e14   : > { %v5011_v11 = vpop.xlane.xlu1 %5010 }
0x1e15   : > { %8403 = vrsqrt.f32 %v5017_v47  ;;  %v5018_v22 = vadd.f32 1e-05, %v5014_v14  ;;  %v5015_v48 = vmul.f32 0.03125, %v5011_v11  ;;  %v4315_v47 = vadd.f32 %v8475_v18, %v10823_v57 }
0x1e17   : > { %8405 = vrsqrt.f32 %v5018_v22  ;;  %v5019_v39 = vadd.f32 1e-05, %v5015_v48  ;;  %v4318_v22 = vadd.f32 %v4312_v13, %v10741_v40  ;;  %v4319_v51 = vadd.f32 %v4315_v47, %v10744_v44  ;;  %v7181_v47 = vld [vmem:[#allocation34] ss:$0 sm:$0xff] }
0x1e19   : > { %8407 = vrsqrt.f32 %v5019_v39  ;;  %v4320_v39 = vsel %vm2253_vm0, %v4318_v22, 0.0  ;;  %v4323_v41 = vsel %vm2253_vm0, %v4319_v51, 0.0 }
0x1e1d   : > { %v8402_v30 = vpop.eup %8401 }
0x1e1e   : > { %v5024_v26 = vmul.f32 %v8402_v30, %v10877_v25  ;;  %v4966_v25 = vadd.f32 %v7173_v55, %v4956_v50 }
0x1e1f   : > { %v8404_v8 = vpop.eup %8403 }
0x1e20   : > { %v5025_v10 = vmul.f32 %v8404_v8, %v10879_v52  ;;  %v5034_v38 = vmul.f32 %v7174_v61, %v5024_v26 }
0x1e21   : > { %v8406_v21 = vpop.eup %8405 }
0x1e22   : > { %v5026_v1 = vmul.f32 %v8406_v21, %v10883_v43  ;;  %v5035_v54 = vmul.f32 %v7174_v61, %v5025_v10  ;;  %v5044_v35 = vadd.f32 %v7175_v29, %v5034_v38 }
0x1e23   : > { %v8408_v45 = vpop.eup %8407 }
0x1e24   : > { %v5036_v42 = vmul.f32 %v7174_v61, %v5026_v1  ;;  %v5027_v63 = vmul.f32 %v8408_v45, %v10888_v33  ;;  %v5045_v2 = vadd.f32 %v7175_v29, %v5035_v54  ;;  %v5048_v49 = vadd.f32 %v5044_v35, %v4966_v25 }
0x1e26   : > { %v5037_v34 = vmul.f32 %v7174_v61, %v5027_v63  ;;  %v5049_v3 = vadd.f32 %v5045_v2, %v4967_v53  ;;  %v5046_v52 = vadd.f32 %v7175_v29, %v5036_v42  ;;  %v8228_v63 = vld [vmem:[%s11335_s2] sm:$0xff]   ;;  %v8229_v2 = vld [vmem:[%s11335_s2 + $0x8] sm:$0xff]   ;;  %s11337_s2 = sld [smem:[#allocation100_spill]] }
0x1e27   : > { %7678 = vmatprep.subr.bf16.mxu1 %v8228_v63 }
0x1e28   : > { %v5052_v59 = vpack.c.bf16 %v5049_v3, %v5048_v49  ;;  %v5047_v28 = vadd.f32 %v7175_v29, %v5037_v34  ;;  %v5050_v43 = vadd.f32 %v5046_v52, %v4968_v5  ;;  %v8230_v34 = vld [vmem:[%s11336_s5] sm:$0xff]   ;;  %v8231_v49 = vld [vmem:[%s11336_s5 + $0x8] sm:$0xff]  }
0x1e29   : > { %7671 = vmatpush3.bf16.msra.mxu0 %v8230_v34  ;;  %v10953_v3 = vld [vmem:[#allocation37] sm:$0xff]  }
0x1e2a   : > { %7666 = vmatprep.mubr.msk.bf16.mxu1 %vm2253_vm0, %v5052_v59  ;;  %v5051_v31 = vadd.f32 %v5047_v28, %v4969_v6  ;;  %7672 = vmatprep.subr.bf16.mxu0 %v9519_v46 }
0x1e2c   : > { %v5053_v12 = vpack.c.bf16 %v5051_v31, %v5050_v43 }
0x1e2d   : > { %7673 = vmatpush3.bf16.msra.mxu0 %v8231_v49  ;;  %v8233_v49 = vld [vmem:[#allocation37 + $0x8] sm:$0xff]  }
0x1e2e   : > { %7667 = vmatmul.mubr.msk.bf16.vlgmr.msra.gmra.mrb[64].mxu1 %vm2253_vm0, %v5053_v12  ;;  %7686 = vmatprep.subr.bf16.mxu0 %v10953_v3 }
0x1e2f   : > { %7679 = vmatpush3.bf16.msra.mxu1 %v8228_v63 }
0x1e30   : > { %7680 = vmatprep.subr.bf16.mxu1 %v8229_v2 }
0x1e33   : > { %7681 = vmatpush3.bf16.msra.mxu1 %v8229_v2  ;;  %v8483_v2 = vld [vmem:[%s10527_s9 + $0x8] sm:$0xff] }
0x1e34   : > { %7694 = vmatprep.subr.bf16.mxu1 %v9519_v46 }
0x1f01   : > { %v7668_v0 = vpop.f32.mrb[64].mxu1 }
0x1f02   : > { %v5117_v16 = vpop.f32.mrb[65].mxu1  ;;  %v5126_v23 = vadd.f32 %v7668_v0, %v7176_v15 }
0x1f03   : > { %v5118_v33 = vadd.f32 %v7176_v15, %v5117_v16  ;;  %v7669_v27 = vpop.f32.mrb[66].mxu1 }
0x1f04   : > { %v5120_v17 = vpop.f32.mrb[67].mxu1  ;;  %v5129_v14 = vadd.f32 %v7669_v27, %v7176_v15  ;;  %v5140_v48 = vsel %vm2253_vm0, %v5126_v23, 0.0 }
0x1f05   : > { %v5121_v24 = vadd.f32 %v7176_v15, %v5120_v17  ;;  %v5134_v58 = vsel %vm2253_vm0, %v5118_v33, 0.0 }
0x1f06   : > { %5135 = vadd.xlane.f32.xlu0 %v5134_v58  ;;  %v5143_v56 = vsel %vm2253_vm0, %v5129_v14, 0.0 }
0x1f07   : > { %v5137_v11 = vsel %vm2253_vm0, %v5121_v24, 0.0 }
0x1f08   : > { %5138 = vadd.xlane.f32.xlu1 %v5137_v11 }
0x1f0a   : > { %5141 = vadd.xlane.f32.xlu0 %v5140_v48 }
0x1f0c   : > { %5144 = vadd.xlane.f32.xlu1 %v5143_v56 }
0x1f0e   : > { %4321 = vadd.xlane.f32.xlu0 %v4320_v39 }
0x1f10   : > { %4324 = vadd.xlane.f32.xlu1 %v4323_v41 }
0x1f93   : > { %v5136_v57 = vpop.xlane.xlu0 %5135 }
0x1f94   : > { %v5146_v19 = vmul.f32 0.03125, %v5136_v57 }
0x1f95   : > { %v5139_v20 = vpop.xlane.xlu1 %5138 }
0x1f96   : > { %v10917_v9 = vsub.f32 %v5118_v33, %v5146_v19  ;;  %v5147_v40 = vmul.f32 0.03125, %v5139_v20 }
0x1f97   : > { %v5142_v37 = vpop.xlane.xlu0 %5141 }
0x1f98   : > { %v10919_v7 = vsub.f32 %v5121_v24, %v5147_v40  ;;  %v5148_v30 = vmul.f32 0.03125, %v5142_v37  ;;  %v5154_v44 = vmul.f32 %v10917_v9, %v10917_v9 }
0x1f99   : > { %v5145_v61 = vpop.xlane.xlu1 %5144 }
0x1f9a   : > { %v10923_v26 = vsub.f32 %v5126_v23, %v5148_v30  ;;  %v5149_v8 = vmul.f32 0.03125, %v5145_v61  ;;  %v5158_v32 = vsel %vm2253_vm0, %v5154_v44, 0.0  ;;  %v5155_v50 = vmul.f32 %v10919_v7, %v10919_v7  ;;  %v8476_v44 = vld [vmem:[%s10278_s11] sm:$0xff] }
0x1f9b   : > { %5159 = vadd.xlane.f32.xlu0 %v5158_v32  ;;  %v4322_v4 = vpop.xlane.xlu0 %4321 }
0x1f9c   : > { %v10928_v29 = vsub.f32 %v5129_v14, %v5149_v8  ;;  %v4326_v36 = vmul.f32 0.03125, %v4322_v4  ;;  %v5161_v10 = vsel %vm2253_vm0, %v5155_v50, 0.0  ;;  %v5156_v55 = vmul.f32 %v10923_v26, %v10923_v26 }
0x1f9d   : > { %5162 = vadd.xlane.f32.xlu1 %v5161_v10  ;;  %v4325_v38 = vpop.xlane.xlu1 %4324 }
0x1f9e   : > { %v10933_v21 = vsub.f32 %v4318_v22, %v4326_v36  ;;  %v4327_v1 = vmul.f32 0.03125, %v4325_v38  ;;  %v5164_v54 = vsel %vm2253_vm0, %v5156_v55, 0.0  ;;  %v5157_v35 = vmul.f32 %v10928_v29, %v10928_v29  ;;  %v7182_v22 = vld [vmem:[#allocation35] ss:$0 sm:$0xff]  ;;  %v8479_v38 = vld [vmem:[#allocation20] ss:$0 sm:$0xff] }
0x1f9f   : > { %5165 = vadd.xlane.f32.xlu0 %v5164_v54 }
0x1fa0   : > { %v10938_v45 = vsub.f32 %v4319_v51, %v4327_v1  ;;  %v5167_v60 = vsel %vm2253_vm0, %v5157_v35, 0.0  ;;  %v4330_v25 = vmul.f32 %v10933_v21, %v10933_v21 }
0x1fa1   : > { %5168 = vadd.xlane.f32.xlu1 %v5167_v60  ;;  %v8481_v60 = vld [vmem:[%s10278_s11 + $0x18] sm:$0xff] }
0x1fa2   : > { %v4332_v53 = vsel %vm2253_vm0, %v4330_v25, 0.0  ;;  %v4331_v62 = vmul.f32 %v10938_v45, %v10938_v45 }
0x1fa3   : > { %4333 = vadd.xlane.f32.xlu0 %v4332_v53 }
0x1fa4   : > { %v4335_v42 = vsel %vm2253_vm0, %v4331_v62, 0.0 }
0x1fa5   : > { %4336 = vadd.xlane.f32.xlu1 %v4335_v42  ;;  %v8482_v42 = vld [vmem:[%s10527_s9] sm:$0xff]  ;;  %s11339_s9 = sld [smem:[#allocation102_spill]] }
0x2028   : > { %v5160_v52 = vpop.xlane.xlu0 %5159 }
0x2029   : > { %v5170_v59 = vmul.f32 0.03125, %v5160_v52 }
0x202a   : > { %v5163_v5 = vpop.xlane.xlu1 %5162 }
0x202b   : > { %v5174_v6 = vadd.f32 1e-05, %v5170_v59  ;;  %v5171_v28 = vmul.f32 0.03125, %v5163_v5 }
0x202c   : > { %v5166_v43 = vpop.xlane.xlu0 %5165 }
0x202d   : > { %8409 = vrsqrt.f32 %v5174_v6  ;;  %v5175_v31 = vadd.f32 1e-05, %v5171_v28  ;;  %v5172_v12 = vmul.f32 0.03125, %v5166_v43  ;;  %v7187_v6 = vld [vmem:[%s11337_s2] ss:$0 sm:$0xff]  ;;  %s11346_s2 = sld [smem:[#allocation111_spill]] }
0x202e   : > { %v5169_v15 = vpop.xlane.xlu1 %5168 }
0x202f   : > { %8411 = vrsqrt.f32 %v5175_v31  ;;  %v5176_v0 = vadd.f32 1e-05, %v5172_v12  ;;  %v5173_v16 = vmul.f32 0.03125, %v5169_v15 }
0x2030   : > { %v4334_v33 = vpop.xlane.xlu0 %4333 }
0x2031   : > { %8413 = vrsqrt.f32 %v5176_v0  ;;  %v5177_v27 = vadd.f32 1e-05, %v5173_v16  ;;  %v4338_v17 = vmul.f32 0.03125, %v4334_v33 }
0x2032   : > { %v4337_v18 = vpop.xlane.xlu1 %4336 }
0x2033   : > { %8415 = vrsqrt.f32 %v5177_v27  ;;  %v4340_v13 = vadd.f32 1e-05, %v4338_v17  ;;  %v4339_v23 = vmul.f32 0.03125, %v4337_v18 }
0x2035   : > { %8417 = vrsqrt.f32 %v4340_v13  ;;  %v4341_v24 = vadd.f32 1e-05, %v4339_v23 }
0x2037   : > { %v8410_v58 = vpop.eup %8409  ;;  %8419 = vrsqrt.f32 %v4341_v24 }
0x2038   : > { %v5182_v14 = vmul.f32 %v8410_v58, %v10917_v9 }
0x2039   : > { %v8412_v11 = vpop.eup %8411 }
0x203a   : > { %v5183_v48 = vmul.f32 %v8412_v11, %v10919_v7  ;;  %v5192_v51 = vmul.f32 %v7181_v47, %v5182_v14  ;;  %v8477_v7 = vld [vmem:[%s10278_s11 + $0x8] sm:$0xff] }
0x203b   : > { %v8414_v56 = vpop.eup %8413 }
0x203c   : > { %v5184_v39 = vmul.f32 %v8414_v56, %v10923_v26  ;;  %v5193_v41 = vmul.f32 %v7181_v47, %v5183_v48  ;;  %v5202_v57 = vadd.f32 %v7182_v22, %v5192_v51  ;;  %v8478_v26 = vld [vmem:[#allocation19] ss:$0 sm:$0xff] }
0x203d   : > { %v8416_v19 = vpop.eup %8415 }
0x203e   : > { %v5194_v20 = vmul.f32 %v7181_v47, %v5184_v39  ;;  %v5185_v40 = vmul.f32 %v8416_v19, %v10928_v29  ;;  %v5203_v37 = vadd.f32 %v7182_v22, %v5193_v41  ;;  %v5276_v61 = vadd.f32 %v8476_v44, %v5202_v57 }
0x203f   : > { %v8418_v30 = vpop.eup %8417 }
0x2040   : > { %v5195_v9 = vmul.f32 %v7181_v47, %v5185_v40  ;;  %v4344_v8 = vmul.f32 %v8418_v30, %v10933_v21  ;;  %v5277_v32 = vadd.f32 %v8477_v7, %v5203_v37  ;;  %v5204_v50 = vadd.f32 %v7182_v22, %v5194_v20  ;;  %v8480_v21 = vld [vmem:[%s10278_s11 + $0x10] sm:$0xff]  ;;  %s11338_s11 = sld [smem:[#allocation98_spill]] }
0x2041   : > { %v8420_v4 = vpop.eup %8419  ;;  %v5360_v52 = vpack.c.bf16 %v5203_v37, %v5202_v57 }
0x2042   : > { %v4346_v36 = vmul.f32 %v8478_v26, %v4344_v8  ;;  %v4345_v10 = vmul.f32 %v8420_v4, %v10938_v45  ;;  %v5280_v29 = vpack.c.bf16 %v5277_v32, %v5276_v61  ;;  %v5205_v55 = vadd.f32 %v7182_v22, %v5195_v9  ;;  %v7192_v22 = vld [vmem:[%s11339_s9] ss:$0 sm:$0xff] }
0x2043   : > { %v5278_v35 = vadd.f32 %v8480_v21, %v5204_v50 }
0x2044   : > { %v10964_v1 = vadd.f32 %v8479_v38, %v4346_v36  ;;  %v4347_v54 = vmul.f32 %v8478_v26, %v4345_v10  ;;  %7682 = vmatprep.mubr.msk.bf16.mxu1 %vm2253_vm0, %v5280_v29  ;;  %v5279_v25 = vadd.f32 %v8481_v60, %v5205_v55  ;;  %v5361_v59 = vpack.c.bf16 %v5205_v55, %v5204_v50 }
0x2046   : > { %v10969_v53 = vadd.f32 %v8479_v38, %v4347_v54  ;;  %v5281_v62 = vpack.c.bf16 %v5279_v25, %v5278_v35  ;;  %v5206_v63 = vadd.f32 %v8482_v42, %v10964_v1  ;;  %v7183_v16 = vld [vmem:[%s11338_s11] ss:$0 sm:$0xff]  ;;  %s2177_s11 = scalar_lea.vmem %s9808_s25, %s11348_s30 }
0x2048   : > { %v5207_v45 = vadd.f32 %v8483_v2, %v10969_v53  ;;  %7683 = vmatmul.mubr.msk.bf16.vlgmr.msra.gmra.mrb[68].mxu1 %vm2253_vm0, %v5281_v62 }
0x2049   : > { %7698 = vmatprep.mubr.msk.bf16.mxu1 %vm9520_vm4, %v9519_v46 }
0x204a   : > { %v5208_v34 = vpack.c.bf16 %v5207_v45, %v5206_v63 }
0x204c   : > { %7675 = vmatmul.mubr.msk.bf16.vlgmr.msra.gmra.mrb[56].mxu0 %vm2253_vm0, %v5208_v34 }
0x204d   : > { %7687 = vmatpush3.bf16.msra.mxu0 %v10953_v3  ;;  %7690 = vmatprep.mubr.msk.bf16.mxu0 %vm2253_vm0, %v5360_v52 }
0x204e   : > { %7688 = vmatprep.subr.bf16.mxu0 %v8233_v49 }
0x2051   : > { %7689 = vmatpush3.bf16.msra.mxu0 %v8233_v49 }
0x2052   : > { %7702 = vmatprep.subr.bf16.mxu0 %v9519_v46 }
0x2054   : > { %7691 = vmatmul.mubr.msk.bf16.vlgmr.msra.gmra.mrb[60].mxu0 %vm2253_vm0, %v5361_v59 }
0x2055   : > { %7706 = vmatprep.mubr.msk.bf16.mxu0 %vm9520_vm4, %v9519_v46 }
0x211b   : > { %v7684_v5 = vpop.f32.mrb[68].mxu1 }
0x211c   : > { %v5345_v28 = vpop.f32.mrb[69].mxu1  ;;  %v5354_v31 = vadd.f32 %v7684_v5, %v7187_v6 }
0x211d   : > { %v7685_v43 = vpop.f32.mrb[70].mxu1  ;;  %v5346_v15 = vadd.f32 %v7187_v6, %v5345_v28 }
0x211e   : > { %v5357_v12 = vadd.f32 %v7685_v43, %v7187_v6  ;;  %v5348_v3 = vpop.f32.mrb[71].mxu1 }
0x211f   : > { %v5349_v0 = vadd.f32 %v7187_v6, %v5348_v3  ;;  %v5269_v33 = vpop.f32.mrb[56].mxu0 }
0x2120   : > { %v10987_v27 = vpack.c.bf16 %v5357_v12, %v5354_v31  ;;  %v7676_v17 = vpop.f32.mrb[57].mxu0  ;;  %v5270_v23 = vadd.f32 %v7183_v16, %v5269_v33 }
0x2121   : > { %v10989_v18 = vpack.c.bf16 %v5349_v0, %v5346_v15  ;;  %v5272_v13 = vpop.f32.mrb[58].mxu0 }
0x2122   : > { %v5273_v24 = vadd.f32 %v7183_v16, %v5272_v13  ;;  %v7677_v58 = vpop.f32.mrb[59].mxu0  ;;  %v5457_v20 = vsel %vm2394_vm1, %v10987_v27, 0 }
0x2123   : > { %v5454_v47 = vsel %vm2394_vm1, %v10989_v18, 0 }
0x2124   : > { %v10993_v14 = vpack.c.bf16 %v5273_v24, %v5270_v23  ;;  %7695 = vmatpush3.bf16.xpose.msra.mxu1 %v5454_v47 }
0x2125   : > { %7696 = vmatprep.subr.bf16.mxu1 %v9519_v46 }
0x2127   : > { %v7692_v11 = vpop.f32.mrb[60].mxu0 }
0x2128   : > { %v5425_v48 = vpop.f32.mrb[61].mxu0  ;;  %v5434_v56 = vadd.f32 %v7692_v11, %v7192_v22 }
0x2129   : > { %v7693_v51 = vpop.f32.mrb[62].mxu0  ;;  %v5426_v57 = vadd.f32 %v7192_v22, %v5425_v48 }
0x212a   : > { %v5437_v39 = vadd.f32 %v7693_v51, %v7192_v22  ;;  %v5428_v41 = vpop.f32.mrb[63].mxu0 }
0x212b   : > { %v5429_v19 = vadd.f32 %v7192_v22, %v5428_v41 }
0x212c   : > { %v10999_v40 = vpack.c.bf16 %v5437_v39, %v5434_v56  ;;  %7697 = vmatpush3.bf16.xpose.msra.mxu1 %v5457_v20 }
0x212d   : > { %v11001_v37 = vpack.c.bf16 %v5429_v19, %v5426_v57  ;;  %7718 = vmatprep.subr.bf16.mxu1 %v9519_v46 }
0x212f   : > { %7703 = vmatpush3.bf16.msra.mxu0 %v11001_v37 }
0x2130   : > { %7704 = vmatprep.subr.bf16.mxu0 %v9519_v46 }
0x2133   : > { %7699 = vmatmul.mubr.msk.bf16.vlgmr.msra.gmra.mrb[72].mxu1 %vm2394_vm1, %v10993_v14  ;;  %7705 = vmatpush3.bf16.msra.mxu0 %v10999_v40 }
0x2134   : > { %7710 = vmatprep.subr.bf16.mxu0 %v9519_v46  ;;  %7722 = vmatprep.mubr.msk.bf16.mxu1 %vm9520_vm4, %v9519_v46 }
0x2206   : > { %v5493_v30 = vpop.f32.mrb[72].mxu1 }
0x2207   : > { %v7700_v44 = vpop.f32.mrb[73].mxu1  ;;  %v5500_v61 = vsel %vm2253_vm0, %v5493_v30, -inf }
0x2208   : > { %5501 = vmax.xlane.f32.xlu0 %v5500_v61  ;;  %v5496_v9 = vpop.f32.mrb[74].mxu1 }
0x2209   : > { %v7701_v8 = vpop.f32.mrb[75].mxu1  ;;  %v5503_v7 = vsel %vm2253_vm0, %v5496_v9, -inf }
0x220a   : > { %5504 = vmax.xlane.f32.xlu1 %v5503_v7 }
0x2295   : > { %v5502_v32 = vpop.xlane.xlu0 %5501 }
0x2296   : > { %v5506_v50 = vsub.f32 %v5493_v30, %v5502_v32 }
0x2297   : > { %v5505_v4 = vpop.xlane.xlu1 %5504 }
0x2298   : > { %v5508_v26 = vmul.f32 1.442695, %v5506_v50  ;;  %v5507_v36 = vsub.f32 %v5496_v9, %v5505_v4 }
0x229a   : > { %8421 = vpow2.f32 %v5508_v26  ;;  %v5510_v10 = vmul.f32 1.442695, %v5507_v36 }
0x229c   : > { %8423 = vpow2.f32 %v5510_v10 }
0x22a4   : > { %v8422_v29 = vpop.eup %8421 }
0x22a5   : > { %v5512_v55 = vsel %vm2253_vm0, %v8422_v29, 0.0 }
0x22a6   : > { %v8424_v38 = vpop.eup %8423  ;;  %5513 = vadd.xlane.f32.xlu0 %v5512_v55 }
0x22a7   : > { %v5515_v54 = vsel %vm2253_vm0, %v8424_v38, 0.0 }
0x22a8   : > { %5516 = vadd.xlane.f32.xlu1 %v5515_v54 }
0x22b9   : > { %5574 = vrot.lane.b32.xlu1 %v10987_v27, %s11322_s8 }
0x22bc   : > { %5572 = vrot.lane.b32.xlu0 %v10989_v18, %s11322_s8 }
0x22bd   : > { %5568 = vrot.lane.b32.xlu1 %v10993_v14, %s11322_s8 }
0x2333   : > { %v5514_v21 = vpop.xlane.xlu0 %5513 }
0x2334   : > { %8425 = vrcp.f32 %v5514_v21 }
0x2335   : > { %v5517_v35 = vpop.xlane.xlu1 %5516 }
0x2336   : > { %8427 = vrcp.f32 %v5517_v35 }
0x2337   : > { %v5573_v63 = vpop.permute.xlu0 %5572 }
0x2338   : > { %v5580_v45 = vsel %vm2394_vm1, %v5573_v63, 0 }
0x2339   : > { %v5575_v34 = vpop.permute.xlu1 %5574 }
0x233a   : > { %v5583_v49 = vsel %vm2394_vm1, %v5575_v34, 0 }
0x233d   : > { %v5569_v52 = vpop.permute.xlu1 %5568 }
0x233e   : > { %v8426_v60 = vpop.eup %8425 }
0x233f   : > { %v5519_v62 = vmul.f32 %v8426_v60, %v8422_v29 }
0x2340   : > { %v8428_v25 = vpop.eup %8427 }
0x2341   : > { %v5521_v42 = vmul.f32 %v8428_v25, %v8424_v38 }
0x2343   : > { %v5522_v2 = vpack.c.bf16 %v5521_v42, %v5519_v62 }
0x2345   : > { %7707 = vmatmul.mubr.msk.bf16.vlgmr.msra.gmra.mrb[64].mxu0 %vm2253_vm0, %v5522_v2 }
0x2346   : > { %7711 = vmatpush3.bf16.xpose.msra.mxu0 %v5580_v45  ;;  %7714 = vmatprep.mubr.msk.bf16.mxu0 %vm9520_vm4, %v9519_v46 }
0x2347   : > { %7712 = vmatprep.subr.bf16.mxu0 %v9519_v46 }
0x234e   : > { %7713 = vmatpush3.bf16.xpose.msra.mxu0 %v5583_v49 }
0x234f   : > { %7734 = vmatprep.subr.bf16.mxu0 %v9519_v46 }
0x2355   : > { %7715 = vmatmul.mubr.msk.bf16.vlgmr.msra.gmra.mrb[68].mxu0 %vm2394_vm1, %v5569_v52 }
0x2356   : > { %7738 = vmatprep.mubr.msk.bf16.mxu0 %vm9520_vm4, %v9519_v46 }
0x2418   : > { %v11032_v59 = vpop.f32.mrb[64].mxu0 }
0x2419   : > { %v7708_v5 = vpop.f32.mrb[65].mxu0 }
0x241a   : > { %v11034_v6 = vpop.f32.mrb[66].mxu0 }
0x241b   : > { %v7709_v28 = vpop.f32.mrb[67].mxu0 }
0x2428   : > { %v5619_v43 = vpop.f32.mrb[68].mxu0 }
0x2429   : > { %v7716_v31 = vpop.f32.mrb[69].mxu0  ;;  %v5626_v12 = vsel %vm2253_vm0, %v5619_v43, -inf }
0x242a   : > { %5627 = vmax.xlane.f32.xlu0 %v5626_v12  ;;  %v5622_v3 = vpop.f32.mrb[70].mxu0 }
0x242b   : > { %v7717_v15 = vpop.f32.mrb[71].mxu0  ;;  %v5629_v0 = vsel %vm2253_vm0, %v5622_v3, -inf }
0x242c   : > { %5630 = vmax.xlane.f32.xlu1 %v5629_v0 }
0x243d   : > { %5651 = vrot.lane.b32.xlu1 %v11001_v37, %s11322_s8 }
0x2441   : > { %5703 = vrot.lane.b32.xlu1 %v10989_v18, %s11321_s3 }
0x2445   : > { %5705 = vrot.lane.b32.xlu1 %v10987_v27, %s11321_s3 }
0x24b7   : > { %v5628_v16 = vpop.xlane.xlu0 %5627 }
0x24b8   : > { %v5632_v33 = vsub.f32 %v5619_v43, %v5628_v16 }
0x24b9   : > { %v5631_v17 = vpop.xlane.xlu1 %5630 }
0x24ba   : > { %v5634_v13 = vmul.f32 1.442695, %v5632_v33  ;;  %v5633_v23 = vsub.f32 %v5622_v3, %v5631_v17 }
0x24bc   : > { %8429 = vpow2.f32 %v5634_v13  ;;  %v5636_v24 = vmul.f32 1.442695, %v5633_v23 }
0x24bd   : > { %v5652_v58 = vpop.permute.xlu1 %5651 }
0x24be   : > { %8431 = vpow2.f32 %v5636_v24  ;;  %7719 = vmatpush3.bf16.msra.mxu1 %v5652_v58 }
0x24bf   : > { %7720 = vmatprep.subr.bf16.mxu1 %v9519_v46 }
0x24c1   : > { %v5704_v30 = vpop.permute.xlu1 %5703 }
0x24c2   : > { %v5711_v61 = vsel %vm2394_vm1, %v5704_v30, 0 }
0x24c5   : > { %v5706_v9 = vpop.permute.xlu1 %5705 }
0x24c6   : > { %v8430_v47 = vpop.eup %8429  ;;  %v5714_v8 = vsel %vm2394_vm1, %v5706_v9, 0 }
0x24c7   : > { %v5638_v11 = vsel %vm2253_vm0, %v8430_v47, 0.0 }
0x24c8   : > { %v8432_v22 = vpop.eup %8431  ;;  %5639 = vadd.xlane.f32.xlu0 %v5638_v11 }
0x24c9   : > { %v5641_v48 = vsel %vm2253_vm0, %v8432_v22, 0.0 }
0x24cc   : > { %5642 = vadd.xlane.f32.xlu0 %v5641_v48 }
0x24e2   : > { %5653 = vrot.lane.b32.xlu0 %v10999_v40, %s11322_s8  ;;  %s11341_s8 = sld [smem:[#allocation105_spill]] }
0x24e6   : > { %5701 = vrot.lane.b32.xlu0 %v10993_v14, %s11321_s3 }
0x2555   : > { %v5640_v51 = vpop.xlane.xlu0 %5639 }
0x2556   : > { %8433 = vrcp.f32 %v5640_v51 }
0x2559   : > { %v5643_v56 = vpop.xlane.xlu0 %5642 }
0x255a   : > { %8435 = vrcp.f32 %v5643_v56 }
0x255d   : > { %v5654_v39 = vpop.permute.xlu0 %5653 }
0x255e   : > { %7721 = vmatpush3.bf16.msra.mxu1 %v5654_v39 }
0x255f   : > { %7726 = vmatprep.subr.bf16.mxu1 %v9519_v46 }
0x2560   : > { %v8434_v41 = vpop.eup %8433 }
0x2561   : > { %v5645_v19 = vmul.f32 %v8434_v41, %v8430_v47  ;;  %v5702_v7 = vpop.permute.xlu0 %5701 }
0x2564   : > { %v8436_v57 = vpop.eup %8435 }
0x2565   : > { %v5647_v20 = vmul.f32 %v8436_v57, %v8432_v22 }
0x2567   : > { %v5648_v44 = vpack.c.bf16 %v5647_v20, %v5645_v19 }
0x2569   : > { %7723 = vmatmul.mubr.msk.bf16.vlgmr.msra.gmra.mrb[76].mxu1 %vm2253_vm0, %v5648_v44 }
0x256a   : > { %7727 = vmatpush3.bf16.xpose.msra.mxu1 %v5711_v61  ;;  %7730 = vmatprep.mubr.msk.bf16.mxu1 %vm9520_vm4, %v9519_v46 }
0x256b   : > { %7728 = vmatprep.subr.bf16.mxu1 %v9519_v46 }
0x2572   : > { %7729 = vmatpush3.bf16.xpose.msra.mxu1 %v5714_v8 }
0x2573   : > { %7750 = vmatprep.subr.bf16.mxu1 %v9519_v46 }
0x2579   : > { %7731 = vmatmul.mubr.msk.bf16.vlgmr.msra.gmra.mrb[80].mxu1 %vm2394_vm1, %v5702_v7 }
0x257a   : > { %7754 = vmatprep.mubr.msk.bf16.mxu1 %vm9520_vm4, %v9519_v46 }
0x263c   : > { %v11062_v32 = vpop.f32.mrb[76].mxu1 }
0x263d   : > { %v7724_v50 = vpop.f32.mrb[77].mxu1 }
0x263e   : > { %v11064_v4 = vpop.f32.mrb[78].mxu1 }
0x263f   : > { %v8199_v26 = vpack.i.bf16 %v11064_v4, %v11062_v32  ;;  %v7725_v36 = vpop.f32.mrb[79].mxu1 }
0x264c   : > { %v5750_v10 = vpop.f32.mrb[80].mxu1 }
0x264d   : > { %v7732_v29 = vpop.f32.mrb[81].mxu1  ;;  %v5757_v55 = vsel %vm2253_vm0, %v5750_v10, -inf }
0x264e   : > { %5758 = vmax.xlane.f32.xlu1 %v5757_v55  ;;  %v5753_v38 = vpop.f32.mrb[82].mxu1  ;;  %v8234_v55 = vld [vmem:[#allocation38] sm:$0xff]  }
0x264f   : > { %v7733_v54 = vpop.f32.mrb[83].mxu1  ;;  %v5760_v21 = vsel %vm2253_vm0, %v5753_v38, -inf }
0x2650   : > { %5761 = vmax.xlane.f32.xlu0 %v5760_v21 }
0x265f   : > { %5782 = vrot.lane.b32.xlu1 %v10999_v40, %s11321_s3 }
0x26db   : > { %v5759_v35 = vpop.xlane.xlu1 %5758 }
0x26dc   : > { %v5763_v60 = vsub.f32 %v5750_v10, %v5759_v35 }
0x26dd   : > { %v5762_v25 = vpop.xlane.xlu0 %5761 }
0x26de   : > { %v5765_v62 = vmul.f32 1.442695, %v5763_v60  ;;  %v5764_v42 = vsub.f32 %v5753_v38, %v5762_v25 }
0x26df   : > { %v5783_v52 = vpop.permute.xlu1 %5782 }
0x26e0   : > { %8437 = vpow2.f32 %v5765_v62  ;;  %v5767_v63 = vmul.f32 1.442695, %v5764_v42 }
0x26e2   : > { %8439 = vpow2.f32 %v5767_v63 }
0x26ea   : > { %v8438_v2 = vpop.eup %8437 }
0x26eb   : > { %v5769_v45 = vsel %vm2253_vm0, %v8438_v2, 0.0 }
0x26ec   : > { %v8440_v34 = vpop.eup %8439  ;;  %5770 = vadd.xlane.f32.xlu0 %v5769_v45 }
0x26ed   : > { %v5772_v49 = vsel %vm2253_vm0, %v8440_v34, 0.0 }
0x26ee   : > { %5773 = vadd.xlane.f32.xlu1 %v5772_v49 }
0x26ff   : > { %5832 = vrot.lane.b32.xlu1 %v10989_v18, %s11323_s28 }
0x2702   : > { %5780 = vrot.lane.b32.xlu0 %v11001_v37, %s11321_s3  ;;  %s11340_s3 = sld [smem:[#allocation103_spill]] }
0x2703   : > { %5830 = vrot.lane.b32.xlu1 %v10993_v14, %s11323_s28 }
0x2706   : > { %5834 = vrot.lane.b32.xlu0 %v10987_v27, %s11323_s28 }
0x2779   : > { %v5771_v5 = vpop.xlane.xlu0 %5770 }
0x277a   : > { %8441 = vrcp.f32 %v5771_v5 }
0x277b   : > { %v5774_v28 = vpop.xlane.xlu1 %5773 }
0x277c   : > { %8443 = vrcp.f32 %v5774_v28 }
0x277d   : > { %v5781_v43 = vpop.permute.xlu0 %5780 }
0x277e   : > { %7735 = vmatpush3.bf16.msra.mxu0 %v5781_v43 }
0x277f   : > { %7736 = vmatprep.subr.bf16.mxu0 %v9519_v46  ;;  %v5833_v14 = vpop.permute.xlu1 %5832 }
0x2780   : > { %v5840_v27 = vsel %vm2394_vm1, %v5833_v14, 0 }
0x2781   : > { %v5835_v0 = vpop.permute.xlu0 %5834 }
0x2782   : > { %7737 = vmatpush3.bf16.msra.mxu0 %v5783_v52  ;;  %v5843_v16 = vsel %vm2394_vm1, %v5835_v0, 0 }
0x2783   : > { %7742 = vmatprep.subr.bf16.mxu0 %v9519_v46  ;;  %v5831_v33 = vpop.permute.xlu1 %5830 }
0x2784   : > { %v8442_v18 = vpop.eup %8441 }
0x2785   : > { %v5776_v12 = vmul.f32 %v8442_v18, %v8438_v2 }
0x2786   : > { %v8444_v31 = vpop.eup %8443 }
0x2787   : > { %v5778_v3 = vmul.f32 %v8444_v31, %v8440_v34 }
0x2789   : > { %v5779_v15 = vpack.c.bf16 %v5778_v3, %v5776_v12 }
0x278b   : > { %7739 = vmatmul.mubr.msk.bf16.vlgmr.msra.gmra.mrb[72].mxu0 %vm2253_vm0, %v5779_v15 }
0x278c   : > { %7743 = vmatpush3.bf16.xpose.msra.mxu0 %v5840_v27  ;;  %7746 = vmatprep.mubr.msk.bf16.mxu0 %vm9520_vm4, %v9519_v46 }
0x278d   : > { %7744 = vmatprep.subr.bf16.mxu0 %v9519_v46 }
0x2794   : > { %7745 = vmatpush3.bf16.xpose.msra.mxu0 %v5843_v16 }
0x2795   : > { %7766 = vmatprep.subr.bf16.mxu0 %v9519_v46 }
0x279b   : > { %7747 = vmatmul.mubr.msk.bf16.vlgmr.msra.gmra.mrb[76].mxu0 %vm2394_vm1, %v5831_v33 }
0x279c   : > { %7770 = vmatprep.mubr.msk.bf16.mxu0 %vm9520_vm4, %v9519_v46 }
0x285e   : > { %v5823_v17 = vpop.f32.mrb[72].mxu0 }
0x285f   : > { %v7740_v13 = vpop.f32.mrb[73].mxu0 }
0x2860   : > { %v5826_v23 = vpop.f32.mrb[74].mxu0 }
0x2861   : > { %v8204_v24 = vpack.i.bf16 %v5826_v23, %v5823_v17  ;;  %v7741_v58 = vpop.f32.mrb[75].mxu0 }
0x286e   : > { %v5879_v47 = vpop.f32.mrb[76].mxu0 }
0x286f   : > { %v7748_v11 = vpop.f32.mrb[77].mxu0  ;;  %v5886_v22 = vsel %vm2253_vm0, %v5879_v47, -inf }
0x2870   : > { %5887 = vmax.xlane.f32.xlu0 %v5886_v22  ;;  %v5882_v48 = vpop.f32.mrb[78].mxu0 }
0x2871   : > { %v7749_v51 = vpop.f32.mrb[79].mxu0  ;;  %v5889_v56 = vsel %vm2253_vm0, %v5882_v48, -inf }
0x2872   : > { %5890 = vmax.xlane.f32.xlu1 %v5889_v56 }
0x2883   : > { %5909 = vrot.lane.b32.xlu1 %v11001_v37, %s11323_s28 }
0x2887   : > { %8200 = vrot.lane.b32.xlu1 %v8199_v26, %s11326_s10  ;;  %s11343_s10 = sld [smem:[#allocation106_spill]] }
0x288b   : > { %8205 = vrot.lane.b32.xlu1 %v8204_v24, %s11327_s12  ;;  %s11344_s12 = sld [smem:[#allocation112_spill]] }
0x28fd   : > { %v5888_v39 = vpop.xlane.xlu0 %5887 }
0x28fe   : > { %v5892_v41 = vsub.f32 %v5879_v47, %v5888_v39  ;;  %v8236_v39 = vld [vmem:[%s11341_s8] sm:$0xff]  }
0x28ff   : > { %v5891_v57 = vpop.xlane.xlu1 %5890  ;;  %7767 = vmatpush3.bf16.msra.mxu0 %v8236_v39 }
0x2900   : > { %v5894_v19 = vmul.f32 1.442695, %v5892_v41  ;;  %v5893_v20 = vsub.f32 %v5882_v48, %v5891_v57  ;;  %7768 = vmatprep.subr.bf16.mxu0 %v9519_v46  ;;  %v8237_v41 = vld [vmem:[%s11341_s8 + $0x8] sm:$0xff]  }
0x2902   : > { %8445 = vpow2.f32 %v5894_v19  ;;  %v5896_v30 = vmul.f32 1.442695, %v5893_v20 }
0x2903   : > { %v5910_v44 = vpop.permute.xlu1 %5909  ;;  %7769 = vmatpush3.bf16.msra.mxu0 %v8237_v41  ;;  %v7222_v41 = vld [vmem:[#allocation46] ss:$0 sm:$0xff] }
0x2904   : > { %8447 = vpow2.f32 %v5896_v30  ;;  %7751 = vmatpush3.bf16.msra.mxu1 %v5910_v44  ;;  %7786 = vmatprep.subr.bf16.mxu0 %v9519_v46 }
0x2905   : > { %7752 = vmatprep.subr.bf16.mxu1 %v9519_v46 }
0x2907   : > { %v8201_v25 = vpop.permute.xlu1 %8200 }
0x2908   : > { %v8203_v42 = vunpack.i.h.bf16 %v8201_v25  ;;  %v8202_v63 = vunpack.i.l.bf16 %v8201_v25 }
0x290a   : > { %v5984_v49 = vsel %vm2394_vm1, %v11034_v6, %v8203_v42  ;;  %v5983_v52 = vsel %vm2394_vm1, %v11032_v59, %v8202_v63  ;;  %v7205_v6 = vld [vmem:[%s11340_s3] ss:$0 sm:$0xff] }
0x290b   : > { %v8206_v62 = vpop.permute.xlu1 %8205 }
0x290c   : > { %v8446_v37 = vpop.eup %8445  ;;  %v8208_v2 = vunpack.i.h.bf16 %v8206_v62  ;;  %v8207_v45 = vunpack.i.l.bf16 %v8206_v62 }
0x290d   : > { %v5898_v61 = vsel %vm2253_vm0, %v8446_v37, 0.0 }
0x290e   : > { %v8448_v9 = vpop.eup %8447  ;;  %5899 = vadd.xlane.f32.xlu0 %v5898_v61  ;;  %v5985_v43 = vsel %vm3139_vm2, %v5983_v52, %v8207_v45  ;;  %v5986_v18 = vsel %vm3139_vm2, %v5984_v49, %v8208_v2  ;;  %v7215_v49 = vld [vmem:[#allocation43] ss:$0 sm:$0xff] }
0x290f   : > { %v5901_v8 = vsel %vm2253_vm0, %v8448_v9, 0.0 }
0x2912   : > { %5902 = vadd.xlane.f32.xlu0 %v5901_v8 }
0x2928   : > { %5911 = vrot.lane.b32.xlu0 %v10999_v40, %s11323_s28  ;;  %v8235_v40 = vld [vmem:[#allocation38 + $0x8] sm:$0xff]   ;;  %s11342_s28 = sld [smem:[#allocation107_spill]] }
0x292e   : > { %v8238_v57 = vld [vmem:[%s11342_s28] sm:$0xff]   ;;  %v8239_v19 = vld [vmem:[%s11342_s28 + $0x8] sm:$0xff]  }
0x299b   : > { %v5900_v7 = vpop.xlane.xlu0 %5899 }
0x299c   : > { %8449 = vrcp.f32 %v5900_v7  ;;  %v7209_v7 = vld [vmem:[#allocation40] ss:$0 sm:$0xff] }
0x299f   : > { %v5903_v32 = vpop.xlane.xlu0 %5902 }
0x29a0   : > { %8451 = vrcp.f32 %v5903_v32 }
0x29a3   : > { %v5912_v50 = vpop.permute.xlu0 %5911 }
0x29a4   : > { %7753 = vmatpush3.bf16.msra.mxu1 %v5912_v50 }
0x29a5   : > { %7758 = vmatprep.subr.bf16.mxu1 %v9519_v46 }
0x29a6   : > { %v8450_v4 = vpop.eup %8449 }
0x29a7   : > { %v5905_v36 = vmul.f32 %v8450_v4, %v8446_v37 }
0x29aa   : > { %v8452_v26 = vpop.eup %8451 }
0x29ab   : > { %v5907_v10 = vmul.f32 %v8452_v26, %v8448_v9 }
0x29ad   : > { %v5908_v29 = vpack.c.bf16 %v5907_v10, %v5905_v36  ;;  %v7210_v36 = vld [vmem:[#allocation41] ss:$0 sm:$0xff] }
0x29af   : > { %7755 = vmatmul.mubr.msk.bf16.vlgmr.msra.gmra.mrb[84].mxu1 %vm2253_vm0, %v5908_v29 }
0x29b0   : > { %7762 = vmatprep.mubr.msk.bf16.mxu1 %vm9520_vm4, %v9519_v46  ;;  %7759 = vmatpush3.bf16.msra.mxu1 %v8234_v55 }
0x29b1   : > { %7760 = vmatprep.subr.bf16.mxu1 %v9519_v46 }
0x29b4   : > { %7761 = vmatpush3.bf16.msra.mxu1 %v8235_v40 }
0x29b5   : > { %7774 = vmatprep.subr.bf16.mxu1 %v9519_v46 }
0x2a82   : > { %v5952_v38 = vpop.f32.mrb[84].mxu1 }
0x2a83   : > { %v7756_v54 = vpop.f32.mrb[85].mxu1 }
0x2a84   : > { %v5955_v21 = vpop.f32.mrb[86].mxu1  ;;  %v8241_v54 = vld [vmem:[%s11342_s28 + $0x18] sm:$0xff]  }
0x2a85   : > { %v8209_v35 = vpack.i.bf16 %v5955_v21, %v5952_v38  ;;  %v7757_v60 = vpop.f32.mrb[87].mxu1  ;;  %v8240_v38 = vld [vmem:[%s11342_s28 + $0x10] sm:$0xff]   ;;  %v7211_v21 = vld [vmem:[%s11343_s10] ss:$0 sm:$0xff] }
0x2a87   : > { %8210 = vrot.lane.b32.xlu0 %v8209_v35, %s11328_s1  ;;  %s11345_s1 = sld [smem:[#allocation110_spill]] }
0x2af9   : > { %v8211_v34 = vpop.permute.xlu0 %8210 }
0x2afa   : > { %v8213_v5 = vunpack.i.h.bf16 %v8211_v34  ;;  %v8212_v28 = vunpack.i.l.bf16 %v8211_v34 }
0x2afc   : > { %v5987_v31 = vsel %vm3144_vm3, %v5985_v43, %v8212_v28  ;;  %v5988_v12 = vsel %vm3144_vm3, %v5986_v18, %v8213_v5 }
0x2afd   : > { %v5989_v3 = vpack.c.bf16 %v5988_v12, %v5987_v31 }
0x2aff   : > { %7763 = vmatmul.mubr.msk.bf16.vlgmr.msra.gmra.mrb[88].mxu1 %vm2253_vm0, %v5989_v3 }
0x2b00   : > { %7782 = vmatprep.mubr.msk.bf16.mxu1 %vm9520_vm4, %v9519_v46  ;;  %7775 = vmatpush3.bf16.msra.mxu1 %v8238_v57 }
0x2b01   : > { %7776 = vmatprep.subr.bf16.mxu1 %v9519_v46 }
0x2b04   : > { %7777 = vmatpush3.bf16.msra.mxu1 %v8239_v19 }
0x2b05   : > { %7778 = vmatprep.subr.bf16.mxu1 %v9519_v46 }
0x2b08   : > { %7779 = vmatpush3.bf16.msra.mxu1 %v8240_v38  ;;  %v8243_v38 = vld [vmem:[%s11344_s12 + $0x8] sm:$0xff]  }
0x2b09   : > { %7780 = vmatprep.subr.bf16.mxu1 %v9519_v46 }
0x2b0c   : > { %7781 = vmatpush3.bf16.msra.mxu1 %v8241_v54 }
0x2b0d   : > { %7800 = vmatprep.subr.bf16.mxu1 %v9519_v46 }
0x2bd2   : > { %v6045_v14 = vpop.f32.mrb[88].mxu1 }
0x2bd3   : > { %v6046_v15 = vadd.f32 %v7205_v6, %v6045_v14  ;;  %v7764_v59 = vpop.f32.mrb[89].mxu1 }
0x2bd4   : > { %v6048_v27 = vpop.f32.mrb[90].mxu1 }
0x2bd5   : > { %v6052_v0 = vadd.f32 %v6046_v15, %v10964_v1  ;;  %v6049_v16 = vadd.f32 %v7205_v6, %v6048_v27  ;;  %v7765_v33 = vpop.f32.mrb[91].mxu1 }
0x2bd7   : > { %v6053_v17 = vadd.f32 %v6049_v16, %v10969_v53  ;;  %v6056_v13 = vsel %vm2253_vm0, %v6052_v0, 0.0 }
0x2bd8   : > { %6057 = vadd.xlane.f32.xlu1 %v6056_v13 }
0x2bd9   : > { %v6059_v23 = vsel %vm2253_vm0, %v6053_v17, 0.0 }
0x2bda   : > { %6060 = vadd.xlane.f32.xlu0 %v6059_v23 }
0x2c65   : > { %v6058_v24 = vpop.xlane.xlu1 %6057 }
0x2c66   : > { %v6062_v58 = vmul.f32 0.03125, %v6058_v24 }
0x2c67   : > { %v6061_v47 = vpop.xlane.xlu0 %6060 }
0x2c68   : > { %v6064_v11 = vsub.f32 %v6052_v0, %v6062_v58  ;;  %v6063_v22 = vmul.f32 0.03125, %v6061_v47 }
0x2c6a   : > { %v6065_v1 = vsub.f32 %v6053_v17, %v6063_v22  ;;  %v6066_v48 = vmul.f32 %v6064_v11, %v6064_v11 }
0x2c6c   : > { %v6068_v51 = vsel %vm2253_vm0, %v6066_v48, 0.0  ;;  %v6067_v53 = vmul.f32 %v6065_v1, %v6065_v1 }
0x2c6d   : > { %6069 = vadd.xlane.f32.xlu0 %v6068_v51 }
0x2c6e   : > { %v6071_v56 = vsel %vm2253_vm0, %v6067_v53, 0.0  ;;  %v7221_v53 = vld [vmem:[#allocation44] ss:$0 sm:$0xff] }
0x2c6f   : > { %6072 = vadd.xlane.f32.xlu1 %v6071_v56 }
0x2cfa   : > { %v6070_v20 = vpop.xlane.xlu0 %6069 }
0x2cfb   : > { %v6074_v30 = vmul.f32 0.03125, %v6070_v20 }
0x2cfc   : > { %v6073_v44 = vpop.xlane.xlu1 %6072 }
0x2cfd   : > { %v6076_v37 = vadd.f32 1e-05, %v6074_v30  ;;  %v6075_v61 = vmul.f32 0.03125, %v6073_v44 }
0x2cff   : > { %8453 = vrsqrt.f32 %v6076_v37  ;;  %v6077_v9 = vadd.f32 1e-05, %v6075_v61 }
0x2d01   : > { %8455 = vrsqrt.f32 %v6077_v9 }
0x2d09   : > { %v8454_v8 = vpop.eup %8453 }
0x2d0a   : > { %v6080_v32 = vmul.f32 %v8454_v8, %v6064_v11 }
0x2d0b   : > { %v8456_v50 = vpop.eup %8455 }
0x2d0c   : > { %v6088_v4 = vmul.f32 %v7209_v7, %v6080_v32  ;;  %v6081_v26 = vmul.f32 %v8456_v50, %v6065_v1 }
0x2d0e   : > { %v6089_v10 = vmul.f32 %v7209_v7, %v6081_v26  ;;  %v6096_v29 = vadd.f32 %v7210_v36, %v6088_v4 }
0x2d10   : > { %v6097_v55 = vadd.f32 %v7210_v36, %v6089_v10 }
0x2d12   : > { %v6114_v40 = vpack.c.bf16 %v6097_v55, %v6096_v29 }
0x2d14   : > { %7771 = vmatmul.mubr.msk.bf16.vlgmr.msra.gmra.mrb[80].mxu0 %vm2253_vm0, %v6114_v40  ;;  %v8242_v40 = vld [vmem:[%s11344_s12] sm:$0xff]  }
0x2d15   : > { %7790 = vmatprep.mubr.msk.bf16.mxu0 %vm9520_vm4, %v9519_v46  ;;  %7787 = vmatpush3.bf16.msra.mxu0 %v8242_v40 }
0x2d16   : > { %7788 = vmatprep.subr.bf16.mxu0 %v9519_v46 }
0x2d19   : > { %7789 = vmatpush3.bf16.msra.mxu0 %v8243_v38 }
0x2d1a   : > { %7794 = vmatprep.subr.bf16.mxu0 %v9519_v46 }
0x2de7   : > { %v6170_v35 = vpop.f32.mrb[80].mxu0 }
0x2de8   : > { %v6171_v60 = vadd.f32 %v7211_v21, %v6170_v35  ;;  %v7772_v25 = vpop.f32.mrb[81].mxu0 }
0x2de9   : > { %v6173_v62 = vpop.f32.mrb[82].mxu0 }
0x2dea   : > { %v6174_v42 = vadd.f32 %v7211_v21, %v6173_v62  ;;  %v7773_v63 = vpop.f32.mrb[83].mxu0  ;;  %v6177_v2 = vmax.f32 %v6171_v60, 0.0 }
0x2deb   : > { %v7223_v63 = vld [vmem:[%s11345_s1] ss:$0 sm:$0xff] }
0x2dec   : > { %v6178_v45 = vmax.f32 %v6174_v42, 0.0 }
0x2dee   : > { %v6179_v34 = vpack.c.bf16 %v6178_v45, %v6177_v2 }
0x2df0   : > { %7783 = vmatmul.mubr.msk.bf16.vlgmr.msra.gmra.mrb[92].mxu1 %vm3412_vm5, %v6179_v34 }
0x2df1   : > { %7802 = vmatprep.mubr.msk.bf16.mxu1 %vm9520_vm4, %v9519_v46 }
0x2ec3   : > { %v6247_v52 = vpop.f32.mrb[92].mxu1 }
0x2ec4   : > { %v6248_v5 = vadd.f32 %v7215_v49, %v6247_v52  ;;  %v7784_v28 = vpop.f32.mrb[93].mxu1  ;;  %v7224_v52 = vld [vmem:[%s11346_s2] ss:$0 sm:$0xff] }
0x2ec5   : > { %v6250_v43 = vpop.f32.mrb[94].mxu1 }
0x2ec6   : > { %v6254_v18 = vadd.f32 %v6248_v5, %v6096_v29  ;;  %v6251_v31 = vadd.f32 %v7215_v49, %v6250_v43  ;;  %v7785_v12 = vpop.f32.mrb[95].mxu1 }
0x2ec7   : > { %v7225_v12 = vld [vmem:[#allocation47] ss:$0 sm:$0xff] }
0x2ec8   : > { %v6255_v3 = vadd.f32 %v6251_v31, %v6097_v55  ;;  %v6256_v6 = vsel %vm2253_vm0, %v6254_v18, 0.0  ;;  %v6476_v55 = vld [vmem:[#allocation2] sm:$0x1]  ;;  %v8244_v31 = vld [vmem:[#allocation49] sm:$0xff]  }
0x2ec9   : > { %6257 = vadd.xlane.f32.xlu0 %v6256_v6 }
0x2eca   : > { %v6259_v14 = vsel %vm2253_vm0, %v6255_v3, 0.0 }
0x2ecb   : > { %6260 = vadd.xlane.f32.xlu1 %v6259_v14 }
0x2f56   : > { %v6258_v15 = vpop.xlane.xlu0 %6257 }
0x2f57   : > { %v6262_v59 = vmul.f32 0.03125, %v6258_v15 }
0x2f58   : > { %v6261_v27 = vpop.xlane.xlu1 %6260 }
0x2f59   : > { %v6264_v0 = vsub.f32 %v6254_v18, %v6262_v59  ;;  %v6263_v16 = vmul.f32 0.03125, %v6261_v27 }
0x2f5b   : > { %v6265_v33 = vsub.f32 %v6255_v3, %v6263_v16  ;;  %v6266_v17 = vmul.f32 %v6264_v0, %v6264_v0 }
0x2f5d   : > { %v6268_v13 = vsel %vm2253_vm0, %v6266_v17, 0.0  ;;  %v6267_v23 = vmul.f32 %v6265_v33, %v6265_v33  ;;  %v7229_v17 = vld [vmem:[#allocation50] ss:$0 sm:$0xff] }
0x2f5e   : > { %6269 = vadd.xlane.f32.xlu0 %v6268_v13 }
0x2f5f   : > { %v6271_v24 = vsel %vm2253_vm0, %v6267_v23, 0.0 }
0x2f60   : > { %6272 = vadd.xlane.f32.xlu1 %v6271_v24 }
0x2feb   : > { %v6270_v58 = vpop.xlane.xlu0 %6269 }
0x2fec   : > { %v6274_v47 = vmul.f32 0.03125, %v6270_v58 }
0x2fed   : > { %v6273_v11 = vpop.xlane.xlu1 %6272 }
0x2fee   : > { %v6276_v22 = vadd.f32 1e-05, %v6274_v47  ;;  %v6275_v1 = vmul.f32 0.03125, %v6273_v11 }
0x2ff0   : > { %8457 = vrsqrt.f32 %v6276_v22  ;;  %v6277_v48 = vadd.f32 1e-05, %v6275_v1 }
0x2ff2   : > { %8459 = vrsqrt.f32 %v6277_v48 }
0x2ffa   : > { %v8458_v51 = vpop.eup %8457 }
0x2ffb   : > { %v6280_v56 = vmul.f32 %v8458_v51, %v6264_v0  ;;  %v6474_v51 = vld [vmem:[#allocation52] sm:$0x1] }
0x2ffc   : > { %v8460_v39 = vpop.eup %8459 }
0x2ffd   : > { %v6288_v57 = vmul.f32 %v7221_v53, %v6280_v56  ;;  %v6281_v19 = vmul.f32 %v8460_v39, %v6265_v33 }
0x2fff   : > { %v6296_v20 = vadd.f32 %v7222_v41, %v6288_v57  ;;  %v6289_v30 = vmul.f32 %v7221_v53, %v6281_v19  ;;  %v6482_v53 = vlaneseq }
0x3001   : > { %v6300_v44 = vsel %vm2253_vm0, %v6296_v20, 0.0  ;;  %v6297_v37 = vadd.f32 %v7222_v41, %v6289_v30  ;;  %v6483_v56 = vshrl.u32 %v6482_v53, 7 }
0x3002   : > { %6301 = vadd.xlane.f32.xlu0 %v6300_v44 }
0x3003   : > { %v6303_v61 = vsel %vm2253_vm0, %v6297_v37, 0.0  ;;  %v6484_v39 = vsub.s32 0, %v6483_v56 }
0x3004   : > { %6304 = vadd.xlane.f32.xlu1 %v6303_v61 }
0x308f   : > { %v6302_v9 = vpop.xlane.xlu0 %6301 }
0x3090   : > { %v6306_v8 = vmul.f32 0.03125, %v6302_v9 }
0x3091   : > { %v6305_v7 = vpop.xlane.xlu1 %6304 }
0x3092   : > { %v6308_v32 = vsub.f32 %v6296_v20, %v6306_v8  ;;  %v6307_v50 = vmul.f32 0.03125, %v6305_v7 }
0x3094   : > { %v6309_v4 = vsub.f32 %v6297_v37, %v6307_v50  ;;  %v6310_v26 = vmul.f32 %v6308_v32, %v6308_v32 }
0x3096   : > { %v6312_v36 = vsel %vm2253_vm0, %v6310_v26, 0.0  ;;  %v6311_v10 = vmul.f32 %v6309_v4, %v6309_v4 }
0x3097   : > { %6313 = vadd.xlane.f32.xlu0 %v6312_v36 }
0x3098   : > { %v6315_v29 = vsel %vm2253_vm0, %v6311_v10, 0.0 }
0x3099   : > { %6316 = vadd.xlane.f32.xlu1 %v6315_v29 }
0x30ad   : > { %6479 = vperm.xlu0 %8197, %v6476_v55  }
0x3124   : > { %v6314_v54 = vpop.xlane.xlu0 %6313 }
0x3125   : > { %v6318_v21 = vmul.f32 0.03125, %v6314_v54 }
0x3126   : > { %v6317_v35 = vpop.xlane.xlu1 %6316 }
0x3127   : > { %v6320_v60 = vadd.f32 1e-05, %v6318_v21  ;;  %v6319_v25 = vmul.f32 0.03125, %v6317_v35 }
0x3129   : > { %8461 = vrsqrt.f32 %v6320_v60  ;;  %v6321_v62 = vadd.f32 1e-05, %v6319_v25 }
0x312b   : > { %8463 = vrsqrt.f32 %v6321_v62 }
0x312c   : > { %v6480_v41 = vpop.permute.xlu0 %6479 }
0x312d   : > { %v6485_v57 = vrot.slane %v6480_v41, %v6484_v39 }
0x3133   : > { %v8462_v42 = vpop.eup %8461 }
0x3134   : > { %v6324_v2 = vmul.f32 %v8462_v42, %v6308_v32 }
0x3135   : > { %v8464_v45 = vpop.eup %8463 }
0x3136   : > { %v6332_v34 = vmul.f32 %v7223_v63, %v6324_v2  ;;  %v6325_v49 = vmul.f32 %v8464_v45, %v6309_v4 }
0x3138   : > { %v6333_v5 = vmul.f32 %v7223_v63, %v6325_v49  ;;  %v6340_v28 = vadd.f32 %v7224_v52, %v6332_v34 }
0x313a   : > { %v6341_v43 = vadd.f32 %v7224_v52, %v6333_v5 }
0x313c   : > { %v6342_v18 = vpack.c.bf16 %v6341_v43, %v6340_v28 }
0x313e   : > { %7791 = vmatmul.mubr.msk.bf16.vlgmr.msra.gmra.mrb[84].mxu0 %vm2253_vm0, %v6342_v18 }
0x313f   : > { %7796 = vmatprep.mubr.msk.bf16.mxu0 %vm9520_vm4, %v9519_v46  ;;  %7795 = vmatpush3.bf16.msra.mxu0 %v8244_v31 }
0x3211   : > { %v6403_v3 = vpop.f32.mrb[84].mxu0 }
0x3212   : > { %v6404_v6 = vadd.f32 %v7225_v12, %v6403_v3  ;;  %v7792_v14 = vpop.f32.mrb[85].mxu0 }
0x3213   : > { %v6406_v15 = vpop.f32.mrb[86].mxu0 }
0x3214   : > { %v6407_v59 = vadd.f32 %v7225_v12, %v6406_v15  ;;  %v7793_v27 = vpop.f32.mrb[87].mxu0  ;;  %v6410_v0 = vmax.f32 %v6404_v6, 0.0 }
0x3216   : > { %v6411_v16 = vmax.f32 %v6407_v59, 0.0 }
0x3218   : > { %v6412_v33 = vpack.c.bf16 %v6411_v16, %v6410_v0 }
0x321a   : > { %7797 = vmatmul.mubr.msk.bf16.vlgmr.msra.gmra.mrb[88].mxu0 %vm3139_vm2, %v6412_v33 }
0x32ed   : > { %v6465_v13 = vpop.f32.mrb[88].mxu0 }
0x32ee   : > { %v6466_v23 = vadd.f32 %v7229_v17, %v6465_v13  ;;  %v7798_v24 = vpop.f32.mrb[89].mxu0 }
0x32ef   : > { %v6468_v46 = vpop.f32.mrb[90].mxu0 }
0x32f0   : > { %v6469_v58 = vadd.f32 %v7229_v17, %v6468_v46  ;;  %v7799_v47 = vpop.f32.mrb[91].mxu0  ;;  %v6472_v11 = vmax.f32 %v6466_v23, 0.0 }
0x32f2   : > { %v6473_v22 = vmax.f32 %v6469_v58, 0.0 }
0x32f4   : > { %v6475_v1 = vpack.c.bf16 %v6473_v22, %v6472_v11 }
0x32f6   : > { %v6490_v48 = vsel %vm3139_vm2, %v6475_v1, 0 }
0x32f7   : > { %7801 = vmatpush3.bf16.xpose.msra.mxu1 %v6490_v48 }
0x32fe   : > { %7803 = vmatmul.mubr.msk.bf16.vlgmr.msra.gmra.mrb[96].mxu1 %vm3139_vm2, %v6474_v51 }
0x33d1   : > { %v6526_v19 = vpop.f32.mrb[96].mxu1 }
0x33d2   : > { %v6527_v20 = vadd.f32 %v6526_v19, %v6485_v57  ;;  %v7804_v30 = vpop.f32.mrb[97].mxu1 }
0x33d3   : > { %v6529_v44 = vpop.f32.mrb[98].mxu1 }
0x33d4   : > { %6533 = vst.msk [vmem:[%s2177_s11] sm:$0x1] %vm6532_vm7, %v6527_v20  ;;  %v7805_v37 = vpop.f32.mrb[99].mxu1 }
0x33d5 PF: > { %s142_s0 = sadd.s32 1, %s9416_s0  }
0x33d6   : > { %p139_p3 = scmp.ge.s32.totalorder %s142_s0, 4  }
0x33d8   :  { %141 = sbr.rel (!%p139_p3) target bundleno = 128 (0x80), region = 478 }
0x33df   :  { %6551 = vsyncpa [#allocation4], 1 }
0x33e0   :  { %6553 = vsyncpa [#allocation4 + $0x1], 1 }
0x33e1   :  { %6554 = vsyncpa [#allocation6], 1 }
0x33e2   :  { %6555 = vsyncpa [#allocation9], 1 }
0x33e3   :  { %6556 = vsyncpa [#allocation12], 1 }
0x33e4   :  { %6557 = vsyncpa [#allocation15], 1 }
0x33e5   :  { %6558 = vsyncpa [#allocation18], 1 }
0x33e6   :  { %6559 = vsyncpa [#allocation21], 1 }
0x33e7   :  { %6560 = vsyncpa [#allocation24], 1 }
0x33e8   :  { %6561 = vsyncpa [#allocation27], 1 }
0x33e9   :  { %6562 = vsyncpa [#allocation30], 1 }
0x33ea   :  { %6563 = vsyncpa [#allocation33], 1 }
0x33eb   :  { %6564 = vsyncpa [#allocation36], 1 }
0x33ec   :  { %6565 = vsyncpa [#allocation39], 1 }
0x33ed   :  { %6566 = vsyncpa [#allocation42], 1 }
0x33ee   :  { %6567 = vsyncpa [#allocation45], 1 }
0x33ef   :  { %6568 = vsyncpa [#allocation48], 1 }
0x33f0   :  { %6569 = vsyncpa [#allocation51], 1 }

</bundles_post_ra>
